<compile_context>
chip_gen: v7x
topology: tpu7x:2x2x1
jax: 0.10.0
libtpu: 0.0.40
codegen_flags: <defaults>
</compile_context>

<pallas_src>
import jax
import jax.numpy as jnp
from jax.experimental import pallas as pl
from jax.experimental.pallas import tpu as pltpu

_BN_EPS = 1e-5


# ----------------------------------------------------------------------------
# Pallas kernels.  Every layer of this net is tiny, so each kernel uses a
# single full-array VMEM block (also required: training-mode BatchNorm must
# see all (b, h, w) rows at once).
# ----------------------------------------------------------------------------
def _linear_ct1_kernel(z_ref, wl_ref, bl_ref, wc_ref, o_ref):
    # nn.Linear(nz, 1024)  followed by  ConvTranspose2d(1024, 64, 3, 2) on a
    # 1x1 spatial input (the latter is just an outer-product GEMM -> (B, 3*3*64)).
    h = jnp.dot(z_ref[...], wl_ref[...], preferred_element_type=jnp.float32)
    h = h + bl_ref[...]
    y = jnp.dot(h.astype(jnp.bfloat16), wc_ref[...],
                preferred_element_type=jnp.float32)
    o_ref[...] = y


def _bn_relu_gemm_kernel(x_ref, g_ref, b_ref, w_ref, o_ref):
    # Prologue: BatchNorm2d (training batch stats, per channel == lane dim,
    # one-pass mean / mean-of-squares) + ReLU applied to the *previous* conv's
    # raw overlap-added output.  Then this layer's GEMM on the MXU in bf16.
    x = x_ref[...]
    m = x.shape[0]
    mean = jnp.sum(x, axis=0, keepdims=True) * (1.0 / m)
    mean_sq = jnp.sum(x * x, axis=0, keepdims=True) * (1.0 / m)
    var = jnp.maximum(mean_sq - mean * mean, 0.0)
    xn = (x - mean) * jax.lax.rsqrt(var + _BN_EPS)
    xn = jnp.maximum(xn * g_ref[...] + b_ref[...], 0.0)
    o_ref[...] = jnp.dot(xn.astype(jnp.bfloat16), w_ref[...],
                         preferred_element_type=jnp.float32)


def _sigmoid_kernel(x_ref, o_ref):
    # Numerically stable sigmoid (exp argument is always <= 0).
    y = x_ref[...]
    pos = y >= 0.0
    e = jnp.exp(jnp.where(pos, -y, y))
    o_ref[...] = jnp.where(pos, 1.0 / (1.0 + e), e / (1.0 + e))


# ----------------------------------------------------------------------------
# pallas_call plumbing (single full-array block, grid=(1,)).
# ----------------------------------------------------------------------------
def _full_spec(shape):
    assert len(shape) == 2
    return pl.BlockSpec(shape, lambda i: (0, 0))


def _run(kernel, inputs, out_shape):
    return pl.pallas_call(
        kernel,
        out_shape=out_shape,
        grid_spec=pltpu.PrefetchScalarGridSpec(
            num_scalar_prefetch=0,
            grid=(1,),
            in_specs=[_full_spec(x.shape) for x in inputs],
            out_specs=_full_spec(out_shape.shape),
        ),
        compiler_params=pltpu.CompilerParams(
            dimension_semantics=("arbitrary",)),
    )(*inputs)


# ----------------------------------------------------------------------------
# col2im overlap-add (pure data movement, XLA glue between Pallas kernels).
# ----------------------------------------------------------------------------
def _col2im(y_col, B, H, W, k, s, co):
    y = y_col.reshape(B, H, W, k, k, co)
    OH, OW = (H - 1) * s + k, (W - 1) * s + k
    hi, wi = (H - 1) * s + 1, (W - 1) * s + 1
    out = jnp.zeros((B, OH, OW, co), y_col.dtype)
    for kh in range(k):
        for kw in range(k):
            out = out.at[:, kh:kh + hi:s, kw:kw + wi:s, :].add(
                y[:, :, :, kh, kw, :])
    return out


def _conv_t_layer(x_nhwc, gamma, beta, w_mat, *, k, s, co):
    # x_nhwc: raw (pre-BN) output of the previous ConvTranspose2d, NHWC.
    B, H, W, Ci = x_nhwc.shape
    y_col = _run(
        _bn_relu_gemm_kernel,
        [x_nhwc.reshape(B * H * W, Ci), gamma, beta, w_mat],
        jax.ShapeDtypeStruct((B * H * W, k * k * co), jnp.float32))
    return _col2im(y_col, B, H, W, k, s, co)


# ----------------------------------------------------------------------------
# Parameters (deterministic, in-script, PyTorch layouts) + one-time packing.
# ----------------------------------------------------------------------------
def init_params(key, nz):
    ks = jax.random.split(key, 20)

    def w(k, shape, scale=0.05):
        return (scale * jax.random.normal(k, shape)).astype(jnp.float32)

    p = {
        "l1_w": w(ks[0], (1024, nz)),          # nn.Linear(nz, 1024).weight
        "l1_b": w(ks[1], (1024,)),             # nn.Linear(nz, 1024).bias
        "ct1_w": w(ks[2], (1024, 64, 3, 3)),   # ConvTranspose2d(1024, 64, 3, 2)
        "ct2_w": w(ks[3], (64, 64, 3, 3)),     # ConvTranspose2d(64, 64, 3, 1)
        "ct3_w": w(ks[4], (64, 32, 3, 3)),     # ConvTranspose2d(64, 32, 3, 2)
        "ct4_w": w(ks[5], (32, 32, 3, 3)),     # ConvTranspose2d(32, 32, 3, 1)
        "ct5_w": w(ks[6], (32, 16, 2, 2)),     # ConvTranspose2d(32, 16, 2, 2)
        "ct6_w": w(ks[7], (16, 1, 3, 3)),      # ConvTranspose2d(16, 1, 3, 1)
    }
    for i, (c, ka, kb) in enumerate(
            [(64, ks[8], ks[9]), (64, ks[10], ks[11]), (32, ks[12], ks[13]),
             (32, ks[14], ks[15]), (16, ks[16], ks[17])], start=1):
        p[f"bn{i}_g"] = (1.0 + 0.1 * jax.random.normal(ka, (c,))).astype(jnp.float32)
        p[f"bn{i}_b"] = (0.1 * jax.random.normal(kb, (c,))).astype(jnp.float32)
    return p


def pack_params(p):
    """One-time packing: GEMM layouts + bf16 MXU operands (outside forward)."""
    def ct(w):      # (Ci, Co, k, k) -> (Ci, k*k*Co), column order (kh, kw, co)
        ci, co, k, _ = w.shape
        return jnp.transpose(w, (0, 2, 3, 1)).reshape(ci, k * k * co).astype(
            jnp.bfloat16)

    def bn(v):
        return v.reshape(1, -1).astype(jnp.float32)

    return {
        "l1_wt": p["l1_w"].T.astype(jnp.bfloat16),               # (nz, 1024)
        "l1_b": p["l1_b"].reshape(1, -1).astype(jnp.float32),    # (1, 1024)
        "ct1_w": ct(p["ct1_w"]), "ct2_w": ct(p["ct2_w"]),
        "ct3_w": ct(p["ct3_w"]), "ct4_w": ct(p["ct4_w"]),
        "ct5_w": ct(p["ct5_w"]), "ct6_w": ct(p["ct6_w"]),
        "bn1_g": bn(p["bn1_g"]), "bn1_b": bn(p["bn1_b"]),
        "bn2_g": bn(p["bn2_g"]), "bn2_b": bn(p["bn2_b"]),
        "bn3_g": bn(p["bn3_g"]), "bn3_b": bn(p["bn3_b"]),
        "bn4_g": bn(p["bn4_g"]), "bn4_b": bn(p["bn4_b"]),
        "bn5_g": bn(p["bn5_g"]), "bn5_b": bn(p["bn5_b"]),
    }


# ----------------------------------------------------------------------------
# Full forward pass (activations kept NHWC internally; NCHW returned).
# ----------------------------------------------------------------------------
def generator_forward(pp, z):
    B = z.shape[0]
    # Linear(nz,1024) + ConvTranspose2d(1024,64,3,2) on the 1x1 input (fused).
    y = _run(_linear_ct1_kernel,
             [z.astype(jnp.bfloat16), pp["l1_wt"], pp["l1_b"], pp["ct1_w"]],
             jax.ShapeDtypeStruct((B, 3 * 3 * 64), jnp.float32))
    x = y.reshape(B, 3, 3, 64)                                  # NHWC, pre-BN1

    x = _conv_t_layer(x, pp["bn1_g"], pp["bn1_b"], pp["ct2_w"], k=3, s=1, co=64)  # 5x5
    x = _conv_t_layer(x, pp["bn2_g"], pp["bn2_b"], pp["ct3_w"], k=3, s=2, co=32)  # 11x11
    x = _conv_t_layer(x, pp["bn3_g"], pp["bn3_b"], pp["ct4_w"], k=3, s=1, co=32)  # 13x13
    x = _conv_t_layer(x, pp["bn4_g"], pp["bn4_b"], pp["ct5_w"], k=2, s=2, co=16)  # 26x26
    x = _conv_t_layer(x, pp["bn5_g"], pp["bn5_b"], pp["ct6_w"], k=3, s=1, co=1)   # 28x28

    # Final Sigmoid on a lane-dense (B, 784) block, then back to NCHW.
    out = _run(_sigmoid_kernel, [x.reshape(B, 28 * 28)],
               jax.ShapeDtypeStruct((B, 28 * 28), jnp.float32))
    return out.reshape(B, 1, 28, 28)


if __name__ == "__main__":
    nz, B = 32, 2
    key = jax.random.PRNGKey(0)
    pkey, zkey = jax.random.split(key)
    params = pack_params(init_params(pkey, nz))   # packed once, outside forward
    z = jax.random.normal(zkey, (B, nz), dtype=jnp.float32)

    out = jax.jit(generator_forward)(params, z)
    out = jax.block_until_ready(out)

    assert out.shape == (B, 1, 28, 28), out.shape
    assert out.dtype == jnp.float32
    assert bool(jnp.all(jnp.isfinite(out)))
    assert bool(jnp.all((out >= 0.0) & (out <= 1.0)))  # sigmoid range
    print("KERNEL_OK")
</pallas_src>

<mosaic_0001>
module attributes {stable_mosaic.version = 11 : i64} {
  func.func @_linear_ct1_kernel(%arg0: i32, %arg1: memref<2x32xbf16, #tpu.memory_space<vmem>>, %arg2: memref<32x1024xbf16, #tpu.memory_space<vmem>>, %arg3: memref<1x1024xf32, #tpu.memory_space<vmem>>, %arg4: memref<1024x576xbf16, #tpu.memory_space<vmem>>, %arg5: memref<2x576xf32, #tpu.memory_space<vmem>>) attributes {dimension_semantics = [#tpu.dimension_semantics<arbitrary>], iteration_bounds = array<i64: 1>, scalar_prefetch = 0 : i64, scratch_operands = 0 : i64, tpu.core_type = #tpu.core_type<tc>, window_params = [{pipeline_mode = #tpu.pipeline_mode<synchronous>, transform_indices = @transform_0, window_bounds = array<i64: 2, 32>}, {pipeline_mode = #tpu.pipeline_mode<synchronous>, transform_indices = @transform_1, window_bounds = array<i64: 32, 1024>}, {pipeline_mode = #tpu.pipeline_mode<synchronous>, transform_indices = @transform_2, window_bounds = array<i64: 1, 1024>}, {pipeline_mode = #tpu.pipeline_mode<synchronous>, transform_indices = @transform_3, window_bounds = array<i64: 1024, 576>}, {pipeline_mode = #tpu.pipeline_mode<synchronous>, transform_indices = @transform_4, window_bounds = array<i64: 2, 576>}]} {
    %c0 = arith.constant 0 : index
    %c0_0 = arith.constant 0 : index
    %0 = vector.load %arg1[%c0, %c0_0] : memref<2x32xbf16, #tpu.memory_space<vmem>>, vector<2x32xbf16>
    %c0_1 = arith.constant 0 : index
    %c0_2 = arith.constant 0 : index
    %1 = vector.load %arg2[%c0_1, %c0_2] : memref<32x1024xbf16, #tpu.memory_space<vmem>>, vector<32x1024xbf16>
    %cst = arith.constant dense<0.000000e+00> : vector<2x1024xf32>
    %2 = tpu.matmul %0, %1, %cst {dimension_numbers = #tpu.dot_dimension_numbers<[1], [0], [0], [1], [0, 0, 1, 1], [], []>} : vector<2x32xbf16>, vector<32x1024xbf16>, vector<2x1024xf32> -> vector<2x1024xf32>
    %c0_3 = arith.constant 0 : index
    %c0_4 = arith.constant 0 : index
    %3 = vector.load %arg3[%c0_3, %c0_4] : memref<1x1024xf32, #tpu.memory_space<vmem>>, vector<1x1024xf32>
    %4 = vector.broadcast %3 : vector<1x1024xf32> to vector<2x1024xf32>
    %5 = arith.addf %2, %4 : vector<2x1024xf32>
    %6 = arith.truncf %5 : vector<2x1024xf32> to vector<2x1024xbf16>
    %c0_5 = arith.constant 0 : index
    %c0_6 = arith.constant 0 : index
    %7 = vector.load %arg4[%c0_5, %c0_6] : memref<1024x576xbf16, #tpu.memory_space<vmem>>, vector<1024x576xbf16>
    %cst_7 = arith.constant dense<0.000000e+00> : vector<2x576xf32>
    %8 = tpu.matmul %6, %7, %cst_7 {dimension_numbers = #tpu.dot_dimension_numbers<[1], [0], [0], [1], [0, 0, 1, 1], [], []>} : vector<2x1024xbf16>, vector<1024x576xbf16>, vector<2x576xf32> -> vector<2x576xf32>
    %c0_8 = arith.constant 0 : index
    %c0_9 = arith.constant 0 : index
    %9 = vector.load %arg5[%c0_8, %c0_9] : memref<2x576xf32, #tpu.memory_space<vmem>>, vector<2x576xf32>
    tpu.vector_store %arg5[%c0_8, %c0_9], %8 {strides = array<i32>} : memref<2x576xf32, #tpu.memory_space<vmem>>, vector<2x576xf32>,
    return
  }
  func.func @transform_0(%arg0: i32) -> (i32, i32) {
    %c0_i32 = arith.constant 0 : i32
    %c0_i32_0 = arith.constant 0 : i32
    %c0_i32_1 = arith.constant 0 : i32
    return %c0_i32, %c0_i32_0 : i32, i32
  }
  func.func @transform_1(%arg0: i32) -> (i32, i32) {
    %c0_i32 = arith.constant 0 : i32
    %c0_i32_0 = arith.constant 0 : i32
    %c0_i32_1 = arith.constant 0 : i32
    return %c0_i32, %c0_i32_0 : i32, i32
  }
  func.func @transform_2(%arg0: i32) -> (i32, i32) {
    %c0_i32 = arith.constant 0 : i32
    %c0_i32_0 = arith.constant 0 : i32
    %c0_i32_1 = arith.constant 0 : i32
    return %c0_i32, %c0_i32_0 : i32, i32
  }
  func.func @transform_3(%arg0: i32) -> (i32, i32) {
    %c0_i32 = arith.constant 0 : i32
    %c0_i32_0 = arith.constant 0 : i32
    %c0_i32_1 = arith.constant 0 : i32
    return %c0_i32, %c0_i32_0 : i32, i32
  }
  func.func @transform_4(%arg0: i32) -> (i32, i32) {
    %c0_i32 = arith.constant 0 : i32
    %c0_i32_0 = arith.constant 0 : i32
    %c0_i32_1 = arith.constant 0 : i32
    return %c0_i32, %c0_i32_0 : i32, i32
  }
}

module attributes {stable_mosaic.version = 11 : i64} {
  func.func @_bn_relu_gemm_kernel(%arg0: i32, %arg1: memref<18x64xf32, #tpu.memory_space<vmem>>, %arg2: memref<1x64xf32, #tpu.memory_space<vmem>>, %arg3: memref<1x64xf32, #tpu.memory_space<vmem>>, %arg4: memref<64x576xbf16, #tpu.memory_space<vmem>>, %arg5: memref<18x576xf32, #tpu.memory_space<vmem>>) attributes {dimension_semantics = [#tpu.dimension_semantics<arbitrary>], iteration_bounds = array<i64: 1>, scalar_prefetch = 0 : i64, scratch_operands = 0 : i64, tpu.core_type = #tpu.core_type<tc>, window_params = [{pipeline_mode = #tpu.pipeline_mode<synchronous>, transform_indices = @transform_0, window_bounds = array<i64: 18, 64>}, {pipeline_mode = #tpu.pipeline_mode<synchronous>, transform_indices = @transform_1, window_bounds = array<i64: 1, 64>}, {pipeline_mode = #tpu.pipeline_mode<synchronous>, transform_indices = @transform_2, window_bounds = array<i64: 1, 64>}, {pipeline_mode = #tpu.pipeline_mode<synchronous>, transform_indices = @transform_3, window_bounds = array<i64: 64, 576>}, {pipeline_mode = #tpu.pipeline_mode<synchronous>, transform_indices = @transform_4, window_bounds = array<i64: 18, 576>}]} {
    %c0 = arith.constant 0 : index
    %c0_0 = arith.constant 0 : index
    %0 = vector.load %arg1[%c0, %c0_0] : memref<18x64xf32, #tpu.memory_space<vmem>>, vector<18x64xf32>
    %cst = arith.constant dense<0.000000e+00> : vector<64xf32>
    %1 = vector.multi_reduction <add>, %0, %cst [0] : vector<18x64xf32> to vector<64xf32>
    %2 = vector.shape_cast %1 : vector<64xf32> to vector<1x64xf32>
    %cst_1 = arith.constant 0.055555556 : f32
    %3 = vector.broadcast %cst_1 : f32 to vector<1x64xf32>
    %4 = arith.mulf %2, %3 : vector<1x64xf32>
    %5 = arith.mulf %0, %0 : vector<18x64xf32>
    %cst_2 = arith.constant dense<0.000000e+00> : vector<64xf32>
    %6 = vector.multi_reduction <add>, %5, %cst_2 [0] : vector<18x64xf32> to vector<64xf32>
    %7 = vector.shape_cast %6 : vector<64xf32> to vector<1x64xf32>
    %cst_3 = arith.constant 0.055555556 : f32
    %8 = vector.broadcast %cst_3 : f32 to vector<1x64xf32>
    %9 = arith.mulf %7, %8 : vector<1x64xf32>
    %10 = arith.mulf %4, %4 : vector<1x64xf32>
    %11 = arith.subf %9, %10 : vector<1x64xf32>
    %cst_4 = arith.constant 0.000000e+00 : f32
    %12 = vector.broadcast %cst_4 : f32 to vector<1x64xf32>
    %13 = arith.maximumf %11, %12 : vector<1x64xf32>
    %14 = vector.broadcast %4 : vector<1x64xf32> to vector<18x64xf32>
    %15 = arith.subf %0, %14 : vector<18x64xf32>
    %cst_5 = arith.constant 9.99999974E-6 : f32
    %16 = vector.broadcast %cst_5 : f32 to vector<1x64xf32>
    %17 = arith.addf %13, %16 : vector<1x64xf32>
    %18 = math.rsqrt %17 : vector<1x64xf32>
    %19 = vector.broadcast %18 : vector<1x64xf32> to vector<18x64xf32>
    %20 = arith.mulf %15, %19 : vector<18x64xf32>
    %c0_6 = arith.constant 0 : index
    %c0_7 = arith.constant 0 : index
    %21 = vector.load %arg2[%c0_6, %c0_7] : memref<1x64xf32, #tpu.memory_space<vmem>>, vector<1x64xf32>
    %22 = vector.broadcast %21 : vector<1x64xf32> to vector<18x64xf32>
    %23 = arith.mulf %20, %22 : vector<18x64xf32>
    %c0_8 = arith.constant 0 : index
    %c0_9 = arith.constant 0 : index
    %24 = vector.load %arg3[%c0_8, %c0_9] : memref<1x64xf32, #tpu.memory_space<vmem>>, vector<1x64xf32>
    %25 = vector.broadcast %24 : vector<1x64xf32> to vector<18x64xf32>
    %26 = arith.addf %23, %25 : vector<18x64xf32>
    %cst_10 = arith.constant 0.000000e+00 : f32
    %27 = vector.broadcast %cst_10 : f32 to vector<18x64xf32>
    %28 = arith.maximumf %26, %27 : vector<18x64xf32>
    %29 = arith.truncf %28 : vector<18x64xf32> to vector<18x64xbf16>
    %c0_11 = arith.constant 0 : index
    %c0_12 = arith.constant 0 : index
    %30 = vector.load %arg4[%c0_11, %c0_12] : memref<64x576xbf16, #tpu.memory_space<vmem>>, vector<64x576xbf16>
    %cst_13 = arith.constant dense<0.000000e+00> : vector<18x576xf32>
    %31 = tpu.matmul %29, %30, %cst_13 {dimension_numbers = #tpu.dot_dimension_numbers<[1], [0], [0], [1], [0, 0, 1, 1], [], []>} : vector<18x64xbf16>, vector<64x576xbf16>, vector<18x576xf32> -> vector<18x576xf32>
    %c0_14 = arith.constant 0 : index
    %c0_15 = arith.constant 0 : index
    %32 = vector.load %arg5[%c0_14, %c0_15] : memref<18x576xf32, #tpu.memory_space<vmem>>, vector<18x576xf32>
    tpu.vector_store %arg5[%c0_14, %c0_15], %31 {strides = array<i32>} : memref<18x576xf32, #tpu.memory_space<vmem>>, vector<18x576xf32>,
    return
  }
  func.func @transform_0(%arg0: i32) -> (i32, i32) {
    %c0_i32 = arith.constant 0 : i32
    %c0_i32_0 = arith.constant 0 : i32
    %c0_i32_1 = arith.constant 0 : i32
    return %c0_i32, %c0_i32_0 : i32, i32
  }
  func.func @transform_1(%arg0: i32) -> (i32, i32) {
    %c0_i32 = arith.constant 0 : i32
    %c0_i32_0 = arith.constant 0 : i32
    %c0_i32_1 = arith.constant 0 : i32
    return %c0_i32, %c0_i32_0 : i32, i32
  }
  func.func @transform_2(%arg0: i32) -> (i32, i32) {
    %c0_i32 = arith.constant 0 : i32
    %c0_i32_0 = arith.constant 0 : i32
    %c0_i32_1 = arith.constant 0 : i32
    return %c0_i32, %c0_i32_0 : i32, i32
  }
  func.func @transform_3(%arg0: i32) -> (i32, i32) {
    %c0_i32 = arith.constant 0 : i32
    %c0_i32_0 = arith.constant 0 : i32
    %c0_i32_1 = arith.constant 0 : i32
    return %c0_i32, %c0_i32_0 : i32, i32
  }
  func.func @transform_4(%arg0: i32) -> (i32, i32) {
    %c0_i32 = arith.constant 0 : i32
    %c0_i32_0 = arith.constant 0 : i32
    %c0_i32_1 = arith.constant 0 : i32
    return %c0_i32, %c0_i32_0 : i32, i32
  }
}

module attributes {stable_mosaic.version = 11 : i64} {
  func.func @_bn_relu_gemm_kernel(%arg0: i32, %arg1: memref<50x64xf32, #tpu.memory_space<vmem>>, %arg2: memref<1x64xf32, #tpu.memory_space<vmem>>, %arg3: memref<1x64xf32, #tpu.memory_space<vmem>>, %arg4: memref<64x288xbf16, #tpu.memory_space<vmem>>, %arg5: memref<50x288xf32, #tpu.memory_space<vmem>>) attributes {dimension_semantics = [#tpu.dimension_semantics<arbitrary>], iteration_bounds = array<i64: 1>, scalar_prefetch = 0 : i64, scratch_operands = 0 : i64, tpu.core_type = #tpu.core_type<tc>, window_params = [{pipeline_mode = #tpu.pipeline_mode<synchronous>, transform_indices = @transform_0, window_bounds = array<i64: 50, 64>}, {pipeline_mode = #tpu.pipeline_mode<synchronous>, transform_indices = @transform_1, window_bounds = array<i64: 1, 64>}, {pipeline_mode = #tpu.pipeline_mode<synchronous>, transform_indices = @transform_2, window_bounds = array<i64: 1, 64>}, {pipeline_mode = #tpu.pipeline_mode<synchronous>, transform_indices = @transform_3, window_bounds = array<i64: 64, 288>}, {pipeline_mode = #tpu.pipeline_mode<synchronous>, transform_indices = @transform_4, window_bounds = array<i64: 50, 288>}]} {
    %c0 = arith.constant 0 : index
    %c0_0 = arith.constant 0 : index
    %0 = vector.load %arg1[%c0, %c0_0] : memref<50x64xf32, #tpu.memory_space<vmem>>, vector<50x64xf32>
    %cst = arith.constant dense<0.000000e+00> : vector<64xf32>
    %1 = vector.multi_reduction <add>, %0, %cst [0] : vector<50x64xf32> to vector<64xf32>
    %2 = vector.shape_cast %1 : vector<64xf32> to vector<1x64xf32>
    %cst_1 = arith.constant 2.000000e-02 : f32
    %3 = vector.broadcast %cst_1 : f32 to vector<1x64xf32>
    %4 = arith.mulf %2, %3 : vector<1x64xf32>
    %5 = arith.mulf %0, %0 : vector<50x64xf32>
    %cst_2 = arith.constant dense<0.000000e+00> : vector<64xf32>
    %6 = vector.multi_reduction <add>, %5, %cst_2 [0] : vector<50x64xf32> to vector<64xf32>
    %7 = vector.shape_cast %6 : vector<64xf32> to vector<1x64xf32>
    %cst_3 = arith.constant 2.000000e-02 : f32
    %8 = vector.broadcast %cst_3 : f32 to vector<1x64xf32>
    %9 = arith.mulf %7, %8 : vector<1x64xf32>
    %10 = arith.mulf %4, %4 : vector<1x64xf32>
    %11 = arith.subf %9, %10 : vector<1x64xf32>
    %cst_4 = arith.constant 0.000000e+00 : f32
    %12 = vector.broadcast %cst_4 : f32 to vector<1x64xf32>
    %13 = arith.maximumf %11, %12 : vector<1x64xf32>
    %14 = vector.broadcast %4 : vector<1x64xf32> to vector<50x64xf32>
    %15 = arith.subf %0, %14 : vector<50x64xf32>
    %cst_5 = arith.constant 9.99999974E-6 : f32
    %16 = vector.broadcast %cst_5 : f32 to vector<1x64xf32>
    %17 = arith.addf %13, %16 : vector<1x64xf32>
    %18 = math.rsqrt %17 : vector<1x64xf32>
    %19 = vector.broadcast %18 : vector<1x64xf32> to vector<50x64xf32>
    %20 = arith.mulf %15, %19 : vector<50x64xf32>
    %c0_6 = arith.constant 0 : index
    %c0_7 = arith.constant 0 : index
    %21 = vector.load %arg2[%c0_6, %c0_7] : memref<1x64xf32, #tpu.memory_space<vmem>>, vector<1x64xf32>
    %22 = vector.broadcast %21 : vector<1x64xf32> to vector<50x64xf32>
    %23 = arith.mulf %20, %22 : vector<50x64xf32>
    %c0_8 = arith.constant 0 : index
    %c0_9 = arith.constant 0 : index
    %24 = vector.load %arg3[%c0_8, %c0_9] : memref<1x64xf32, #tpu.memory_space<vmem>>, vector<1x64xf32>
    %25 = vector.broadcast %24 : vector<1x64xf32> to vector<50x64xf32>
    %26 = arith.addf %23, %25 : vector<50x64xf32>
    %cst_10 = arith.constant 0.000000e+00 : f32
    %27 = vector.broadcast %cst_10 : f32 to vector<50x64xf32>
    %28 = arith.maximumf %26, %27 : vector<50x64xf32>
    %29 = arith.truncf %28 : vector<50x64xf32> to vector<50x64xbf16>
    %c0_11 = arith.constant 0 : index
    %c0_12 = arith.constant 0 : index
    %30 = vector.load %arg4[%c0_11, %c0_12] : memref<64x288xbf16, #tpu.memory_space<vmem>>, vector<64x288xbf16>
    %cst_13 = arith.constant dense<0.000000e+00> : vector<50x288xf32>
    %31 = tpu.matmul %29, %30, %cst_13 {dimension_numbers = #tpu.dot_dimension_numbers<[1], [0], [0], [1], [0, 0, 1, 1], [], []>} : vector<50x64xbf16>, vector<64x288xbf16>, vector<50x288xf32> -> vector<50x288xf32>
    %c0_14 = arith.constant 0 : index
    %c0_15 = arith.constant 0 : index
    %32 = vector.load %arg5[%c0_14, %c0_15] : memref<50x288xf32, #tpu.memory_space<vmem>>, vector<50x288xf32>
    tpu.vector_store %arg5[%c0_14, %c0_15], %31 {strides = array<i32>} : memref<50x288xf32, #tpu.memory_space<vmem>>, vector<50x288xf32>,
    return
  }
  func.func @transform_0(%arg0: i32) -> (i32, i32) {
    %c0_i32 = arith.constant 0 : i32
    %c0_i32_0 = arith.constant 0 : i32
    %c0_i32_1 = arith.constant 0 : i32
    return %c0_i32, %c0_i32_0 : i32, i32
  }
  func.func @transform_1(%arg0: i32) -> (i32, i32) {
    %c0_i32 = arith.constant 0 : i32
    %c0_i32_0 = arith.constant 0 : i32
    %c0_i32_1 = arith.constant 0 : i32
    return %c0_i32, %c0_i32_0 : i32, i32
  }
  func.func @transform_2(%arg0: i32) -> (i32, i32) {
    %c0_i32 = arith.constant 0 : i32
    %c0_i32_0 = arith.constant 0 : i32
    %c0_i32_1 = arith.constant 0 : i32
    return %c0_i32, %c0_i32_0 : i32, i32
  }
  func.func @transform_3(%arg0: i32) -> (i32, i32) {
    %c0_i32 = arith.constant 0 : i32
    %c0_i32_0 = arith.constant 0 : i32
    %c0_i32_1 = arith.constant 0 : i32
    return %c0_i32, %c0_i32_0 : i32, i32
  }
  func.func @transform_4(%arg0: i32) -> (i32, i32) {
    %c0_i32 = arith.constant 0 : i32
    %c0_i32_0 = arith.constant 0 : i32
    %c0_i32_1 = arith.constant 0 : i32
    return %c0_i32, %c0_i32_0 : i32, i32
  }
}

module attributes {stable_mosaic.version = 11 : i64} {
  func.func @_bn_relu_gemm_kernel(%arg0: i32, %arg1: memref<242x32xf32, #tpu.memory_space<vmem>>, %arg2: memref<1x32xf32, #tpu.memory_space<vmem>>, %arg3: memref<1x32xf32, #tpu.memory_space<vmem>>, %arg4: memref<32x288xbf16, #tpu.memory_space<vmem>>, %arg5: memref<242x288xf32, #tpu.memory_space<vmem>>) attributes {dimension_semantics = [#tpu.dimension_semantics<arbitrary>], iteration_bounds = array<i64: 1>, scalar_prefetch = 0 : i64, scratch_operands = 0 : i64, tpu.core_type = #tpu.core_type<tc>, window_params = [{pipeline_mode = #tpu.pipeline_mode<synchronous>, transform_indices = @transform_0, window_bounds = array<i64: 242, 32>}, {pipeline_mode = #tpu.pipeline_mode<synchronous>, transform_indices = @transform_1, window_bounds = array<i64: 1, 32>}, {pipeline_mode = #tpu.pipeline_mode<synchronous>, transform_indices = @transform_2, window_bounds = array<i64: 1, 32>}, {pipeline_mode = #tpu.pipeline_mode<synchronous>, transform_indices = @transform_3, window_bounds = array<i64: 32, 288>}, {pipeline_mode = #tpu.pipeline_mode<synchronous>, transform_indices = @transform_4, window_bounds = array<i64: 242, 288>}]} {
    %c0 = arith.constant 0 : index
    %c0_0 = arith.constant 0 : index
    %0 = vector.load %arg1[%c0, %c0_0] : memref<242x32xf32, #tpu.memory_space<vmem>>, vector<242x32xf32>
    %cst = arith.constant dense<0.000000e+00> : vector<32xf32>
    %1 = vector.multi_reduction <add>, %0, %cst [0] : vector<242x32xf32> to vector<32xf32>
    %2 = vector.shape_cast %1 : vector<32xf32> to vector<1x32xf32>
    %cst_1 = arith.constant 0.00413223123 : f32
    %3 = vector.broadcast %cst_1 : f32 to vector<1x32xf32>
    %4 = arith.mulf %2, %3 : vector<1x32xf32>
    %5 = arith.mulf %0, %0 : vector<242x32xf32>
    %cst_2 = arith.constant dense<0.000000e+00> : vector<32xf32>
    %6 = vector.multi_reduction <add>, %5, %cst_2 [0] : vector<242x32xf32> to vector<32xf32>
    %7 = vector.shape_cast %6 : vector<32xf32> to vector<1x32xf32>
    %cst_3 = arith.constant 0.00413223123 : f32
    %8 = vector.broadcast %cst_3 : f32 to vector<1x32xf32>
    %9 = arith.mulf %7, %8 : vector<1x32xf32>
    %10 = arith.mulf %4, %4 : vector<1x32xf32>
    %11 = arith.subf %9, %10 : vector<1x32xf32>
    %cst_4 = arith.constant 0.000000e+00 : f32
    %12 = vector.broadcast %cst_4 : f32 to vector<1x32xf32>
    %13 = arith.maximumf %11, %12 : vector<1x32xf32>
    %14 = vector.broadcast %4 : vector<1x32xf32> to vector<242x32xf32>
    %15 = arith.subf %0, %14 : vector<242x32xf32>
    %cst_5 = arith.constant 9.99999974E-6 : f32
    %16 = vector.broadcast %cst_5 : f32 to vector<1x32xf32>
    %17 = arith.addf %13, %16 : vector<1x32xf32>
    %18 = math.rsqrt %17 : vector<1x32xf32>
    %19 = vector.broadcast %18 : vector<1x32xf32> to vector<242x32xf32>
    %20 = arith.mulf %15, %19 : vector<242x32xf32>
    %c0_6 = arith.constant 0 : index
    %c0_7 = arith.constant 0 : index
    %21 = vector.load %arg2[%c0_6, %c0_7] : memref<1x32xf32, #tpu.memory_space<vmem>>, vector<1x32xf32>
    %22 = vector.broadcast %21 : vector<1x32xf32> to vector<242x32xf32>
    %23 = arith.mulf %20, %22 : vector<242x32xf32>
    %c0_8 = arith.constant 0 : index
    %c0_9 = arith.constant 0 : index
    %24 = vector.load %arg3[%c0_8, %c0_9] : memref<1x32xf32, #tpu.memory_space<vmem>>, vector<1x32xf32>
    %25 = vector.broadcast %24 : vector<1x32xf32> to vector<242x32xf32>
    %26 = arith.addf %23, %25 : vector<242x32xf32>
    %cst_10 = arith.constant 0.000000e+00 : f32
    %27 = vector.broadcast %cst_10 : f32 to vector<242x32xf32>
    %28 = arith.maximumf %26, %27 : vector<242x32xf32>
    %29 = arith.truncf %28 : vector<242x32xf32> to vector<242x32xbf16>
    %c0_11 = arith.constant 0 : index
    %c0_12 = arith.constant 0 : index
    %30 = vector.load %arg4[%c0_11, %c0_12] : memref<32x288xbf16, #tpu.memory_space<vmem>>, vector<32x288xbf16>
    %cst_13 = arith.constant dense<0.000000e+00> : vector<242x288xf32>
    %31 = tpu.matmul %29, %30, %cst_13 {dimension_numbers = #tpu.dot_dimension_numbers<[1], [0], [0], [1], [0, 0, 1, 1], [], []>} : vector<242x32xbf16>, vector<32x288xbf16>, vector<242x288xf32> -> vector<242x288xf32>
    %c0_14 = arith.constant 0 : index
    %c0_15 = arith.constant 0 : index
    %32 = vector.load %arg5[%c0_14, %c0_15] : memref<242x288xf32, #tpu.memory_space<vmem>>, vector<242x288xf32>
    tpu.vector_store %arg5[%c0_14, %c0_15], %31 {strides = array<i32>} : memref<242x288xf32, #tpu.memory_space<vmem>>, vector<242x288xf32>,
    return
  }
  func.func @transform_0(%arg0: i32) -> (i32, i32) {
    %c0_i32 = arith.constant 0 : i32
    %c0_i32_0 = arith.constant 0 : i32
    %c0_i32_1 = arith.constant 0 : i32
    return %c0_i32, %c0_i32_0 : i32, i32
  }
  func.func @transform_1(%arg0: i32) -> (i32, i32) {
    %c0_i32 = arith.constant 0 : i32
    %c0_i32_0 = arith.constant 0 : i32
    %c0_i32_1 = arith.constant 0 : i32
    return %c0_i32, %c0_i32_0 : i32, i32
  }
  func.func @transform_2(%arg0: i32) -> (i32, i32) {
    %c0_i32 = arith.constant 0 : i32
    %c0_i32_0 = arith.constant 0 : i32
    %c0_i32_1 = arith.constant 0 : i32
    return %c0_i32, %c0_i32_0 : i32, i32
  }
  func.func @transform_3(%arg0: i32) -> (i32, i32) {
    %c0_i32 = arith.constant 0 : i32
    %c0_i32_0 = arith.constant 0 : i32
    %c0_i32_1 = arith.constant 0 : i32
    return %c0_i32, %c0_i32_0 : i32, i32
  }
  func.func @transform_4(%arg0: i32) -> (i32, i32) {
    %c0_i32 = arith.constant 0 : i32
    %c0_i32_0 = arith.constant 0 : i32
    %c0_i32_1 = arith.constant 0 : i32
    return %c0_i32, %c0_i32_0 : i32, i32
  }
}

module attributes {stable_mosaic.version = 11 : i64} {
  func.func @_bn_relu_gemm_kernel(%arg0: i32, %arg1: memref<338x32xf32, #tpu.memory_space<vmem>>, %arg2: memref<1x32xf32, #tpu.memory_space<vmem>>, %arg3: memref<1x32xf32, #tpu.memory_space<vmem>>, %arg4: memref<32x64xbf16, #tpu.memory_space<vmem>>, %arg5: memref<338x64xf32, #tpu.memory_space<vmem>>) attributes {dimension_semantics = [#tpu.dimension_semantics<arbitrary>], iteration_bounds = array<i64: 1>, scalar_prefetch = 0 : i64, scratch_operands = 0 : i64, tpu.core_type = #tpu.core_type<tc>, window_params = [{pipeline_mode = #tpu.pipeline_mode<synchronous>, transform_indices = @transform_0, window_bounds = array<i64: 338, 32>}, {pipeline_mode = #tpu.pipeline_mode<synchronous>, transform_indices = @transform_1, window_bounds = array<i64: 1, 32>}, {pipeline_mode = #tpu.pipeline_mode<synchronous>, transform_indices = @transform_2, window_bounds = array<i64: 1, 32>}, {pipeline_mode = #tpu.pipeline_mode<synchronous>, transform_indices = @transform_3, window_bounds = array<i64: 32, 64>}, {pipeline_mode = #tpu.pipeline_mode<synchronous>, transform_indices = @transform_4, window_bounds = array<i64: 338, 64>}]} {
    %c0 = arith.constant 0 : index
    %c0_0 = arith.constant 0 : index
    %0 = vector.load %arg1[%c0, %c0_0] : memref<338x32xf32, #tpu.memory_space<vmem>>, vector<338x32xf32>
    %cst = arith.constant dense<0.000000e+00> : vector<32xf32>
    %1 = vector.multi_reduction <add>, %0, %cst [0] : vector<338x32xf32> to vector<32xf32>
    %2 = vector.shape_cast %1 : vector<32xf32> to vector<1x32xf32>
    %cst_1 = arith.constant 2.958580e-03 : f32
    %3 = vector.broadcast %cst_1 : f32 to vector<1x32xf32>
    %4 = arith.mulf %2, %3 : vector<1x32xf32>
    %5 = arith.mulf %0, %0 : vector<338x32xf32>
    %cst_2 = arith.constant dense<0.000000e+00> : vector<32xf32>
    %6 = vector.multi_reduction <add>, %5, %cst_2 [0] : vector<338x32xf32> to vector<32xf32>
    %7 = vector.shape_cast %6 : vector<32xf32> to vector<1x32xf32>
    %cst_3 = arith.constant 2.958580e-03 : f32
    %8 = vector.broadcast %cst_3 : f32 to vector<1x32xf32>
    %9 = arith.mulf %7, %8 : vector<1x32xf32>
    %10 = arith.mulf %4, %4 : vector<1x32xf32>
    %11 = arith.subf %9, %10 : vector<1x32xf32>
    %cst_4 = arith.constant 0.000000e+00 : f32
    %12 = vector.broadcast %cst_4 : f32 to vector<1x32xf32>
    %13 = arith.maximumf %11, %12 : vector<1x32xf32>
    %14 = vector.broadcast %4 : vector<1x32xf32> to vector<338x32xf32>
    %15 = arith.subf %0, %14 : vector<338x32xf32>
    %cst_5 = arith.constant 9.99999974E-6 : f32
    %16 = vector.broadcast %cst_5 : f32 to vector<1x32xf32>
    %17 = arith.addf %13, %16 : vector<1x32xf32>
    %18 = math.rsqrt %17 : vector<1x32xf32>
    %19 = vector.broadcast %18 : vector<1x32xf32> to vector<338x32xf32>
    %20 = arith.mulf %15, %19 : vector<338x32xf32>
    %c0_6 = arith.constant 0 : index
    %c0_7 = arith.constant 0 : index
    %21 = vector.load %arg2[%c0_6, %c0_7] : memref<1x32xf32, #tpu.memory_space<vmem>>, vector<1x32xf32>
    %22 = vector.broadcast %21 : vector<1x32xf32> to vector<338x32xf32>
    %23 = arith.mulf %20, %22 : vector<338x32xf32>
    %c0_8 = arith.constant 0 : index
    %c0_9 = arith.constant 0 : index
    %24 = vector.load %arg3[%c0_8, %c0_9] : memref<1x32xf32, #tpu.memory_space<vmem>>, vector<1x32xf32>
    %25 = vector.broadcast %24 : vector<1x32xf32> to vector<338x32xf32>
    %26 = arith.addf %23, %25 : vector<338x32xf32>
    %cst_10 = arith.constant 0.000000e+00 : f32
    %27 = vector.broadcast %cst_10 : f32 to vector<338x32xf32>
    %28 = arith.maximumf %26, %27 : vector<338x32xf32>
    %29 = arith.truncf %28 : vector<338x32xf32> to vector<338x32xbf16>
    %c0_11 = arith.constant 0 : index
    %c0_12 = arith.constant 0 : index
    %30 = vector.load %arg4[%c0_11, %c0_12] : memref<32x64xbf16, #tpu.memory_space<vmem>>, vector<32x64xbf16>
    %cst_13 = arith.constant dense<0.000000e+00> : vector<338x64xf32>
    %31 = tpu.matmul %29, %30, %cst_13 {dimension_numbers = #tpu.dot_dimension_numbers<[1], [0], [0], [1], [0, 0, 1, 1], [], []>} : vector<338x32xbf16>, vector<32x64xbf16>, vector<338x64xf32> -> vector<338x64xf32>
    %c0_14 = arith.constant 0 : index
    %c0_15 = arith.constant 0 : index
    %32 = vector.load %arg5[%c0_14, %c0_15] : memref<338x64xf32, #tpu.memory_space<vmem>>, vector<338x64xf32>
    tpu.vector_store %arg5[%c0_14, %c0_15], %31 {strides = array<i32>} : memref<338x64xf32, #tpu.memory_space<vmem>>, vector<338x64xf32>,
    return
  }
  func.func @transform_0(%arg0: i32) -> (i32, i32) {
    %c0_i32 = arith.constant 0 : i32
    %c0_i32_0 = arith.constant 0 : i32
    %c0_i32_1 = arith.constant 0 : i32
    return %c0_i32, %c0_i32_0 : i32, i32
  }
  func.func @transform_1(%arg0: i32) -> (i32, i32) {
    %c0_i32 = arith.constant 0 : i32
    %c0_i32_0 = arith.constant 0 : i32
    %c0_i32_1 = arith.constant 0 : i32
    return %c0_i32, %c0_i32_0 : i32, i32
  }
  func.func @transform_2(%arg0: i32) -> (i32, i32) {
    %c0_i32 = arith.constant 0 : i32
    %c0_i32_0 = arith.constant 0 : i32
    %c0_i32_1 = arith.constant 0 : i32
    return %c0_i32, %c0_i32_0 : i32, i32
  }
  func.func @transform_3(%arg0: i32) -> (i32, i32) {
    %c0_i32 = arith.constant 0 : i32
    %c0_i32_0 = arith.constant 0 : i32
    %c0_i32_1 = arith.constant 0 : i32
    return %c0_i32, %c0_i32_0 : i32, i32
  }
  func.func @transform_4(%arg0: i32) -> (i32, i32) {
    %c0_i32 = arith.constant 0 : i32
    %c0_i32_0 = arith.constant 0 : i32
    %c0_i32_1 = arith.constant 0 : i32
    return %c0_i32, %c0_i32_0 : i32, i32
  }
}

module attributes {stable_mosaic.version = 11 : i64} {
  func.func @_bn_relu_gemm_kernel(%arg0: i32, %arg1: memref<1352x16xf32, #tpu.memory_space<vmem>>, %arg2: memref<1x16xf32, #tpu.memory_space<vmem>>, %arg3: memref<1x16xf32, #tpu.memory_space<vmem>>, %arg4: memref<16x9xbf16, #tpu.memory_space<vmem>>, %arg5: memref<1352x9xf32, #tpu.memory_space<vmem>>) attributes {dimension_semantics = [#tpu.dimension_semantics<arbitrary>], iteration_bounds = array<i64: 1>, scalar_prefetch = 0 : i64, scratch_operands = 0 : i64, tpu.core_type = #tpu.core_type<tc>, window_params = [{pipeline_mode = #tpu.pipeline_mode<synchronous>, transform_indices = @transform_0, window_bounds = array<i64: 1352, 16>}, {pipeline_mode = #tpu.pipeline_mode<synchronous>, transform_indices = @transform_1, window_bounds = array<i64: 1, 16>}, {pipeline_mode = #tpu.pipeline_mode<synchronous>, transform_indices = @transform_2, window_bounds = array<i64: 1, 16>}, {pipeline_mode = #tpu.pipeline_mode<synchronous>, transform_indices = @transform_3, window_bounds = array<i64: 16, 9>}, {pipeline_mode = #tpu.pipeline_mode<synchronous>, transform_indices = @transform_4, window_bounds = array<i64: 1352, 9>}]} {
    %c0 = arith.constant 0 : index
    %c0_0 = arith.constant 0 : index
    %0 = vector.load %arg1[%c0, %c0_0] : memref<1352x16xf32, #tpu.memory_space<vmem>>, vector<1352x16xf32>
    %cst = arith.constant dense<0.000000e+00> : vector<16xf32>
    %1 = vector.multi_reduction <add>, %0, %cst [0] : vector<1352x16xf32> to vector<16xf32>
    %2 = vector.shape_cast %1 : vector<16xf32> to vector<1x16xf32>
    %cst_1 = arith.constant 7.396450e-04 : f32
    %3 = vector.broadcast %cst_1 : f32 to vector<1x16xf32>
    %4 = arith.mulf %2, %3 : vector<1x16xf32>
    %5 = arith.mulf %0, %0 : vector<1352x16xf32>
    %cst_2 = arith.constant dense<0.000000e+00> : vector<16xf32>
    %6 = vector.multi_reduction <add>, %5, %cst_2 [0] : vector<1352x16xf32> to vector<16xf32>
    %7 = vector.shape_cast %6 : vector<16xf32> to vector<1x16xf32>
    %cst_3 = arith.constant 7.396450e-04 : f32
    %8 = vector.broadcast %cst_3 : f32 to vector<1x16xf32>
    %9 = arith.mulf %7, %8 : vector<1x16xf32>
    %10 = arith.mulf %4, %4 : vector<1x16xf32>
    %11 = arith.subf %9, %10 : vector<1x16xf32>
    %cst_4 = arith.constant 0.000000e+00 : f32
    %12 = vector.broadcast %cst_4 : f32 to vector<1x16xf32>
    %13 = arith.maximumf %11, %12 : vector<1x16xf32>
    %14 = vector.broadcast %4 : vector<1x16xf32> to vector<1352x16xf32>
    %15 = arith.subf %0, %14 : vector<1352x16xf32>
    %cst_5 = arith.constant 9.99999974E-6 : f32
    %16 = vector.broadcast %cst_5 : f32 to vector<1x16xf32>
    %17 = arith.addf %13, %16 : vector<1x16xf32>
    %18 = math.rsqrt %17 : vector<1x16xf32>
    %19 = vector.broadcast %18 : vector<1x16xf32> to vector<1352x16xf32>
    %20 = arith.mulf %15, %19 : vector<1352x16xf32>
    %c0_6 = arith.constant 0 : index
    %c0_7 = arith.constant 0 : index
    %21 = vector.load %arg2[%c0_6, %c0_7] : memref<1x16xf32, #tpu.memory_space<vmem>>, vector<1x16xf32>
    %22 = vector.broadcast %21 : vector<1x16xf32> to vector<1352x16xf32>
    %23 = arith.mulf %20, %22 : vector<1352x16xf32>
    %c0_8 = arith.constant 0 : index
    %c0_9 = arith.constant 0 : index
    %24 = vector.load %arg3[%c0_8, %c0_9] : memref<1x16xf32, #tpu.memory_space<vmem>>, vector<1x16xf32>
    %25 = vector.broadcast %24 : vector<1x16xf32> to vector<1352x16xf32>
    %26 = arith.addf %23, %25 : vector<1352x16xf32>
    %cst_10 = arith.constant 0.000000e+00 : f32
    %27 = vector.broadcast %cst_10 : f32 to vector<1352x16xf32>
    %28 = arith.maximumf %26, %27 : vector<1352x16xf32>
    %29 = arith.truncf %28 : vector<1352x16xf32> to vector<1352x16xbf16>
    %c0_11 = arith.constant 0 : index
    %c0_12 = arith.constant 0 : index
    %30 = vector.load %arg4[%c0_11, %c0_12] : memref<16x9xbf16, #tpu.memory_space<vmem>>, vector<16x9xbf16>
    %cst_13 = arith.constant dense<0.000000e+00> : vector<1352x9xf32>
    %31 = tpu.matmul %29, %30, %cst_13 {dimension_numbers = #tpu.dot_dimension_numbers<[1], [0], [0], [1], [0, 0, 1, 1], [], []>} : vector<1352x16xbf16>, vector<16x9xbf16>, vector<1352x9xf32> -> vector<1352x9xf32>
    %c0_14 = arith.constant 0 : index
    %c0_15 = arith.constant 0 : index
    %32 = vector.load %arg5[%c0_14, %c0_15] : memref<1352x9xf32, #tpu.memory_space<vmem>>, vector<1352x9xf32>
    tpu.vector_store %arg5[%c0_14, %c0_15], %31 {strides = array<i32>} : memref<1352x9xf32, #tpu.memory_space<vmem>>, vector<1352x9xf32>,
    return
  }
  func.func @transform_0(%arg0: i32) -> (i32, i32) {
    %c0_i32 = arith.constant 0 : i32
    %c0_i32_0 = arith.constant 0 : i32
    %c0_i32_1 = arith.constant 0 : i32
    return %c0_i32, %c0_i32_0 : i32, i32
  }
  func.func @transform_1(%arg0: i32) -> (i32, i32) {
    %c0_i32 = arith.constant 0 : i32
    %c0_i32_0 = arith.constant 0 : i32
    %c0_i32_1 = arith.constant 0 : i32
    return %c0_i32, %c0_i32_0 : i32, i32
  }
  func.func @transform_2(%arg0: i32) -> (i32, i32) {
    %c0_i32 = arith.constant 0 : i32
    %c0_i32_0 = arith.constant 0 : i32
    %c0_i32_1 = arith.constant 0 : i32
    return %c0_i32, %c0_i32_0 : i32, i32
  }
  func.func @transform_3(%arg0: i32) -> (i32, i32) {
    %c0_i32 = arith.constant 0 : i32
    %c0_i32_0 = arith.constant 0 : i32
    %c0_i32_1 = arith.constant 0 : i32
    return %c0_i32, %c0_i32_0 : i32, i32
  }
  func.func @transform_4(%arg0: i32) -> (i32, i32) {
    %c0_i32 = arith.constant 0 : i32
    %c0_i32_0 = arith.constant 0 : i32
    %c0_i32_1 = arith.constant 0 : i32
    return %c0_i32, %c0_i32_0 : i32, i32
  }
}

module attributes {stable_mosaic.version = 11 : i64} {
  func.func @_sigmoid_kernel(%arg0: i32, %arg1: memref<2x784xf32, #tpu.memory_space<vmem>>, %arg2: memref<2x784xf32, #tpu.memory_space<vmem>>) attributes {dimension_semantics = [#tpu.dimension_semantics<arbitrary>], iteration_bounds = array<i64: 1>, scalar_prefetch = 0 : i64, scratch_operands = 0 : i64, tpu.core_type = #tpu.core_type<tc>, window_params = [{pipeline_mode = #tpu.pipeline_mode<synchronous>, transform_indices = @transform_0, window_bounds = array<i64: 2, 784>}, {pipeline_mode = #tpu.pipeline_mode<synchronous>, transform_indices = @transform_1, window_bounds = array<i64: 2, 784>}]} {
    %c0 = arith.constant 0 : index
    %c0_0 = arith.constant 0 : index
    %0 = vector.load %arg1[%c0, %c0_0] : memref<2x784xf32, #tpu.memory_space<vmem>>, vector<2x784xf32>
    %cst = arith.constant 0.000000e+00 : f32
    %1 = vector.broadcast %cst : f32 to vector<2x784xf32>
    %2 = arith.cmpf oge, %0, %1 : vector<2x784xf32>
    %cst_1 = arith.constant 0.000000e+00 : f32
    %3 = vector.broadcast %cst_1 : f32 to vector<2x784xf32>
    %4 = arith.subf %3, %0 : vector<2x784xf32>
    %5 = arith.select %2, %4, %0 : vector<2x784xi1>, vector<2x784xf32>
    %6 = math.exp %5 : vector<2x784xf32>
    %cst_2 = arith.constant 1.000000e+00 : f32
    %7 = vector.broadcast %cst_2 : f32 to vector<2x784xf32>
    %8 = arith.addf %7, %6 : vector<2x784xf32>
    %cst_3 = arith.constant 1.000000e+00 : f32
    %9 = vector.broadcast %cst_3 : f32 to vector<2x784xf32>
    %10 = arith.divf %9, %8 : vector<2x784xf32>
    %cst_4 = arith.constant 1.000000e+00 : f32
    %11 = vector.broadcast %cst_4 : f32 to vector<2x784xf32>
    %12 = arith.addf %11, %6 : vector<2x784xf32>
    %13 = arith.divf %6, %12 : vector<2x784xf32>
    %14 = arith.select %2, %10, %13 : vector<2x784xi1>, vector<2x784xf32>
    %c0_5 = arith.constant 0 : index
    %c0_6 = arith.constant 0 : index
    %15 = vector.load %arg2[%c0_5, %c0_6] : memref<2x784xf32, #tpu.memory_space<vmem>>, vector<2x784xf32>
    tpu.vector_store %arg2[%c0_5, %c0_6], %14 {strides = array<i32>} : memref<2x784xf32, #tpu.memory_space<vmem>>, vector<2x784xf32>,
    return
  }
  func.func @transform_0(%arg0: i32) -> (i32, i32) {
    %c0_i32 = arith.constant 0 : i32
    %c0_i32_0 = arith.constant 0 : i32
    %c0_i32_1 = arith.constant 0 : i32
    return %c0_i32, %c0_i32_0 : i32, i32
  }
  func.func @transform_1(%arg0: i32) -> (i32, i32) {
    %c0_i32 = arith.constant 0 : i32
    %c0_i32_0 = arith.constant 0 : i32
    %c0_i32_1 = arith.constant 0 : i32
    return %c0_i32, %c0_i32_0 : i32, i32
  }
}

</mosaic_0001>

<bundles_post_ra>
// kernel: generator_forward.8
= control target key start
LH: loop header
LB: loop body
LE: loop exit
PB: predicated region body
PF: predicated region fallthrough
CT: control target
= control target key end

     0   :  { %v466_v1 = vmov 0   ;;  %vm21_vm0 = vcmask 523264   ;;  %vm25_vm1 = vcmask 517120   ;;  %s631_s3 = inlined_call_operand.vmem [shape: bf16[64,576], index: 3, kind: input, shape index: {}]   ;;  %s632_s0 = inlined_call_operand.vmem [shape: f32[18,64], index: 0, kind: input, shape index: {}]   ;;  %s633_s1 = inlined_call_operand.vmem [shape: f32[1,64], index: 1, kind: input, shape index: {}]   ;;  %s634_s2 = inlined_call_operand.vmem [shape: f32[1,64], index: 2, kind: input, shape index: {}]   ;;  %s635_s4 = inlined_call_operand.vmem [shape: f32[18,576], index: 4, kind: output, shape index: {}]  }
   0x1   :  { %v436_v0 = vld [vmem:[%s631_s3 + $0x4] ss:$20 sps:$4 sm:$0xff]   ;;  %252 = vmatprep.mubr.bf16.mxu0 %v466_v1  ;;  %303 = vmatprep.mubr.bf16.mxu1 %v466_v1  ;;  %v438_v2 = vld [vmem:[%s631_s3] ss:$20 sps:$4 sm:$0xff]   ;;  %v441_v4 = vld [vmem:[%s631_s3 + $0x28] ss:$20 sps:$4 sm:$0xff]  }
   0x2   :  { %220 = vmatprep.subr.bf16.mxu0 %v436_v0  ;;  %v439_v3 = vld [vmem:[%s631_s3 + $0x2c] ss:$20 sps:$4 sm:$0xff]   ;;  %v444_v6 = vld [vmem:[%s631_s3 + $0x54] ss:$20 sps:$4 sm:$0xff]   ;;  %v447_v9 = vld [vmem:[%s631_s3 + $0x50] ss:$20 sps:$4 sm:$0xff]  }
   0x3   :  { %221 = vmatpush1.bf16.msra.mxu0 %v438_v2  ;;  %v442_v5 = vld [vmem:[%s631_s3 + $0xc] ss:$20 sps:$4 sm:$0xff]   ;;  %v446_v7 = vld [vmem:[%s631_s3 + $0x8] ss:$20 sps:$4 sm:$0xff]   ;;  %v452_v11 = vld [vmem:[%s631_s3 + $0x30] ss:$20 sps:$4 sm:$0xff]  }
   0x4   :  { %222 = vmatprep.subr.bf16.mxu0 %v439_v3  ;;  %271 = vmatprep.subr.bf16.mxu1 %v442_v5  ;;  %v448_v8 = vld [vmem:[%s631_s3 + $0x34] ss:$20 sps:$4 sm:$0xff]   ;;  %v450_v10 = vld [vmem:[%s631_s3 + $0x7c] ss:$20 sps:$4 sm:$0xff]   ;;  %v456_v13 = vld [vmem:[%s631_s3 + $0x58] ss:$20 sps:$4 sm:$0xff]  }
   0x5   :  { %272 = vmatpush1.bf16.msra.mxu1 %v446_v7  ;;  %v454_v12 = vld [vmem:[%s631_s3 + $0x5c] ss:$20 sps:$4 sm:$0xff]   ;;  %v18_v14 = vld [vmem:[%s632_s0] sm:$0xff]  ;;  %v19_v15 = vld [vmem:[%s632_s0 + $0x8] sm:$0xff] }
   0x6   :  { %273 = vmatprep.subr.bf16.mxu1 %v448_v8  ;;  %v453_v16 = vld [vmem:[%s631_s3 + $0x78] ss:$20 sps:$4 sm:$0xff]   ;;  %v20_v17 = vld [vmem:[%s632_s0 + $0x10] sm:$0x3]  ;;  %v22_v18 = vsel %vm21_vm0, %v18_v14, 0.0  ;;  %v23_v19 = vsel %vm21_vm0, %v19_v15, 0.0  ;;  %v35_v20 = vmul.f32 %v18_v14, %v18_v14  ;;  %v36_v21 = vmul.f32 %v19_v15, %v19_v15 }
   0x7   :  { %223 = vmatpush1.bf16.msra.mxu0 %v441_v4  ;;  %v457_v22 = vld [vmem:[%s631_s3 + $0x10] ss:$20 sps:$4 sm:$0xff]   ;;  %v24_v23 = vadd.f32 %v23_v19, %v22_v18  ;;  %v26_v24 = vsel %vm25_vm1, %v20_v17, 0.0  ;;  %v37_v25 = vmul.f32 %v20_v17, %v20_v17  ;;  %v460_v29 = vld [vmem:[%s631_s3 + $0x80] ss:$20 sps:$4 sm:$0xff]  }
   0x8   :  { %224 = vmatprep.subr.bf16.mxu0 %v444_v6  ;;  %v38_v26 = vsel %vm21_vm0, %v35_v20, 0.0  ;;  %v39_v27 = vsel %vm21_vm0, %v36_v21, 0.0  ;;  %v458_v28 = vld [vmem:[%s631_s3 + $0x84] ss:$20 sps:$4 sm:$0xff]   ;;  %v389_v56 = vld [vmem:[%s633_s1] ss:$0 sm:$0xff] }
   0x9   :  { %274 = vmatpush1.bf16.msra.mxu1 %v452_v11  ;;  %v27_v30 = vadd.f32 %v26_v24, %v24_v23  ;;  %v40_v31 = vadd.f32 %v39_v27, %v38_v26  ;;  %v41_v32 = vsel %vm25_vm1, %v37_v25, 0.0  ;;  %v390_v60 = vld [vmem:[%s634_s2] ss:$0 sm:$0xff]  ;;  %v461_v7 = vld [vmem:[%s631_s3 + $0x38] ss:$20 sps:$4 sm:$0xff]  }
   0xa   :  { %275 = vmatprep.subr.bf16.mxu1 %v454_v12  ;;  %v463_v11 = vld [vmem:[%s631_s3 + $0x88] ss:$20 sps:$4 sm:$0xff]  }
   0xb   :  { %225 = vmatpush1.bf16.msra.mxu0 %v447_v9  ;;  %v28_v33 = vrot.slane %v27_v30, 4  ;;  %v42_v34 = vadd.f32 %v41_v32, %v40_v31  ;;  %v462_v9 = vld [vmem:[%s631_s3 + $0x60] ss:$20 sps:$4 sm:$0xff]  }
   0xc   :  { %226 = vmatprep.subr.bf16.mxu0 %v450_v10 }
   0xd   :  { %276 = vmatpush1.bf16.msra.mxu1 %v456_v13  ;;  %v29_v35 = vadd.f32 %v28_v33, %v27_v30  ;;  %v43_v36 = vrot.slane %v42_v34, 4 }
   0xe   :  { %277 = vmatprep.subr.bf16.mxu1 %v458_v28 }
   0xf   :  { %227 = vmatpush1.bf16.msra.mxu0 %v453_v16  ;;  %v30_v37 = vrot.slane %v29_v35, 2  ;;  %v44_v38 = vadd.f32 %v43_v36, %v42_v34 }
  0x10   :  { %423 = vmatprep.subr.bf16.mxu0 %v457_v22 }
  0x11   :  { %278 = vmatpush1.bf16.msra.mxu1 %v460_v29  ;;  %v31_v39 = vadd.f32 %v30_v37, %v29_v35  ;;  %v45_v40 = vrot.slane %v44_v38, 2 }
  0x13   :  { %v32_v41 = vrot.slane %v31_v39, 1  ;;  %v46_v42 = vadd.f32 %v45_v40, %v44_v38 }
  0x15   :  { %v33_v43 = vadd.f32 %v32_v41, %v31_v39  ;;  %v47_v44 = vrot.slane %v46_v42, 1 }
  0x17   :  { %v34_v45 = vmul.f32 0.055555556, %v33_v43  ;;  %v48_v46 = vadd.f32 %v47_v44, %v46_v42 }
  0x19   :  { %v49_v47 = vmul.f32 0.055555556, %v48_v46  ;;  %v50_v48 = vmul.f32 %v34_v45, %v34_v45  ;;  %v53_v52 = vsub.f32 %v18_v14, %v34_v45  ;;  %v54_v53 = vsub.f32 %v19_v15, %v34_v45 }
  0x1a   :  { %v55_v54 = vsub.f32 %v20_v17, %v34_v45 }
  0x1b   :  { %v51_v49 = vsub.f32 %v49_v47, %v50_v48 }
  0x1d   :  { %v52_v50 = vmax.f32 %v51_v49, 0.0 }
  0x1f   :  { %v56_v51 = vadd.f32 1e-05, %v52_v50 }
  0x21   :  { %464 = vrsqrt.f32 %v56_v51 }
  0x2b   :  { %v465_v55 = vpop.eup %464 }
  0x2c   :  { %v58_v57 = vmul.f32 %v465_v55, %v53_v52  ;;  %v59_v58 = vmul.f32 %v465_v55, %v54_v53  ;;  %v60_v59 = vmul.f32 %v465_v55, %v55_v54 }
  0x2e   :  { %v68_v61 = vmul.f32 %v389_v56, %v58_v57  ;;  %v69_v62 = vmul.f32 %v389_v56, %v59_v58  ;;  %v70_v63 = vmul.f32 %v389_v56, %v60_v59 }
  0x30   :  { %v78_v0 = vadd.f32 %v390_v60, %v68_v61  ;;  %v79_v2 = vadd.f32 %v390_v60, %v69_v62  ;;  %v80_v5 = vadd.f32 %v390_v60, %v70_v63 }
  0x32   :  { %v81_v3 = vmax.f32 %v78_v0, 0.0  ;;  %v82_v4 = vmax.f32 %v79_v2, 0.0  ;;  %v83_v8 = vmax.f32 %v80_v5, 0.0 }
  0x34   :  { %v84_v6 = vpack.c.bf16 %v82_v4, %v81_v3  ;;  %v85_v10 = vpack.c.bf16 %v83_v8, %v83_v8 }
  0x36   :  { %411 = vmatmul.mubr.msk.bf16.vlgmr.msra.gmra.mrb[0].mxu0 %vm21_vm0, %v84_v6  ;;  %413 = vmatmul.mubr.msk.bf16.vlgmr.msra.gmra.mrb[0].mxu1 %vm21_vm0, %v84_v6 }
  0x37   :  { %424 = vmatpush3.bf16.msra.mxu0 %v457_v22  ;;  %262 = vmatprep.mubr.bf16.mxu0 %v466_v1 }
  0x38   :  { %425 = vmatprep.subr.bf16.mxu0 %v461_v7  ;;  %313 = vmatprep.mubr.bf16.mxu1 %v466_v1 }
  0x3b   :  { %426 = vmatpush3.bf16.msra.mxu0 %v461_v7 }
  0x3c   :  { %427 = vmatprep.subr.bf16.mxu0 %v462_v9 }
  0x3e   :  { %412 = vmatmul.mubr.msk.bf16.gmra.mrb[4].mxu0 %vm21_vm0, %v85_v10  ;;  %414 = vmatmul.mubr.msk.bf16.gmra.mrb[4].mxu1 %vm21_vm0, %v85_v10 }
  0x3f   :  { %428 = vmatpush3.bf16.msra.mxu0 %v462_v9  ;;  %431 = vmatprep.mubr.msk.bf16.mxu0 %vm21_vm0, %v84_v6 }
  0x40   :  { %429 = vmatprep.subr.bf16.mxu0 %v463_v11 }
  0x43   :  { %430 = vmatpush3.bf16.msra.mxu0 %v463_v11 }
  0x46   :  { %432 = vmatmul.mubr.msk.bf16.vlgmr.msra.gmra.mrb[8].mxu0 %vm21_vm0, %v85_v10 }
 0x109   :  { %v254_v12 = vpop.f32.mrb[0].mxu0  ;;  %v305_v1 = vpop.f32.mrb[0].mxu1 }
 0x10a   :  { %370 = vst [vmem:[%s635_s4] sm:$0xff] %v254_v12  ;;  %v256_v13 = vpop.f32.mrb[1].mxu0  ;;  %372 = vst [vmem:[%s635_s4 + $0x10] sm:$0xff] %v305_v1  ;;  %v307_v14 = vpop.f32.mrb[1].mxu1 }
 0x10b   :  { %371 = vst [vmem:[%s635_s4 + $0x8] sm:$0xff] %v256_v13  ;;  %v258_v15 = vpop.f32.mrb[2].mxu0  ;;  %373 = vst [vmem:[%s635_s4 + $0x18] sm:$0xff] %v307_v14  ;;  %v309_v16 = vpop.f32.mrb[2].mxu1 }
 0x10c   :  { %375 = vst [vmem:[%s635_s4 + $0x28] sm:$0xff] %v258_v15  ;;  %v260_v17 = vpop.f32.mrb[3].mxu0  ;;  %377 = vst [vmem:[%s635_s4 + $0x38] sm:$0xff] %v309_v16  ;;  %v311_v18 = vpop.f32.mrb[3].mxu1 }
 0x10d   :  { %376 = vst [vmem:[%s635_s4 + $0x30] sm:$0xff] %v260_v17  ;;  %378 = vst [vmem:[%s635_s4 + $0x40] sm:$0xff] %v311_v18 }
 0x111   :  { %v264_v19 = vpop.f32.mrb[4].mxu0  ;;  %v315_v20 = vpop.f32.mrb[4].mxu1 }
 0x112   :  { %380 = vst [vmem:[%s635_s4 + $0x50] sm:$0x3] %v264_v19  ;;  %v266_v21 = vpop.f32.mrb[5].mxu0  ;;  %382 = vst [vmem:[%s635_s4 + $0x60] sm:$0x3] %v315_v20  ;;  %v317_v22 = vpop.f32.mrb[5].mxu1 }
 0x113   :  { %381 = vst [vmem:[%s635_s4 + $0x58] sm:$0x3] %v266_v21  ;;  %v268_v23 = vpop.f32.mrb[6].mxu0  ;;  %383 = vst [vmem:[%s635_s4 + $0x68] sm:$0x3] %v317_v22  ;;  %v319_v24 = vpop.f32.mrb[6].mxu1 }
 0x114   :  { %v269_v25 = vpop.f32.mrb[7].mxu0  ;;  %v320_v26 = vpop.f32.mrb[7].mxu1 }
 0x119   :  { %v433_v27 = vpop.f32.mrb[8].mxu0 }
 0x11a   :  { %384 = vst.msk [vmem:[%s635_s4 + $0x70] sm:$0x3] %vm25_vm1, %v433_v27  ;;  %v356_v28 = vpop.f32.mrb[9].mxu0 }
 0x11b   :  { %374 = vst.msk [vmem:[%s635_s4 + $0x20] sm:$0xff] %vm21_vm0, %v356_v28  ;;  %v434_v29 = vpop.f32.mrb[10].mxu0 }
 0x11c   :  { %v359_v30 = vpop.f32.mrb[11].mxu0 }
 0x11d   :  { %379 = vst.msk [vmem:[%s635_s4 + $0x48] sm:$0xff] %vm21_vm0, %v359_v30 }

// kernel: generator_forward.7
= control target key start
LH: loop header
LB: loop body
LE: loop exit
PB: predicated region body
PF: predicated region fallthrough
CT: control target
= control target key end

     0   :  { %v3809_v3 = vmov 0   ;;  %vm157_vm0 = vcmask 261120   ;;  %vm2901_vm1 = vcmask 517120   ;;  %s4936_s1 = inlined_call_operand.vmem [shape: bf16[32,1024], index: 1, kind: input, shape index: {}]   ;;  %s4937_s0 = inlined_call_operand.vmem [shape: bf16[2,32], index: 0, kind: input, shape index: {}]   ;;  %s4938_s3 = inlined_call_operand.vmem [shape: bf16[1024,576], index: 3, kind: input, shape index: {}]   ;;  %s4939_s2 = inlined_call_operand.vmem [shape: f32[1,1024], index: 2, kind: input, shape index: {}]   ;;  %s4940_s4 = inlined_call_operand.vmem [shape: f32[2,576], index: 4, kind: output, shape index: {}]  }
   0x1   :  { %v19_v0 = vld [vmem:[%s4936_s1] sm:$0xff]  ;;  %193 = vmatprep.mubr.bf16.mxu0 %v3809_v3  ;;  %234 = vmatprep.mubr.bf16.mxu1 %v3809_v3  ;;  %v20_v7 = vld [vmem:[%s4936_s1 + $0x8] sm:$0xff]  ;;  %v21_v15 = vld [vmem:[%s4936_s1 + $0x10] sm:$0xff] }
   0x2   :  { %v23_v1 = vld [vmem:[%s4936_s1 + $0x20] sm:$0xff]  ;;  %v24_v9 = vld [vmem:[%s4936_s1 + $0x28] sm:$0xff]  ;;  %v25_v16 = vld [vmem:[%s4936_s1 + $0x30] sm:$0xff] }
   0x3   :  { %v27_v2 = vld [vmem:[%s4936_s1 + $0x40] sm:$0xff]  ;;  %v2908_v4 = vcombine.high %v19_v0, %v23_v1  ;;  %v2907_v5 = vcombine.low %v19_v0, %v23_v1  ;;  %v28_v10 = vld [vmem:[%s4936_s1 + $0x48] sm:$0xff]  ;;  %v2910_v12 = vcombine.high %v20_v7, %v24_v9  ;;  %v2909_v13 = vcombine.low %v20_v7, %v24_v9  ;;  %v22_v18 = vld [vmem:[%s4936_s1 + $0x18] sm:$0xff] }
   0x4   :  { %v31_v6 = vld [vmem:[%s4936_s1 + $0x60] sm:$0xff]  ;;  %v32_v11 = vld [vmem:[%s4936_s1 + $0x68] sm:$0xff]  ;;  %v26_v19 = vld [vmem:[%s4936_s1 + $0x38] sm:$0xff]  ;;  %v2912_v20 = vcombine.high %v21_v15, %v25_v16  ;;  %v2911_v27 = vcombine.low %v21_v15, %v25_v16 }
   0x5   :  { %v2916_v8 = vcombine.high %v27_v2, %v31_v6  ;;  %161 = vmatprep.subr.bf16.mxu0 %v2908_v4  ;;  %v2918_v14 = vcombine.high %v28_v10, %v32_v11  ;;  %v2915_v17 = vcombine.low %v27_v2, %v31_v6  ;;  %202 = vmatprep.subr.bf16.mxu1 %v2910_v12  ;;  %v18_v21 = vld [vmem:[%s4937_s0] sm:$0x1]  ;;  %v29_v23 = vld [vmem:[%s4936_s1 + $0x50] sm:$0xff]  ;;  %v30_v26 = vld [vmem:[%s4936_s1 + $0x58] sm:$0xff] }
   0x6   :  { %162 = vmatpush1.bf16.msra.mxu0 %v2907_v5  ;;  %203 = vmatpush1.bf16.msra.mxu1 %v2909_v13  ;;  %v2917_v22 = vcombine.low %v28_v10, %v32_v11  ;;  %v33_v24 = vld [vmem:[%s4936_s1 + $0x70] sm:$0xff]  ;;  %v2914_v25 = vcombine.high %v22_v18, %v26_v19  ;;  %v34_v28 = vld [vmem:[%s4936_s1 + $0x78] sm:$0xff]  ;;  %v2913_v30 = vcombine.low %v22_v18, %v26_v19  ;;  %v3366_v35 = vld [vmem:[%s4938_s3 + $0xc] ss:$20 sps:$4 sm:$0xff]  }
   0x7   :  { %163 = vmatprep.subr.bf16.mxu0 %v2916_v8  ;;  %204 = vmatprep.subr.bf16.mxu1 %v2918_v14  ;;  %v2920_v29 = vcombine.high %v29_v23, %v33_v24  ;;  %v2922_v31 = vcombine.high %v30_v26, %v34_v28  ;;  %v2919_v32 = vcombine.low %v29_v23, %v33_v24  ;;  %v3363_v33 = vld [vmem:[%s4938_s3 + $0x4] ss:$20 sps:$4 sm:$0xff]   ;;  %v3361_v36 = vld [vmem:[%s4938_s3] ss:$20 sps:$4 sm:$0xff]   ;;  %v3364_v38 = vld [vmem:[%s4938_s3 + $0x8] ss:$20 sps:$4 sm:$0xff]  }
   0x8   :  { %v2921_v34 = vcombine.low %v30_v26, %v34_v28  ;;  %v3369_v37 = vld [vmem:[%s4938_s3 + $0x2c] ss:$20 sps:$4 sm:$0xff]   ;;  %v3372_v39 = vld [vmem:[%s4938_s3 + $0x34] ss:$20 sps:$4 sm:$0xff]   ;;  %v3370_v42 = vld [vmem:[%s4938_s3 + $0x30] ss:$20 sps:$4 sm:$0xff]  }
   0x9   :  { %v3367_v40 = vld [vmem:[%s4938_s3 + $0x28] ss:$20 sps:$4 sm:$0xff]   ;;  %v3373_v44 = vld [vmem:[%s4938_s3 + $0x50] ss:$20 sps:$4 sm:$0xff]   ;;  %v3376_v46 = vld [vmem:[%s4938_s3 + $0x58] ss:$20 sps:$4 sm:$0xff]  }
   0xa   :  { %164 = vmatpush1.bf16.msra.mxu0 %v2915_v17  ;;  %205 = vmatpush1.bf16.msra.mxu1 %v2917_v22  ;;  %v3375_v41 = vld [vmem:[%s4938_s3 + $0x54] ss:$20 sps:$4 sm:$0xff]   ;;  %v3378_v43 = vld [vmem:[%s4938_s3 + $0x5c] ss:$20 sps:$4 sm:$0xff]   ;;  %v3384_v47 = vld [vmem:[%s4938_s3 + $0x84] ss:$20 sps:$4 sm:$0xff]  }
   0xb   :  { %243 = vmatprep.subr.bf16.mxu0 %v2912_v20  ;;  %284 = vmatprep.subr.bf16.mxu1 %v2914_v25  ;;  %v3381_v45 = vld [vmem:[%s4938_s3 + $0x7c] ss:$20 sps:$4 sm:$0xff]   ;;  %v3379_v48 = vld [vmem:[%s4938_s3 + $0x78] ss:$20 sps:$4 sm:$0xff]   ;;  %v3382_v50 = vld [vmem:[%s4938_s3 + $0x80] ss:$20 sps:$4 sm:$0xff]  }
   0xc   :  { %v3387_v49 = vld [vmem:[%s4938_s3 + $0xa4] ss:$20 sps:$4 sm:$0xff]   ;;  %v3390_v51 = vld [vmem:[%s4938_s3 + $0xac] ss:$20 sps:$4 sm:$0xff]   ;;  %v3388_v54 = vld [vmem:[%s4938_s3 + $0xa8] ss:$20 sps:$4 sm:$0xff]  }
   0xd   :  { %2923 = vmatmul.mubr.msk.bf16.vlgmr.msra.gmra.mrb[0].mxu0 %vm157_vm0, %v18_v21  ;;  %2924 = vmatmul.mubr.msk.bf16.vlgmr.msra.gmra.mrb[0].mxu1 %vm157_vm0, %v18_v21  ;;  %v3385_v52 = vld [vmem:[%s4938_s3 + $0xa0] ss:$20 sps:$4 sm:$0xff]   ;;  %v3391_v56 = vld [vmem:[%s4938_s3 + $0xc8] ss:$20 sps:$4 sm:$0xff]   ;;  %v3394_v58 = vld [vmem:[%s4938_s3 + $0xd0] ss:$20 sps:$4 sm:$0xff]  }
   0xe   :  { %244 = vmatpush1.bf16.msra.mxu0 %v2911_v27  ;;  %275 = vmatprep.mubr.bf16.mxu0 %v3809_v3  ;;  %v3393_v53 = vld [vmem:[%s4938_s3 + $0xcc] ss:$20 sps:$4 sm:$0xff]   ;;  %v3396_v55 = vld [vmem:[%s4938_s3 + $0xd4] ss:$20 sps:$4 sm:$0xff]   ;;  %v3402_v59 = vld [vmem:[%s4938_s3 + $0xfc] ss:$20 sps:$4 sm:$0xff]  }
   0xf   :  { %245 = vmatprep.subr.bf16.mxu0 %v2920_v29  ;;  %285 = vmatpush1.bf16.msra.mxu1 %v2913_v30  ;;  %v3399_v57 = vld [vmem:[%s4938_s3 + $0xf4] ss:$20 sps:$4 sm:$0xff]   ;;  %v3397_v60 = vld [vmem:[%s4938_s3 + $0xf0] ss:$20 sps:$4 sm:$0xff]   ;;  %v3400_v62 = vld [vmem:[%s4938_s3 + $0xf8] ss:$20 sps:$4 sm:$0xff]  }
  0x10   :  { %316 = vmatprep.mubr.bf16.mxu1 %v3809_v3  ;;  %286 = vmatprep.subr.bf16.mxu1 %v2922_v31  ;;  %v3405_v61 = vld [vmem:[%s4938_s3 + $0x11c] ss:$20 sps:$4 sm:$0xff]   ;;  %v3408_v63 = vld [vmem:[%s4938_s3 + $0x124] ss:$20 sps:$4 sm:$0xff]   ;;  %v3406_v1 = vld [vmem:[%s4938_s3 + $0x120] ss:$20 sps:$4 sm:$0xff]  }
  0x11   :  { %v3403_v0 = vld [vmem:[%s4938_s3 + $0x118] ss:$20 sps:$4 sm:$0xff]   ;;  %v3409_v4 = vld [vmem:[%s4938_s3 + $0x140] ss:$20 sps:$4 sm:$0xff]   ;;  %v3412_v6 = vld [vmem:[%s4938_s3 + $0x148] ss:$20 sps:$4 sm:$0xff]  }
  0x12   :  { %246 = vmatpush1.bf16.msra.mxu0 %v2919_v32  ;;  %v3411_v2 = vld [vmem:[%s4938_s3 + $0x144] ss:$20 sps:$4 sm:$0xff]   ;;  %v3414_v3 = vld [vmem:[%s4938_s3 + $0x14c] ss:$20 sps:$4 sm:$0xff]   ;;  %v3420_v7 = vld [vmem:[%s4938_s3 + $0x174] ss:$20 sps:$4 sm:$0xff]  }
  0x13   :  { %2381 = vmatprep.subr.bf16.mxu0 %v3363_v33  ;;  %287 = vmatpush1.bf16.msra.mxu1 %v2921_v34  ;;  %v3417_v5 = vld [vmem:[%s4938_s3 + $0x16c] ss:$20 sps:$4 sm:$0xff]   ;;  %v3415_v8 = vld [vmem:[%s4938_s3 + $0x168] ss:$20 sps:$4 sm:$0xff]   ;;  %v3418_v10 = vld [vmem:[%s4938_s3 + $0x170] ss:$20 sps:$4 sm:$0xff]  }
  0x14   :  { %2545 = vmatprep.subr.bf16.mxu1 %v3366_v35  ;;  %v3423_v9 = vld [vmem:[%s4938_s3 + $0x194] ss:$20 sps:$4 sm:$0xff]   ;;  %v3426_v11 = vld [vmem:[%s4938_s3 + $0x19c] ss:$20 sps:$4 sm:$0xff]   ;;  %v3424_v14 = vld [vmem:[%s4938_s3 + $0x198] ss:$20 sps:$4 sm:$0xff]  }
  0x15   :  { %2925 = vmatmul.mubr.msk.bf16.vlgmr.msra.gmra.mrb[4].mxu0 %vm157_vm0, %v18_v21  ;;  %v3421_v12 = vld [vmem:[%s4938_s3 + $0x190] ss:$20 sps:$4 sm:$0xff]   ;;  %v3427_v16 = vld [vmem:[%s4938_s3 + $0x1b8] ss:$20 sps:$4 sm:$0xff]   ;;  %v3430_v18 = vld [vmem:[%s4938_s3 + $0x1c0] ss:$20 sps:$4 sm:$0xff]  }
  0x16   :  { %2382 = vmatpush1.bf16.msra.mxu0 %v3361_v36  ;;  %2926 = vmatmul.mubr.msk.bf16.vlgmr.msra.gmra.mrb[4].mxu1 %vm157_vm0, %v18_v21  ;;  %v3429_v13 = vld [vmem:[%s4938_s3 + $0x1bc] ss:$20 sps:$4 sm:$0xff]   ;;  %v3432_v15 = vld [vmem:[%s4938_s3 + $0x1c4] ss:$20 sps:$4 sm:$0xff]   ;;  %v3438_v19 = vld [vmem:[%s4938_s3 + $0x1ec] ss:$20 sps:$4 sm:$0xff]   ;;  %v37_v36 = vlaneseq }
  0x17   :  { %2383 = vmatprep.subr.bf16.mxu0 %v3369_v37  ;;  %2546 = vmatpush1.bf16.msra.mxu1 %v3364_v38  ;;  %v3435_v17 = vld [vmem:[%s4938_s3 + $0x1e4] ss:$20 sps:$4 sm:$0xff]   ;;  %v3433_v20 = vld [vmem:[%s4938_s3 + $0x1e0] ss:$20 sps:$4 sm:$0xff]   ;;  %v3436_v22 = vld [vmem:[%s4938_s3 + $0x1e8] ss:$20 sps:$4 sm:$0xff]  }
  0x18   :  { %2547 = vmatprep.subr.bf16.mxu1 %v3372_v39  ;;  %v3441_v21 = vld [vmem:[%s4938_s3 + $0x20c] ss:$20 sps:$4 sm:$0xff]   ;;  %v3444_v23 = vld [vmem:[%s4938_s3 + $0x214] ss:$20 sps:$4 sm:$0xff]   ;;  %v3442_v26 = vld [vmem:[%s4938_s3 + $0x210] ss:$20 sps:$4 sm:$0xff]  }
  0x19   :  { %v3439_v24 = vld [vmem:[%s4938_s3 + $0x208] ss:$20 sps:$4 sm:$0xff]   ;;  %v3445_v28 = vld [vmem:[%s4938_s3 + $0x230] ss:$20 sps:$4 sm:$0xff]   ;;  %v3448_v29 = vld [vmem:[%s4938_s3 + $0x238] ss:$20 sps:$4 sm:$0xff]  }
  0x1a   :  { %2384 = vmatpush1.bf16.msra.mxu0 %v3367_v40  ;;  %v3447_v25 = vld [vmem:[%s4938_s3 + $0x234] ss:$20 sps:$4 sm:$0xff]   ;;  %v3450_v27 = vld [vmem:[%s4938_s3 + $0x23c] ss:$20 sps:$4 sm:$0xff]   ;;  %v3456_v31 = vld [vmem:[%s4938_s3 + $0x264] ss:$20 sps:$4 sm:$0xff]  }
  0x1b   :  { %2385 = vmatprep.subr.bf16.mxu0 %v3375_v41  ;;  %2548 = vmatpush1.bf16.msra.mxu1 %v3370_v42  ;;  %v3453_v30 = vld [vmem:[%s4938_s3 + $0x25c] ss:$20 sps:$4 sm:$0xff]   ;;  %v3451_v32 = vld [vmem:[%s4938_s3 + $0x258] ss:$20 sps:$4 sm:$0xff]   ;;  %v3454_v33 = vld [vmem:[%s4938_s3 + $0x260] ss:$20 sps:$4 sm:$0xff]  }
  0x1c   :  { %2549 = vmatprep.subr.bf16.mxu1 %v3378_v43  ;;  %v3459_v34 = vld [vmem:[%s4938_s3 + $0x284] ss:$20 sps:$4 sm:$0xff]   ;;  %v3462_v35 = vld [vmem:[%s4938_s3 + $0x28c] ss:$20 sps:$4 sm:$0xff]   ;;  %v4089_v37 = vshrl.u32 %v37_v36, 7 }
  0x1d   :  { %v4095_v39 = vld [vmem:[%s4939_s2] sm:$0xff]  ;;  %v3508_v36 = vld [vmem:[%s4938_s3 + $0x3c8] ss:$20 sps:$4 sm:$0xff]  }
  0x1e   :  { %2386 = vmatpush1.bf16.msra.mxu0 %v3373_v44  ;;  %v39_v38 = vsub.s32 0, %v4089_v37  ;;  %v43_v40 = vsub.s32 1, %v4089_v37  ;;  %v51_v41 = vsub.s32 3, %v4089_v37 }
  0x1f   :  { %2387 = vmatprep.subr.bf16.mxu0 %v3381_v45  ;;  %2550 = vmatpush1.bf16.msra.mxu1 %v3376_v46 }
  0x20   :  { %2551 = vmatprep.subr.bf16.mxu1 %v3384_v47  ;;  %v40_v42 = vrot.slane %v4095_v39, %v39_v38  ;;  %v44_v43 = vrot.slane %v4095_v39, %v43_v40  ;;  %v52_v45 = vrot.slane %v4095_v39, %v51_v41  ;;  %v3513_v38 = vld [vmem:[%s4938_s3 + $0x3ec] ss:$20 sps:$4 sm:$0xff]   ;;  %v3516_v40 = vld [vmem:[%s4938_s3 + $0x3f4] ss:$20 sps:$4 sm:$0xff]  }
  0x21   :  { %v3511_v41 = vld [vmem:[%s4938_s3 + $0x3e8] ss:$20 sps:$4 sm:$0xff]  }
  0x22   :  { %2388 = vmatpush1.bf16.msra.mxu0 %v3379_v48 }
  0x23   :  { %2389 = vmatprep.subr.bf16.mxu0 %v3387_v49  ;;  %2552 = vmatpush1.bf16.msra.mxu1 %v3382_v50 }
  0x24   :  { %2553 = vmatprep.subr.bf16.mxu1 %v3390_v51 }
  0x26   :  { %2390 = vmatpush1.bf16.msra.mxu0 %v3385_v52 }
  0x27   :  { %2391 = vmatprep.subr.bf16.mxu0 %v3393_v53  ;;  %2554 = vmatpush1.bf16.msra.mxu1 %v3388_v54  ;;  %v3457_v54 = vld [vmem:[%s4938_s3 + $0x280] ss:$20 sps:$4 sm:$0xff]  }
  0x28   :  { %2555 = vmatprep.subr.bf16.mxu1 %v3396_v55  ;;  %v3460_v55 = vld [vmem:[%s4938_s3 + $0x288] ss:$20 sps:$4 sm:$0xff]  }
  0x2a   :  { %2392 = vmatpush1.bf16.msra.mxu0 %v3391_v56 }
  0x2b   :  { %2393 = vmatprep.subr.bf16.mxu0 %v3399_v57  ;;  %2556 = vmatpush1.bf16.msra.mxu1 %v3394_v58 }
  0x2c   :  { %2557 = vmatprep.subr.bf16.mxu1 %v3402_v59  ;;  %v3465_v59 = vld [vmem:[%s4938_s3 + $0x2ac] ss:$20 sps:$4 sm:$0xff]  }
  0x2e   :  { %2394 = vmatpush1.bf16.msra.mxu0 %v3397_v60  ;;  %v3468_v60 = vld [vmem:[%s4938_s3 + $0x2b4] ss:$20 sps:$4 sm:$0xff]  }
  0x2f   :  { %2395 = vmatprep.subr.bf16.mxu0 %v3405_v61  ;;  %2558 = vmatpush1.bf16.msra.mxu1 %v3400_v62 }
  0x30   :  { %2559 = vmatprep.subr.bf16.mxu1 %v3408_v63  ;;  %v3463_v63 = vld [vmem:[%s4938_s3 + $0x2a8] ss:$20 sps:$4 sm:$0xff]  }
  0x32   :  { %2396 = vmatpush1.bf16.msra.mxu0 %v3403_v0  ;;  %v3466_v0 = vld [vmem:[%s4938_s3 + $0x2b0] ss:$20 sps:$4 sm:$0xff]  }
  0x33   :  { %2397 = vmatprep.subr.bf16.mxu0 %v3411_v2  ;;  %2560 = vmatpush1.bf16.msra.mxu1 %v3406_v1  ;;  %v3471_v2 = vld [vmem:[%s4938_s3 + $0x2d4] ss:$20 sps:$4 sm:$0xff]  }
  0x34   :  { %2561 = vmatprep.subr.bf16.mxu1 %v3414_v3  ;;  %v3474_v3 = vld [vmem:[%s4938_s3 + $0x2dc] ss:$20 sps:$4 sm:$0xff]  }
  0x36   :  { %2398 = vmatpush1.bf16.msra.mxu0 %v3409_v4 }
  0x37   :  { %2399 = vmatprep.subr.bf16.mxu0 %v3417_v5  ;;  %2562 = vmatpush1.bf16.msra.mxu1 %v3412_v6 }
  0x38   :  { %2563 = vmatprep.subr.bf16.mxu1 %v3420_v7  ;;  %v3469_v7 = vld [vmem:[%s4938_s3 + $0x2d0] ss:$20 sps:$4 sm:$0xff]  }
  0x3a   :  { %2400 = vmatpush1.bf16.msra.mxu0 %v3415_v8  ;;  %v3472_v8 = vld [vmem:[%s4938_s3 + $0x2d8] ss:$20 sps:$4 sm:$0xff]  }
  0x3b   :  { %2401 = vmatprep.subr.bf16.mxu0 %v3423_v9  ;;  %2564 = vmatpush1.bf16.msra.mxu1 %v3418_v10  ;;  %v3477_v9 = vld [vmem:[%s4938_s3 + $0x2fc] ss:$20 sps:$4 sm:$0xff]   ;;  %v3480_v10 = vld [vmem:[%s4938_s3 + $0x304] ss:$20 sps:$4 sm:$0xff]  }
  0x3c   :  { %2565 = vmatprep.subr.bf16.mxu1 %v3426_v11  ;;  %v3475_v11 = vld [vmem:[%s4938_s3 + $0x2f8] ss:$20 sps:$4 sm:$0xff]  }
  0x3e   :  { %2402 = vmatpush1.bf16.msra.mxu0 %v3421_v12  ;;  %v3478_v12 = vld [vmem:[%s4938_s3 + $0x300] ss:$20 sps:$4 sm:$0xff]  }
  0x3f   :  { %2403 = vmatprep.subr.bf16.mxu0 %v3429_v13  ;;  %2566 = vmatpush1.bf16.msra.mxu1 %v3424_v14  ;;  %v3483_v13 = vld [vmem:[%s4938_s3 + $0x324] ss:$20 sps:$4 sm:$0xff]   ;;  %v3486_v14 = vld [vmem:[%s4938_s3 + $0x32c] ss:$20 sps:$4 sm:$0xff]  }
  0x40   :  { %2567 = vmatprep.subr.bf16.mxu1 %v3432_v15  ;;  %v3481_v15 = vld [vmem:[%s4938_s3 + $0x320] ss:$20 sps:$4 sm:$0xff]  }
  0x42   :  { %2404 = vmatpush1.bf16.msra.mxu0 %v3427_v16  ;;  %v3484_v16 = vld [vmem:[%s4938_s3 + $0x328] ss:$20 sps:$4 sm:$0xff]  }
  0x43   :  { %2405 = vmatprep.subr.bf16.mxu0 %v3435_v17  ;;  %2568 = vmatpush1.bf16.msra.mxu1 %v3430_v18  ;;  %v3489_v17 = vld [vmem:[%s4938_s3 + $0x34c] ss:$20 sps:$4 sm:$0xff]   ;;  %v3492_v18 = vld [vmem:[%s4938_s3 + $0x354] ss:$20 sps:$4 sm:$0xff]  }
  0x44   :  { %2569 = vmatprep.subr.bf16.mxu1 %v3438_v19  ;;  %v3487_v19 = vld [vmem:[%s4938_s3 + $0x348] ss:$20 sps:$4 sm:$0xff]  }
  0x46   :  { %2406 = vmatpush1.bf16.msra.mxu0 %v3433_v20  ;;  %v3490_v20 = vld [vmem:[%s4938_s3 + $0x350] ss:$20 sps:$4 sm:$0xff]  }
  0x47   :  { %2407 = vmatprep.subr.bf16.mxu0 %v3441_v21  ;;  %2570 = vmatpush1.bf16.msra.mxu1 %v3436_v22  ;;  %v3495_v22 = vld [vmem:[%s4938_s3 + $0x374] ss:$20 sps:$4 sm:$0xff]  }
  0x48   :  { %2571 = vmatprep.subr.bf16.mxu1 %v3444_v23  ;;  %v3498_v23 = vld [vmem:[%s4938_s3 + $0x37c] ss:$20 sps:$4 sm:$0xff]  }
  0x4a   :  { %2408 = vmatpush1.bf16.msra.mxu0 %v3439_v24 }
  0x4b   :  { %2409 = vmatprep.subr.bf16.mxu0 %v3447_v25  ;;  %2572 = vmatpush1.bf16.msra.mxu1 %v3442_v26 }
  0x4c   :  { %2573 = vmatprep.subr.bf16.mxu1 %v3450_v27  ;;  %v3493_v27 = vld [vmem:[%s4938_s3 + $0x370] ss:$20 sps:$4 sm:$0xff]  }
  0x4e   :  { %2410 = vmatpush1.bf16.msra.mxu0 %v3445_v28  ;;  %v3496_v28 = vld [vmem:[%s4938_s3 + $0x378] ss:$20 sps:$4 sm:$0xff]  }
  0x4f   :  { %2574 = vmatpush1.bf16.msra.mxu1 %v3448_v29  ;;  %2411 = vmatprep.subr.bf16.mxu0 %v3453_v30  ;;  %v3501_v29 = vld [vmem:[%s4938_s3 + $0x39c] ss:$20 sps:$4 sm:$0xff]   ;;  %v3504_v30 = vld [vmem:[%s4938_s3 + $0x3a4] ss:$20 sps:$4 sm:$0xff]  }
  0x50   :  { %2575 = vmatprep.subr.bf16.mxu1 %v3456_v31  ;;  %v3499_v31 = vld [vmem:[%s4938_s3 + $0x398] ss:$20 sps:$4 sm:$0xff]  }
  0x52   :  { %2412 = vmatpush1.bf16.msra.mxu0 %v3451_v32  ;;  %v3502_v32 = vld [vmem:[%s4938_s3 + $0x3a0] ss:$20 sps:$4 sm:$0xff]  }
  0x53   :  { %2576 = vmatpush1.bf16.msra.mxu1 %v3454_v33  ;;  %2422 = vmatprep.subr.bf16.mxu0 %v3459_v34  ;;  %v3507_v33 = vld [vmem:[%s4938_s3 + $0x3c4] ss:$20 sps:$4 sm:$0xff]   ;;  %v3510_v34 = vld [vmem:[%s4938_s3 + $0x3cc] ss:$20 sps:$4 sm:$0xff]  }
  0x54   :  { %2586 = vmatprep.subr.bf16.mxu1 %v3462_v35  ;;  %v3505_v35 = vld [vmem:[%s4938_s3 + $0x3c0] ss:$20 sps:$4 sm:$0xff]  }
  0xe0   :  { %v195_v44 = vpop.f32.mrb[0].mxu0  ;;  %v4102_v50 = vpop.f32.mrb[0].mxu1 }
  0xe1   :  { %v196_v46 = vadd.f32 %v195_v44, %v40_v42  ;;  %v197_v47 = vpop.f32.mrb[1].mxu0  ;;  %v238_v52 = vpop.f32.mrb[1].mxu1  ;;  %v3514_v42 = vld [vmem:[%s4938_s3 + $0x3f0] ss:$20 sps:$4 sm:$0xff]  }
  0xe2   :  { %v198_v48 = vadd.f32 %v197_v47, %v44_v43  ;;  %v199_v49 = vpop.f32.mrb[2].mxu0  ;;  %v239_v56 = vadd.f32 %v238_v52, %v52_v45  ;;  %v240_v57 = vpop.f32.mrb[2].mxu1  ;;  %v3519_v43 = vld [vmem:[%s4938_s3 + $0x414] ss:$20 sps:$4 sm:$0xff]   ;;  %v3522_v44 = vld [vmem:[%s4938_s3 + $0x41c] ss:$20 sps:$4 sm:$0xff]  }
  0xe3   :  { %v200_v51 = vpop.f32.mrb[3].mxu0  ;;  %v4112_v58 = vpack.c.bf16 %v196_v46, %v196_v46  ;;  %v241_v61 = vpop.f32.mrb[3].mxu1  ;;  %v3517_v45 = vld [vmem:[%s4938_s3 + $0x410] ss:$20 sps:$4 sm:$0xff]   ;;  %v3520_v46 = vld [vmem:[%s4938_s3 + $0x418] ss:$20 sps:$4 sm:$0xff]  }
  0xe4   :  { %v4104_v53 = vpack.c.bf16 %v198_v48, %v198_v48  ;;  %v4122_v62 = vpack.c.bf16 %v239_v56, %v239_v56  ;;  %v3525_v47 = vld [vmem:[%s4938_s3 + $0x43c] ss:$20 sps:$4 sm:$0xff]   ;;  %v3528_v48 = vld [vmem:[%s4938_s3 + $0x444] ss:$20 sps:$4 sm:$0xff]   ;;  %v3526_v51 = vld [vmem:[%s4938_s3 + $0x440] ss:$20 sps:$4 sm:$0xff]  }
  0xe5   :  { %v3523_v49 = vld [vmem:[%s4938_s3 + $0x438] ss:$20 sps:$4 sm:$0xff]   ;;  %v3532_v56 = vld [vmem:[%s4938_s3 + $0x468] ss:$20 sps:$4 sm:$0xff]  }
  0xe6   :  { %2413 = vmatprep.mubr.bf16.mxu0 %v4104_v53  ;;  %2577 = vmatprep.mubr.bf16.mxu1 %v4104_v53  ;;  %v3531_v52 = vld [vmem:[%s4938_s3 + $0x464] ss:$20 sps:$4 sm:$0xff]   ;;  %v3537_v57 = vld [vmem:[%s4938_s3 + $0x48c] ss:$20 sps:$4 sm:$0xff]   ;;  %v3535_v61 = vld [vmem:[%s4938_s3 + $0x488] ss:$20 sps:$4 sm:$0xff]  }
  0xe7   :  { %2414 = vmatmul.mubr.bf16.vlgmr.msra.gmra.mrb[8].mxu0 %v4112_v58  ;;  %2578 = vmatmul.mubr.bf16.vlgmr.msra.gmra.mrb[8].mxu1 %v4112_v58 }
  0xe8   :  { %2423 = vmatpush1.bf16.msra.mxu0 %v3457_v54  ;;  %2587 = vmatpush1.bf16.msra.mxu1 %v3460_v55  ;;  %v4132_v1 = vpop.f32.mrb[4].mxu0  ;;  %v3534_v54 = vld [vmem:[%s4938_s3 + $0x46c] ss:$20 sps:$4 sm:$0xff]  }
  0xe9   :  { %2424 = vmatprep.subr.bf16.mxu0 %v3465_v59  ;;  %2588 = vmatprep.subr.bf16.mxu1 %v3468_v60  ;;  %v4140_v4 = vpop.f32.mrb[5].mxu0  ;;  %v4186_v21 = vpop.f32.mrb[4].mxu1  ;;  %v3529_v55 = vld [vmem:[%s4938_s3 + $0x460] ss:$20 sps:$4 sm:$0xff]   ;;  %v47_v60 = vsub.s32 2, %v4089_v37 }
  0xea   :  { %2454 = vmatprep.mubr.bf16.mxu0 %v4122_v62  ;;  %2618 = vmatprep.mubr.bf16.mxu1 %v4122_v62  ;;  %v281_v5 = vpop.f32.mrb[6].mxu0  ;;  %v4194_v24 = vpop.f32.mrb[5].mxu1  ;;  %v3540_v59 = vld [vmem:[%s4938_s3 + $0x494] ss:$20 sps:$4 sm:$0xff]  }
  0xeb   :  { %v282_v6 = vpop.f32.mrb[7].mxu0  ;;  %v322_v25 = vpop.f32.mrb[6].mxu1  ;;  %v48_v5 = vrot.slane %v4095_v39, %v47_v60  ;;  %v3607_v60 = vld [vmem:[%s4938_s3 + $0x668] ss:$20 sps:$4 sm:$0xff]  }
  0xec   :  { %2425 = vmatpush1.bf16.msra.mxu0 %v3463_v63  ;;  %2589 = vmatpush1.bf16.msra.mxu1 %v3466_v0  ;;  %v323_v26 = vpop.f32.mrb[7].mxu1  ;;  %v3538_v63 = vld [vmem:[%s4938_s3 + $0x490] ss:$20 sps:$4 sm:$0xff]   ;;  %v3543_v0 = vld [vmem:[%s4938_s3 + $0x4b4] ss:$20 sps:$4 sm:$0xff]  }
  0xed   :  { %2426 = vmatprep.subr.bf16.mxu0 %v3471_v2  ;;  %2590 = vmatprep.subr.bf16.mxu1 %v3474_v3  ;;  %v3546_v2 = vld [vmem:[%s4938_s3 + $0x4bc] ss:$20 sps:$4 sm:$0xff]   ;;  %v59_v3 = vsub.s32 5, %v4089_v37  ;;  %v3567_v25 = vld [vmem:[%s4938_s3 + $0x554] ss:$20 sps:$4 sm:$0xff]  }
  0xee   :  { %v3541_v6 = vld [vmem:[%s4938_s3 + $0x4b0] ss:$20 sps:$4 sm:$0xff]  }
  0xef   :  { %v3570_v26 = vld [vmem:[%s4938_s3 + $0x55c] ss:$20 sps:$4 sm:$0xff]  }
  0xf0   :  { %2427 = vmatpush1.bf16.msra.mxu0 %v3469_v7  ;;  %2591 = vmatpush1.bf16.msra.mxu1 %v3472_v8  ;;  %v3544_v7 = vld [vmem:[%s4938_s3 + $0x4b8] ss:$20 sps:$4 sm:$0xff]   ;;  %v3549_v8 = vld [vmem:[%s4938_s3 + $0x4dc] ss:$20 sps:$4 sm:$0xff]  }
  0xf1   :  { %2428 = vmatprep.subr.bf16.mxu0 %v3477_v9  ;;  %2592 = vmatprep.subr.bf16.mxu1 %v3480_v10  ;;  %v3552_v9 = vld [vmem:[%s4938_s3 + $0x4e4] ss:$20 sps:$4 sm:$0xff]   ;;  %v60_v10 = vrot.slane %v4095_v39, %v59_v3 }
  0xf2   :  { %v3616_v3 = vld [vmem:[%s4938_s3 + $0x698] ss:$20 sps:$4 sm:$0xff]  }
  0xf4   :  { %2429 = vmatpush1.bf16.msra.mxu0 %v3475_v11  ;;  %2593 = vmatpush1.bf16.msra.mxu1 %v3478_v12  ;;  %v237_v11 = vadd.f32 %v4102_v50, %v48_v5  ;;  %v3547_v12 = vld [vmem:[%s4938_s3 + $0x4d8] ss:$20 sps:$4 sm:$0xff]   ;;  %v3621_v5 = vld [vmem:[%s4938_s3 + $0x6bc] ss:$20 sps:$4 sm:$0xff]  }
  0xf5   :  { %2430 = vmatprep.subr.bf16.mxu0 %v3483_v13  ;;  %2594 = vmatprep.subr.bf16.mxu1 %v3486_v14  ;;  %v3550_v13 = vld [vmem:[%s4938_s3 + $0x4e0] ss:$20 sps:$4 sm:$0xff]   ;;  %v3555_v14 = vld [vmem:[%s4938_s3 + $0x504] ss:$20 sps:$4 sm:$0xff]  }
  0xf6   :  { %v3558_v50 = vld [vmem:[%s4938_s3 + $0x50c] ss:$20 sps:$4 sm:$0xff]  }
  0xf8   :  { %2431 = vmatpush1.bf16.msra.mxu0 %v3481_v15  ;;  %2595 = vmatpush1.bf16.msra.mxu1 %v3484_v16  ;;  %v280_v15 = vadd.f32 %v4140_v4, %v60_v10  ;;  %v4322_v16 = vpack.c.bf16 %v237_v11, %v237_v11  ;;  %v3564_v4 = vld [vmem:[%s4938_s3 + $0x534] ss:$20 sps:$4 sm:$0xff]   ;;  %v3630_v10 = vld [vmem:[%s4938_s3 + $0x6ec] ss:$20 sps:$4 sm:$0xff]  }
  0xf9   :  { %2432 = vmatprep.subr.bf16.mxu0 %v3489_v17  ;;  %2596 = vmatprep.subr.bf16.mxu1 %v3492_v18  ;;  %v3553_v17 = vld [vmem:[%s4938_s3 + $0x500] ss:$20 sps:$4 sm:$0xff]   ;;  %v3556_v18 = vld [vmem:[%s4938_s3 + $0x508] ss:$20 sps:$4 sm:$0xff]  }
  0xfa   :  { %v3625_v11 = vld [vmem:[%s4938_s3 + $0x6e0] ss:$20 sps:$4 sm:$0xff]  }
  0xfc   :  { %2433 = vmatpush1.bf16.msra.mxu0 %v3487_v19  ;;  %2597 = vmatpush1.bf16.msra.mxu1 %v3490_v20  ;;  %v3561_v19 = vld [vmem:[%s4938_s3 + $0x52c] ss:$20 sps:$4 sm:$0xff]   ;;  %v4336_v20 = vpack.c.bf16 %v280_v15, %v280_v15  ;;  %v3631_v15 = vld [vmem:[%s4938_s3 + $0x708] ss:$20 sps:$4 sm:$0xff]  }
  0xfd   :  { %2434 = vmatprep.subr.bf16.mxu0 %v3495_v22  ;;  %2598 = vmatprep.subr.bf16.mxu1 %v3498_v23  ;;  %v3559_v22 = vld [vmem:[%s4938_s3 + $0x528] ss:$20 sps:$4 sm:$0xff]   ;;  %v3562_v23 = vld [vmem:[%s4938_s3 + $0x530] ss:$20 sps:$4 sm:$0xff]  }
 0x100   :  { %2435 = vmatpush1.bf16.msra.mxu0 %v3493_v27  ;;  %2599 = vmatpush1.bf16.msra.mxu1 %v3496_v28  ;;  %v3565_v27 = vld [vmem:[%s4938_s3 + $0x550] ss:$20 sps:$4 sm:$0xff]   ;;  %v3568_v28 = vld [vmem:[%s4938_s3 + $0x558] ss:$20 sps:$4 sm:$0xff]  }
 0x101   :  { %2436 = vmatprep.subr.bf16.mxu0 %v3501_v29  ;;  %2600 = vmatprep.subr.bf16.mxu1 %v3504_v30  ;;  %v3573_v29 = vld [vmem:[%s4938_s3 + $0x57c] ss:$20 sps:$4 sm:$0xff]   ;;  %v3576_v30 = vld [vmem:[%s4938_s3 + $0x584] ss:$20 sps:$4 sm:$0xff]  }
 0x104   :  { %2437 = vmatpush1.bf16.msra.mxu0 %v3499_v31  ;;  %2601 = vmatpush1.bf16.msra.mxu1 %v3502_v32  ;;  %v3571_v31 = vld [vmem:[%s4938_s3 + $0x578] ss:$20 sps:$4 sm:$0xff]   ;;  %v3574_v32 = vld [vmem:[%s4938_s3 + $0x580] ss:$20 sps:$4 sm:$0xff]  }
 0x105   :  { %2438 = vmatprep.subr.bf16.mxu0 %v3507_v33  ;;  %2602 = vmatprep.subr.bf16.mxu1 %v3510_v34  ;;  %v3579_v33 = vld [vmem:[%s4938_s3 + $0x5a4] ss:$20 sps:$4 sm:$0xff]   ;;  %v3582_v34 = vld [vmem:[%s4938_s3 + $0x5ac] ss:$20 sps:$4 sm:$0xff]  }
 0x108   :  { %2439 = vmatpush1.bf16.msra.mxu0 %v3505_v35  ;;  %2603 = vmatpush1.bf16.msra.mxu1 %v3508_v36  ;;  %v3577_v35 = vld [vmem:[%s4938_s3 + $0x5a0] ss:$20 sps:$4 sm:$0xff]   ;;  %v3580_v36 = vld [vmem:[%s4938_s3 + $0x5a8] ss:$20 sps:$4 sm:$0xff]  }
 0x109   :  { %2440 = vmatprep.subr.bf16.mxu0 %v3513_v38  ;;  %2604 = vmatprep.subr.bf16.mxu1 %v3516_v40  ;;  %v3585_v38 = vld [vmem:[%s4938_s3 + $0x5cc] ss:$20 sps:$4 sm:$0xff]   ;;  %v3588_v40 = vld [vmem:[%s4938_s3 + $0x5d4] ss:$20 sps:$4 sm:$0xff]  }
 0x10c   :  { %2441 = vmatpush1.bf16.msra.mxu0 %v3511_v41  ;;  %2605 = vmatpush1.bf16.msra.mxu1 %v3514_v42  ;;  %v3583_v41 = vld [vmem:[%s4938_s3 + $0x5c8] ss:$20 sps:$4 sm:$0xff]   ;;  %v3586_v42 = vld [vmem:[%s4938_s3 + $0x5d0] ss:$20 sps:$4 sm:$0xff]  }
 0x10d   :  { %2442 = vmatprep.subr.bf16.mxu0 %v3519_v43  ;;  %2606 = vmatprep.subr.bf16.mxu1 %v3522_v44  ;;  %v3591_v43 = vld [vmem:[%s4938_s3 + $0x5f4] ss:$20 sps:$4 sm:$0xff]   ;;  %v3594_v44 = vld [vmem:[%s4938_s3 + $0x5fc] ss:$20 sps:$4 sm:$0xff]  }
 0x110   :  { %2443 = vmatpush1.bf16.msra.mxu0 %v3517_v45  ;;  %2607 = vmatpush1.bf16.msra.mxu1 %v3520_v46  ;;  %v3589_v45 = vld [vmem:[%s4938_s3 + $0x5f0] ss:$20 sps:$4 sm:$0xff]   ;;  %v3592_v46 = vld [vmem:[%s4938_s3 + $0x5f8] ss:$20 sps:$4 sm:$0xff]  }
 0x111   :  { %2444 = vmatprep.subr.bf16.mxu0 %v3525_v47  ;;  %2608 = vmatprep.subr.bf16.mxu1 %v3528_v48  ;;  %v3597_v47 = vld [vmem:[%s4938_s3 + $0x61c] ss:$20 sps:$4 sm:$0xff]   ;;  %v3600_v48 = vld [vmem:[%s4938_s3 + $0x624] ss:$20 sps:$4 sm:$0xff]  }
 0x114   :  { %2445 = vmatpush1.bf16.msra.mxu0 %v3523_v49  ;;  %2609 = vmatpush1.bf16.msra.mxu1 %v3526_v51  ;;  %v3595_v49 = vld [vmem:[%s4938_s3 + $0x618] ss:$20 sps:$4 sm:$0xff]   ;;  %v3598_v51 = vld [vmem:[%s4938_s3 + $0x620] ss:$20 sps:$4 sm:$0xff]  }
 0x115   :  { %2446 = vmatprep.subr.bf16.mxu0 %v3531_v52  ;;  %2610 = vmatprep.subr.bf16.mxu1 %v3534_v54  ;;  %v3603_v52 = vld [vmem:[%s4938_s3 + $0x644] ss:$20 sps:$4 sm:$0xff]   ;;  %v3606_v54 = vld [vmem:[%s4938_s3 + $0x64c] ss:$20 sps:$4 sm:$0xff]  }
 0x118   :  { %2447 = vmatpush1.bf16.msra.mxu0 %v3529_v55  ;;  %2611 = vmatpush1.bf16.msra.mxu1 %v3532_v56  ;;  %v3601_v55 = vld [vmem:[%s4938_s3 + $0x640] ss:$20 sps:$4 sm:$0xff]   ;;  %v3604_v56 = vld [vmem:[%s4938_s3 + $0x648] ss:$20 sps:$4 sm:$0xff]  }
 0x119   :  { %2448 = vmatprep.subr.bf16.mxu0 %v3537_v57  ;;  %2612 = vmatprep.subr.bf16.mxu1 %v3540_v59  ;;  %v3609_v57 = vld [vmem:[%s4938_s3 + $0x66c] ss:$20 sps:$4 sm:$0xff]   ;;  %v3612_v59 = vld [vmem:[%s4938_s3 + $0x674] ss:$20 sps:$4 sm:$0xff]  }
 0x11c   :  { %2449 = vmatpush1.bf16.msra.mxu0 %v3535_v61  ;;  %2613 = vmatpush1.bf16.msra.mxu1 %v3538_v63  ;;  %v3610_v61 = vld [vmem:[%s4938_s3 + $0x670] ss:$20 sps:$4 sm:$0xff]   ;;  %v3615_v63 = vld [vmem:[%s4938_s3 + $0x694] ss:$20 sps:$4 sm:$0xff]  }
 0x11d   :  { %2450 = vmatprep.subr.bf16.mxu0 %v3543_v0  ;;  %2614 = vmatprep.subr.bf16.mxu1 %v3546_v2  ;;  %v3618_v0 = vld [vmem:[%s4938_s3 + $0x69c] ss:$20 sps:$4 sm:$0xff]  }
 0x11e   :  { %v3613_v2 = vld [vmem:[%s4938_s3 + $0x690] ss:$20 sps:$4 sm:$0xff]  }
 0x120   :  { %2451 = vmatpush1.bf16.msra.mxu0 %v3541_v6  ;;  %2615 = vmatpush1.bf16.msra.mxu1 %v3544_v7  ;;  %v3624_v6 = vld [vmem:[%s4938_s3 + $0x6c4] ss:$20 sps:$4 sm:$0xff]  }
 0x121   :  { %2452 = vmatprep.subr.bf16.mxu0 %v3549_v8  ;;  %2616 = vmatprep.subr.bf16.mxu1 %v3552_v9  ;;  %v3619_v7 = vld [vmem:[%s4938_s3 + $0x6b8] ss:$20 sps:$4 sm:$0xff]   ;;  %v3622_v8 = vld [vmem:[%s4938_s3 + $0x6c0] ss:$20 sps:$4 sm:$0xff]  }
 0x122   :  { %v3627_v9 = vld [vmem:[%s4938_s3 + $0x6e4] ss:$20 sps:$4 sm:$0xff]  }
 0x124   :  { %2453 = vmatpush1.bf16.msra.mxu0 %v3547_v12  ;;  %2617 = vmatpush1.bf16.msra.mxu1 %v3550_v13  ;;  %v3628_v12 = vld [vmem:[%s4938_s3 + $0x6e8] ss:$20 sps:$4 sm:$0xff]   ;;  %v3633_v13 = vld [vmem:[%s4938_s3 + $0x70c] ss:$20 sps:$4 sm:$0xff]  }
 0x125   :  { %2463 = vmatprep.subr.bf16.mxu0 %v3555_v14  ;;  %2627 = vmatprep.subr.bf16.mxu1 %v3558_v50  ;;  %v3636_v14 = vld [vmem:[%s4938_s3 + $0x714] ss:$20 sps:$4 sm:$0xff]   ;;  %v55_v50 = vsub.s32 4, %v4089_v37 }
 0x127   :  { %2455 = vmatmul.mubr.bf16.vlgmr.msra.gmra.mrb[8].mxu0 %v4322_v16  ;;  %2619 = vmatmul.mubr.bf16.vlgmr.msra.gmra.mrb[8].mxu1 %v4322_v16 }
 0x128   :  { %2464 = vmatpush1.bf16.msra.mxu0 %v3553_v17  ;;  %2628 = vmatpush1.bf16.msra.mxu1 %v3556_v18  ;;  %v3634_v17 = vld [vmem:[%s4938_s3 + $0x710] ss:$20 sps:$4 sm:$0xff]   ;;  %v3639_v18 = vld [vmem:[%s4938_s3 + $0x734] ss:$20 sps:$4 sm:$0xff]  }
 0x129   :  { %2465 = vmatprep.subr.bf16.mxu0 %v3561_v19  ;;  %2629 = vmatprep.subr.bf16.mxu1 %v3564_v4  ;;  %v3642_v19 = vld [vmem:[%s4938_s3 + $0x73c] ss:$20 sps:$4 sm:$0xff]   ;;  %v67_v4 = vsub.s32 7, %v4089_v37 }
 0x12a   :  { %2495 = vmatprep.mubr.bf16.mxu0 %v4336_v20  ;;  %2659 = vmatprep.mubr.bf16.mxu1 %v4336_v20 }
 0x12c   :  { %2466 = vmatpush1.bf16.msra.mxu0 %v3559_v22  ;;  %2630 = vmatpush1.bf16.msra.mxu1 %v3562_v23  ;;  %v56_v22 = vrot.slane %v4095_v39, %v55_v50  ;;  %v3637_v23 = vld [vmem:[%s4938_s3 + $0x730] ss:$20 sps:$4 sm:$0xff]   ;;  %v3703_v50 = vld [vmem:[%s4938_s3 + $0x8e8] ss:$20 sps:$4 sm:$0xff]  }
 0x12d   :  { %2467 = vmatprep.subr.bf16.mxu0 %v3567_v25  ;;  %2631 = vmatprep.subr.bf16.mxu1 %v3570_v26  ;;  %v3640_v25 = vld [vmem:[%s4938_s3 + $0x738] ss:$20 sps:$4 sm:$0xff]   ;;  %v3645_v26 = vld [vmem:[%s4938_s3 + $0x75c] ss:$20 sps:$4 sm:$0xff]  }
 0x130   :  { %2468 = vmatpush1.bf16.msra.mxu0 %v3565_v27  ;;  %2632 = vmatpush1.bf16.msra.mxu1 %v3568_v28  ;;  %v3648_v27 = vld [vmem:[%s4938_s3 + $0x764] ss:$20 sps:$4 sm:$0xff]   ;;  %v68_v28 = vrot.slane %v4095_v39, %v67_v4 }
 0x131   :  { %2469 = vmatprep.subr.bf16.mxu0 %v3573_v29  ;;  %2633 = vmatprep.subr.bf16.mxu1 %v3576_v30  ;;  %v278_v29 = vadd.f32 %v4132_v1, %v56_v22  ;;  %v3643_v30 = vld [vmem:[%s4938_s3 + $0x758] ss:$20 sps:$4 sm:$0xff]   ;;  %v3717_v22 = vld [vmem:[%s4938_s3 + $0x93c] ss:$20 sps:$4 sm:$0xff]  }
 0x132   :  { %v3654_v1 = vld [vmem:[%s4938_s3 + $0x78c] ss:$20 sps:$4 sm:$0xff]  }
 0x133   :  { %v3712_v4 = vld [vmem:[%s4938_s3 + $0x918] ss:$20 sps:$4 sm:$0xff]  }
 0x134   :  { %2470 = vmatpush1.bf16.msra.mxu0 %v3571_v31  ;;  %2634 = vmatpush1.bf16.msra.mxu1 %v3574_v32  ;;  %v3646_v31 = vld [vmem:[%s4938_s3 + $0x760] ss:$20 sps:$4 sm:$0xff]   ;;  %v3651_v32 = vld [vmem:[%s4938_s3 + $0x784] ss:$20 sps:$4 sm:$0xff]  }
 0x135   :  { %2471 = vmatprep.subr.bf16.mxu0 %v3579_v33  ;;  %2635 = vmatprep.subr.bf16.mxu1 %v3582_v34  ;;  %v321_v33 = vadd.f32 %v4194_v24, %v68_v28  ;;  %v4528_v34 = vpack.c.bf16 %v278_v29, %v278_v29  ;;  %v3660_v24 = vld [vmem:[%s4938_s3 + $0x7b4] ss:$20 sps:$4 sm:$0xff]   ;;  %v3726_v28 = vld [vmem:[%s4938_s3 + $0x96c] ss:$20 sps:$4 sm:$0xff]  }
 0x136   :  { %v3721_v29 = vld [vmem:[%s4938_s3 + $0x960] ss:$20 sps:$4 sm:$0xff]  }
 0x138   :  { %2472 = vmatpush1.bf16.msra.mxu0 %v3577_v35  ;;  %2636 = vmatpush1.bf16.msra.mxu1 %v3580_v36  ;;  %v3649_v35 = vld [vmem:[%s4938_s3 + $0x780] ss:$20 sps:$4 sm:$0xff]   ;;  %v3652_v36 = vld [vmem:[%s4938_s3 + $0x788] ss:$20 sps:$4 sm:$0xff]  }
 0x139   :  { %2473 = vmatprep.subr.bf16.mxu0 %v3585_v38  ;;  %2637 = vmatprep.subr.bf16.mxu1 %v3588_v40  ;;  %v3657_v38 = vld [vmem:[%s4938_s3 + $0x7ac] ss:$20 sps:$4 sm:$0xff]   ;;  %v4542_v40 = vpack.c.bf16 %v321_v33, %v321_v33  ;;  %v3730_v33 = vld [vmem:[%s4938_s3 + $0x990] ss:$20 sps:$4 sm:$0xff]  }
 0x13c   :  { %2474 = vmatpush1.bf16.msra.mxu0 %v3583_v41  ;;  %2638 = vmatpush1.bf16.msra.mxu1 %v3586_v42  ;;  %v3655_v41 = vld [vmem:[%s4938_s3 + $0x7a8] ss:$20 sps:$4 sm:$0xff]   ;;  %v3658_v42 = vld [vmem:[%s4938_s3 + $0x7b0] ss:$20 sps:$4 sm:$0xff]  }
 0x13d   :  { %2475 = vmatprep.subr.bf16.mxu0 %v3591_v43  ;;  %2639 = vmatprep.subr.bf16.mxu1 %v3594_v44  ;;  %v3663_v43 = vld [vmem:[%s4938_s3 + $0x7d4] ss:$20 sps:$4 sm:$0xff]   ;;  %v3666_v44 = vld [vmem:[%s4938_s3 + $0x7dc] ss:$20 sps:$4 sm:$0xff]  }
 0x140   :  { %2476 = vmatpush1.bf16.msra.mxu0 %v3589_v45  ;;  %2640 = vmatpush1.bf16.msra.mxu1 %v3592_v46  ;;  %v3661_v45 = vld [vmem:[%s4938_s3 + $0x7d0] ss:$20 sps:$4 sm:$0xff]   ;;  %v3664_v46 = vld [vmem:[%s4938_s3 + $0x7d8] ss:$20 sps:$4 sm:$0xff]  }
 0x141   :  { %2477 = vmatprep.subr.bf16.mxu0 %v3597_v47  ;;  %2641 = vmatprep.subr.bf16.mxu1 %v3600_v48  ;;  %v3669_v47 = vld [vmem:[%s4938_s3 + $0x7fc] ss:$20 sps:$4 sm:$0xff]   ;;  %v3672_v48 = vld [vmem:[%s4938_s3 + $0x804] ss:$20 sps:$4 sm:$0xff]  }
 0x144   :  { %2478 = vmatpush1.bf16.msra.mxu0 %v3595_v49  ;;  %2642 = vmatpush1.bf16.msra.mxu1 %v3598_v51  ;;  %v3667_v49 = vld [vmem:[%s4938_s3 + $0x7f8] ss:$20 sps:$4 sm:$0xff]   ;;  %v3670_v51 = vld [vmem:[%s4938_s3 + $0x800] ss:$20 sps:$4 sm:$0xff]  }
 0x145   :  { %2479 = vmatprep.subr.bf16.mxu0 %v3603_v52  ;;  %2643 = vmatprep.subr.bf16.mxu1 %v3606_v54  ;;  %v3675_v52 = vld [vmem:[%s4938_s3 + $0x824] ss:$20 sps:$4 sm:$0xff]   ;;  %v3678_v54 = vld [vmem:[%s4938_s3 + $0x82c] ss:$20 sps:$4 sm:$0xff]  }
 0x148   :  { %2480 = vmatpush1.bf16.msra.mxu0 %v3601_v55  ;;  %2644 = vmatpush1.bf16.msra.mxu1 %v3604_v56  ;;  %v3673_v55 = vld [vmem:[%s4938_s3 + $0x820] ss:$20 sps:$4 sm:$0xff]   ;;  %v3676_v56 = vld [vmem:[%s4938_s3 + $0x828] ss:$20 sps:$4 sm:$0xff]  }
 0x149   :  { %2481 = vmatprep.subr.bf16.mxu0 %v3609_v57  ;;  %2645 = vmatprep.subr.bf16.mxu1 %v3612_v59  ;;  %v3681_v57 = vld [vmem:[%s4938_s3 + $0x84c] ss:$20 sps:$4 sm:$0xff]   ;;  %v3684_v59 = vld [vmem:[%s4938_s3 + $0x854] ss:$20 sps:$4 sm:$0xff]  }
 0x14c   :  { %2482 = vmatpush1.bf16.msra.mxu0 %v3607_v60  ;;  %2646 = vmatpush1.bf16.msra.mxu1 %v3610_v61  ;;  %v3679_v60 = vld [vmem:[%s4938_s3 + $0x848] ss:$20 sps:$4 sm:$0xff]   ;;  %v3682_v61 = vld [vmem:[%s4938_s3 + $0x850] ss:$20 sps:$4 sm:$0xff]  }
 0x14d   :  { %2483 = vmatprep.subr.bf16.mxu0 %v3615_v63  ;;  %2647 = vmatprep.subr.bf16.mxu1 %v3618_v0  ;;  %v3687_v63 = vld [vmem:[%s4938_s3 + $0x874] ss:$20 sps:$4 sm:$0xff]   ;;  %v3690_v0 = vld [vmem:[%s4938_s3 + $0x87c] ss:$20 sps:$4 sm:$0xff]  }
 0x150   :  { %2484 = vmatpush1.bf16.msra.mxu0 %v3613_v2  ;;  %2648 = vmatpush1.bf16.msra.mxu1 %v3616_v3  ;;  %v3685_v2 = vld [vmem:[%s4938_s3 + $0x870] ss:$20 sps:$4 sm:$0xff]   ;;  %v3688_v3 = vld [vmem:[%s4938_s3 + $0x878] ss:$20 sps:$4 sm:$0xff]  }
 0x151   :  { %2485 = vmatprep.subr.bf16.mxu0 %v3621_v5  ;;  %2649 = vmatprep.subr.bf16.mxu1 %v3624_v6  ;;  %v3693_v5 = vld [vmem:[%s4938_s3 + $0x89c] ss:$20 sps:$4 sm:$0xff]   ;;  %v3696_v6 = vld [vmem:[%s4938_s3 + $0x8a4] ss:$20 sps:$4 sm:$0xff]  }
 0x154   :  { %2486 = vmatpush1.bf16.msra.mxu0 %v3619_v7  ;;  %2650 = vmatpush1.bf16.msra.mxu1 %v3622_v8  ;;  %v3691_v7 = vld [vmem:[%s4938_s3 + $0x898] ss:$20 sps:$4 sm:$0xff]   ;;  %v3694_v8 = vld [vmem:[%s4938_s3 + $0x8a0] ss:$20 sps:$4 sm:$0xff]  }
 0x155   :  { %2487 = vmatprep.subr.bf16.mxu0 %v3627_v9  ;;  %2651 = vmatprep.subr.bf16.mxu1 %v3630_v10  ;;  %v3699_v9 = vld [vmem:[%s4938_s3 + $0x8c4] ss:$20 sps:$4 sm:$0xff]   ;;  %v3702_v10 = vld [vmem:[%s4938_s3 + $0x8cc] ss:$20 sps:$4 sm:$0xff]  }
 0x158   :  { %2488 = vmatpush1.bf16.msra.mxu0 %v3625_v11  ;;  %2652 = vmatpush1.bf16.msra.mxu1 %v3628_v12  ;;  %v3697_v11 = vld [vmem:[%s4938_s3 + $0x8c0] ss:$20 sps:$4 sm:$0xff]   ;;  %v3700_v12 = vld [vmem:[%s4938_s3 + $0x8c8] ss:$20 sps:$4 sm:$0xff]  }
 0x159   :  { %2489 = vmatprep.subr.bf16.mxu0 %v3633_v13  ;;  %2653 = vmatprep.subr.bf16.mxu1 %v3636_v14  ;;  %v3705_v13 = vld [vmem:[%s4938_s3 + $0x8ec] ss:$20 sps:$4 sm:$0xff]   ;;  %v3708_v14 = vld [vmem:[%s4938_s3 + $0x8f4] ss:$20 sps:$4 sm:$0xff]  }
 0x15c   :  { %2490 = vmatpush1.bf16.msra.mxu0 %v3631_v15  ;;  %2654 = vmatpush1.bf16.msra.mxu1 %v3634_v17  ;;  %v3706_v15 = vld [vmem:[%s4938_s3 + $0x8f0] ss:$20 sps:$4 sm:$0xff]   ;;  %v3711_v17 = vld [vmem:[%s4938_s3 + $0x914] ss:$20 sps:$4 sm:$0xff]  }
 0x15d   :  { %2491 = vmatprep.subr.bf16.mxu0 %v3639_v18  ;;  %2655 = vmatprep.subr.bf16.mxu1 %v3642_v19  ;;  %v3714_v18 = vld [vmem:[%s4938_s3 + $0x91c] ss:$20 sps:$4 sm:$0xff]  }
 0x15e   :  { %v3709_v19 = vld [vmem:[%s4938_s3 + $0x910] ss:$20 sps:$4 sm:$0xff]  }
 0x160   :  { %2492 = vmatpush1.bf16.msra.mxu0 %v3637_v23  ;;  %2656 = vmatpush1.bf16.msra.mxu1 %v3640_v25  ;;  %v3720_v23 = vld [vmem:[%s4938_s3 + $0x944] ss:$20 sps:$4 sm:$0xff]  }
 0x161   :  { %2493 = vmatprep.subr.bf16.mxu0 %v3645_v26  ;;  %2657 = vmatprep.subr.bf16.mxu1 %v3648_v27  ;;  %v3715_v25 = vld [vmem:[%s4938_s3 + $0x938] ss:$20 sps:$4 sm:$0xff]   ;;  %v3718_v26 = vld [vmem:[%s4938_s3 + $0x940] ss:$20 sps:$4 sm:$0xff]  }
 0x162   :  { %v3723_v27 = vld [vmem:[%s4938_s3 + $0x964] ss:$20 sps:$4 sm:$0xff]  }
 0x164   :  { %2494 = vmatpush1.bf16.msra.mxu0 %v3643_v30  ;;  %2658 = vmatpush1.bf16.msra.mxu1 %v3646_v31  ;;  %v3724_v30 = vld [vmem:[%s4938_s3 + $0x968] ss:$20 sps:$4 sm:$0xff]   ;;  %v3729_v31 = vld [vmem:[%s4938_s3 + $0x98c] ss:$20 sps:$4 sm:$0xff]  }
 0x165   :  { %2504 = vmatprep.subr.bf16.mxu0 %v3651_v32  ;;  %2668 = vmatprep.subr.bf16.mxu1 %v3654_v1  ;;  %v3732_v32 = vld [vmem:[%s4938_s3 + $0x994] ss:$20 sps:$4 sm:$0xff]  }
 0x166   :  { %v3727_v1 = vld [vmem:[%s4938_s3 + $0x988] ss:$20 sps:$4 sm:$0xff]  }
 0x167   :  { %2496 = vmatmul.mubr.bf16.vlgmr.msra.gmra.mrb[8].mxu0 %v4528_v34  ;;  %2660 = vmatmul.mubr.bf16.vlgmr.msra.gmra.mrb[8].mxu1 %v4528_v34 }
 0x168   :  { %2505 = vmatpush1.bf16.msra.mxu0 %v3649_v35  ;;  %2669 = vmatpush1.bf16.msra.mxu1 %v3652_v36  ;;  %v63_v35 = vsub.s32 6, %v4089_v37  ;;  %v3735_v36 = vld [vmem:[%s4938_s3 + $0x9b4] ss:$20 sps:$4 sm:$0xff]  }
 0x169   :  { %2506 = vmatprep.subr.bf16.mxu0 %v3657_v38  ;;  %2670 = vmatprep.subr.bf16.mxu1 %v3660_v24  ;;  %v3738_v38 = vld [vmem:[%s4938_s3 + $0x9bc] ss:$20 sps:$4 sm:$0xff]  }
 0x16a   :  { %2536 = vmatprep.mubr.bf16.mxu0 %v4542_v40  ;;  %2700 = vmatprep.mubr.bf16.mxu1 %v4542_v40  ;;  %v3733_v24 = vld [vmem:[%s4938_s3 + $0x9b0] ss:$20 sps:$4 sm:$0xff]  }
 0x16c   :  { %2507 = vmatpush1.bf16.msra.mxu0 %v3655_v41  ;;  %2671 = vmatpush1.bf16.msra.mxu1 %v3658_v42  ;;  %v3736_v41 = vld [vmem:[%s4938_s3 + $0x9b8] ss:$20 sps:$4 sm:$0xff]   ;;  %v64_v42 = vrot.slane %v4095_v39, %v63_v35  ;;  %v3742_v39 = vld [vmem:[%s4938_s3 + $0x9e0] ss:$20 sps:$4 sm:$0xff]   ;;  %v3795_v35 = vld [vmem:[%s4938_s3 + $0x5b0] ss:$20 sps:$4 sm:$0xff]  }
 0x16d   :  { %2508 = vmatprep.subr.bf16.mxu0 %v3663_v43  ;;  %2672 = vmatprep.subr.bf16.mxu1 %v3666_v44  ;;  %v3741_v43 = vld [vmem:[%s4938_s3 + $0x9dc] ss:$20 sps:$4 sm:$0xff]   ;;  %v3744_v44 = vld [vmem:[%s4938_s3 + $0x9e4] ss:$20 sps:$4 sm:$0xff]  }
 0x170   :  { %2509 = vmatpush1.bf16.msra.mxu0 %v3661_v45  ;;  %2673 = vmatpush1.bf16.msra.mxu1 %v3664_v46  ;;  %v3739_v45 = vld [vmem:[%s4938_s3 + $0x9d8] ss:$20 sps:$4 sm:$0xff]   ;;  %v319_v46 = vadd.f32 %v4186_v21, %v64_v42  ;;  %v3748_v21 = vld [vmem:[%s4938_s3 + $0x290] ss:$20 sps:$4 sm:$0xff]  }
 0x171   :  { %2510 = vmatprep.subr.bf16.mxu0 %v3669_v47  ;;  %2674 = vmatprep.subr.bf16.mxu1 %v3672_v48  ;;  %v3745_v47 = vld [vmem:[%s4938_s3 + $0x150] ss:$20 sps:$4 sm:$0xff]   ;;  %v3800_v42 = vld [vmem:[%s4938_s3 + $0x858] ss:$20 sps:$4 sm:$0xff]  }
 0x172   :  { %v3746_v48 = vld [vmem:[%s4938_s3 + $0x3d0] ss:$20 sps:$4 sm:$0xff]  }
 0x174   :  { %2511 = vmatpush1.bf16.msra.mxu0 %v3667_v49  ;;  %2675 = vmatpush1.bf16.msra.mxu1 %v3670_v51  ;;  %v3747_v49 = vld [vmem:[%s4938_s3 + $0x10] ss:$20 sps:$4 sm:$0xff]   ;;  %v4734_v51 = vpack.c.bf16 %v319_v46, %v319_v46  ;;  %v3805_v46 = vld [vmem:[%s4938_s3 + $0x768] ss:$20 sps:$4 sm:$0xff]  }
 0x175   :  { %2512 = vmatprep.subr.bf16.mxu0 %v3675_v52  ;;  %2676 = vmatprep.subr.bf16.mxu1 %v3678_v54  ;;  %v3749_v52 = vld [vmem:[%s4938_s3 + $0x178] ss:$20 sps:$4 sm:$0xff]  }
 0x176   :  { %v3750_v54 = vld [vmem:[%s4938_s3 + $0x3f8] ss:$20 sps:$4 sm:$0xff]  }
 0x178   :  { %2513 = vmatpush1.bf16.msra.mxu0 %v3673_v55  ;;  %2677 = vmatpush1.bf16.msra.mxu1 %v3676_v56  ;;  %v3751_v55 = vld [vmem:[%s4938_s3 + $0x38] ss:$20 sps:$4 sm:$0xff]  }
 0x179   :  { %2514 = vmatprep.subr.bf16.mxu0 %v3681_v57  ;;  %2678 = vmatprep.subr.bf16.mxu1 %v3684_v59  ;;  %v3752_v56 = vld [vmem:[%s4938_s3 + $0x2b8] ss:$20 sps:$4 sm:$0xff]   ;;  %v3753_v57 = vld [vmem:[%s4938_s3 + $0x1a0] ss:$20 sps:$4 sm:$0xff]  }
 0x17a   :  { %v3755_v59 = vld [vmem:[%s4938_s3 + $0x60] ss:$20 sps:$4 sm:$0xff]  }
 0x17c   :  { %2515 = vmatpush1.bf16.msra.mxu0 %v3679_v60  ;;  %2679 = vmatpush1.bf16.msra.mxu1 %v3682_v61  ;;  %v3757_v60 = vld [vmem:[%s4938_s3 + $0x1c8] ss:$20 sps:$4 sm:$0xff]  }
 0x17d   :  { %2516 = vmatprep.subr.bf16.mxu0 %v3687_v63  ;;  %2680 = vmatprep.subr.bf16.mxu1 %v3690_v0  ;;  %v3758_v61 = vld [vmem:[%s4938_s3 + $0x448] ss:$20 sps:$4 sm:$0xff]  }
 0x17e   :  { %v3759_v63 = vld [vmem:[%s4938_s3 + $0x88] ss:$20 sps:$4 sm:$0xff]  }
 0x17f   :  { %v3760_v0 = vld [vmem:[%s4938_s3 + $0x308] ss:$20 sps:$4 sm:$0xff]  }
 0x180   :  { %2517 = vmatpush1.bf16.msra.mxu0 %v3685_v2  ;;  %2681 = vmatpush1.bf16.msra.mxu1 %v3688_v3  ;;  %v3761_v2 = vld [vmem:[%s4938_s3 + $0x1f0] ss:$20 sps:$4 sm:$0xff]  }
 0x181   :  { %2518 = vmatprep.subr.bf16.mxu0 %v3693_v5  ;;  %2682 = vmatprep.subr.bf16.mxu1 %v3696_v6  ;;  %v3762_v3 = vld [vmem:[%s4938_s3 + $0x470] ss:$20 sps:$4 sm:$0xff]  }
 0x182   :  { %v3763_v5 = vld [vmem:[%s4938_s3 + $0xb0] ss:$20 sps:$4 sm:$0xff]  }
 0x183   :  { %v3764_v6 = vld [vmem:[%s4938_s3 + $0x330] ss:$20 sps:$4 sm:$0xff]  }
 0x184   :  { %2519 = vmatpush1.bf16.msra.mxu0 %v3691_v7  ;;  %2683 = vmatpush1.bf16.msra.mxu1 %v3694_v8  ;;  %v3765_v7 = vld [vmem:[%s4938_s3 + $0x218] ss:$20 sps:$4 sm:$0xff]  }
 0x185   :  { %2520 = vmatprep.subr.bf16.mxu0 %v3699_v9  ;;  %2684 = vmatprep.subr.bf16.mxu1 %v3702_v10  ;;  %v3766_v8 = vld [vmem:[%s4938_s3 + $0x498] ss:$20 sps:$4 sm:$0xff]  }
 0x186   :  { %v3767_v9 = vld [vmem:[%s4938_s3 + $0xd8] ss:$20 sps:$4 sm:$0xff]  }
 0x187   :  { %v3768_v10 = vld [vmem:[%s4938_s3 + $0x358] ss:$20 sps:$4 sm:$0xff]  }
 0x188   :  { %2521 = vmatpush1.bf16.msra.mxu0 %v3697_v11  ;;  %2685 = vmatpush1.bf16.msra.mxu1 %v3700_v12  ;;  %v3769_v11 = vld [vmem:[%s4938_s3 + $0x240] ss:$20 sps:$4 sm:$0xff]  }
 0x189   :  { %2522 = vmatprep.subr.bf16.mxu0 %v3705_v13  ;;  %2686 = vmatprep.subr.bf16.mxu1 %v3708_v14  ;;  %v3770_v12 = vld [vmem:[%s4938_s3 + $0x4c0] ss:$20 sps:$4 sm:$0xff]  }
 0x18a   :  { %v3771_v13 = vld [vmem:[%s4938_s3 + $0x100] ss:$20 sps:$4 sm:$0xff]  }
 0x18b   :  { %v3772_v14 = vld [vmem:[%s4938_s3 + $0x380] ss:$20 sps:$4 sm:$0xff]  }
 0x18c   :  { %2523 = vmatpush1.bf16.msra.mxu0 %v3703_v50  ;;  %2687 = vmatpush1.bf16.msra.mxu1 %v3706_v15  ;;  %v3773_v50 = vld [vmem:[%s4938_s3 + $0x268] ss:$20 sps:$4 sm:$0xff]  }
 0x18d   :  { %2524 = vmatprep.subr.bf16.mxu0 %v3711_v17  ;;  %2688 = vmatprep.subr.bf16.mxu1 %v3714_v18  ;;  %v3774_v15 = vld [vmem:[%s4938_s3 + $0x4e8] ss:$20 sps:$4 sm:$0xff]  }
 0x18e   :  { %v3775_v17 = vld [vmem:[%s4938_s3 + $0x128] ss:$20 sps:$4 sm:$0xff]  }
 0x18f   :  { %v3776_v18 = vld [vmem:[%s4938_s3 + $0x3a8] ss:$20 sps:$4 sm:$0xff]  }
 0x190   :  { %2525 = vmatpush1.bf16.msra.mxu0 %v3709_v19  ;;  %2689 = vmatpush1.bf16.msra.mxu1 %v3712_v4  ;;  %v3777_v19 = vld [vmem:[%s4938_s3 + $0x650] ss:$20 sps:$4 sm:$0xff]  }
 0x191   :  { %2526 = vmatprep.subr.bf16.mxu0 %v3717_v22  ;;  %2690 = vmatprep.subr.bf16.mxu1 %v3720_v23  ;;  %v3778_v4 = vld [vmem:[%s4938_s3 + $0x8d0] ss:$20 sps:$4 sm:$0xff]  }
 0x192   :  { %v3779_v22 = vld [vmem:[%s4938_s3 + $0x510] ss:$20 sps:$4 sm:$0xff]  }
 0x193   :  { %v3780_v23 = vld [vmem:[%s4938_s3 + $0x790] ss:$20 sps:$4 sm:$0xff]  }
 0x194   :  { %2527 = vmatpush1.bf16.msra.mxu0 %v3715_v25  ;;  %2691 = vmatpush1.bf16.msra.mxu1 %v3718_v26  ;;  %v3781_v25 = vld [vmem:[%s4938_s3 + $0x678] ss:$20 sps:$4 sm:$0xff]  }
 0x195   :  { %2528 = vmatprep.subr.bf16.mxu0 %v3723_v27  ;;  %2692 = vmatprep.subr.bf16.mxu1 %v3726_v28  ;;  %v3782_v26 = vld [vmem:[%s4938_s3 + $0x8f8] ss:$20 sps:$4 sm:$0xff]  }
 0x196   :  { %v3783_v27 = vld [vmem:[%s4938_s3 + $0x538] ss:$20 sps:$4 sm:$0xff]  }
 0x197   :  { %v3784_v28 = vld [vmem:[%s4938_s3 + $0x7b8] ss:$20 sps:$4 sm:$0xff]  }
 0x198   :  { %2529 = vmatpush1.bf16.msra.mxu0 %v3721_v29  ;;  %2693 = vmatpush1.bf16.msra.mxu1 %v3724_v30  ;;  %v3788_v29 = vld [vmem:[%s4938_s3 + $0x7e0] ss:$20 sps:$4 sm:$0xff]   ;;  %v3790_v30 = vld [vmem:[%s4938_s3 + $0x948] ss:$20 sps:$4 sm:$0xff]  }
 0x199   :  { %2530 = vmatprep.subr.bf16.mxu0 %v3729_v31  ;;  %2694 = vmatprep.subr.bf16.mxu1 %v3732_v32  ;;  %v3791_v31 = vld [vmem:[%s4938_s3 + $0x588] ss:$20 sps:$4 sm:$0xff]  }
 0x19a   :  { %v3792_v32 = vld [vmem:[%s4938_s3 + $0x808] ss:$20 sps:$4 sm:$0xff]  }
 0x19c   :  { %2531 = vmatpush1.bf16.msra.mxu0 %v3727_v1  ;;  %2695 = vmatpush1.bf16.msra.mxu1 %v3730_v33  ;;  %v3793_v1 = vld [vmem:[%s4938_s3 + $0x6f0] ss:$20 sps:$4 sm:$0xff]  }
 0x19d   :  { %2532 = vmatprep.subr.bf16.mxu0 %v3735_v36  ;;  %2696 = vmatprep.subr.bf16.mxu1 %v3738_v38  ;;  %v3794_v33 = vld [vmem:[%s4938_s3 + $0x970] ss:$20 sps:$4 sm:$0xff]   ;;  %v3797_v38 = vld [vmem:[%s4938_s3 + $0x718] ss:$20 sps:$4 sm:$0xff]  }
 0x19e   :  { %v3796_v36 = vld [vmem:[%s4938_s3 + $0x830] ss:$20 sps:$4 sm:$0xff]  }
 0x1a0   :  { %2533 = vmatpush1.bf16.msra.mxu0 %v3733_v24  ;;  %2697 = vmatpush1.bf16.msra.mxu1 %v3736_v41  ;;  %v3798_v24 = vld [vmem:[%s4938_s3 + $0x998] ss:$20 sps:$4 sm:$0xff]  }
 0x1a1   :  { %2534 = vmatprep.subr.bf16.mxu0 %v3741_v43  ;;  %2698 = vmatprep.subr.bf16.mxu1 %v3744_v44  ;;  %v3799_v41 = vld [vmem:[%s4938_s3 + $0x5d8] ss:$20 sps:$4 sm:$0xff]   ;;  %v3801_v43 = vld [vmem:[%s4938_s3 + $0x740] ss:$20 sps:$4 sm:$0xff]  }
 0x1a2   :  { %v3802_v44 = vld [vmem:[%s4938_s3 + $0x9c0] ss:$20 sps:$4 sm:$0xff]  }
 0x1a4   :  { %2535 = vmatpush1.bf16.msra.mxu0 %v3739_v45  ;;  %2699 = vmatpush1.bf16.msra.mxu1 %v3742_v39  ;;  %v3803_v45 = vld [vmem:[%s4938_s3 + $0x600] ss:$20 sps:$4 sm:$0xff]  }
 0x1a5   :  { %3247 = vmatprep.subr.bf16.mxu0 %v3745_v47  ;;  %3269 = vmatprep.subr.bf16.mxu1 %v3746_v48  ;;  %v3804_v39 = vld [vmem:[%s4938_s3 + $0x880] ss:$20 sps:$4 sm:$0xff]   ;;  %v3806_v47 = vld [vmem:[%s4938_s3 + $0x9e8] ss:$20 sps:$4 sm:$0xff]  }
 0x1a6   :  { %v3807_v48 = vld [vmem:[%s4938_s3 + $0x628] ss:$20 sps:$4 sm:$0xff]  }
 0x1a7   :  { %2537 = vmatmul.mubr.bf16.vlgmr.msra.gmra.mrb[8].mxu0 %v4734_v51  ;;  %2701 = vmatmul.mubr.bf16.vlgmr.msra.gmra.mrb[8].mxu1 %v4734_v51 }
 0x1a8   :  { %3248 = vmatpush3.bf16.msra.mxu0 %v3747_v49  ;;  %2741 = vmatprep.mubr.bf16.mxu0 %v4104_v53  ;;  %v3754_v53 = vld [vmem:[%s4938_s3 + $0x420] ss:$20 sps:$4 sm:$0xff]   ;;  %v3808_v49 = vld [vmem:[%s4938_s3 + $0x8a8] ss:$20 sps:$4 sm:$0xff]  }
 0x1a9   :  { %3270 = vmatpush3.bf16.msra.mxu1 %v3748_v21  ;;  %2781 = vmatprep.mubr.bf16.mxu1 %v4122_v62  ;;  %v3756_v62 = vld [vmem:[%s4938_s3 + $0x2e0] ss:$20 sps:$4 sm:$0xff]   ;;  %v3810_v21 = vmov 1983009808  }
 0x1aa   :  { %3249 = vmatprep.subr.bf16.mxu0 %v3749_v52  ;;  %3271 = vmatprep.subr.bf16.mxu1 %v3750_v54  ;;  %v2877_v52 = vunpack.c.l.s4 %v3810_v21 }
 0x1ac   :  { %3250 = vmatpush3.bf16.msra.mxu0 %v3751_v55  ;;  %v2878_v54 = vunpack.c.0.s8 %v2877_v52 }
 0x1ad   :  { %3272 = vmatpush3.bf16.msra.mxu1 %v3752_v56  ;;  %3251 = vmatprep.subr.bf16.mxu0 %v3753_v57 }
 0x1ae   :  { %3273 = vmatprep.subr.bf16.mxu1 %v3754_v53  ;;  %v2881_v57 = vsub.s32 %v2878_v54, %v4089_v37 }
 0x1b0   :  { %3252 = vmatpush3.bf16.msra.mxu0 %v3755_v59 }
 0x1b1   :  { %3274 = vmatpush3.bf16.msra.mxu1 %v3756_v62  ;;  %3253 = vmatprep.subr.bf16.mxu0 %v3757_v60 }
 0x1b2   :  { %3275 = vmatprep.subr.bf16.mxu1 %v3758_v61 }
 0x1b4   :  { %3254 = vmatpush3.bf16.msra.mxu0 %v3759_v63 }
 0x1b5   :  { %3276 = vmatpush3.bf16.msra.mxu1 %v3760_v0  ;;  %3255 = vmatprep.subr.bf16.mxu0 %v3761_v2 }
 0x1b6   :  { %3277 = vmatprep.subr.bf16.mxu1 %v3762_v3 }
 0x1b8   :  { %3256 = vmatpush3.bf16.msra.mxu0 %v3763_v5 }
 0x1b9   :  { %3278 = vmatpush3.bf16.msra.mxu1 %v3764_v6  ;;  %3257 = vmatprep.subr.bf16.mxu0 %v3765_v7 }
 0x1ba   :  { %3279 = vmatprep.subr.bf16.mxu1 %v3766_v8 }
 0x1bc   :  { %3258 = vmatpush3.bf16.msra.mxu0 %v3767_v9 }
 0x1bd   :  { %3280 = vmatpush3.bf16.msra.mxu1 %v3768_v10  ;;  %3259 = vmatprep.subr.bf16.mxu0 %v3769_v11 }
 0x1be   :  { %3281 = vmatprep.subr.bf16.mxu1 %v3770_v12 }
 0x1c0   :  { %3260 = vmatpush3.bf16.msra.mxu0 %v3771_v13 }
 0x1c1   :  { %3282 = vmatpush3.bf16.msra.mxu1 %v3772_v14  ;;  %3261 = vmatprep.subr.bf16.mxu0 %v3773_v50 }
 0x1c2   :  { %3283 = vmatprep.subr.bf16.mxu1 %v3774_v15 }
 0x1c4   :  { %3262 = vmatpush3.bf16.msra.mxu0 %v3775_v17 }
 0x1c5   :  { %3284 = vmatpush3.bf16.msra.mxu1 %v3776_v18  ;;  %3291 = vmatprep.subr.bf16.mxu0 %v3777_v19 }
 0x1c6   :  { %3313 = vmatprep.subr.bf16.mxu1 %v3778_v4 }
 0x1c7   :  { %2742 = vmatmul.mubr.bf16.vlgmr.msra.gmra.mrb[12].mxu0 %v4112_v58  ;;  %v3785_v58 = vld [vmem:[%s4938_s3 + $0x6a0] ss:$20 sps:$4 sm:$0xff]  }
 0x1c8   :  { %2782 = vmatmul.mubr.bf16.vlgmr.msra.gmra.mrb[12].mxu1 %v4322_v16  ;;  %3292 = vmatpush3.bf16.msra.mxu0 %v3779_v22  ;;  %v3786_v16 = vld [vmem:[%s4938_s3 + $0x920] ss:$20 sps:$4 sm:$0xff]  }
 0x1c9   :  { %2821 = vmatprep.mubr.bf16.mxu0 %v4336_v20  ;;  %3314 = vmatpush3.bf16.msra.mxu1 %v3780_v23  ;;  %v3787_v20 = vld [vmem:[%s4938_s3 + $0x560] ss:$20 sps:$4 sm:$0xff]  }
 0x1ca   :  { %2861 = vmatprep.mubr.bf16.mxu1 %v4542_v40  ;;  %3293 = vmatprep.subr.bf16.mxu0 %v3781_v25  ;;  %v3789_v40 = vld [vmem:[%s4938_s3 + $0x6c8] ss:$20 sps:$4 sm:$0xff]  }
 0x1cb   :  { %3315 = vmatprep.subr.bf16.mxu1 %v3782_v26 }
 0x1cc   :  { %3294 = vmatpush3.bf16.msra.mxu0 %v3783_v27 }
 0x1cd   :  { %3316 = vmatpush3.bf16.msra.mxu1 %v3784_v28  ;;  %3295 = vmatprep.subr.bf16.mxu0 %v3785_v58 }
 0x1ce   :  { %3317 = vmatprep.subr.bf16.mxu1 %v3786_v16 }
 0x1d0   :  { %3296 = vmatpush3.bf16.msra.mxu0 %v3787_v20 }
 0x1d1   :  { %3318 = vmatpush3.bf16.msra.mxu1 %v3788_v29  ;;  %3297 = vmatprep.subr.bf16.mxu0 %v3789_v40 }
 0x1d2   :  { %3319 = vmatprep.subr.bf16.mxu1 %v3790_v30 }
 0x1d4   :  { %3298 = vmatpush3.bf16.msra.mxu0 %v3791_v31 }
 0x1d5   :  { %3320 = vmatpush3.bf16.msra.mxu1 %v3792_v32  ;;  %3299 = vmatprep.subr.bf16.mxu0 %v3793_v1 }
 0x1d6   :  { %3321 = vmatprep.subr.bf16.mxu1 %v3794_v33 }
 0x1d8   :  { %3300 = vmatpush3.bf16.msra.mxu0 %v3795_v35 }
 0x1d9   :  { %3322 = vmatpush3.bf16.msra.mxu1 %v3796_v36  ;;  %3301 = vmatprep.subr.bf16.mxu0 %v3797_v38 }
 0x1da   :  { %3323 = vmatprep.subr.bf16.mxu1 %v3798_v24 }
 0x1dc   :  { %3302 = vmatpush3.bf16.msra.mxu0 %v3799_v41 }
 0x1dd   :  { %3324 = vmatpush3.bf16.msra.mxu1 %v3800_v42  ;;  %3303 = vmatprep.subr.bf16.mxu0 %v3801_v43 }
 0x1de   :  { %3325 = vmatprep.subr.bf16.mxu1 %v3802_v44 }
 0x1e0   :  { %3304 = vmatpush3.bf16.msra.mxu0 %v3803_v45 }
 0x1e1   :  { %3326 = vmatpush3.bf16.msra.mxu1 %v3804_v39  ;;  %3305 = vmatprep.subr.bf16.mxu0 %v3805_v46 }
 0x1e2   :  { %3327 = vmatprep.subr.bf16.mxu1 %v3806_v47 }
 0x1e4   :  { %3306 = vmatpush3.bf16.msra.mxu0 %v3807_v48 }
 0x1e5   :  { %3328 = vmatpush3.bf16.msra.mxu1 %v3808_v49 }
 0x1e7   :  { %2822 = vmatmul.mubr.bf16.vlgmr.msra.gmra.mrb[16].mxu0 %v4528_v34 }
 0x1e8   :  { %2862 = vmatmul.mubr.bf16.vlgmr.msra.gmra.mrb[16].mxu1 %v4734_v51 }
 0x27a   :  { %v2538_v55 = vpop.f32.mrb[8].mxu0  ;;  %v2702_v56 = vpop.f32.mrb[8].mxu1 }
 0x27b   :  { %v2540_v53 = vpop.f32.mrb[9].mxu0  ;;  %v2704_v59 = vpop.f32.mrb[9].mxu1 }
 0x27c   :  { %v2874_v62 = vcombine.low %v2538_v55, %v2540_v53  ;;  %v2875_v60 = vcombine.low %v2702_v56, %v2704_v59  ;;  %v2542_v61 = vpop.f32.mrb[10].mxu0  ;;  %v2706_v63 = vpop.f32.mrb[10].mxu1 }
 0x27d   :  { %v2543_v0 = vpop.f32.mrb[11].mxu0  ;;  %v2707_v2 = vpop.f32.mrb[11].mxu1 }
 0x27e   :  { %v2882_v3 = vrot.slane %v2874_v62, %v2881_v57  ;;  %v2889_v5 = vrot.slane %v2875_v60, %v2881_v57 }
 0x280   :  { %v2890_v34 = vcombine.low %v2882_v3, %v2889_v5 }
 0x282   :  { %2900 = vst [vmem:[%s4940_s4] sm:$0xff] %v2890_v34 }
 0x29a   :  { %v3263_v51 = vpop.f32.mrb[12].mxu0 }
 0x29b   :  { %v3285_v6 = vpop.f32.mrb[12].mxu1  ;;  %v3264_v7 = vpop.f32.mrb[13].mxu0 }
 0x29c   :  { %v3265_v8 = vadd.f32 %v3264_v7, %v3263_v51  ;;  %v3286_v37 = vpop.f32.mrb[13].mxu1  ;;  %v3266_v9 = vpop.f32.mrb[14].mxu0 }
 0x29d   :  { %v3287_v10 = vadd.f32 %v3286_v37, %v3285_v6  ;;  %v3288_v11 = vpop.f32.mrb[14].mxu1  ;;  %v3267_v12 = vpop.f32.mrb[15].mxu0 }
 0x29e   :  { %v3289_v13 = vpop.f32.mrb[15].mxu1 }
 0x29f   :  { %v2784_v14 = vadd.f32 %v3287_v10, %v3265_v8 }
 0x2ba   :  { %v3307_v50 = vpop.f32.mrb[16].mxu0 }
 0x2bb   :  { %v3329_v15 = vpop.f32.mrb[16].mxu1  ;;  %v3308_v17 = vpop.f32.mrb[17].mxu0 }
 0x2bc   :  { %v3309_v18 = vadd.f32 %v3308_v17, %v3307_v50  ;;  %v3330_v19 = vpop.f32.mrb[17].mxu1  ;;  %v3310_v4 = vpop.f32.mrb[18].mxu0 }
 0x2bd   :  { %v3331_v22 = vadd.f32 %v3330_v19, %v3329_v15  ;;  %v3332_v23 = vpop.f32.mrb[18].mxu1  ;;  %v3311_v25 = vpop.f32.mrb[19].mxu0 }
 0x2be   :  { %v2824_v26 = vadd.f32 %v3309_v18, %v2784_v14  ;;  %v3333_v27 = vpop.f32.mrb[19].mxu1 }
 0x2c0   :  { %v2864_v28 = vadd.f32 %v3331_v22, %v2824_v26 }
 0x2c2   :  { %v2897_v58 = vrot.slane %v2864_v28, %v2881_v57 }
 0x2c4   :  { %2902 = vst.msk [vmem:[%s4940_s4 + $0x8] sm:$0x3] %vm2901_vm1, %v2897_v58 }

// kernel: generator_forward.9
= control target key start
LH: loop header
LB: loop body
LE: loop exit
PB: predicated region body
PF: predicated region fallthrough
CT: control target
= control target key end

     0   :  { %v451_v1 = vmov 0   ;;  %vm25_vm0 = vcmask 523264   ;;  %vm37_vm1 = vcmask 517120   ;;  %vm361_vm2 = vcmask 261120   ;;  %s677_s3 = inlined_call_operand.vmem [shape: bf16[64,288], index: 3, kind: input, shape index: {}]   ;;  %s678_s0 = inlined_call_operand.vmem [shape: f32[50,64], index: 0, kind: input, shape index: {}]   ;;  %s679_s1 = inlined_call_operand.vmem [shape: f32[1,64], index: 1, kind: input, shape index: {}]   ;;  %s680_s2 = inlined_call_operand.vmem [shape: f32[1,64], index: 2, kind: input, shape index: {}]   ;;  %s681_s4 = inlined_call_operand.vmem [shape: f32[50,288], index: 4, kind: output, shape index: {}]  }
   0x1   :  { %v433_v0 = vld [vmem:[%s677_s3 + $0x4] ss:$12 sps:$4 sm:$0xff]   ;;  %256 = vmatprep.mubr.bf16.mxu0 %v451_v1  ;;  %v435_v2 = vld [vmem:[%s677_s3] ss:$12 sps:$4 sm:$0xff]   ;;  %v436_v3 = vld [vmem:[%s677_s3 + $0x1c] ss:$12 sps:$4 sm:$0xff]  }
   0x2   :  { %224 = vmatprep.subr.bf16.mxu0 %v433_v0  ;;  %v438_v4 = vld [vmem:[%s677_s3 + $0x18] ss:$12 sps:$4 sm:$0xff]   ;;  %v439_v5 = vld [vmem:[%s677_s3 + $0x34] ss:$12 sps:$4 sm:$0xff]   ;;  %v441_v7 = vld [vmem:[%s677_s3 + $0x30] ss:$12 sps:$4 sm:$0xff]  }
   0x3   :  { %225 = vmatpush1.bf16.msra.mxu0 %v435_v2  ;;  %v444_v6 = vld [vmem:[%s677_s3 + $0x8] ss:$12 sps:$4 sm:$0xff]   ;;  %v502_v8 = vld [vmem:[%s678_s0] sm:$0xff]  ;;  %v517_v11 = vld [vmem:[%s678_s0 + $0x18] sm:$0xff]  ;;  %vm380_vm3 = vcmask 254976  }
   0x4   :  { %226 = vmatprep.subr.bf16.mxu0 %v436_v3  ;;  %v507_v9 = vld [vmem:[%s678_s0 + $0x8] sm:$0xff]  ;;  %416 = vmatprep.subr.bf16.mxu1 %v444_v6  ;;  %v512_v10 = vld [vmem:[%s678_s0 + $0x10] sm:$0xff]  ;;  %v522_v12 = vld [vmem:[%s678_s0 + $0x20] sm:$0xff]  ;;  %v26_v13 = vsel %vm25_vm0, %v502_v8, 0.0  ;;  %v47_v15 = vmul.f32 %v502_v8, %v502_v8  ;;  %v31_v22 = vsel %vm25_vm0, %v517_v11, 0.0  ;;  %v50_v25 = vmul.f32 %v517_v11, %v517_v11 }
   0x5   :  { %v27_v14 = vsel %vm25_vm0, %v507_v9, 0.0  ;;  %v48_v16 = vmul.f32 %v507_v9, %v507_v9  ;;  %v442_v17 = vld [vmem:[%s677_s3 + $0x4c] ss:$12 sps:$4 sm:$0xff]   ;;  %417 = vmatpush3.bf16.msra.mxu1 %v444_v6  ;;  %v29_v19 = vsel %vm25_vm0, %v512_v10, 0.0  ;;  %v445_v20 = vld [vmem:[%s677_s3 + $0x48] ss:$12 sps:$4 sm:$0xff]   ;;  %v49_v24 = vmul.f32 %v512_v10, %v512_v10 }
   0x6   :  { %v28_v18 = vadd.f32 %v27_v14, %v26_v13  ;;  %v543_v21 = vld [vmem:[%s678_s0 + $0x28] sm:$0xff]  ;;  %v33_v23 = vsel %vm25_vm0, %v522_v12, 0.0  ;;  %v51_v28 = vmul.f32 %v522_v12, %v522_v12  ;;  %v54_v29 = vsel %vm25_vm0, %v47_v15, 0.0  ;;  %v564_v32 = vld [vmem:[%s678_s0 + $0x30] sm:$0x3] }
   0x7   :  { %227 = vmatpush1.bf16.msra.mxu0 %v438_v4  ;;  %v446_v27 = vld [vmem:[%s677_s3 + $0x20] ss:$12 sps:$4 sm:$0xff]   ;;  %v55_v30 = vsel %vm25_vm0, %v48_v16, 0.0  ;;  %v57_v31 = vsel %vm25_vm0, %v49_v24, 0.0  ;;  %v447_v35 = vld [vmem:[%s677_s3 + $0x38] ss:$12 sps:$4 sm:$0xff]   ;;  %v52_v37 = vmul.f32 %v543_v21, %v543_v21  ;;  %v53_v43 = vmul.f32 %v564_v32, %v564_v32 }
   0x8   :  { %228 = vmatprep.subr.bf16.mxu0 %v439_v5  ;;  %v30_v26 = vadd.f32 %v29_v19, %v28_v18  ;;  %v56_v34 = vadd.f32 %v55_v30, %v54_v29  ;;  %418 = vmatprep.subr.bf16.mxu1 %v446_v27  ;;  %v35_v36 = vsel %vm25_vm0, %v543_v21, 0.0  ;;  %v59_v38 = vsel %vm25_vm0, %v50_v25, 0.0  ;;  %v448_v41 = vld [vmem:[%s677_s3 + $0x50] ss:$12 sps:$4 sm:$0xff]  }
   0x9   :  { %419 = vmatpush3.bf16.msra.mxu1 %v446_v27  ;;  %v38_v42 = vsel %vm37_vm1, %v564_v32, 0.0  ;;  %v61_v44 = vsel %vm25_vm0, %v51_v28, 0.0  ;;  %v63_v47 = vsel %vm25_vm0, %v52_v37, 0.0  ;;  %v65_v50 = vsel %vm37_vm1, %v53_v43, 0.0 }
   0xa   :  { %v32_v33 = vadd.f32 %v31_v22, %v30_v26  ;;  %v58_v40 = vadd.f32 %v57_v31, %v56_v34  ;;  %420 = vmatprep.subr.bf16.mxu1 %v447_v35  ;;  %v386_v22 = vld [vmem:[%s679_s1] ss:$0 sm:$0xff] }
   0xb   :  { %229 = vmatpush1.bf16.msra.mxu0 %v441_v7 }
   0xc   :  { %230 = vmatprep.subr.bf16.mxu0 %v442_v17  ;;  %v34_v39 = vadd.f32 %v33_v23, %v32_v33  ;;  %v60_v46 = vadd.f32 %v59_v38, %v58_v40 }
   0xd   :  { %421 = vmatpush3.bf16.msra.mxu1 %v447_v35 }
   0xe   :  { %v36_v45 = vadd.f32 %v35_v36, %v34_v39  ;;  %v62_v49 = vadd.f32 %v61_v44, %v60_v46  ;;  %422 = vmatprep.subr.bf16.mxu1 %v448_v41 }
   0xf   :  { %231 = vmatpush1.bf16.msra.mxu0 %v445_v20 }
  0x10   :  { %v39_v48 = vadd.f32 %v38_v42, %v36_v45  ;;  %v64_v52 = vadd.f32 %v63_v47, %v62_v49 }
  0x11   :  { %423 = vmatpush3.bf16.msra.mxu1 %v448_v41 }
  0x12   :  { %v40_v51 = vrot.slane %v39_v48, 4  ;;  %v66_v54 = vadd.f32 %v65_v50, %v64_v52 }
  0x14   :  { %v41_v53 = vadd.f32 %v40_v51, %v39_v48  ;;  %v67_v56 = vrot.slane %v66_v54, 4 }
  0x16   :  { %v42_v55 = vrot.slane %v41_v53, 2  ;;  %v68_v58 = vadd.f32 %v67_v56, %v66_v54 }
  0x18   :  { %v43_v57 = vadd.f32 %v42_v55, %v41_v53  ;;  %v69_v60 = vrot.slane %v68_v58, 2 }
  0x1a   :  { %v44_v59 = vrot.slane %v43_v57, 1  ;;  %v70_v62 = vadd.f32 %v69_v60, %v68_v58 }
  0x1c   :  { %v45_v61 = vadd.f32 %v44_v59, %v43_v57  ;;  %v71_v0 = vrot.slane %v70_v62, 1 }
  0x1e   :  { %v46_v63 = vmul.f32 0.02, %v45_v61  ;;  %v72_v2 = vadd.f32 %v71_v0, %v70_v62 }
  0x20   :  { %v74_v3 = vmul.f32 %v46_v63, %v46_v63  ;;  %v73_v4 = vmul.f32 0.02, %v72_v2  ;;  %v77_v13 = vsub.f32 %v502_v8, %v46_v63  ;;  %v78_v14 = vsub.f32 %v507_v9, %v46_v63  ;;  %v387_v9 = vld [vmem:[%s680_s2] ss:$0 sm:$0xff] }
  0x21   :  { %v79_v15 = vsub.f32 %v512_v10, %v46_v63  ;;  %v80_v16 = vsub.f32 %v517_v11, %v46_v63  ;;  %v81_v17 = vsub.f32 %v522_v12, %v46_v63  ;;  %v82_v18 = vsub.f32 %v543_v21, %v46_v63 }
  0x22   :  { %v75_v5 = vsub.f32 %v73_v4, %v74_v3  ;;  %v83_v19 = vsub.f32 %v564_v32, %v46_v63 }
  0x24   :  { %v76_v6 = vmax.f32 %v75_v5, 0.0 }
  0x26   :  { %v84_v7 = vadd.f32 1e-05, %v76_v6 }
  0x28   :  { %449 = vrsqrt.f32 %v84_v7 }
  0x32   :  { %v450_v20 = vpop.eup %449 }
  0x33   :  { %v86_v23 = vmul.f32 %v450_v20, %v77_v13  ;;  %v87_v24 = vmul.f32 %v450_v20, %v78_v14  ;;  %v88_v8 = vmul.f32 %v450_v20, %v79_v15  ;;  %v89_v25 = vmul.f32 %v450_v20, %v80_v16 }
  0x34   :  { %v90_v10 = vmul.f32 %v450_v20, %v81_v17  ;;  %v91_v11 = vmul.f32 %v450_v20, %v82_v18  ;;  %v92_v12 = vmul.f32 %v450_v20, %v83_v19 }
  0x35   :  { %v100_v26 = vmul.f32 %v386_v22, %v86_v23  ;;  %v101_v21 = vmul.f32 %v386_v22, %v87_v24  ;;  %v102_v27 = vmul.f32 %v386_v22, %v88_v8  ;;  %v103_v28 = vmul.f32 %v386_v22, %v89_v25 }
  0x36   :  { %v104_v29 = vmul.f32 %v386_v22, %v90_v10  ;;  %v105_v30 = vmul.f32 %v386_v22, %v91_v11  ;;  %v106_v31 = vmul.f32 %v386_v22, %v92_v12 }
  0x37   :  { %v114_v32 = vadd.f32 %v387_v9, %v100_v26  ;;  %v115_v33 = vadd.f32 %v387_v9, %v101_v21  ;;  %v116_v34 = vadd.f32 %v387_v9, %v102_v27  ;;  %v117_v35 = vadd.f32 %v387_v9, %v103_v28 }
  0x38   :  { %v118_v36 = vadd.f32 %v387_v9, %v104_v29  ;;  %v119_v37 = vadd.f32 %v387_v9, %v105_v30  ;;  %v120_v44 = vadd.f32 %v387_v9, %v106_v31 }
  0x39   :  { %v121_v38 = vmax.f32 %v114_v32, 0.0  ;;  %v122_v39 = vmax.f32 %v115_v33, 0.0  ;;  %v123_v40 = vmax.f32 %v116_v34, 0.0  ;;  %v124_v41 = vmax.f32 %v117_v35, 0.0 }
  0x3a   :  { %v125_v42 = vmax.f32 %v118_v36, 0.0  ;;  %v126_v43 = vmax.f32 %v119_v37, 0.0  ;;  %v127_v48 = vmax.f32 %v120_v44, 0.0 }
  0x3b   :  { %v128_v45 = vpack.c.bf16 %v122_v39, %v121_v38  ;;  %v129_v46 = vpack.c.bf16 %v124_v41, %v123_v40 }
  0x3c   :  { %v130_v47 = vpack.c.bf16 %v126_v43, %v125_v42  ;;  %v131_v49 = vpack.c.bf16 %v127_v48, %v127_v48 }
  0x3d   :  { %400 = vmatmul.mubr.msk.bf16.vlgmr.msra.gmra.mrb[0].mxu0 %vm25_vm0, %v128_v45  ;;  %424 = vmatprep.mubr.msk.bf16.mxu1 %vm25_vm0, %v128_v45 }
  0x3e   :  { %266 = vmatprep.mubr.bf16.mxu0 %v451_v1  ;;  %425 = vmatmul.mubr.msk.bf16.vlgmr.msra.gmra.mrb[0].mxu1 %vm25_vm0, %v129_v46 }
  0x3f   :  { %428 = vmatprep.mubr.msk.bf16.mxu1 %vm25_vm0, %v130_v47 }
  0x45   :  { %401 = vmatmul.mubr.msk.bf16.gmra.mrb[4].mxu0 %vm25_vm0, %v129_v46 }
  0x46   :  { %276 = vmatprep.mubr.bf16.mxu0 %v451_v1  ;;  %429 = vmatmul.mubr.msk.bf16.gmra.mrb[4].mxu1 %vm25_vm0, %v131_v49 }
  0x4d   :  { %402 = vmatmul.mubr.msk.bf16.gmra.mrb[8].mxu0 %vm25_vm0, %v130_v47 }
  0x4e   :  { %286 = vmatprep.mubr.bf16.mxu0 %v451_v1 }
  0x55   :  { %403 = vmatmul.mubr.msk.bf16.gmra.mrb[12].mxu0 %vm25_vm0, %v131_v49 }
 0x110   :  { %v258_v50 = vpop.f32.mrb[0].mxu0 }
 0x111   :  { %359 = vst [vmem:[%s681_s4] sm:$0xff] %v258_v50  ;;  %v260_v51 = vpop.f32.mrb[1].mxu0  ;;  %v426_v52 = vpop.f32.mrb[0].mxu1 }
 0x112   :  { %360 = vst [vmem:[%s681_s4 + $0x8] sm:$0xff] %v260_v51  ;;  %v262_v53 = vpop.f32.mrb[2].mxu0  ;;  %368 = vst.msk [vmem:[%s681_s4 + $0x40] sm:$0xff] %vm361_vm2, %v426_v52  ;;  %v329_v1 = vpop.f32.mrb[1].mxu1 }
 0x113   :  { %363 = vst [vmem:[%s681_s4 + $0x18] sm:$0xff] %v262_v53  ;;  %v264_v54 = vpop.f32.mrb[3].mxu0  ;;  %362 = vst.msk [vmem:[%s681_s4 + $0x10] sm:$0xff] %vm361_vm2, %v329_v1  ;;  %v427_v55 = vpop.f32.mrb[2].mxu1 }
 0x114   :  { %364 = vst [vmem:[%s681_s4 + $0x20] sm:$0xff] %v264_v54  ;;  %371 = vst.msk [vmem:[%s681_s4 + $0x58] sm:$0xff] %vm361_vm2, %v427_v55  ;;  %v332_v56 = vpop.f32.mrb[3].mxu1 }
 0x115   :  { %365 = vst.msk [vmem:[%s681_s4 + $0x28] sm:$0xff] %vm361_vm2, %v332_v56 }
 0x118   :  { %v268_v57 = vpop.f32.mrb[4].mxu0 }
 0x119   :  { %366 = vst [vmem:[%s681_s4 + $0x30] sm:$0xff] %v268_v57  ;;  %v270_v58 = vpop.f32.mrb[5].mxu0  ;;  %v430_v59 = vpop.f32.mrb[4].mxu1 }
 0x11a   :  { %367 = vst [vmem:[%s681_s4 + $0x38] sm:$0xff] %v270_v58  ;;  %v272_v60 = vpop.f32.mrb[6].mxu0  ;;  %381 = vst.msk [vmem:[%s681_s4 + $0xa0] sm:$0x3] %vm380_vm3, %v430_v59  ;;  %v345_v61 = vpop.f32.mrb[5].mxu1 }
 0x11b   :  { %369 = vst [vmem:[%s681_s4 + $0x48] sm:$0xff] %v272_v60  ;;  %v274_v62 = vpop.f32.mrb[7].mxu0  ;;  %374 = vst.msk [vmem:[%s681_s4 + $0x70] sm:$0xff] %vm361_vm2, %v345_v61  ;;  %v431_v63 = vpop.f32.mrb[6].mxu1 }
 0x11c   :  { %370 = vst [vmem:[%s681_s4 + $0x50] sm:$0xff] %v274_v62  ;;  %v348_v0 = vpop.f32.mrb[7].mxu1 }
 0x11d   :  { %377 = vst.msk [vmem:[%s681_s4 + $0x88] sm:$0xff] %vm361_vm2, %v348_v0 }
 0x120   :  { %v278_v2 = vpop.f32.mrb[8].mxu0 }
 0x121   :  { %372 = vst [vmem:[%s681_s4 + $0x60] sm:$0xff] %v278_v2  ;;  %v280_v3 = vpop.f32.mrb[9].mxu0 }
 0x122   :  { %373 = vst [vmem:[%s681_s4 + $0x68] sm:$0xff] %v280_v3  ;;  %v282_v4 = vpop.f32.mrb[10].mxu0 }
 0x123   :  { %375 = vst [vmem:[%s681_s4 + $0x78] sm:$0xff] %v282_v4  ;;  %v284_v5 = vpop.f32.mrb[11].mxu0 }
 0x124   :  { %376 = vst [vmem:[%s681_s4 + $0x80] sm:$0xff] %v284_v5 }
 0x128   :  { %v288_v6 = vpop.f32.mrb[12].mxu0 }
 0x129   :  { %378 = vst [vmem:[%s681_s4 + $0x90] sm:$0x3] %v288_v6  ;;  %v290_v7 = vpop.f32.mrb[13].mxu0 }
 0x12a   :  { %379 = vst [vmem:[%s681_s4 + $0x98] sm:$0x3] %v290_v7  ;;  %v292_v13 = vpop.f32.mrb[14].mxu0 }
 0x12b   :  { %v293_v14 = vpop.f32.mrb[15].mxu0 }

// kernel: generator_forward.10
= control target key start
LH: loop header
LB: loop body
LE: loop exit
PB: predicated region body
PF: predicated region fallthrough
CT: control target
= control target key end

     0   :  { %v1053_v1 = vmov 0   ;;  %vm49_vm0 = vcmask 261120   ;;  %vm109_vm1 = vcmask 254976   ;;  %s1981_s3 = inlined_call_operand.vmem [shape: bf16[32,288], index: 3, kind: input, shape index: {}]   ;;  %s1982_s0 = inlined_call_operand.vmem [shape: f32[242,32], index: 0, kind: input, shape index: {}]   ;;  %s1983_s1 = inlined_call_operand.vmem [shape: f32[1,32], index: 1, kind: input, shape index: {}]   ;;  %s1984_s2 = inlined_call_operand.vmem [shape: f32[1,32], index: 2, kind: input, shape index: {}]   ;;  %s1985_s4 = inlined_call_operand.vmem [shape: f32[242,288], index: 4, kind: output, shape index: {}]  }
   0x1   :  { %v1043_v0 = vld [vmem:[%s1981_s3 + $0x4] ss:$12 sps:$4 sm:$0xff]   ;;  %528 = vmatprep.mubr.bf16.mxu0 %v1053_v1  ;;  %648 = vmatprep.mubr.bf16.mxu1 %v1053_v1  ;;  %v1045_v2 = vld [vmem:[%s1981_s3] ss:$12 sps:$4 sm:$0xff]   ;;  %v1046_v3 = vld [vmem:[%s1981_s3 + $0x1c] ss:$12 sps:$4 sm:$0xff]  }
   0x2   :  { %1038 = vmatprep.subr.bf16.mxu1 %v1043_v0  ;;  %496 = vmatprep.subr.bf16.mxu0 %v1043_v0  ;;  %v1048_v4 = vld [vmem:[%s1981_s3 + $0x18] ss:$12 sps:$4 sm:$0xff]   ;;  %v1096_v5 = vld [vmem:[%s1981_s3 + $0x8] ss:$12 sps:$4 sm:$0xff]  }
   0x3   :  { %1040 = vmatpush1.bf16.msra.mxu1 %v1045_v2  ;;  %497 = vmatpush1.bf16.msra.mxu0 %v1045_v2  ;;  %v1101_v6 = vld [vmem:[%s1982_s0] sm:$0xff]  ;;  %v1106_v7 = vld [vmem:[%s1982_s0 + $0x8] sm:$0xff]  ;;  %v1111_v8 = vld [vmem:[%s1982_s0 + $0x10] sm:$0xff] }
   0x4   :  { %1039 = vmatprep.subr.bf16.mxu1 %v1046_v3  ;;  %498 = vmatprep.subr.bf16.mxu0 %v1046_v3  ;;  %v1116_v9 = vld [vmem:[%s1982_s0 + $0x18] sm:$0xff]  ;;  %v50_v10 = vsel %vm49_vm0, %v1101_v6, 0.0  ;;  %v51_v11 = vsel %vm49_vm0, %v1106_v7, 0.0  ;;  %v53_v12 = vsel %vm49_vm0, %v1111_v8, 0.0  ;;  %v1127_v13 = vld [vmem:[%s1982_s0 + $0x20] sm:$0xff]  ;;  %v1135_v16 = vld [vmem:[%s1982_s0 + $0x28] sm:$0xff]  ;;  %v119_v33 = vmul.f32 %v1101_v6, %v1101_v6 }
   0x5   :  { %v52_v14 = vadd.f32 %v51_v11, %v50_v10  ;;  %v55_v15 = vsel %vm49_vm0, %v1116_v9, 0.0  ;;  %v57_v18 = vsel %vm49_vm0, %v1127_v13, 0.0  ;;  %v1142_v19 = vld [vmem:[%s1982_s0 + $0x30] sm:$0xff]  ;;  %v59_v21 = vsel %vm49_vm0, %v1135_v16, 0.0  ;;  %v1149_v22 = vld [vmem:[%s1982_s0 + $0x38] sm:$0xff]  ;;  %v1156_v25 = vld [vmem:[%s1982_s0 + $0x40] sm:$0xff] }
   0x6   :  { %v61_v24 = vsel %vm49_vm0, %v1142_v19, 0.0  ;;  %v63_v27 = vsel %vm49_vm0, %v1149_v22, 0.0  ;;  %v1163_v28 = vld [vmem:[%s1982_s0 + $0x48] sm:$0xff]  ;;  %v65_v30 = vsel %vm49_vm0, %v1156_v25, 0.0  ;;  %v1170_v31 = vld [vmem:[%s1982_s0 + $0x50] sm:$0xff]  ;;  %v120_v34 = vmul.f32 %v1106_v7, %v1106_v7  ;;  %v1183_v37 = vld [vmem:[%s1982_s0 + $0x58] sm:$0xff] }
   0x7   :  { %1041 = vmatpush1.bf16.msra.mxu1 %v1048_v4  ;;  %499 = vmatpush1.bf16.msra.mxu0 %v1048_v4  ;;  %v54_v17 = vadd.f32 %v53_v12, %v52_v14  ;;  %v121_v35 = vmul.f32 %v1111_v8, %v1111_v8  ;;  %v67_v36 = vsel %vm49_vm0, %v1163_v28, 0.0  ;;  %v122_v39 = vmul.f32 %v1116_v9, %v1116_v9  ;;  %v1194_v42 = vld [vmem:[%s1982_s0 + $0x60] sm:$0xff]  ;;  %v1204_v49 = vld [vmem:[%s1982_s0 + $0x68] sm:$0xff]  ;;  %v1214_v55 = vld [vmem:[%s1982_s0 + $0x70] sm:$0xff] }
   0x8   :  { %1002 = vmatprep.subr.bf16.mxu1 %v1096_v5  ;;  %v69_v40 = vsel %vm49_vm0, %v1170_v31, 0.0  ;;  %v123_v41 = vmul.f32 %v1127_v13, %v1127_v13  ;;  %v150_v44 = vsel %vm49_vm0, %v119_v33, 0.0  ;;  %v151_v45 = vsel %vm49_vm0, %v120_v34, 0.0  ;;  %v1224_v61 = vld [vmem:[%s1982_s0 + $0x78] sm:$0xff]  ;;  %v1234_v4 = vld [vmem:[%s1982_s0 + $0x80] sm:$0xff] }
   0x9   :  { %v56_v20 = vadd.f32 %v55_v15, %v54_v17  ;;  %v153_v46 = vsel %vm49_vm0, %v121_v35, 0.0  ;;  %v71_v47 = vsel %vm49_vm0, %v1183_v37, 0.0  ;;  %v152_v48 = vadd.f32 %v151_v45, %v150_v44  ;;  %v1244_v17 = vld [vmem:[%s1982_s0 + $0x88] sm:$0xff]  ;;  %v1264_v34 = vld [vmem:[%s1982_s0 + $0x98] sm:$0xff] }
   0xa   :  { %v124_v51 = vmul.f32 %v1135_v16, %v1135_v16  ;;  %v155_v52 = vsel %vm49_vm0, %v122_v39, 0.0  ;;  %v73_v53 = vsel %vm49_vm0, %v1194_v42, 0.0  ;;  %v125_v57 = vmul.f32 %v1142_v19, %v1142_v19 }
   0xb   :  { %v58_v23 = vadd.f32 %v57_v18, %v56_v20  ;;  %v154_v54 = vadd.f32 %v153_v46, %v152_v48  ;;  %v157_v58 = vsel %vm49_vm0, %v123_v41, 0.0  ;;  %v75_v59 = vsel %vm49_vm0, %v1204_v49, 0.0  ;;  %v1274_v41 = vld [vmem:[%s1982_s0 + $0xa0] sm:$0xff]  ;;  %v1284_v48 = vld [vmem:[%s1982_s0 + $0xa8] sm:$0xff] }
   0xc   :  { %v126_v63 = vmul.f32 %v1149_v22, %v1149_v22  ;;  %v159_v0 = vsel %vm49_vm0, %v124_v51, 0.0  ;;  %v77_v2 = vsel %vm49_vm0, %v1214_v55, 0.0  ;;  %v127_v11 = vmul.f32 %v1156_v25, %v1156_v25 }
   0xd   :  { %v60_v26 = vadd.f32 %v59_v21, %v58_v23  ;;  %v156_v60 = vadd.f32 %v155_v52, %v154_v54  ;;  %v161_v12 = vsel %vm49_vm0, %v125_v57, 0.0  ;;  %v79_v14 = vsel %vm49_vm0, %v1224_v61, 0.0 }
   0xe   :  { %v128_v20 = vmul.f32 %v1163_v28, %v1163_v28  ;;  %v163_v21 = vsel %vm49_vm0, %v126_v63, 0.0  ;;  %v81_v23 = vsel %vm49_vm0, %v1234_v4, 0.0  ;;  %v131_v44 = vmul.f32 %v1194_v42, %v1194_v42  ;;  %v1304_v63 = vld [vmem:[%s1982_s0 + $0xb8] sm:$0xff] }
   0xf   :  { %v62_v29 = vadd.f32 %v61_v24, %v60_v26  ;;  %v158_v3 = vadd.f32 %v157_v58, %v156_v60  ;;  %v1254_v26 = vld [vmem:[%s1982_s0 + $0x90] sm:$0xff]  ;;  %v87_v46 = vsel %vm49_vm0, %v1264_v34, 0.0  ;;  %v132_v51 = vmul.f32 %v1204_v49, %v1204_v49 }
  0x10   :  { %v85_v39 = vsel %vm49_vm0, %v1254_v26, 0.0  ;;  %v133_v58 = vmul.f32 %v1214_v55, %v1214_v55  ;;  %v91_v60 = vsel %vm49_vm0, %v1284_v48, 0.0 }
  0x11   :  { %v64_v32 = vadd.f32 %v63_v27, %v62_v29  ;;  %v160_v15 = vadd.f32 %v159_v0, %v158_v3  ;;  %v129_v29 = vmul.f32 %v1170_v31, %v1170_v31  ;;  %v175_v3 = vsel %vm49_vm0, %v132_v51, 0.0  ;;  %v1354_v51 = vld [vmem:[%s1982_s0 + $0xe0] sm:$0xff] }
  0x13   :  { %v66_v38 = vadd.f32 %v65_v30, %v64_v32  ;;  %v162_v24 = vadd.f32 %v161_v12, %v160_v15  ;;  %v165_v30 = vsel %vm49_vm0, %v127_v11, 0.0  ;;  %v83_v32 = vsel %vm49_vm0, %v1244_v17, 0.0  ;;  %v1314_v12 = vld [vmem:[%s1982_s0 + $0xc0] sm:$0xff] }
  0x14   :  { %v169_v45 = vsel %vm49_vm0, %v129_v29, 0.0  ;;  %v135_v15 = vmul.f32 %v1234_v4, %v1234_v4 }
  0x15   :  { %v68_v43 = vadd.f32 %v67_v36, %v66_v38  ;;  %v164_v33 = vadd.f32 %v163_v21, %v162_v24  ;;  %v130_v36 = vmul.f32 %v1183_v37, %v1183_v37  ;;  %v167_v38 = vsel %vm49_vm0, %v128_v20, 0.0 }
  0x16   :  { %v95_v20 = vsel %vm49_vm0, %v1304_v63, 0.0 }
  0x17   :  { %v70_v50 = vadd.f32 %v69_v40, %v68_v43  ;;  %v166_v40 = vadd.f32 %v165_v30, %v164_v33  ;;  %v171_v52 = vsel %vm49_vm0, %v130_v36, 0.0  ;;  %v97_v30 = vsel %vm49_vm0, %v1314_v12, 0.0  ;;  %v1334_v33 = vld [vmem:[%s1982_s0 + $0xd0] sm:$0xff] }
  0x18   :  { %v137_v36 = vmul.f32 %v1254_v26, %v1254_v26 }
  0x19   :  { %v72_v56 = vadd.f32 %v71_v47, %v70_v50  ;;  %v168_v47 = vadd.f32 %v167_v38, %v166_v40  ;;  %v181_v38 = vsel %vm49_vm0, %v135_v15, 0.0 }
  0x1b   :  { %v74_v62 = vadd.f32 %v73_v53, %v72_v56  ;;  %v89_v53 = vsel %vm49_vm0, %v1274_v41, 0.0  ;;  %v170_v54 = vadd.f32 %v169_v45, %v168_v47  ;;  %v1294_v56 = vld [vmem:[%s1982_s0 + $0xb0] sm:$0xff]  ;;  %v138_v45 = vmul.f32 %v1264_v34, %v1264_v34 }
  0x1c   :  { %v101_v47 = vsel %vm49_vm0, %v1334_v33, 0.0 }
  0x1d   :  { %v76_v10 = vadd.f32 %v75_v59, %v74_v62  ;;  %v173_v59 = vsel %vm49_vm0, %v131_v44, 0.0  ;;  %v172_v62 = vadd.f32 %v171_v52, %v170_v54  ;;  %v185_v54 = vsel %vm49_vm0, %v137_v36, 0.0 }
  0x1f   :  { %v78_v18 = vadd.f32 %v77_v2, %v76_v10  ;;  %v134_v2 = vmul.f32 %v1224_v61, %v1224_v61  ;;  %v93_v10 = vsel %vm49_vm0, %v1294_v56, 0.0  ;;  %v174_v11 = vadd.f32 %v173_v59, %v172_v62  ;;  %v1364_v59 = vld [vmem:[%s1982_s0 + $0xe8] sm:$0xff] }
  0x20   :  { %v140_v62 = vmul.f32 %v1284_v48, %v1284_v48 }
  0x21   :  { %v80_v27 = vadd.f32 %v79_v14, %v78_v18  ;;  %v177_v18 = vsel %vm49_vm0, %v133_v58, 0.0  ;;  %v176_v21 = vadd.f32 %v175_v3, %v174_v11  ;;  %v179_v29 = vsel %vm49_vm0, %v134_v2, 0.0 }
  0x22   :  { %v105_v2 = vsel %vm49_vm0, %v1354_v51, 0.0 }
  0x23   :  { %v82_v35 = vadd.f32 %v81_v23, %v80_v27  ;;  %v1324_v23 = vld [vmem:[%s1982_s0 + $0xc8] sm:$0xff]  ;;  %v136_v27 = vmul.f32 %v1244_v17, %v1244_v17 }
  0x25   :  { %v84_v43 = vadd.f32 %v83_v32, %v82_v35  ;;  %v178_v32 = vadd.f32 %v177_v18, %v176_v21  ;;  %v107_v18 = vsel %vm49_vm0, %v1364_v59, 0.0 }
  0x27   :  { %v86_v50 = vadd.f32 %v85_v39, %v84_v43  ;;  %v99_v39 = vsel %vm49_vm0, %v1324_v23, 0.0  ;;  %v180_v40 = vadd.f32 %v179_v29, %v178_v32  ;;  %v1344_v43 = vld [vmem:[%s1982_s0 + $0xd8] sm:$0xff] }
  0x29   :  { %v88_v57 = vadd.f32 %v87_v46, %v86_v50  ;;  %v183_v46 = vsel %vm49_vm0, %v136_v27, 0.0  ;;  %v182_v50 = vadd.f32 %v181_v38, %v180_v40  ;;  %v191_v27 = vsel %vm49_vm0, %v140_v62, 0.0 }
  0x2a   :  { %v144_v40 = vmul.f32 %v1324_v23, %v1324_v23 }
  0x2b   :  { %v90_v0 = vadd.f32 %v89_v53, %v88_v57  ;;  %v139_v53 = vmul.f32 %v1274_v41, %v1274_v41  ;;  %v103_v57 = vsel %vm49_vm0, %v1344_v43, 0.0  ;;  %v184_v58 = vadd.f32 %v183_v46, %v182_v50 }
  0x2d   :  { %v92_v14 = vadd.f32 %v91_v60, %v90_v0  ;;  %v187_v0 = vsel %vm49_vm0, %v138_v45, 0.0  ;;  %v186_v3 = vadd.f32 %v185_v54, %v184_v58  ;;  %v189_v15 = vsel %vm49_vm0, %v139_v53, 0.0 }
  0x2e   :  { %v146_v53 = vmul.f32 %v1344_v43, %v1344_v43  ;;  %v199_v54 = vsel %vm49_vm0, %v144_v40, 0.0 }
  0x2f   :  { %v94_v24 = vadd.f32 %v93_v10, %v92_v14  ;;  %v1374_v10 = vld [vmem:[%s1982_s0 + $0xf0] sm:$0x3]  ;;  %v141_v14 = vmul.f32 %v1294_v56, %v1294_v56 }
  0x30   :  { %v110_v29 = vsel %vm109_vm1, %v1374_v10, 0.0 }
  0x31   :  { %v96_v35 = vadd.f32 %v95_v20, %v94_v24  ;;  %v188_v20 = vadd.f32 %v187_v0, %v186_v3  ;;  %v142_v24 = vmul.f32 %v1304_v63, %v1304_v63  ;;  %v193_v36 = vsel %vm49_vm0, %v141_v14, 0.0 }
  0x32   :  { %v203_v3 = vsel %vm49_vm0, %v146_v53, 0.0 }
  0x33   :  { %v98_v44 = vadd.f32 %v97_v30, %v96_v35  ;;  %v190_v30 = vadd.f32 %v189_v15, %v188_v20  ;;  %v143_v35 = vmul.f32 %v1314_v12, %v1314_v12  ;;  %v149_v15 = vmul.f32 %v1374_v10, %v1374_v10 }
  0x35   :  { %v100_v52 = vadd.f32 %v99_v39, %v98_v44  ;;  %v192_v38 = vadd.f32 %v191_v27, %v190_v30  ;;  %v195_v44 = vsel %vm49_vm0, %v142_v24, 0.0  ;;  %v197_v50 = vsel %vm49_vm0, %v143_v35, 0.0 }
  0x37   :  { %v102_v60 = vadd.f32 %v101_v47, %v100_v52  ;;  %v194_v45 = vadd.f32 %v193_v36, %v192_v38  ;;  %v145_v47 = vmul.f32 %v1334_v33, %v1334_v33 }
  0x39   :  { %v104_v11 = vadd.f32 %v103_v57, %v102_v60  ;;  %v196_v52 = vadd.f32 %v195_v44, %v194_v45  ;;  %v147_v60 = vmul.f32 %v1354_v51, %v1354_v51  ;;  %v201_v62 = vsel %vm49_vm0, %v145_v47, 0.0 }
  0x3b   :  { %v106_v21 = vadd.f32 %v105_v2, %v104_v11  ;;  %v198_v58 = vadd.f32 %v197_v50, %v196_v52  ;;  %v148_v2 = vmul.f32 %v1364_v59, %v1364_v59 }
  0x3d   :  { %v108_v32 = vadd.f32 %v107_v18, %v106_v21  ;;  %v200_v0 = vadd.f32 %v199_v54, %v198_v58  ;;  %v205_v18 = vsel %vm49_vm0, %v147_v60, 0.0  ;;  %v207_v21 = vsel %vm49_vm0, %v148_v2, 0.0 }
  0x3f   :  { %v111_v39 = vadd.f32 %v110_v29, %v108_v32  ;;  %v202_v14 = vadd.f32 %v201_v62, %v200_v0  ;;  %v209_v29 = vsel %vm109_vm1, %v149_v15, 0.0 }
  0x41   :  { %v112_v46 = vrot.slane %v111_v39, 4  ;;  %v204_v20 = vadd.f32 %v203_v3, %v202_v14 }
  0x43   :  { %v113_v57 = vadd.f32 %v112_v46, %v111_v39  ;;  %v206_v27 = vadd.f32 %v205_v18, %v204_v20 }
  0x45   :  { %v114_v11 = vrot.slane %v113_v57, 2  ;;  %v208_v30 = vadd.f32 %v207_v21, %v206_v27 }
  0x47   :  { %v115_v24 = vadd.f32 %v114_v11, %v113_v57  ;;  %v210_v35 = vadd.f32 %v209_v29, %v208_v30 }
  0x49   :  { %v116_v32 = vrot.slane %v115_v24, 1  ;;  %v211_v36 = vrot.slane %v210_v35, 4 }
  0x4b   :  { %v117_v38 = vadd.f32 %v116_v32, %v115_v24  ;;  %v212_v39 = vadd.f32 %v211_v36, %v210_v35 }
  0x4d   :  { %v213_v40 = vrot.slane %v212_v39, 2  ;;  %v1409_v44 = vmul.f32 0.004132231, %v117_v38 }
  0x4f   :  { %v214_v45 = vadd.f32 %v213_v40, %v212_v39  ;;  %v218_v50 = vmul.f32 %v1409_v44, %v1409_v44  ;;  %v221_v58 = vsub.f32 %v1101_v6, %v1409_v44  ;;  %v222_v60 = vsub.f32 %v1106_v7, %v1409_v44 }
  0x50   :  { %v245_v62 = vsub.f32 %v1314_v12, %v1409_v44  ;;  %v246_v0 = vsub.f32 %v1324_v23, %v1409_v44  ;;  %v223_v2 = vsub.f32 %v1111_v8, %v1409_v44  ;;  %v224_v3 = vsub.f32 %v1116_v9, %v1409_v44  ;;  %v1436_v12 = vld [vmem:[%s1983_s1] ss:$0 sm:$0xff] }
  0x51   :  { %v215_v46 = vrot.slane %v214_v45, 1  ;;  %v247_v11 = vsub.f32 %v1334_v33, %v1409_v44  ;;  %v248_v6 = vsub.f32 %v1344_v43, %v1409_v44  ;;  %v225_v7 = vsub.f32 %v1127_v13, %v1409_v44 }
  0x52   :  { %v226_v8 = vsub.f32 %v1135_v16, %v1409_v44  ;;  %v249_v9 = vsub.f32 %v1354_v51, %v1409_v44  ;;  %v250_v23 = vsub.f32 %v1364_v59, %v1409_v44  ;;  %v227_v33 = vsub.f32 %v1142_v19, %v1409_v44  ;;  %v1453_v16 = vld [vmem:[%s1984_s2] ss:$0 sm:$0xff] }
  0x53   :  { %v216_v47 = vadd.f32 %v215_v46, %v214_v45 }
  0x55   :  { %v217_v52 = vmul.f32 0.004132231, %v216_v47 }
  0x57   :  { %v219_v53 = vsub.f32 %v217_v52, %v218_v50 }
  0x59   :  { %v220_v54 = vmax.f32 %v219_v53, 0.0 }
  0x5b   :  { %v252_v57 = vadd.f32 1e-05, %v220_v54 }
  0x5d   :  { %1051 = vrsqrt.f32 %v252_v57 }
  0x67   :  { %v1431_v14 = vpop.eup %1051 }
  0x68   :  { %v254_v13 = vmul.f32 %v1431_v14, %v221_v58  ;;  %v255_v43 = vmul.f32 %v1431_v14, %v222_v60  ;;  %v278_v15 = vmul.f32 %v1431_v14, %v245_v62  ;;  %v279_v18 = vmul.f32 %v1431_v14, %v246_v0 }
  0x69   :  { %v256_v51 = vmul.f32 %v1431_v14, %v223_v2  ;;  %v257_v59 = vmul.f32 %v1431_v14, %v224_v3  ;;  %v280_v20 = vmul.f32 %v1431_v14, %v247_v11  ;;  %v281_v19 = vmul.f32 %v1431_v14, %v248_v6  ;;  %v1050_v6 = vld [vmem:[%s1981_s3 + $0x20] ss:$12 sps:$4 sm:$0xff]  }
  0x6a   :  { %v292_v21 = vmul.f32 %v1436_v12, %v254_v13  ;;  %v293_v24 = vmul.f32 %v1436_v12, %v255_v43  ;;  %v316_v27 = vmul.f32 %v1436_v12, %v278_v15  ;;  %v317_v29 = vmul.f32 %v1436_v12, %v279_v18 }
  0x6b   :  { %v294_v30 = vmul.f32 %v1436_v12, %v256_v51  ;;  %v295_v32 = vmul.f32 %v1436_v12, %v257_v59  ;;  %v318_v35 = vmul.f32 %v1436_v12, %v280_v20  ;;  %v319_v36 = vmul.f32 %v1436_v12, %v281_v19 }
  0x6c   :  { %v330_v38 = vadd.f32 %v1453_v16, %v292_v21  ;;  %v331_v39 = vadd.f32 %v1453_v16, %v293_v24  ;;  %v354_v40 = vadd.f32 %v1453_v16, %v316_v27  ;;  %v355_v45 = vadd.f32 %v1453_v16, %v317_v29 }
  0x6d   :  { %v332_v46 = vadd.f32 %v1453_v16, %v294_v30  ;;  %v333_v47 = vadd.f32 %v1453_v16, %v295_v32  ;;  %v356_v50 = vadd.f32 %v1453_v16, %v318_v35  ;;  %v357_v52 = vadd.f32 %v1453_v16, %v319_v36 }
  0x6e   :  { %v361_v53 = vmax.f32 %v330_v38, 0.0  ;;  %v362_v54 = vmax.f32 %v331_v39, 0.0  ;;  %v385_v57 = vmax.f32 %v354_v40, 0.0  ;;  %v386_v58 = vmax.f32 %v355_v45, 0.0 }
  0x6f   :  { %v363_v60 = vmax.f32 %v332_v46, 0.0  ;;  %v228_v62 = vsub.f32 %v1149_v22, %v1409_v44  ;;  %v251_v0 = vsub.f32 %v1374_v10, %v1409_v44  ;;  %v229_v2 = vsub.f32 %v1156_v25, %v1409_v44 }
  0x70   :  { %v1481_v3 = vpack.c.bf16 %v362_v54, %v361_v53  ;;  %v1483_v11 = vpack.c.bf16 %v386_v58, %v385_v57  ;;  %v258_v13 = vmul.f32 %v1431_v14, %v225_v7  ;;  %v259_v43 = vmul.f32 %v1431_v14, %v226_v8 }
  0x71   :  { %v364_v15 = vmax.f32 %v333_v47, 0.0  ;;  %v387_v22 = vmax.f32 %v356_v50, 0.0  ;;  %v282_v18 = vmul.f32 %v1431_v14, %v249_v9  ;;  %v283_v10 = vmul.f32 %v1431_v14, %v250_v23 }
  0x72   :  { %952 = vmatmul.mubr.msk.bf16.vlgmr.msra.gmra.mrb[0].mxu0 %vm49_vm0, %v1481_v3  ;;  %964 = vmatmul.mubr.msk.bf16.vlgmr.msra.gmra.mrb[0].mxu1 %vm49_vm0, %v1483_v11  ;;  %v388_v25 = vmax.f32 %v357_v52, 0.0  ;;  %v296_v51 = vmul.f32 %v1436_v12, %v258_v13  ;;  %v297_v59 = vmul.f32 %v1436_v12, %v259_v43  ;;  %v260_v7 = vmul.f32 %v1431_v14, %v227_v33 }
  0x73   :  { %1003 = vmatpush3.bf16.msra.mxu1 %v1096_v5  ;;  %538 = vmatprep.mubr.bf16.mxu0 %v1053_v1  ;;  %v320_v8 = vmul.f32 %v1436_v12, %v282_v18  ;;  %v321_v9 = vmul.f32 %v1436_v12, %v283_v10  ;;  %v261_v23 = vmul.f32 %v1431_v14, %v228_v62 }
  0x74   :  { %658 = vmatprep.mubr.bf16.mxu1 %v1053_v1  ;;  %1004 = vmatprep.subr.bf16.mxu1 %v1050_v6  ;;  %v298_v20 = vmul.f32 %v1436_v12, %v260_v7  ;;  %v230_v19 = vsub.f32 %v1163_v28, %v1409_v44  ;;  %v231_v33 = vsub.f32 %v1170_v31, %v1409_v44 }
  0x75   :  { %v1510_v5 = vpack.c.bf16 %v364_v15, %v363_v60  ;;  %v334_v21 = vadd.f32 %v1453_v16, %v296_v51  ;;  %v299_v24 = vmul.f32 %v1436_v12, %v261_v23  ;;  %v284_v27 = vmul.f32 %v1431_v14, %v251_v0 }
  0x76   :  { %v1515_v29 = vpack.c.bf16 %v388_v25, %v387_v22  ;;  %v335_v30 = vadd.f32 %v1453_v16, %v297_v59  ;;  %v358_v32 = vadd.f32 %v1453_v16, %v320_v8  ;;  %v359_v35 = vadd.f32 %v1453_v16, %v321_v9 }
  0x77   :  { %1005 = vmatpush3.bf16.msra.mxu1 %v1050_v6  ;;  %v262_v28 = vmul.f32 %v1431_v14, %v229_v2  ;;  %v232_v31 = vsub.f32 %v1183_v37, %v1409_v44  ;;  %v233_v36 = vsub.f32 %v1194_v42, %v1409_v44  ;;  %v234_v38 = vsub.f32 %v1204_v49, %v1409_v44 }
  0x78   :  { %v336_v39 = vadd.f32 %v1453_v16, %v298_v20  ;;  %v337_v40 = vadd.f32 %v1453_v16, %v299_v24  ;;  %v322_v45 = vmul.f32 %v1436_v12, %v284_v27  ;;  %v235_v46 = vsub.f32 %v1214_v55, %v1409_v44 }
  0x79   :  { %v365_v47 = vmax.f32 %v334_v21, 0.0  ;;  %v236_v50 = vsub.f32 %v1224_v61, %v1409_v44  ;;  %v237_v37 = vsub.f32 %v1234_v4, %v1409_v44  ;;  %v238_v52 = vsub.f32 %v1244_v17, %v1409_v44 }
  0x7a   :  { %953 = vmatmul.mubr.msk.bf16.gmra.mrb[4].mxu0 %vm49_vm0, %v1510_v5  ;;  %965 = vmatmul.mubr.msk.bf16.gmra.mrb[4].mxu1 %vm49_vm0, %v1515_v29  ;;  %v366_v53 = vmax.f32 %v335_v30, 0.0  ;;  %v389_v54 = vmax.f32 %v358_v32, 0.0  ;;  %v390_v57 = vmax.f32 %v359_v35, 0.0  ;;  %v263_v55 = vmul.f32 %v1431_v14, %v230_v19 }
  0x7b   :  { %548 = vmatprep.mubr.bf16.mxu0 %v1053_v1  ;;  %668 = vmatprep.mubr.bf16.mxu1 %v1053_v1  ;;  %v300_v61 = vmul.f32 %v1436_v12, %v262_v28  ;;  %v239_v4 = vsub.f32 %v1254_v26, %v1409_v44  ;;  %v240_v17 = vsub.f32 %v1264_v34, %v1409_v44  ;;  %v367_v58 = vmax.f32 %v336_v39, 0.0 }
  0x7c   :  { %v368_v60 = vmax.f32 %v337_v40, 0.0  ;;  %v360_v62 = vadd.f32 %v1453_v16, %v322_v45  ;;  %v241_v0 = vsub.f32 %v1274_v41, %v1409_v44  ;;  %v264_v2 = vmul.f32 %v1431_v14, %v231_v33 }
  0x7d   :  { %v268_v6 = vmul.f32 %v1431_v14, %v235_v46  ;;  %v242_v13 = vsub.f32 %v1284_v48, %v1409_v44  ;;  %v243_v26 = vsub.f32 %v1294_v56, %v1409_v44  ;;  %v1559_v43 = vpack.c.bf16 %v366_v53, %v365_v47 }
  0x7e   :  { %v1561_v34 = vpack.c.bf16 %v390_v57, %v389_v54  ;;  %v301_v15 = vmul.f32 %v1436_v12, %v263_v55  ;;  %v269_v22 = vmul.f32 %v1431_v14, %v236_v50  ;;  %v1566_v41 = vadd.f32 %v1453_v16, %v300_v61 }
  0x7f   :  { %v306_v18 = vmul.f32 %v1436_v12, %v268_v6  ;;  %v270_v10 = vmul.f32 %v1431_v14, %v237_v37  ;;  %v244_v48 = vsub.f32 %v1304_v63, %v1409_v44  ;;  %v1572_v25 = vpack.c.bf16 %v368_v60, %v367_v58 }
  0x80   :  { %v391_v56 = vmax.f32 %v360_v62, 0.0  ;;  %v265_v51 = vmul.f32 %v1431_v14, %v232_v31  ;;  %v307_v59 = vmul.f32 %v1436_v12, %v269_v22  ;;  %v302_v7 = vmul.f32 %v1436_v12, %v264_v2 }
  0x81   :  { %v344_v8 = vadd.f32 %v1453_v16, %v306_v18  ;;  %v271_v9 = vmul.f32 %v1431_v14, %v238_v52  ;;  %v308_v23 = vmul.f32 %v1436_v12, %v270_v10  ;;  %v339_v63 = vadd.f32 %v1453_v16, %v301_v15 }
  0x82   :  { %954 = vmatmul.mubr.msk.bf16.gmra.mrb[8].mxu0 %vm49_vm0, %v1559_v43  ;;  %966 = vmatmul.mubr.msk.bf16.gmra.mrb[8].mxu1 %vm49_vm0, %v1561_v34  ;;  %v345_v20 = vadd.f32 %v1453_v16, %v307_v59  ;;  %v272_v19 = vmul.f32 %v1431_v14, %v239_v4  ;;  %v273_v27 = vmul.f32 %v1431_v14, %v240_v17  ;;  %v369_v55 = vmax.f32 %v1566_v41, 0.0 }
  0x83   :  { %558 = vmatprep.mubr.bf16.mxu0 %v1053_v1  ;;  %678 = vmatprep.mubr.bf16.mxu1 %v1053_v1  ;;  %v375_v33 = vmax.f32 %v344_v8, 0.0  ;;  %v309_v21 = vmul.f32 %v1436_v12, %v271_v9  ;;  %v346_v24 = vadd.f32 %v1453_v16, %v308_v23  ;;  %v1592_v30 = vpack.c.bf16 %v391_v56, %v391_v56 }
  0x84   :  { %v376_v32 = vmax.f32 %v345_v20, 0.0  ;;  %v310_v35 = vmul.f32 %v1436_v12, %v272_v19  ;;  %v274_v28 = vmul.f32 %v1431_v14, %v241_v0  ;;  %v311_v40 = vmul.f32 %v1436_v12, %v273_v27 }
  0x85   :  { %v347_v31 = vadd.f32 %v1453_v16, %v309_v21  ;;  %v377_v39 = vmax.f32 %v346_v24, 0.0  ;;  %v275_v45 = vmul.f32 %v1431_v14, %v242_v13  ;;  %v276_v37 = vmul.f32 %v1431_v14, %v243_v26 }
  0x86   :  { %v399_v46 = vpack.c.bf16 %v376_v32, %v375_v33  ;;  %v348_v47 = vadd.f32 %v1453_v16, %v310_v35  ;;  %v312_v50 = vmul.f32 %v1436_v12, %v274_v28  ;;  %v349_v53 = vadd.f32 %v1453_v16, %v311_v40 }
  0x87   :  { %v378_v52 = vmax.f32 %v347_v31, 0.0  ;;  %v313_v54 = vmul.f32 %v1436_v12, %v275_v45  ;;  %v277_v57 = vmul.f32 %v1431_v14, %v244_v48  ;;  %v314_v17 = vmul.f32 %v1436_v12, %v276_v37 }
  0x88   :  { %v379_v61 = vmax.f32 %v348_v47, 0.0  ;;  %v350_v4 = vadd.f32 %v1453_v16, %v312_v50  ;;  %v380_v60 = vmax.f32 %v349_v53, 0.0  ;;  %v370_v2 = vmax.f32 %v339_v63, 0.0 }
  0x89   :  { %v400_v58 = vpack.c.bf16 %v378_v52, %v377_v39  ;;  %v351_v62 = vadd.f32 %v1453_v16, %v313_v54  ;;  %v315_v0 = vmul.f32 %v1436_v12, %v277_v57  ;;  %v303_v6 = vmul.f32 %v1436_v12, %v265_v51 }
  0x8a   :  { %955 = vmatmul.mubr.msk.bf16.gmra.mrb[12].mxu0 %vm49_vm0, %v1572_v25  ;;  %967 = vmatmul.mubr.msk.bf16.gmra.mrb[12].mxu1 %vm49_vm0, %v1592_v30  ;;  %v381_v13 = vmax.f32 %v350_v4, 0.0  ;;  %v352_v26 = vadd.f32 %v1453_v16, %v314_v17  ;;  %v401_v15 = vpack.c.bf16 %v380_v60, %v379_v61  ;;  %v266_v10 = vmul.f32 %v1431_v14, %v233_v36 }
  0x8b   :  { %568 = vmatprep.mubr.bf16.mxu0 %v1053_v1  ;;  %1006 = vmatprep.mubr.msk.bf16.mxu1 %vm49_vm0, %v1481_v3  ;;  %v382_v22 = vmax.f32 %v351_v62, 0.0  ;;  %v353_v41 = vadd.f32 %v1453_v16, %v315_v0  ;;  %v396_v51 = vpack.c.bf16 %v370_v2, %v369_v55  ;;  %v340_v59 = vadd.f32 %v1453_v16, %v302_v7 }
  0x8c   :  { %v383_v18 = vmax.f32 %v352_v26, 0.0  ;;  %v341_v8 = vadd.f32 %v1453_v16, %v303_v6  ;;  %v267_v3 = vmul.f32 %v1431_v14, %v234_v38  ;;  %v304_v23 = vmul.f32 %v1436_v12, %v266_v10 }
  0x8d   :  { %v402_v48 = vpack.c.bf16 %v382_v22, %v381_v13  ;;  %v384_v56 = vmax.f32 %v353_v41, 0.0  ;;  %v371_v42 = vmax.f32 %v340_v59, 0.0 }
  0x8e   :  { %v372_v36 = vmax.f32 %v341_v8, 0.0  ;;  %v305_v63 = vmul.f32 %v1436_v12, %v267_v3  ;;  %v342_v44 = vadd.f32 %v1453_v16, %v304_v23 }
  0x8f   :  { %v403_v9 = vpack.c.bf16 %v384_v56, %v383_v18 }
  0x90   :  { %v397_v49 = vpack.c.bf16 %v372_v36, %v371_v42  ;;  %v343_v14 = vadd.f32 %v1453_v16, %v305_v63 }
  0x92   :  { %956 = vmatmul.mubr.msk.bf16.gmra.mrb[16].mxu0 %vm49_vm0, %v396_v51  ;;  %1007 = vmatmul.mubr.msk.bf16.vlgmr.msra.gmra.mrb[16].mxu1 %vm49_vm0, %v1510_v5  ;;  %v373_v5 = vmax.f32 %v342_v44, 0.0  ;;  %v374_v38 = vmax.f32 %v343_v14, 0.0 }
  0x93   :  { %578 = vmatprep.mubr.bf16.mxu0 %v1053_v1  ;;  %1010 = vmatprep.mubr.msk.bf16.mxu1 %vm49_vm0, %v1559_v43 }
  0x94   :  { %v398_v12 = vpack.c.bf16 %v374_v38, %v373_v5 }
  0x9a   :  { %957 = vmatmul.mubr.msk.bf16.gmra.mrb[20].mxu0 %vm49_vm0, %v397_v49  ;;  %1011 = vmatmul.mubr.msk.bf16.gmra.mrb[20].mxu1 %vm49_vm0, %v1572_v25 }
  0x9b   :  { %588 = vmatprep.mubr.bf16.mxu0 %v1053_v1  ;;  %1014 = vmatprep.mubr.msk.bf16.mxu1 %vm49_vm0, %v396_v51 }
  0xa2   :  { %958 = vmatmul.mubr.msk.bf16.gmra.mrb[24].mxu0 %vm49_vm0, %v398_v12  ;;  %1015 = vmatmul.mubr.msk.bf16.gmra.mrb[24].mxu1 %vm49_vm0, %v397_v49 }
  0xa3   :  { %598 = vmatprep.mubr.bf16.mxu0 %v1053_v1  ;;  %1018 = vmatprep.mubr.msk.bf16.mxu1 %vm49_vm0, %v398_v12 }
  0xaa   :  { %959 = vmatmul.mubr.msk.bf16.gmra.mrb[28].mxu0 %vm49_vm0, %v399_v46  ;;  %1019 = vmatmul.mubr.msk.bf16.gmra.mrb[28].mxu1 %vm49_vm0, %v399_v46 }
  0xab   :  { %608 = vmatprep.mubr.bf16.mxu0 %v1053_v1  ;;  %1022 = vmatprep.mubr.msk.bf16.mxu1 %vm49_vm0, %v400_v58 }
  0xb2   :  { %960 = vmatmul.mubr.msk.bf16.gmra.mrb[32].mxu0 %vm49_vm0, %v400_v58  ;;  %1023 = vmatmul.mubr.msk.bf16.gmra.mrb[32].mxu1 %vm49_vm0, %v401_v15 }
  0xb3   :  { %618 = vmatprep.mubr.bf16.mxu0 %v1053_v1  ;;  %1026 = vmatprep.mubr.msk.bf16.mxu1 %vm49_vm0, %v402_v48 }
  0xba   :  { %961 = vmatmul.mubr.msk.bf16.gmra.mrb[36].mxu0 %vm49_vm0, %v401_v15  ;;  %1027 = vmatmul.mubr.msk.bf16.gmra.mrb[36].mxu1 %vm49_vm0, %v403_v9 }
  0xbb   :  { %628 = vmatprep.mubr.bf16.mxu0 %v1053_v1  ;;  %1030 = vmatprep.mubr.msk.bf16.mxu1 %vm49_vm0, %v1483_v11 }
  0xc2   :  { %962 = vmatmul.mubr.msk.bf16.gmra.mrb[40].mxu0 %vm49_vm0, %v402_v48  ;;  %1031 = vmatmul.mubr.msk.bf16.gmra.mrb[40].mxu1 %vm49_vm0, %v1515_v29 }
  0xc3   :  { %638 = vmatprep.mubr.bf16.mxu0 %v1053_v1  ;;  %1034 = vmatprep.mubr.msk.bf16.mxu1 %vm49_vm0, %v1561_v34 }
  0xca   :  { %963 = vmatmul.mubr.msk.bf16.gmra.mrb[44].mxu0 %vm49_vm0, %v403_v9  ;;  %1035 = vmatmul.mubr.msk.bf16.gmra.mrb[44].mxu1 %vm49_vm0, %v1592_v30 }
 0x145   :  { %v530_v16 = vpop.f32.mrb[0].mxu0  ;;  %v650_v43 = vpop.f32.mrb[0].mxu1 }
 0x146   :  { %847 = vst [vmem:[%s1985_s4] sm:$0xff] %v530_v16  ;;  %919 = vst [vmem:[%s1985_s4 + $0x240] sm:$0xff] %v650_v43  ;;  %v532_v11 = vpop.f32.mrb[1].mxu0  ;;  %v652_v1 = vpop.f32.mrb[1].mxu1 }
 0x147   :  { %848 = vst [vmem:[%s1985_s4 + $0x8] sm:$0xff] %v532_v11  ;;  %920 = vst [vmem:[%s1985_s4 + $0x248] sm:$0xff] %v652_v1  ;;  %v534_v29 = vpop.f32.mrb[2].mxu0  ;;  %v654_v34 = vpop.f32.mrb[2].mxu1 }
 0x148   :  { %850 = vst [vmem:[%s1985_s4 + $0x18] sm:$0xff] %v534_v29  ;;  %922 = vst [vmem:[%s1985_s4 + $0x258] sm:$0xff] %v654_v34  ;;  %v536_v25 = vpop.f32.mrb[3].mxu0  ;;  %v656_v7 = vpop.f32.mrb[3].mxu1 }
 0x149   :  { %851 = vst [vmem:[%s1985_s4 + $0x20] sm:$0xff] %v536_v25  ;;  %923 = vst [vmem:[%s1985_s4 + $0x260] sm:$0xff] %v656_v7 }
 0x14d   :  { %v540_v20 = vpop.f32.mrb[4].mxu0  ;;  %v660_v19 = vpop.f32.mrb[4].mxu1 }
 0x14e   :  { %853 = vst [vmem:[%s1985_s4 + $0x30] sm:$0xff] %v540_v20  ;;  %925 = vst [vmem:[%s1985_s4 + $0x270] sm:$0xff] %v660_v19  ;;  %v542_v33 = vpop.f32.mrb[5].mxu0  ;;  %v662_v21 = vpop.f32.mrb[5].mxu1 }
 0x14f   :  { %854 = vst [vmem:[%s1985_s4 + $0x38] sm:$0xff] %v542_v33  ;;  %926 = vst [vmem:[%s1985_s4 + $0x278] sm:$0xff] %v662_v21  ;;  %v544_v24 = vpop.f32.mrb[6].mxu0  ;;  %v664_v27 = vpop.f32.mrb[6].mxu1 }
 0x150   :  { %856 = vst [vmem:[%s1985_s4 + $0x48] sm:$0xff] %v544_v24  ;;  %928 = vst [vmem:[%s1985_s4 + $0x288] sm:$0xff] %v664_v27  ;;  %v546_v30 = vpop.f32.mrb[7].mxu0  ;;  %v666_v32 = vpop.f32.mrb[7].mxu1 }
 0x151   :  { %857 = vst [vmem:[%s1985_s4 + $0x50] sm:$0xff] %v546_v30  ;;  %929 = vst [vmem:[%s1985_s4 + $0x290] sm:$0xff] %v666_v32 }
 0x155   :  { %v550_v35 = vpop.f32.mrb[8].mxu0  ;;  %v670_v28 = vpop.f32.mrb[8].mxu1 }
 0x156   :  { %859 = vst [vmem:[%s1985_s4 + $0x60] sm:$0xff] %v550_v35  ;;  %931 = vst [vmem:[%s1985_s4 + $0x2a0] sm:$0xff] %v670_v28  ;;  %v552_v31 = vpop.f32.mrb[9].mxu0  ;;  %v672_v39 = vpop.f32.mrb[9].mxu1 }
 0x157   :  { %860 = vst [vmem:[%s1985_s4 + $0x68] sm:$0xff] %v552_v31  ;;  %932 = vst [vmem:[%s1985_s4 + $0x2a8] sm:$0xff] %v672_v39  ;;  %v554_v40 = vpop.f32.mrb[10].mxu0  ;;  %v674_v45 = vpop.f32.mrb[10].mxu1 }
 0x158   :  { %862 = vst [vmem:[%s1985_s4 + $0x78] sm:$0xff] %v554_v40  ;;  %934 = vst [vmem:[%s1985_s4 + $0x2b8] sm:$0xff] %v674_v45  ;;  %v556_v46 = vpop.f32.mrb[11].mxu0  ;;  %v676_v47 = vpop.f32.mrb[11].mxu1 }
 0x159   :  { %863 = vst [vmem:[%s1985_s4 + $0x80] sm:$0xff] %v556_v46  ;;  %935 = vst [vmem:[%s1985_s4 + $0x2c0] sm:$0xff] %v676_v47 }
 0x15d   :  { %v560_v50 = vpop.f32.mrb[12].mxu0  ;;  %v680_v37 = vpop.f32.mrb[12].mxu1 }
 0x15e   :  { %865 = vst [vmem:[%s1985_s4 + $0x90] sm:$0xff] %v560_v50  ;;  %937 = vst [vmem:[%s1985_s4 + $0x2d0] sm:$0x3] %v680_v37  ;;  %v562_v52 = vpop.f32.mrb[13].mxu0  ;;  %v682_v53 = vpop.f32.mrb[13].mxu1 }
 0x15f   :  { %866 = vst [vmem:[%s1985_s4 + $0x98] sm:$0xff] %v562_v52  ;;  %938 = vst [vmem:[%s1985_s4 + $0x2d8] sm:$0x3] %v682_v53  ;;  %v564_v54 = vpop.f32.mrb[14].mxu0  ;;  %v684_v57 = vpop.f32.mrb[14].mxu1 }
 0x160   :  { %868 = vst [vmem:[%s1985_s4 + $0xa8] sm:$0xff] %v564_v54  ;;  %v566_v55 = vpop.f32.mrb[15].mxu0  ;;  %v685_v61 = vpop.f32.mrb[15].mxu1 }
 0x161   :  { %869 = vst [vmem:[%s1985_s4 + $0xb0] sm:$0xff] %v566_v55 }
 0x165   :  { %v570_v4 = vpop.f32.mrb[16].mxu0  ;;  %v1008_v17 = vpop.f32.mrb[16].mxu1 }
 0x166   :  { %871 = vst [vmem:[%s1985_s4 + $0xc0] sm:$0xff] %v570_v4  ;;  %855 = vst.msk [vmem:[%s1985_s4 + $0x40] sm:$0xff] %vm49_vm0, %v1008_v17  ;;  %v572_v58 = vpop.f32.mrb[17].mxu0  ;;  %v721_v60 = vpop.f32.mrb[17].mxu1 }
 0x167   :  { %872 = vst [vmem:[%s1985_s4 + $0xc8] sm:$0xff] %v572_v58  ;;  %849 = vst.msk [vmem:[%s1985_s4 + $0x10] sm:$0xff] %vm49_vm0, %v721_v60  ;;  %v574_v62 = vpop.f32.mrb[18].mxu0  ;;  %v1009_v0 = vpop.f32.mrb[18].mxu1 }
 0x168   :  { %874 = vst [vmem:[%s1985_s4 + $0xd8] sm:$0xff] %v574_v62  ;;  %858 = vst.msk [vmem:[%s1985_s4 + $0x58] sm:$0xff] %vm49_vm0, %v1009_v0  ;;  %v576_v2 = vpop.f32.mrb[19].mxu0  ;;  %v724_v6 = vpop.f32.mrb[19].mxu1 }
 0x169   :  { %875 = vst [vmem:[%s1985_s4 + $0xe0] sm:$0xff] %v576_v2  ;;  %852 = vst.msk [vmem:[%s1985_s4 + $0x28] sm:$0xff] %vm49_vm0, %v724_v6 }
 0x16d   :  { %v580_v13 = vpop.f32.mrb[20].mxu0  ;;  %v1012_v26 = vpop.f32.mrb[20].mxu1 }
 0x16e   :  { %877 = vst [vmem:[%s1985_s4 + $0xf0] sm:$0xff] %v580_v13  ;;  %867 = vst.msk [vmem:[%s1985_s4 + $0xa0] sm:$0xff] %vm49_vm0, %v1012_v26  ;;  %v582_v15 = vpop.f32.mrb[21].mxu0  ;;  %v737_v22 = vpop.f32.mrb[21].mxu1 }
 0x16f   :  { %878 = vst [vmem:[%s1985_s4 + $0xf8] sm:$0xff] %v582_v15  ;;  %861 = vst.msk [vmem:[%s1985_s4 + $0x70] sm:$0xff] %vm49_vm0, %v737_v22  ;;  %v584_v41 = vpop.f32.mrb[22].mxu0  ;;  %v1013_v18 = vpop.f32.mrb[22].mxu1 }
 0x170   :  { %880 = vst [vmem:[%s1985_s4 + $0x108] sm:$0xff] %v584_v41  ;;  %870 = vst.msk [vmem:[%s1985_s4 + $0xb8] sm:$0xff] %vm49_vm0, %v1013_v18  ;;  %v586_v10 = vpop.f32.mrb[23].mxu0  ;;  %v740_v48 = vpop.f32.mrb[23].mxu1 }
 0x171   :  { %881 = vst [vmem:[%s1985_s4 + $0x110] sm:$0xff] %v586_v10  ;;  %864 = vst.msk [vmem:[%s1985_s4 + $0x88] sm:$0xff] %vm49_vm0, %v740_v48 }
 0x175   :  { %v590_v56 = vpop.f32.mrb[24].mxu0  ;;  %v1016_v51 = vpop.f32.mrb[24].mxu1 }
 0x176   :  { %883 = vst [vmem:[%s1985_s4 + $0x120] sm:$0xff] %v590_v56  ;;  %879 = vst.msk [vmem:[%s1985_s4 + $0x100] sm:$0xff] %vm49_vm0, %v1016_v51  ;;  %v592_v59 = vpop.f32.mrb[25].mxu0  ;;  %v753_v8 = vpop.f32.mrb[25].mxu1 }
 0x177   :  { %884 = vst [vmem:[%s1985_s4 + $0x128] sm:$0xff] %v592_v59  ;;  %873 = vst.msk [vmem:[%s1985_s4 + $0xd0] sm:$0xff] %vm49_vm0, %v753_v8  ;;  %v594_v3 = vpop.f32.mrb[26].mxu0  ;;  %v1017_v9 = vpop.f32.mrb[26].mxu1 }
 0x178   :  { %886 = vst [vmem:[%s1985_s4 + $0x138] sm:$0xff] %v594_v3  ;;  %882 = vst.msk [vmem:[%s1985_s4 + $0x118] sm:$0xff] %vm49_vm0, %v1017_v9  ;;  %v596_v42 = vpop.f32.mrb[27].mxu0  ;;  %v756_v36 = vpop.f32.mrb[27].mxu1 }
 0x179   :  { %887 = vst [vmem:[%s1985_s4 + $0x140] sm:$0xff] %v596_v42  ;;  %876 = vst.msk [vmem:[%s1985_s4 + $0xe8] sm:$0xff] %vm49_vm0, %v756_v36 }
 0x17d   :  { %v600_v23 = vpop.f32.mrb[28].mxu0  ;;  %v1020_v63 = vpop.f32.mrb[28].mxu1 }
 0x17e   :  { %889 = vst [vmem:[%s1985_s4 + $0x150] sm:$0xff] %v600_v23  ;;  %891 = vst.msk [vmem:[%s1985_s4 + $0x160] sm:$0xff] %vm49_vm0, %v1020_v63  ;;  %v602_v49 = vpop.f32.mrb[29].mxu0  ;;  %v769_v44 = vpop.f32.mrb[29].mxu1 }
 0x17f   :  { %890 = vst [vmem:[%s1985_s4 + $0x158] sm:$0xff] %v602_v49  ;;  %885 = vst.msk [vmem:[%s1985_s4 + $0x130] sm:$0xff] %vm49_vm0, %v769_v44  ;;  %v604_v14 = vpop.f32.mrb[30].mxu0  ;;  %v1021_v5 = vpop.f32.mrb[30].mxu1 }
 0x180   :  { %892 = vst [vmem:[%s1985_s4 + $0x168] sm:$0xff] %v604_v14  ;;  %894 = vst.msk [vmem:[%s1985_s4 + $0x178] sm:$0xff] %vm49_vm0, %v1021_v5  ;;  %v606_v38 = vpop.f32.mrb[31].mxu0  ;;  %v772_v12 = vpop.f32.mrb[31].mxu1 }
 0x181   :  { %893 = vst [vmem:[%s1985_s4 + $0x170] sm:$0xff] %v606_v38  ;;  %888 = vst.msk [vmem:[%s1985_s4 + $0x148] sm:$0xff] %vm49_vm0, %v772_v12 }
 0x185   :  { %v610_v16 = vpop.f32.mrb[32].mxu0  ;;  %v1024_v43 = vpop.f32.mrb[32].mxu1 }
 0x186   :  { %895 = vst [vmem:[%s1985_s4 + $0x180] sm:$0xff] %v610_v16  ;;  %903 = vst.msk [vmem:[%s1985_s4 + $0x1c0] sm:$0xff] %vm49_vm0, %v1024_v43  ;;  %v612_v11 = vpop.f32.mrb[33].mxu0  ;;  %v785_v1 = vpop.f32.mrb[33].mxu1 }
 0x187   :  { %896 = vst [vmem:[%s1985_s4 + $0x188] sm:$0xff] %v612_v11  ;;  %897 = vst.msk [vmem:[%s1985_s4 + $0x190] sm:$0xff] %vm49_vm0, %v785_v1  ;;  %v614_v29 = vpop.f32.mrb[34].mxu0  ;;  %v1025_v34 = vpop.f32.mrb[34].mxu1 }
 0x188   :  { %898 = vst [vmem:[%s1985_s4 + $0x198] sm:$0xff] %v614_v29  ;;  %906 = vst.msk [vmem:[%s1985_s4 + $0x1d8] sm:$0xff] %vm49_vm0, %v1025_v34  ;;  %v616_v25 = vpop.f32.mrb[35].mxu0  ;;  %v788_v7 = vpop.f32.mrb[35].mxu1 }
 0x189   :  { %899 = vst [vmem:[%s1985_s4 + $0x1a0] sm:$0xff] %v616_v25  ;;  %900 = vst.msk [vmem:[%s1985_s4 + $0x1a8] sm:$0xff] %vm49_vm0, %v788_v7 }
 0x18d   :  { %v620_v20 = vpop.f32.mrb[36].mxu0  ;;  %v1028_v19 = vpop.f32.mrb[36].mxu1 }
 0x18e   :  { %901 = vst [vmem:[%s1985_s4 + $0x1b0] sm:$0xff] %v620_v20  ;;  %915 = vst.msk [vmem:[%s1985_s4 + $0x220] sm:$0xff] %vm49_vm0, %v1028_v19  ;;  %v622_v33 = vpop.f32.mrb[37].mxu0  ;;  %v801_v21 = vpop.f32.mrb[37].mxu1 }
 0x18f   :  { %902 = vst [vmem:[%s1985_s4 + $0x1b8] sm:$0xff] %v622_v33  ;;  %909 = vst.msk [vmem:[%s1985_s4 + $0x1f0] sm:$0xff] %vm49_vm0, %v801_v21  ;;  %v624_v24 = vpop.f32.mrb[38].mxu0  ;;  %v1029_v27 = vpop.f32.mrb[38].mxu1 }
 0x190   :  { %904 = vst [vmem:[%s1985_s4 + $0x1c8] sm:$0xff] %v624_v24  ;;  %918 = vst.msk [vmem:[%s1985_s4 + $0x238] sm:$0xff] %vm49_vm0, %v1029_v27  ;;  %v626_v30 = vpop.f32.mrb[39].mxu0  ;;  %v804_v32 = vpop.f32.mrb[39].mxu1 }
 0x191   :  { %905 = vst [vmem:[%s1985_s4 + $0x1d0] sm:$0xff] %v626_v30  ;;  %912 = vst.msk [vmem:[%s1985_s4 + $0x208] sm:$0xff] %vm49_vm0, %v804_v32 }
 0x195   :  { %v630_v35 = vpop.f32.mrb[40].mxu0  ;;  %v1032_v28 = vpop.f32.mrb[40].mxu1 }
 0x196   :  { %907 = vst [vmem:[%s1985_s4 + $0x1e0] sm:$0xff] %v630_v35  ;;  %927 = vst.msk [vmem:[%s1985_s4 + $0x280] sm:$0xff] %vm49_vm0, %v1032_v28  ;;  %v632_v31 = vpop.f32.mrb[41].mxu0  ;;  %v817_v39 = vpop.f32.mrb[41].mxu1 }
 0x197   :  { %908 = vst [vmem:[%s1985_s4 + $0x1e8] sm:$0xff] %v632_v31  ;;  %921 = vst.msk [vmem:[%s1985_s4 + $0x250] sm:$0xff] %vm49_vm0, %v817_v39  ;;  %v634_v40 = vpop.f32.mrb[42].mxu0  ;;  %v1033_v45 = vpop.f32.mrb[42].mxu1 }
 0x198   :  { %910 = vst [vmem:[%s1985_s4 + $0x1f8] sm:$0xff] %v634_v40  ;;  %930 = vst.msk [vmem:[%s1985_s4 + $0x298] sm:$0xff] %vm49_vm0, %v1033_v45  ;;  %v636_v46 = vpop.f32.mrb[43].mxu0  ;;  %v820_v47 = vpop.f32.mrb[43].mxu1 }
 0x199   :  { %911 = vst [vmem:[%s1985_s4 + $0x200] sm:$0xff] %v636_v46  ;;  %924 = vst.msk [vmem:[%s1985_s4 + $0x268] sm:$0xff] %vm49_vm0, %v820_v47 }
 0x19d   :  { %v640_v50 = vpop.f32.mrb[44].mxu0  ;;  %v1036_v37 = vpop.f32.mrb[44].mxu1 }
 0x19e   :  { %913 = vst [vmem:[%s1985_s4 + $0x210] sm:$0xff] %v640_v50  ;;  %939 = vst.msk [vmem:[%s1985_s4 + $0x2e0] sm:$0x3] %vm109_vm1, %v1036_v37  ;;  %v642_v52 = vpop.f32.mrb[45].mxu0  ;;  %v833_v53 = vpop.f32.mrb[45].mxu1 }
 0x19f   :  { %914 = vst [vmem:[%s1985_s4 + $0x218] sm:$0xff] %v642_v52  ;;  %933 = vst.msk [vmem:[%s1985_s4 + $0x2b0] sm:$0xff] %vm49_vm0, %v833_v53  ;;  %v644_v54 = vpop.f32.mrb[46].mxu0  ;;  %v1037_v57 = vpop.f32.mrb[46].mxu1 }
 0x1a0   :  { %916 = vst [vmem:[%s1985_s4 + $0x228] sm:$0xff] %v644_v54  ;;  %v646_v55 = vpop.f32.mrb[47].mxu0  ;;  %v836_v61 = vpop.f32.mrb[47].mxu1 }
 0x1a1   :  { %917 = vst [vmem:[%s1985_s4 + $0x230] sm:$0xff] %v646_v55  ;;  %936 = vst.msk [vmem:[%s1985_s4 + $0x2c8] sm:$0xff] %vm49_vm0, %v836_v61 }

// kernel: generator_forward.11
= control target key start
LH: loop header
LB: loop body
LE: loop exit
PB: predicated region body
PF: predicated region fallthrough
CT: control target
= control target key end

     0   :  { %vm61_vm0 = vcmask 261120   ;;  %vm145_vm1 = vcmask 254976   ;;  %vm836_vm2 = vcmask 523264   ;;  %vm879_vm3 = vcmask 517120   ;;  %s1981_s3 = inlined_call_operand.vmem [shape: bf16[32,64], index: 3, kind: input, shape index: {}]   ;;  %s1982_s0 = inlined_call_operand.vmem [shape: f32[338,32], index: 0, kind: input, shape index: {}]   ;;  %s1983_s1 = inlined_call_operand.vmem [shape: f32[1,32], index: 1, kind: input, shape index: {}]   ;;  %s1984_s2 = inlined_call_operand.vmem [shape: f32[1,32], index: 2, kind: input, shape index: {}]   ;;  %s1985_s4 = inlined_call_operand.vmem [shape: f32[338,64], index: 4, kind: output, shape index: {}]  }
   0x1   :  { %v987_v0 = vld [vmem:[%s1981_s3] sm:$0xff]   ;;  %v988_v1 = vld [vmem:[%s1981_s3 + $0x8] sm:$0xff]   ;;  %v1035_v4 = vld [vmem:[%s1982_s0 + $0x10] sm:$0xff] }
   0x2   :  { %935 = vmatprep.subr.bf16.mxu0 %v987_v0  ;;  %983 = vmatprep.subr.bf16.mxu1 %v987_v0  ;;  %v1025_v2 = vld [vmem:[%s1982_s0] sm:$0xff]  ;;  %v1030_v3 = vld [vmem:[%s1982_s0 + $0x8] sm:$0xff]  ;;  %v1040_v5 = vld [vmem:[%s1982_s0 + $0x18] sm:$0xff]  ;;  %v65_v8 = vsel %vm61_vm0, %v1035_v4, 0.0  ;;  %v157_v43 = vmul.f32 %v1035_v4, %v1035_v4 }
   0x3   :  { %936 = vmatpush3.bf16.msra.mxu0 %v987_v0  ;;  %985 = vmatpush3.bf16.msra.mxu1 %v987_v0  ;;  %v62_v6 = vsel %vm61_vm0, %v1025_v2, 0.0  ;;  %v63_v7 = vsel %vm61_vm0, %v1030_v3, 0.0  ;;  %v1051_v9 = vld [vmem:[%s1982_s0 + $0x20] sm:$0xff]  ;;  %v67_v11 = vsel %vm61_vm0, %v1040_v5, 0.0  ;;  %v1058_v12 = vld [vmem:[%s1982_s0 + $0x28] sm:$0xff]  ;;  %v1065_v15 = vld [vmem:[%s1982_s0 + $0x30] sm:$0xff]  ;;  %v155_v39 = vmul.f32 %v1025_v2, %v1025_v2 }
   0x4   :  { %937 = vmatprep.subr.bf16.mxu0 %v988_v1  ;;  %v64_v10 = vadd.f32 %v63_v7, %v62_v6  ;;  %984 = vmatprep.subr.bf16.mxu1 %v988_v1  ;;  %v69_v14 = vsel %vm61_vm0, %v1051_v9, 0.0  ;;  %v71_v17 = vsel %vm61_vm0, %v1058_v12, 0.0  ;;  %v1072_v18 = vld [vmem:[%s1982_s0 + $0x38] sm:$0xff]  ;;  %v73_v20 = vsel %vm61_vm0, %v1065_v15, 0.0  ;;  %v1079_v21 = vld [vmem:[%s1982_s0 + $0x40] sm:$0xff]  ;;  %v1086_v24 = vld [vmem:[%s1982_s0 + $0x48] sm:$0xff] }
   0x5   :  { %v75_v23 = vsel %vm61_vm0, %v1072_v18, 0.0  ;;  %v77_v26 = vsel %vm61_vm0, %v1079_v21, 0.0  ;;  %v1093_v27 = vld [vmem:[%s1982_s0 + $0x50] sm:$0xff]  ;;  %v79_v29 = vsel %vm61_vm0, %v1086_v24, 0.0  ;;  %v1100_v30 = vld [vmem:[%s1982_s0 + $0x58] sm:$0xff]  ;;  %v1107_v33 = vld [vmem:[%s1982_s0 + $0x60] sm:$0xff]  ;;  %v156_v40 = vmul.f32 %v1030_v3, %v1030_v3 }
   0x6   :  { %v66_v13 = vadd.f32 %v65_v8, %v64_v10  ;;  %v81_v32 = vsel %vm61_vm0, %v1093_v27, 0.0  ;;  %v83_v35 = vsel %vm61_vm0, %v1100_v30, 0.0  ;;  %v1114_v36 = vld [vmem:[%s1982_s0 + $0x68] sm:$0xff]  ;;  %v85_v38 = vsel %vm61_vm0, %v1107_v33, 0.0  ;;  %v1125_v41 = vld [vmem:[%s1982_s0 + $0x70] sm:$0xff]  ;;  %v1136_v46 = vld [vmem:[%s1982_s0 + $0x78] sm:$0xff] }
   0x7   :  { %938 = vmatpush3.bf16.msra.mxu0 %v988_v1  ;;  %986 = vmatpush3.bf16.msra.mxu1 %v988_v1  ;;  %v87_v44 = vsel %vm61_vm0, %v1114_v36, 0.0  ;;  %v158_v45 = vmul.f32 %v1040_v5, %v1040_v5  ;;  %v89_v48 = vsel %vm61_vm0, %v1125_v41, 0.0  ;;  %v159_v49 = vmul.f32 %v1051_v9, %v1051_v9  ;;  %v1147_v52 = vld [vmem:[%s1982_s0 + $0x80] sm:$0xff]  ;;  %v1158_v59 = vld [vmem:[%s1982_s0 + $0x88] sm:$0xff]  ;;  %v1168_v1 = vld [vmem:[%s1982_s0 + $0x90] sm:$0xff] }
   0x8   :  { %v68_v16 = vadd.f32 %v67_v11, %v66_v13  ;;  %v198_v50 = vsel %vm61_vm0, %v155_v39, 0.0  ;;  %v199_v51 = vsel %vm61_vm0, %v156_v40, 0.0  ;;  %v201_v55 = vsel %vm61_vm0, %v157_v43, 0.0  ;;  %v1178_v13 = vld [vmem:[%s1982_s0 + $0x98] sm:$0xff]  ;;  %v1208_v39 = vld [vmem:[%s1982_s0 + $0xb0] sm:$0xff] }
   0x9   :  { %v200_v54 = vadd.f32 %v199_v51, %v198_v50  ;;  %v91_v56 = vsel %vm61_vm0, %v1136_v46, 0.0  ;;  %v160_v57 = vmul.f32 %v1058_v12, %v1058_v12  ;;  %v203_v58 = vsel %vm61_vm0, %v158_v45, 0.0  ;;  %1993 = vst [vmem:[#allocation3_spill] sm:$0xff] %v1208_v39 }
   0xa   :  { %v70_v19 = vadd.f32 %v69_v14, %v68_v16  ;;  %v93_v62 = vsel %vm61_vm0, %v1147_v52, 0.0  ;;  %v161_v63 = vmul.f32 %v1065_v15, %v1065_v15  ;;  %v205_v0 = vsel %vm61_vm0, %v159_v49, 0.0 }
   0xb   :  { %v202_v61 = vadd.f32 %v201_v55, %v200_v54  ;;  %v95_v8 = vsel %vm61_vm0, %v1158_v59, 0.0  ;;  %v162_v10 = vmul.f32 %v1072_v18, %v1072_v18  ;;  %v207_v11 = vsel %vm61_vm0, %v160_v57, 0.0  ;;  %v1228_v54 = vld [vmem:[%s1982_s0 + $0xc0] sm:$0xff] }
   0xc   :  { %v72_v22 = vadd.f32 %v71_v17, %v70_v19  ;;  %v97_v17 = vsel %vm61_vm0, %v1168_v1, 0.0  ;;  %v163_v19 = vmul.f32 %v1079_v21, %v1079_v21  ;;  %v105_v50 = vsel %vm61_vm0, %v1208_v39, 0.0 }
   0xd   :  { %v204_v7 = vadd.f32 %v203_v58, %v202_v61  ;;  %v167_v51 = vmul.f32 %v1107_v33, %v1107_v33  ;;  %v168_v58 = vmul.f32 %v1114_v36, %v1114_v36  ;;  %v1238_v61 = vld [vmem:[%s1982_s0 + $0xc8] sm:$0xff] }
   0xe   :  { %v74_v25 = vadd.f32 %v73_v20, %v72_v22  ;;  %v209_v20 = vsel %vm61_vm0, %v161_v63, 0.0  ;;  %v1188_v22 = vld [vmem:[%s1982_s0 + $0xa0] sm:$0xff] }
   0xf   :  { %v206_v16 = vadd.f32 %v205_v0, %v204_v7  ;;  %v109_v0 = vsel %vm61_vm0, %v1228_v54, 0.0  ;;  %v221_v7 = vsel %vm61_vm0, %v167_v51, 0.0 }
  0x10   :  { %v76_v28 = vadd.f32 %v75_v23, %v74_v25 }
  0x11   :  { %v208_v25 = vadd.f32 %v207_v11, %v206_v16  ;;  %v170_v16 = vmul.f32 %v1136_v46, %v1136_v46 }
  0x12   :  { %v78_v31 = vadd.f32 %v77_v26, %v76_v28  ;;  %v99_v26 = vsel %vm61_vm0, %v1178_v13, 0.0  ;;  %v164_v28 = vmul.f32 %v1086_v24, %v1086_v24 }
  0x14   :  { %v80_v34 = vadd.f32 %v79_v29, %v78_v31  ;;  %v211_v29 = vsel %vm61_vm0, %v162_v10, 0.0  ;;  %v1198_v31 = vld [vmem:[%s1982_s0 + $0xa8] sm:$0xff]  ;;  %v215_v45 = vsel %vm61_vm0, %v164_v28, 0.0 }
  0x15   :  { %1992 = vst [vmem:[#allocation2_spill] sm:$0xff] %v1198_v31  ;;  %v103_v43 = vsel %vm61_vm0, %v1198_v31, 0.0 }
  0x16   :  { %v82_v37 = vadd.f32 %v81_v32, %v80_v34  ;;  %v210_v34 = vadd.f32 %v209_v20, %v208_v25 }
  0x18   :  { %v84_v42 = vadd.f32 %v83_v35, %v82_v37  ;;  %v101_v35 = vsel %vm61_vm0, %v1188_v22, 0.0  ;;  %v165_v37 = vmul.f32 %v1093_v27, %v1093_v27 }
  0x1a   :  { %v86_v47 = vadd.f32 %v85_v38, %v84_v42  ;;  %v213_v38 = vsel %vm61_vm0, %v163_v19, 0.0  ;;  %v212_v42 = vadd.f32 %v211_v29, %v210_v34  ;;  %v1258_v19 = vld [vmem:[%s1982_s0 + $0xd8] sm:$0xff]  ;;  %v1268_v29 = vld [vmem:[%s1982_s0 + $0xe0] sm:$0xff] }
  0x1c   :  { %v88_v53 = vadd.f32 %v87_v44, %v86_v47  ;;  %v166_v44 = vmul.f32 %v1100_v30, %v1100_v30  ;;  %v1218_v47 = vld [vmem:[%s1982_s0 + $0xb8] sm:$0xff]  ;;  %v214_v49 = vadd.f32 %v213_v38, %v212_v42  ;;  %v227_v38 = vsel %vm61_vm0, %v170_v16, 0.0 }
  0x1d   :  { %1994 = vst [vmem:[#allocation4_spill] sm:$0xff] %v1218_v47  ;;  %v107_v57 = vsel %vm61_vm0, %v1218_v47, 0.0 }
  0x1e   :  { %v90_v60 = vadd.f32 %v89_v48, %v88_v53  ;;  %v217_v53 = vsel %vm61_vm0, %v165_v37, 0.0  ;;  %v172_v37 = vmul.f32 %v1158_v59, %v1158_v59 }
  0x20   :  { %v92_v6 = vadd.f32 %v91_v56, %v90_v60  ;;  %v216_v56 = vadd.f32 %v215_v45, %v214_v49  ;;  %v219_v60 = vsel %vm61_vm0, %v166_v44, 0.0  ;;  %v117_v44 = vsel %vm61_vm0, %v1268_v29, 0.0  ;;  %v1288_v49 = vld [vmem:[%s1982_s0 + $0xf0] sm:$0xff] }
  0x21   :  { %v173_v45 = vmul.f32 %v1168_v1, %v1168_v1 }
  0x22   :  { %v94_v14 = vadd.f32 %v93_v62, %v92_v6  ;;  %v218_v63 = vadd.f32 %v217_v53, %v216_v56  ;;  %v169_v6 = vmul.f32 %v1125_v41, %v1125_v41  ;;  %v231_v56 = vsel %vm61_vm0, %v172_v37, 0.0 }
  0x24   :  { %v96_v23 = vadd.f32 %v95_v8, %v94_v14  ;;  %v1248_v8 = vld [vmem:[%s1982_s0 + $0xd0] sm:$0xff]  ;;  %v220_v11 = vadd.f32 %v219_v60, %v218_v63  ;;  %v111_v14 = vsel %vm61_vm0, %v1238_v61, 0.0  ;;  %v225_v28 = vsel %vm61_vm0, %v169_v6, 0.0  ;;  %v1308_v6 = vld [vmem:[%s1982_s0 + $0x100] sm:$0xff] }
  0x25   :  { %v113_v25 = vsel %vm61_vm0, %v1248_v8, 0.0  ;;  %v175_v63 = vmul.f32 %v1188_v22, %v1188_v22 }
  0x26   :  { %v98_v32 = vadd.f32 %v97_v17, %v96_v23  ;;  %v223_v17 = vsel %vm61_vm0, %v168_v58, 0.0  ;;  %v222_v23 = vadd.f32 %v221_v7, %v220_v11 }
  0x28   :  { %v100_v40 = vadd.f32 %v99_v26, %v98_v32  ;;  %v171_v26 = vmul.f32 %v1147_v52, %v1147_v52  ;;  %v224_v34 = vadd.f32 %v223_v17, %v222_v23  ;;  %v1318_v17 = vld [vmem:[%s1982_s0 + $0x108] sm:$0xff] }
  0x29   :  { %v127_v37 = vsel %vm61_vm0, %v1318_v17, 0.0 }
  0x2a   :  { %v102_v48 = vadd.f32 %v101_v35, %v100_v40  ;;  %v115_v35 = vsel %vm61_vm0, %v1258_v19, 0.0  ;;  %v1278_v40 = vld [vmem:[%s1982_s0 + $0xe8] sm:$0xff] }
  0x2b   :  { %v119_v53 = vsel %vm61_vm0, %v1278_v40, 0.0 }
  0x2c   :  { %v104_v55 = vadd.f32 %v103_v43, %v102_v48  ;;  %v226_v43 = vadd.f32 %v225_v28, %v224_v34  ;;  %v229_v48 = vsel %vm61_vm0, %v171_v26, 0.0  ;;  %v177_v26 = vmul.f32 %v1208_v39, %v1208_v39 }
  0x2d   :  { %v237_v28 = vsel %vm61_vm0, %v175_v63, 0.0  ;;  %v1358_v63 = vld [vmem:[%s1982_s0 + $0x128] sm:$0xff] }
  0x2e   :  { %v106_v62 = vadd.f32 %v105_v50, %v104_v55  ;;  %v228_v51 = vadd.f32 %v227_v38, %v226_v43  ;;  %v174_v55 = vmul.f32 %v1178_v13, %v1178_v13  ;;  %v178_v38 = vmul.f32 %v1218_v47, %v1218_v47  ;;  %v1338_v43 = vld [vmem:[%s1982_s0 + $0x118] sm:$0xff] }
  0x30   :  { %v108_v10 = vadd.f32 %v107_v57, %v106_v62  ;;  %v1298_v57 = vld [vmem:[%s1982_s0 + $0xf8] sm:$0xff]  ;;  %v230_v60 = vadd.f32 %v229_v48, %v228_v51  ;;  %v121_v62 = vsel %vm61_vm0, %v1288_v49, 0.0  ;;  %v235_v16 = vsel %vm61_vm0, %v174_v55, 0.0 }
  0x31   :  { %v123_v11 = vsel %vm61_vm0, %v1298_v57, 0.0  ;;  %v241_v51 = vsel %vm61_vm0, %v177_v26, 0.0  ;;  %v182_v26 = vmul.f32 %v1258_v19, %v1258_v19 }
  0x32   :  { %v110_v20 = vadd.f32 %v109_v0, %v108_v10  ;;  %v233_v0 = vsel %vm61_vm0, %v173_v45, 0.0  ;;  %v232_v10 = vadd.f32 %v231_v56, %v230_v60  ;;  %v180_v60 = vmul.f32 %v1238_v61, %v1238_v61 }
  0x34   :  { %v112_v32 = vadd.f32 %v111_v14, %v110_v20  ;;  %v176_v14 = vmul.f32 %v1198_v31, %v1198_v31  ;;  %v234_v23 = vadd.f32 %v233_v0, %v232_v10 }
  0x36   :  { %v114_v42 = vadd.f32 %v113_v25, %v112_v32  ;;  %v125_v25 = vsel %vm61_vm0, %v1308_v6, 0.0  ;;  %v1328_v32 = vld [vmem:[%s1982_s0 + $0x110] sm:$0xff] }
  0x37   :  { %v129_v48 = vsel %vm61_vm0, %v1328_v32, 0.0 }
  0x38   :  { %v116_v50 = vadd.f32 %v115_v35, %v114_v42  ;;  %v236_v35 = vadd.f32 %v235_v16, %v234_v23  ;;  %v239_v42 = vsel %vm61_vm0, %v176_v14, 0.0  ;;  %v1368_v16 = vld [vmem:[%s1982_s0 + $0x130] sm:$0xff] }
  0x3a   :  { %v118_v58 = vadd.f32 %v117_v44, %v116_v50  ;;  %v238_v45 = vadd.f32 %v237_v28, %v236_v35  ;;  %v179_v50 = vmul.f32 %v1228_v54, %v1228_v54  ;;  %v247_v28 = vsel %vm61_vm0, %v180_v60, 0.0 }
  0x3c   :  { %v120_v7 = vadd.f32 %v119_v53, %v118_v58  ;;  %v1348_v53 = vld [vmem:[%s1982_s0 + $0x120] sm:$0xff]  ;;  %v240_v56 = vadd.f32 %v239_v42, %v238_v45  ;;  %v131_v58 = vsel %vm61_vm0, %v1338_v43, 0.0  ;;  %v245_v14 = vsel %vm61_vm0, %v179_v50, 0.0 }
  0x3d   :  { %v133_v10 = vsel %vm61_vm0, %v1348_v53, 0.0  ;;  %v183_v42 = vmul.f32 %v1268_v29, %v1268_v29  ;;  %v1388_v45 = vld [vmem:[%s1982_s0 + $0x140] sm:$0xff] }
  0x3e   :  { %v122_v20 = vadd.f32 %v121_v62, %v120_v7  ;;  %v243_v62 = vsel %vm61_vm0, %v178_v38, 0.0  ;;  %v242_v7 = vadd.f32 %v241_v51, %v240_v56  ;;  %v137_v38 = vsel %vm61_vm0, %v1368_v16, 0.0 }
  0x3f   :  { %v251_v56 = vsel %vm61_vm0, %v182_v26, 0.0 }
  0x40   :  { %v124_v34 = vadd.f32 %v123_v11, %v122_v20  ;;  %v181_v11 = vmul.f32 %v1248_v8, %v1248_v8  ;;  %v244_v23 = vadd.f32 %v243_v62, %v242_v7  ;;  %v141_v62 = vsel %vm61_vm0, %v1388_v45, 0.0 }
  0x41   :  { %v253_v7 = vsel %vm61_vm0, %v183_v42, 0.0 }
  0x42   :  { %v126_v44 = vadd.f32 %v125_v25, %v124_v34  ;;  %v135_v25 = vsel %vm61_vm0, %v1358_v63, 0.0  ;;  %v1378_v34 = vld [vmem:[%s1982_s0 + $0x138] sm:$0xff] }
  0x43   :  { %v139_v51 = vsel %vm61_vm0, %v1378_v34, 0.0 }
  0x44   :  { %v128_v55 = vadd.f32 %v127_v37, %v126_v44  ;;  %v246_v37 = vadd.f32 %v245_v14, %v244_v23  ;;  %v249_v44 = vsel %vm61_vm0, %v181_v11, 0.0 }
  0x46   :  { %v130_v0 = vadd.f32 %v129_v48, %v128_v55  ;;  %v248_v50 = vadd.f32 %v247_v28, %v246_v37  ;;  %v184_v55 = vmul.f32 %v1278_v40, %v1278_v40 }
  0x48   :  { %v132_v20 = vadd.f32 %v131_v58, %v130_v0  ;;  %v250_v60 = vadd.f32 %v249_v44, %v248_v50  ;;  %v185_v0 = vmul.f32 %v1288_v49, %v1288_v49  ;;  %v255_v23 = vsel %vm61_vm0, %v184_v55, 0.0 }
  0x49   :  { %v188_v44 = vmul.f32 %v1318_v17, %v1318_v17 }
  0x4a   :  { %v134_v35 = vadd.f32 %v133_v10, %v132_v20  ;;  %v1403_v10 = vld [vmem:[%s1982_s0 + $0x148] sm:$0xff]  ;;  %v252_v14 = vadd.f32 %v251_v56, %v250_v60  ;;  %v186_v20 = vmul.f32 %v1298_v57, %v1298_v57  ;;  %v257_v37 = vsel %vm61_vm0, %v185_v0, 0.0 }
  0x4b   :  { %v143_v28 = vsel %vm61_vm0, %v1403_v10, 0.0  ;;  %v189_v56 = vmul.f32 %v1328_v32, %v1328_v32  ;;  %v263_v0 = vsel %vm61_vm0, %v188_v44, 0.0 }
  0x4c   :  { %v136_v48 = vadd.f32 %v135_v25, %v134_v35  ;;  %v254_v26 = vadd.f32 %v253_v7, %v252_v14  ;;  %v187_v35 = vmul.f32 %v1308_v6, %v1308_v6  ;;  %v191_v14 = vmul.f32 %v1348_v53, %v1348_v53 }
  0x4e   :  { %v138_v58 = vadd.f32 %v137_v38, %v136_v48  ;;  %v1416_v38 = vld [vmem:[%s1982_s0 + $0x150] sm:$0x3]  ;;  %v256_v42 = vadd.f32 %v255_v23, %v254_v26  ;;  %v259_v48 = vsel %vm61_vm0, %v186_v20, 0.0  ;;  %v265_v20 = vsel %vm61_vm0, %v189_v56, 0.0 }
  0x4f   :  { %v146_v55 = vsel %vm145_vm1, %v1416_v38, 0.0  ;;  %v195_v56 = vmul.f32 %v1388_v45, %v1388_v45 }
  0x50   :  { %v140_v11 = vadd.f32 %v139_v51, %v138_v58  ;;  %v258_v51 = vadd.f32 %v257_v37, %v256_v42  ;;  %v261_v58 = vsel %vm61_vm0, %v187_v35, 0.0  ;;  %v193_v37 = vmul.f32 %v1368_v16, %v1368_v16 }
  0x51   :  { %v269_v42 = vsel %vm61_vm0, %v191_v14, 0.0 }
  0x52   :  { %v142_v25 = vadd.f32 %v141_v62, %v140_v11  ;;  %v260_v60 = vadd.f32 %v259_v48, %v258_v51  ;;  %v190_v62 = vmul.f32 %v1338_v43, %v1338_v43  ;;  %v194_v48 = vmul.f32 %v1378_v34, %v1378_v34 }
  0x54   :  { %v144_v50 = vadd.f32 %v143_v28, %v142_v25  ;;  %v262_v11 = vadd.f32 %v261_v58, %v260_v60  ;;  %v192_v25 = vmul.f32 %v1358_v63, %v1358_v63  ;;  %v267_v26 = vsel %vm61_vm0, %v190_v62, 0.0 }
  0x55   :  { %v273_v58 = vsel %vm61_vm0, %v193_v37, 0.0  ;;  %v196_v62 = vmul.f32 %v1403_v10, %v1403_v10 }
  0x56   :  { %v147_v7 = vadd.f32 %v146_v55, %v144_v50  ;;  %v264_v23 = vadd.f32 %v263_v0, %v262_v11  ;;  %v271_v50 = vsel %vm61_vm0, %v192_v25, 0.0  ;;  %v275_v0 = vsel %vm61_vm0, %v194_v48, 0.0 }
  0x57   :  { %v279_v25 = vsel %vm61_vm0, %v196_v62, 0.0 }
  0x58   :  { %v148_v28 = vrot.slane %v147_v7, 4  ;;  %v266_v35 = vadd.f32 %v265_v20, %v264_v23  ;;  %v197_v20 = vmul.f32 %v1416_v38, %v1416_v38  ;;  %v277_v23 = vsel %vm61_vm0, %v195_v56, 0.0 }
  0x5a   :  { %v268_v44 = vadd.f32 %v267_v26, %v266_v35  ;;  %v149_v51 = vadd.f32 %v148_v28, %v147_v7  ;;  %v281_v35 = vsel %vm145_vm1, %v197_v20, 0.0 }
  0x5c   :  { %v270_v55 = vadd.f32 %v269_v42, %v268_v44  ;;  %v150_v11 = vrot.slane %v149_v51, 2 }
  0x5e   :  { %v272_v60 = vadd.f32 %v271_v50, %v270_v55  ;;  %v151_v26 = vadd.f32 %v150_v11, %v149_v51 }
  0x60   :  { %v274_v14 = vadd.f32 %v273_v58, %v272_v60  ;;  %v152_v42 = vrot.slane %v151_v26, 1 }
  0x62   :  { %v276_v7 = vadd.f32 %v275_v0, %v274_v14  ;;  %v153_v55 = vadd.f32 %v152_v42, %v151_v26 }
  0x64   :  { %v278_v28 = vadd.f32 %v277_v23, %v276_v7  ;;  %v1452_v58 = vmul.f32 0.00295858, %v153_v55 }
  0x66   :  { %v280_v37 = vadd.f32 %v279_v25, %v278_v28  ;;  %v290_v56 = vmul.f32 %v1452_v58, %v1452_v58  ;;  %v293_v14 = vsub.f32 %v1025_v2, %v1452_v58  ;;  %v294_v20 = vsub.f32 %v1030_v3, %v1452_v58 }
  0x67   :  { %v295_v23 = vsub.f32 %v1035_v4, %v1452_v58  ;;  %v319_v7 = vsub.f32 %v1248_v8, %v1452_v58  ;;  %v320_v2 = vsub.f32 %v1258_v19, %v1452_v58  ;;  %v297_v3 = vsub.f32 %v1051_v9, %v1452_v58 }
  0x68   :  { %v282_v44 = vadd.f32 %v281_v35, %v280_v37  ;;  %v298_v4 = vsub.f32 %v1058_v12, %v1452_v58 }
  0x6a   :  { %v283_v50 = vrot.slane %v282_v44, 4 }
  0x6c   :  { %v284_v48 = vadd.f32 %v283_v50, %v282_v44 }
  0x6e   :  { %v285_v47 = vrot.slane %v284_v48, 2 }
  0x70   :  { %v286_v60 = vadd.f32 %v285_v47, %v284_v48  ;;  %v317_v47 = vsub.f32 %v1228_v54, %v1452_v58 }
  0x72   :  { %v287_v39 = vrot.slane %v286_v60, 1 }
  0x74   :  { %v288_v31 = vadd.f32 %v287_v39, %v286_v60  ;;  %v296_v39 = vsub.f32 %v1040_v5, %v1452_v58 }
  0x76   :  { %v289_v62 = vmul.f32 0.00295858, %v288_v31  ;;  %v318_v31 = vsub.f32 %v1238_v61, %v1452_v58 }
  0x78   :  { %v291_v51 = vsub.f32 %v289_v62, %v290_v56  ;;  %v1539_v56 = vld [vmem:[%s1983_s1] ss:$0 sm:$0xff] }
  0x79   :  { %v1556_v62 = vld [vmem:[%s1984_s2] ss:$0 sm:$0xff] }
  0x7a   :  { %v292_v0 = vmax.f32 %v291_v51, 0.0  ;;  %v1995_v51 = vld [vmem:[#allocation2_spill] sm:$0xff] }
  0x7c   :  { %v336_v11 = vadd.f32 1e-05, %v292_v0  ;;  %v1996_v0 = vld [vmem:[#allocation3_spill] sm:$0xff] }
  0x7e   :  { %989 = vrsqrt.f32 %v336_v11  ;;  %v1997_v11 = vld [vmem:[#allocation4_spill] sm:$0xff] }
  0x88   :  { %v1534_v55 = vpop.eup %989 }
  0x89   :  { %v338_v48 = vmul.f32 %v1534_v55, %v293_v14  ;;  %v339_v42 = vmul.f32 %v1534_v55, %v294_v20  ;;  %v340_v37 = vmul.f32 %v1534_v55, %v295_v23  ;;  %v341_v35 = vmul.f32 %v1534_v55, %v296_v39 }
  0x8a   :  { %v362_v60 = vmul.f32 %v1534_v55, %v317_v47  ;;  %v363_v50 = vmul.f32 %v1534_v55, %v318_v31  ;;  %v364_v28 = vmul.f32 %v1534_v55, %v319_v7  ;;  %v365_v44 = vmul.f32 %v1534_v55, %v320_v2 }
  0x8b   :  { %v388_v14 = vmul.f32 %v1539_v56, %v338_v48  ;;  %v389_v20 = vmul.f32 %v1539_v56, %v339_v42  ;;  %v390_v23 = vmul.f32 %v1539_v56, %v340_v37  ;;  %v391_v39 = vmul.f32 %v1539_v56, %v341_v35 }
  0x8c   :  { %v412_v26 = vmul.f32 %v1539_v56, %v362_v60  ;;  %v413_v25 = vmul.f32 %v1539_v56, %v363_v50  ;;  %v414_v47 = vmul.f32 %v1539_v56, %v364_v28  ;;  %v415_v31 = vmul.f32 %v1539_v56, %v365_v44 }
  0x8d   :  { %v438_v7 = vadd.f32 %v1556_v62, %v388_v14  ;;  %v439_v2 = vadd.f32 %v1556_v62, %v389_v20  ;;  %v440_v48 = vadd.f32 %v1556_v62, %v390_v23  ;;  %v441_v42 = vadd.f32 %v1556_v62, %v391_v39 }
  0x8e   :  { %v462_v37 = vadd.f32 %v1556_v62, %v412_v26  ;;  %v463_v35 = vadd.f32 %v1556_v62, %v413_v25  ;;  %v464_v60 = vadd.f32 %v1556_v62, %v414_v47  ;;  %v465_v50 = vadd.f32 %v1556_v62, %v415_v31 }
  0x8f   :  { %v481_v19 = vmax.f32 %v438_v7, 0.0  ;;  %v482_v28 = vmax.f32 %v439_v2, 0.0  ;;  %v483_v8 = vmax.f32 %v440_v48, 0.0  ;;  %v484_v44 = vmax.f32 %v441_v42, 0.0 }
  0x90   :  { %v505_v61 = vmax.f32 %v462_v37, 0.0  ;;  %v506_v14 = vmax.f32 %v463_v35, 0.0  ;;  %v507_v54 = vmax.f32 %v464_v60, 0.0  ;;  %v508_v20 = vmax.f32 %v465_v50, 0.0 }
  0x91   :  { %v524_v5 = vpack.c.bf16 %v482_v28, %v481_v19  ;;  %v525_v23 = vpack.c.bf16 %v484_v44, %v483_v8  ;;  %v342_v26 = vmul.f32 %v1534_v55, %v297_v3  ;;  %v343_v25 = vmul.f32 %v1534_v55, %v298_v4 }
  0x92   :  { %v536_v39 = vpack.c.bf16 %v506_v14, %v505_v61  ;;  %v537_v47 = vpack.c.bf16 %v508_v20, %v507_v54  ;;  %v1998_v31 = vsub.f32 %v1065_v15, %v1452_v58  ;;  %v1999_v8 = vsub.f32 %v1072_v18, %v1452_v58 }
  0x93   :  { %939 = vmatprep.mubr.msk.bf16.mxu0 %vm61_vm0, %v524_v5  ;;  %v392_v9 = vmul.f32 %v1539_v56, %v342_v26  ;;  %v393_v12 = vmul.f32 %v1539_v56, %v343_v25  ;;  %v2000_v3 = vsub.f32 %v1268_v29, %v1452_v58  ;;  %v2001_v15 = vsub.f32 %v1278_v40, %v1452_v58 }
  0x94   :  { %v344_v7 = vmul.f32 %v1534_v55, %v1998_v31  ;;  %v345_v19 = vmul.f32 %v1534_v55, %v1999_v8  ;;  %940 = vmatmul.mubr.msk.bf16.vlgmr.msra.gmra.mrb[0].mxu0 %vm61_vm0, %v525_v23  ;;  %963 = vmatprep.mubr.msk.bf16.mxu1 %vm61_vm0, %v536_v39  ;;  %v2002_v61 = vsub.f32 %v1288_v49, %v1452_v58 }
  0x95   :  { %v366_v4 = vmul.f32 %v1534_v55, %v2000_v3  ;;  %v367_v54 = vmul.f32 %v1534_v55, %v2001_v15  ;;  %964 = vmatmul.mubr.msk.bf16.vlgmr.msra.gmra.mrb[0].mxu1 %vm61_vm0, %v537_v47  ;;  %v442_v2 = vadd.f32 %v1556_v62, %v392_v9  ;;  %v443_v40 = vadd.f32 %v1556_v62, %v393_v12 }
  0x96   :  { %v394_v18 = vmul.f32 %v1539_v56, %v344_v7  ;;  %v395_v5 = vmul.f32 %v1539_v56, %v345_v19  ;;  %v368_v29 = vmul.f32 %v1534_v55, %v2002_v61  ;;  %v2003_v60 = vsub.f32 %v1298_v57, %v1452_v58 }
  0x97   :  { %v416_v48 = vmul.f32 %v1539_v56, %v366_v4  ;;  %v417_v42 = vmul.f32 %v1539_v56, %v367_v54  ;;  %v485_v28 = vmax.f32 %v442_v2, 0.0  ;;  %v486_v44 = vmax.f32 %v443_v40, 0.0 }
  0x98   :  { %v444_v37 = vadd.f32 %v1556_v62, %v394_v18  ;;  %v445_v35 = vadd.f32 %v1556_v62, %v395_v5  ;;  %v369_v49 = vmul.f32 %v1534_v55, %v2003_v60  ;;  %v418_v50 = vmul.f32 %v1539_v56, %v368_v29 }
  0x99   :  { %v466_v14 = vadd.f32 %v1556_v62, %v416_v48  ;;  %v467_v20 = vadd.f32 %v1556_v62, %v417_v42  ;;  %v526_v47 = vpack.c.bf16 %v486_v44, %v485_v28  ;;  %v2004_v57 = vsub.f32 %v1079_v21, %v1452_v58 }
  0x9a   :  { %v487_v23 = vmax.f32 %v444_v37, 0.0  ;;  %v488_v26 = vmax.f32 %v445_v35, 0.0  ;;  %v419_v25 = vmul.f32 %v1539_v56, %v369_v49  ;;  %v468_v39 = vadd.f32 %v1556_v62, %v418_v50 }
  0x9b   :  { %v509_v31 = vmax.f32 %v466_v14, 0.0  ;;  %v510_v7 = vmax.f32 %v467_v20, 0.0  ;;  %v346_v8 = vmul.f32 %v1534_v55, %v2004_v57  ;;  %v2005_v3 = vsub.f32 %v1086_v24, %v1452_v58  ;;  %943 = vmatprep.mubr.msk.bf16.mxu0 %vm61_vm0, %v526_v47 }
  0x9c   :  { %v527_v19 = vpack.c.bf16 %v488_v26, %v487_v23  ;;  %v469_v9 = vadd.f32 %v1556_v62, %v419_v25  ;;  %v511_v12 = vmax.f32 %v468_v39, 0.0  ;;  %v2006_v18 = vsub.f32 %v1093_v27, %v1452_v58 }
  0x9d   :  { %v347_v4 = vmul.f32 %v1534_v55, %v2005_v3  ;;  %v538_v15 = vpack.c.bf16 %v510_v7, %v509_v31  ;;  %v396_v54 = vmul.f32 %v1539_v56, %v346_v8  ;;  %v2007_v5 = vsub.f32 %v1100_v30, %v1452_v58 }
  0x9e   :  { %v348_v21 = vmul.f32 %v1534_v55, %v2006_v18  ;;  %944 = vmatmul.mubr.msk.bf16.gmra.mrb[4].mxu0 %vm61_vm0, %v527_v19  ;;  %v512_v24 = vmax.f32 %v469_v9, 0.0  ;;  %v2008_v2 = vsub.f32 %v1308_v6, %v1452_v58  ;;  %v2009_v27 = vsub.f32 %v1318_v17, %v1452_v58 }
  0x9f   :  { %v349_v61 = vmul.f32 %v1534_v55, %v2007_v5  ;;  %v397_v29 = vmul.f32 %v1539_v56, %v347_v4  ;;  %967 = vmatprep.mubr.msk.bf16.mxu1 %vm61_vm0, %v538_v15  ;;  %v446_v30 = vadd.f32 %v1556_v62, %v396_v54  ;;  %v2010_v35 = vsub.f32 %v1328_v32, %v1452_v58 }
  0xa0   :  { %v370_v40 = vmul.f32 %v1534_v55, %v2008_v2  ;;  %v371_v48 = vmul.f32 %v1534_v55, %v2009_v27  ;;  %v398_v42 = vmul.f32 %v1539_v56, %v348_v21  ;;  %v539_v60 = vpack.c.bf16 %v512_v24, %v511_v12 }
  0xa1   :  { %v399_v37 = vmul.f32 %v1539_v56, %v349_v61  ;;  %v372_v6 = vmul.f32 %v1534_v55, %v2010_v35  ;;  %v447_v49 = vadd.f32 %v1556_v62, %v397_v29  ;;  %v489_v28 = vmax.f32 %v446_v30, 0.0 }
  0xa2   :  { %v420_v17 = vmul.f32 %v1539_v56, %v370_v40  ;;  %v421_v50 = vmul.f32 %v1539_v56, %v371_v48  ;;  %v448_v44 = vadd.f32 %v1556_v62, %v398_v42  ;;  %v2011_v20 = vsub.f32 %v1338_v43, %v1452_v58  ;;  %968 = vmatmul.mubr.msk.bf16.gmra.mrb[4].mxu1 %vm61_vm0, %v539_v60 }
  0xa3   :  { %v449_v14 = vadd.f32 %v1556_v62, %v399_v37  ;;  %v490_v32 = vmax.f32 %v447_v49, 0.0  ;;  %v422_v39 = vmul.f32 %v1539_v56, %v372_v6  ;;  %v2012_v57 = vsub.f32 %v1107_v33, %v1452_v58 }
  0xa4   :  { %v373_v23 = vmul.f32 %v1534_v55, %v2011_v20  ;;  %v470_v26 = vadd.f32 %v1556_v62, %v420_v17  ;;  %v471_v25 = vadd.f32 %v1556_v62, %v421_v50  ;;  %v491_v47 = vmax.f32 %v448_v44, 0.0 }
  0xa5   :  { %v492_v31 = vmax.f32 %v449_v14, 0.0  ;;  %v350_v43 = vmul.f32 %v1534_v55, %v2012_v57  ;;  %v528_v8 = vpack.c.bf16 %v490_v32, %v489_v28  ;;  %v472_v12 = vadd.f32 %v1556_v62, %v422_v39 }
  0xa6   :  { %v423_v7 = vmul.f32 %v1539_v56, %v373_v23  ;;  %v513_v19 = vmax.f32 %v470_v26, 0.0  ;;  %v514_v9 = vmax.f32 %v471_v25, 0.0  ;;  %v2013_v15 = vsub.f32 %v1114_v36, %v1452_v58 }
  0xa7   :  { %v529_v3 = vpack.c.bf16 %v492_v31, %v491_v47  ;;  %v400_v18 = vmul.f32 %v1539_v56, %v350_v43  ;;  %947 = vmatprep.mubr.msk.bf16.mxu0 %vm61_vm0, %v528_v8  ;;  %v515_v21 = vmax.f32 %v472_v12, 0.0  ;;  %v2014_v5 = vsub.f32 %v1125_v41, %v1452_v58 }
  0xa8   :  { %v473_v4 = vadd.f32 %v1556_v62, %v423_v7  ;;  %v351_v54 = vmul.f32 %v1534_v55, %v2013_v15  ;;  %v540_v33 = vpack.c.bf16 %v514_v9, %v513_v19  ;;  %v2015_v24 = vsub.f32 %v1136_v46, %v1452_v58 }
  0xa9   :  { %v352_v61 = vmul.f32 %v1534_v55, %v2014_v5  ;;  %948 = vmatmul.mubr.msk.bf16.gmra.mrb[8].mxu0 %vm61_vm0, %v529_v3  ;;  %v450_v40 = vadd.f32 %v1556_v62, %v400_v18  ;;  %v2016_v27 = vsub.f32 %v1348_v53, %v1452_v58  ;;  %v2017_v30 = vsub.f32 %v1358_v63, %v1452_v58 }
  0xaa   :  { %v353_v29 = vmul.f32 %v1534_v55, %v2015_v24  ;;  %v516_v36 = vmax.f32 %v473_v4, 0.0  ;;  %v401_v2 = vmul.f32 %v1539_v56, %v351_v54  ;;  %971 = vmatprep.mubr.msk.bf16.mxu1 %vm61_vm0, %v540_v33  ;;  %v2018_v37 = vsub.f32 %v1368_v16, %v1452_v58 }
  0xab   :  { %v374_v48 = vmul.f32 %v1534_v55, %v2016_v27  ;;  %v402_v41 = vmul.f32 %v1539_v56, %v352_v61  ;;  %v375_v42 = vmul.f32 %v1534_v55, %v2017_v30  ;;  %v493_v60 = vmax.f32 %v450_v40, 0.0 }
  0xac   :  { %v403_v46 = vmul.f32 %v1539_v56, %v353_v29  ;;  %v376_v35 = vmul.f32 %v1534_v55, %v2018_v37  ;;  %v541_v6 = vpack.c.bf16 %v516_v36, %v515_v21  ;;  %v451_v53 = vadd.f32 %v1556_v62, %v401_v2 }
  0xad   :  { %v424_v49 = vmul.f32 %v1539_v56, %v374_v48  ;;  %v452_v17 = vadd.f32 %v1556_v62, %v402_v41  ;;  %v425_v28 = vmul.f32 %v1539_v56, %v375_v42  ;;  %v2019_v63 = vsub.f32 %v1378_v34, %v1452_v58 }
  0xae   :  { %v453_v50 = vadd.f32 %v1556_v62, %v403_v46  ;;  %972 = vmatmul.mubr.msk.bf16.gmra.mrb[8].mxu1 %vm61_vm0, %v541_v6  ;;  %v494_v16 = vmax.f32 %v451_v53, 0.0  ;;  %v426_v20 = vmul.f32 %v1539_v56, %v376_v35  ;;  %v2020_v23 = vsub.f32 %v1147_v52, %v1452_v58 }
  0xaf   :  { %v377_v44 = vmul.f32 %v1534_v55, %v2019_v63  ;;  %v474_v14 = vadd.f32 %v1556_v62, %v424_v49  ;;  %v495_v26 = vmax.f32 %v452_v17, 0.0  ;;  %v475_v39 = vadd.f32 %v1556_v62, %v425_v28 }
  0xb0   :  { %v354_v32 = vmul.f32 %v1534_v55, %v2020_v23  ;;  %v496_v25 = vmax.f32 %v453_v50, 0.0  ;;  %v530_v47 = vpack.c.bf16 %v494_v16, %v493_v60  ;;  %v476_v7 = vadd.f32 %v1556_v62, %v426_v20 }
  0xb1   :  { %v427_v34 = vmul.f32 %v1539_v56, %v377_v44  ;;  %v517_v31 = vmax.f32 %v474_v14, 0.0  ;;  %v2021_v57 = vsub.f32 %v1158_v59, %v1452_v58  ;;  %v518_v19 = vmax.f32 %v475_v39, 0.0 }
  0xb2   :  { %v531_v8 = vpack.c.bf16 %v496_v25, %v495_v26  ;;  %v404_v9 = vmul.f32 %v1539_v56, %v354_v32  ;;  %951 = vmatprep.mubr.msk.bf16.mxu0 %vm61_vm0, %v530_v47  ;;  %v519_v12 = vmax.f32 %v476_v7, 0.0  ;;  %v2022_v4 = vsub.f32 %v1168_v1, %v1452_v58 }
  0xb3   :  { %v355_v43 = vmul.f32 %v1534_v55, %v2021_v57  ;;  %v477_v52 = vadd.f32 %v1556_v62, %v427_v34  ;;  %v2023_v59 = vsub.f32 %v1178_v13, %v1452_v58  ;;  %v542_v18 = vpack.c.bf16 %v518_v19, %v517_v31 }
  0xb4   :  { %v356_v15 = vmul.f32 %v1534_v55, %v2022_v4  ;;  %952 = vmatmul.mubr.msk.bf16.gmra.mrb[12].mxu0 %vm61_vm0, %v531_v8  ;;  %v454_v21 = vadd.f32 %v1556_v62, %v404_v9  ;;  %v2024_v5 = vsub.f32 %v1388_v45, %v1452_v58  ;;  %v2025_v13 = vsub.f32 %v1403_v10, %v1452_v58 }
  0xb5   :  { %v405_v3 = vmul.f32 %v1539_v56, %v355_v43  ;;  %v357_v54 = vmul.f32 %v1534_v55, %v2023_v59  ;;  %v520_v33 = vmax.f32 %v477_v52, 0.0  ;;  %975 = vmatprep.mubr.msk.bf16.mxu1 %vm61_vm0, %v542_v18  ;;  %v2026_v45 = vsub.f32 %v1416_v38, %v1452_v58 }
  0xb6   :  { %v378_v61 = vmul.f32 %v1534_v55, %v2024_v5  ;;  %v406_v24 = vmul.f32 %v1539_v56, %v356_v15  ;;  %v379_v36 = vmul.f32 %v1534_v55, %v2025_v13  ;;  %v497_v40 = vmax.f32 %v454_v21, 0.0 }
  0xb7   :  { %v455_v1 = vadd.f32 %v1556_v62, %v405_v3  ;;  %v407_v29 = vmul.f32 %v1539_v56, %v357_v54  ;;  %v543_v2 = vpack.c.bf16 %v520_v33, %v519_v12  ;;  %v380_v48 = vmul.f32 %v1534_v55, %v2026_v45 }
  0xb8   :  { %v428_v27 = vmul.f32 %v1539_v56, %v378_v61  ;;  %v456_v46 = vadd.f32 %v1556_v62, %v406_v24  ;;  %v429_v10 = vmul.f32 %v1539_v56, %v379_v36  ;;  %v2027_v35 = vsub.f32 %v1188_v22, %v1452_v58 }
  0xb9   :  { %v498_v41 = vmax.f32 %v455_v1, 0.0  ;;  %v457_v30 = vadd.f32 %v1556_v62, %v407_v29  ;;  %976 = vmatmul.mubr.msk.bf16.gmra.mrb[12].mxu1 %vm61_vm0, %v543_v2  ;;  %v430_v37 = vmul.f32 %v1539_v56, %v380_v48  ;;  %v2028_v6 = vsub.f32 %v1995_v51, %v1452_v58 }
  0xba   :  { %v478_v42 = vadd.f32 %v1556_v62, %v428_v27  ;;  %v358_v38 = vmul.f32 %v1534_v55, %v2027_v35  ;;  %v499_v49 = vmax.f32 %v456_v46, 0.0  ;;  %v479_v50 = vadd.f32 %v1556_v62, %v429_v10 }
  0xbb   :  { %v359_v53 = vmul.f32 %v1534_v55, %v2028_v6  ;;  %v532_v60 = vpack.c.bf16 %v498_v41, %v497_v40  ;;  %v500_v17 = vmax.f32 %v457_v30, 0.0  ;;  %v480_v63 = vadd.f32 %v1556_v62, %v430_v37 }
  0xbc   :  { %v521_v28 = vmax.f32 %v478_v42, 0.0  ;;  %v408_v44 = vmul.f32 %v1539_v56, %v358_v38  ;;  %v522_v14 = vmax.f32 %v479_v50, 0.0  ;;  %v2029_v51 = vsub.f32 %v1996_v0, %v1452_v58 }
  0xbd   :  { %v409_v16 = vmul.f32 %v1539_v56, %v359_v53  ;;  %955 = vmatprep.mubr.msk.bf16.mxu0 %vm61_vm0, %v532_v60  ;;  %v533_v22 = vpack.c.bf16 %v500_v17, %v499_v49  ;;  %v2030_v23 = vsub.f32 %v1997_v11, %v1452_v58  ;;  %v523_v26 = vmax.f32 %v480_v63, 0.0 }
  0xbe   :  { %v360_v20 = vmul.f32 %v1534_v55, %v2029_v51  ;;  %v458_v25 = vadd.f32 %v1556_v62, %v408_v44  ;;  %v544_v34 = vpack.c.bf16 %v522_v14, %v521_v28 }
  0xbf   :  { %v361_v32 = vmul.f32 %v1534_v55, %v2030_v23  ;;  %v459_v39 = vadd.f32 %v1556_v62, %v409_v16  ;;  %956 = vmatmul.mubr.msk.bf16.gmra.mrb[16].mxu0 %vm61_vm0, %v533_v22  ;;  %v545_v0 = vpack.c.bf16 %v523_v26, %v523_v26 }
  0xc0   :  { %v410_v47 = vmul.f32 %v1539_v56, %v360_v20  ;;  %v501_v7 = vmax.f32 %v458_v25, 0.0  ;;  %979 = vmatprep.mubr.msk.bf16.mxu1 %vm61_vm0, %v544_v34 }
  0xc1   :  { %v411_v31 = vmul.f32 %v1539_v56, %v361_v32  ;;  %v502_v57 = vmax.f32 %v459_v39, 0.0  ;;  %980 = vmatmul.mubr.msk.bf16.gmra.mrb[16].mxu1 %vm61_vm0, %v545_v0 }
  0xc2   :  { %v460_v58 = vadd.f32 %v1556_v62, %v410_v47 }
  0xc3   :  { %v461_v55 = vadd.f32 %v1556_v62, %v411_v31  ;;  %v534_v11 = vpack.c.bf16 %v502_v57, %v501_v7 }
  0xc4   :  { %v503_v43 = vmax.f32 %v460_v58, 0.0 }
  0xc5   :  { %v504_v8 = vmax.f32 %v461_v55, 0.0  ;;  %959 = vmatprep.mubr.msk.bf16.mxu0 %vm61_vm0, %v534_v11 }
  0xc7   :  { %v535_v19 = vpack.c.bf16 %v504_v8, %v503_v43 }
  0xc9   :  { %960 = vmatmul.mubr.msk.bf16.gmra.mrb[20].mxu0 %vm61_vm0, %v535_v19 }
 0x167   :  { %v941_v56 = vpop.f32.mrb[0].mxu0 }
 0x168   :  { %839 = vst.msk [vmem:[%s1985_s4 + $0x10] sm:$0xff] %vm836_vm2, %v941_v56  ;;  %v662_v52 = vpop.f32.mrb[1].mxu0  ;;  %v965_v9 = vpop.f32.mrb[0].mxu1 }
 0x169   :  { %837 = vst.msk [vmem:[%s1985_s4] sm:$0xff] %vm836_vm2, %v662_v52  ;;  %v942_v62 = vpop.f32.mrb[2].mxu0  ;;  %863 = vst.msk [vmem:[%s1985_s4 + $0xd0] sm:$0xff] %vm836_vm2, %v965_v9  ;;  %v758_v12 = vpop.f32.mrb[1].mxu1 }
 0x16a   :  { %840 = vst.msk [vmem:[%s1985_s4 + $0x18] sm:$0xff] %vm836_vm2, %v942_v62  ;;  %v665_v3 = vpop.f32.mrb[3].mxu0  ;;  %861 = vst.msk [vmem:[%s1985_s4 + $0xc0] sm:$0xff] %vm836_vm2, %v758_v12  ;;  %v966_v4 = vpop.f32.mrb[2].mxu1 }
 0x16b   :  { %838 = vst.msk [vmem:[%s1985_s4 + $0x8] sm:$0xff] %vm836_vm2, %v665_v3  ;;  %864 = vst.msk [vmem:[%s1985_s4 + $0xd8] sm:$0xff] %vm836_vm2, %v966_v4  ;;  %v761_v15 = vpop.f32.mrb[3].mxu1 }
 0x16c   :  { %862 = vst.msk [vmem:[%s1985_s4 + $0xc8] sm:$0xff] %vm836_vm2, %v761_v15 }
 0x171   :  { %v945_v59 = vpop.f32.mrb[4].mxu0 }
 0x172   :  { %843 = vst.msk [vmem:[%s1985_s4 + $0x30] sm:$0xff] %vm836_vm2, %v945_v59  ;;  %v678_v54 = vpop.f32.mrb[5].mxu0 }
 0x173   :  { %841 = vst.msk [vmem:[%s1985_s4 + $0x20] sm:$0xff] %vm836_vm2, %v678_v54  ;;  %v946_v18 = vpop.f32.mrb[6].mxu0 }
 0x174   :  { %844 = vst.msk [vmem:[%s1985_s4 + $0x38] sm:$0xff] %vm836_vm2, %v946_v18  ;;  %v681_v33 = vpop.f32.mrb[7].mxu0 }
 0x175   :  { %842 = vst.msk [vmem:[%s1985_s4 + $0x28] sm:$0xff] %vm836_vm2, %v681_v33  ;;  %v969_v21 = vpop.f32.mrb[4].mxu1 }
 0x176   :  { %867 = vst.msk [vmem:[%s1985_s4 + $0xf0] sm:$0xff] %vm836_vm2, %v969_v21  ;;  %v774_v5 = vpop.f32.mrb[5].mxu1 }
 0x177   :  { %865 = vst.msk [vmem:[%s1985_s4 + $0xe0] sm:$0xff] %vm836_vm2, %v774_v5  ;;  %v970_v61 = vpop.f32.mrb[6].mxu1 }
 0x178   :  { %868 = vst.msk [vmem:[%s1985_s4 + $0xf8] sm:$0xff] %vm836_vm2, %v970_v61  ;;  %v777_v1 = vpop.f32.mrb[7].mxu1 }
 0x179   :  { %866 = vst.msk [vmem:[%s1985_s4 + $0xe8] sm:$0xff] %vm836_vm2, %v777_v1 }
 0x17c   :  { %v949_v24 = vpop.f32.mrb[8].mxu0 }
 0x17d   :  { %847 = vst.msk [vmem:[%s1985_s4 + $0x50] sm:$0xff] %vm836_vm2, %v949_v24  ;;  %v694_v29 = vpop.f32.mrb[9].mxu0 }
 0x17e   :  { %845 = vst.msk [vmem:[%s1985_s4 + $0x40] sm:$0xff] %vm836_vm2, %v694_v29  ;;  %v950_v13 = vpop.f32.mrb[10].mxu0 }
 0x17f   :  { %848 = vst.msk [vmem:[%s1985_s4 + $0x58] sm:$0xff] %vm836_vm2, %v950_v13  ;;  %v697_v36 = vpop.f32.mrb[11].mxu0 }
 0x180   :  { %846 = vst.msk [vmem:[%s1985_s4 + $0x48] sm:$0xff] %vm836_vm2, %v697_v36 }
 0x181   :  { %v973_v2 = vpop.f32.mrb[8].mxu1 }
 0x182   :  { %871 = vst.msk [vmem:[%s1985_s4 + $0x110] sm:$0xff] %vm836_vm2, %v973_v2  ;;  %v790_v40 = vpop.f32.mrb[9].mxu1 }
 0x183   :  { %869 = vst.msk [vmem:[%s1985_s4 + $0x100] sm:$0xff] %vm836_vm2, %v790_v40  ;;  %v974_v27 = vpop.f32.mrb[10].mxu1 }
 0x184   :  { %872 = vst.msk [vmem:[%s1985_s4 + $0x118] sm:$0xff] %vm836_vm2, %v974_v27  ;;  %v793_v45 = vpop.f32.mrb[11].mxu1 }
 0x185   :  { %870 = vst.msk [vmem:[%s1985_s4 + $0x108] sm:$0xff] %vm836_vm2, %v793_v45 }
 0x187   :  { %v953_v48 = vpop.f32.mrb[12].mxu0 }
 0x188   :  { %851 = vst.msk [vmem:[%s1985_s4 + $0x70] sm:$0xff] %vm836_vm2, %v953_v48  ;;  %v710_v41 = vpop.f32.mrb[13].mxu0 }
 0x189   :  { %849 = vst.msk [vmem:[%s1985_s4 + $0x60] sm:$0xff] %vm836_vm2, %v710_v41  ;;  %v954_v46 = vpop.f32.mrb[14].mxu0 }
 0x18a   :  { %852 = vst.msk [vmem:[%s1985_s4 + $0x78] sm:$0xff] %vm836_vm2, %v954_v46  ;;  %v713_v30 = vpop.f32.mrb[15].mxu0 }
 0x18b   :  { %850 = vst.msk [vmem:[%s1985_s4 + $0x68] sm:$0xff] %vm836_vm2, %v713_v30 }
 0x18c   :  { %v977_v10 = vpop.f32.mrb[12].mxu1 }
 0x18d   :  { %875 = vst.msk [vmem:[%s1985_s4 + $0x130] sm:$0xff] %vm836_vm2, %v977_v10  ;;  %v806_v42 = vpop.f32.mrb[13].mxu1 }
 0x18e   :  { %873 = vst.msk [vmem:[%s1985_s4 + $0x120] sm:$0xff] %vm836_vm2, %v806_v42  ;;  %v978_v37 = vpop.f32.mrb[14].mxu1 }
 0x18f   :  { %876 = vst.msk [vmem:[%s1985_s4 + $0x138] sm:$0xff] %vm836_vm2, %v978_v37  ;;  %v809_v35 = vpop.f32.mrb[15].mxu1 }
 0x190   :  { %874 = vst.msk [vmem:[%s1985_s4 + $0x128] sm:$0xff] %vm836_vm2, %v809_v35 }
 0x192   :  { %v957_v38 = vpop.f32.mrb[16].mxu0 }
 0x193   :  { %855 = vst.msk [vmem:[%s1985_s4 + $0x90] sm:$0xff] %vm836_vm2, %v957_v38  ;;  %v726_v6 = vpop.f32.mrb[17].mxu0 }
 0x194   :  { %853 = vst.msk [vmem:[%s1985_s4 + $0x80] sm:$0xff] %vm836_vm2, %v726_v6  ;;  %v958_v53 = vpop.f32.mrb[18].mxu0  ;;  %v981_v49 = vpop.f32.mrb[16].mxu1 }
 0x195   :  { %856 = vst.msk [vmem:[%s1985_s4 + $0x98] sm:$0xff] %vm836_vm2, %v958_v53  ;;  %v729_v60 = vpop.f32.mrb[19].mxu0  ;;  %v822_v17 = vpop.f32.mrb[17].mxu1 }
 0x196   :  { %854 = vst.msk [vmem:[%s1985_s4 + $0x88] sm:$0xff] %vm836_vm2, %v729_v60  ;;  %877 = vst.msk [vmem:[%s1985_s4 + $0x140] sm:$0xff] %vm836_vm2, %v822_v17  ;;  %v982_v50 = vpop.f32.mrb[18].mxu1 }
 0x197   :  { %880 = vst.msk [vmem:[%s1985_s4 + $0x150] sm:$0x3] %vm879_vm3, %v981_v49  ;;  %v825_v28 = vpop.f32.mrb[19].mxu1 }
 0x198   :  { %878 = vst.msk [vmem:[%s1985_s4 + $0x148] sm:$0xff] %vm836_vm2, %v825_v28 }
 0x19c   :  { %v961_v63 = vpop.f32.mrb[20].mxu0 }
 0x19d   :  { %859 = vst.msk [vmem:[%s1985_s4 + $0xb0] sm:$0xff] %vm836_vm2, %v961_v63  ;;  %v742_v44 = vpop.f32.mrb[21].mxu0 }
 0x19e   :  { %857 = vst.msk [vmem:[%s1985_s4 + $0xa0] sm:$0xff] %vm836_vm2, %v742_v44  ;;  %v962_v16 = vpop.f32.mrb[22].mxu0 }
 0x19f   :  { %860 = vst.msk [vmem:[%s1985_s4 + $0xb8] sm:$0xff] %vm836_vm2, %v962_v16  ;;  %v745_v22 = vpop.f32.mrb[23].mxu0 }
 0x1a0   :  { %858 = vst.msk [vmem:[%s1985_s4 + $0xa8] sm:$0xff] %vm836_vm2, %v745_v22 }

// kernel: generator_forward.12
= control target key start
LH: loop header
LB: loop body
LE: loop exit
PB: predicated region body
PF: predicated region fallthrough
CT: control target
= control target key end

     0   :  { %vm187_vm0 = vcmask 130048   ;;  %v3839_v0 = vmov 0.0   ;;  %vm3840_vm1 = vmmov 0   ;;  %vm2969_vm2 = vcmask 72704   ;;  %s7681_s3 = inlined_call_operand.vmem [shape: bf16[16,9], index: 3, kind: input, shape index: {}]   ;;  %s7682_s0 = inlined_call_operand.vmem [shape: f32[1352,16], index: 0, kind: input, shape index: {}]   ;;  %s7683_s1 = inlined_call_operand.vmem [shape: f32[1,16], index: 1, kind: input, shape index: {}]   ;;  %s7684_s2 = inlined_call_operand.vmem [shape: f32[1,16], index: 2, kind: input, shape index: {}]   ;;  %s7685_s4 = inlined_call_operand.vmem [shape: f32[1352,9], index: 4, kind: output, shape index: {}]  }
   0x1   :  { %3317 = vmatprep.subr.bf16.mxu0 %v3839_v0  ;;  %v3663_v1 = vld [vmem:[%s7681_s3] sm:$0xff]   ;;  %3319 = vmatprep.mubr.msk.bf16.mxu0 %vm3840_vm1, %v3839_v0  ;;  %v3880_v3 = vld [vmem:[%s7682_s0 + $0x8] sm:$0xff]  ;;  %v3885_v4 = vld [vmem:[%s7682_s0 + $0x10] sm:$0xff] }
   0x2   :  { %v3875_v2 = vld [vmem:[%s7682_s0] sm:$0xff]  ;;  %3659 = vmatprep.subr.bf16.mxu1 %v3839_v0  ;;  %3491 = vmatprep.mubr.msk.bf16.mxu1 %vm3840_vm1, %v3839_v0  ;;  %v3893_v5 = vld [vmem:[%s7682_s0 + $0x18] sm:$0xff]  ;;  %v189_v7 = vsel %vm187_vm0, %v3880_v3, 0.0  ;;  %v191_v8 = vsel %vm187_vm0, %v3885_v4, 0.0  ;;  %v3911_v12 = vld [vmem:[%s7682_s0 + $0x28] sm:$0xff] }
   0x3   :  { %3318 = vmatpush3.bf16.msra.mxu0 %v3663_v1  ;;  %v188_v6 = vsel %vm187_vm0, %v3875_v2, 0.0  ;;  %3660 = vmatpush3.bf16.msra.mxu1 %v3663_v1  ;;  %v3904_v9 = vld [vmem:[%s7682_s0 + $0x20] sm:$0xff]  ;;  %v193_v11 = vsel %vm187_vm0, %v3893_v5, 0.0  ;;  %v3918_v15 = vld [vmem:[%s7682_s0 + $0x30] sm:$0xff]  ;;  %v197_v17 = vsel %vm187_vm0, %v3911_v12, 0.0  ;;  %v3925_v18 = vld [vmem:[%s7682_s0 + $0x38] sm:$0xff] }
   0x4   :  { %v190_v10 = vadd.f32 %v189_v7, %v188_v6  ;;  %v195_v14 = vsel %vm187_vm0, %v3904_v9, 0.0  ;;  %v199_v20 = vsel %vm187_vm0, %v3918_v15, 0.0  ;;  %v3932_v21 = vld [vmem:[%s7682_s0 + $0x40] sm:$0xff]  ;;  %v201_v23 = vsel %vm187_vm0, %v3925_v18, 0.0  ;;  %v3939_v24 = vld [vmem:[%s7682_s0 + $0x48] sm:$0xff]  ;;  %v3946_v27 = vld [vmem:[%s7682_s0 + $0x50] sm:$0xff] }
   0x5   :  { %v203_v26 = vsel %vm187_vm0, %v3932_v21, 0.0  ;;  %v205_v29 = vsel %vm187_vm0, %v3939_v24, 0.0  ;;  %v3953_v30 = vld [vmem:[%s7682_s0 + $0x58] sm:$0xff]  ;;  %v207_v32 = vsel %vm187_vm0, %v3946_v27, 0.0  ;;  %v3960_v33 = vld [vmem:[%s7682_s0 + $0x60] sm:$0xff]  ;;  %v3967_v36 = vld [vmem:[%s7682_s0 + $0x68] sm:$0xff] }
   0x6   :  { %v192_v13 = vadd.f32 %v191_v8, %v190_v10  ;;  %v209_v35 = vsel %vm187_vm0, %v3953_v30, 0.0  ;;  %v211_v38 = vsel %vm187_vm0, %v3960_v33, 0.0  ;;  %v3974_v39 = vld [vmem:[%s7682_s0 + $0x70] sm:$0xff]  ;;  %v213_v41 = vsel %vm187_vm0, %v3967_v36, 0.0  ;;  %v3981_v42 = vld [vmem:[%s7682_s0 + $0x78] sm:$0xff]  ;;  %v3988_v45 = vld [vmem:[%s7682_s0 + $0x80] sm:$0xff] }
   0x7   :  { %v215_v44 = vsel %vm187_vm0, %v3974_v39, 0.0  ;;  %v217_v47 = vsel %vm187_vm0, %v3981_v42, 0.0  ;;  %v3995_v48 = vld [vmem:[%s7682_s0 + $0x88] sm:$0xff]  ;;  %v219_v50 = vsel %vm187_vm0, %v3988_v45, 0.0  ;;  %v4002_v51 = vld [vmem:[%s7682_s0 + $0x90] sm:$0xff]  ;;  %v4009_v54 = vld [vmem:[%s7682_s0 + $0x98] sm:$0xff] }
   0x8   :  { %v194_v16 = vadd.f32 %v193_v11, %v192_v13  ;;  %v221_v53 = vsel %vm187_vm0, %v3995_v48, 0.0  ;;  %v223_v56 = vsel %vm187_vm0, %v4002_v51, 0.0  ;;  %v4016_v57 = vld [vmem:[%s7682_s0 + $0xa0] sm:$0xff]  ;;  %v225_v59 = vsel %vm187_vm0, %v4009_v54, 0.0  ;;  %v4023_v60 = vld [vmem:[%s7682_s0 + $0xa8] sm:$0xff]  ;;  %v4030_v63 = vld [vmem:[%s7682_s0 + $0xb0] sm:$0xff] }
   0x9   :  { %v227_v62 = vsel %vm187_vm0, %v4016_v57, 0.0  ;;  %v229_v6 = vsel %vm187_vm0, %v4023_v60, 0.0  ;;  %v4037_v7 = vld [vmem:[%s7682_s0 + $0xb8] sm:$0xff]  ;;  %v231_v10 = vsel %vm187_vm0, %v4030_v63, 0.0  ;;  %v4044_v11 = vld [vmem:[%s7682_s0 + $0xc0] sm:$0xff] }
   0xa   :  { %v196_v19 = vadd.f32 %v195_v14, %v194_v16  ;;  %v233_v14 = vsel %vm187_vm0, %v4037_v7, 0.0  ;;  %v4051_v16 = vld [vmem:[%s7682_s0 + $0xc8] sm:$0xff] }
   0xc   :  { %v198_v22 = vadd.f32 %v197_v17, %v196_v19  ;;  %v235_v19 = vsel %vm187_vm0, %v4044_v11, 0.0 }
   0xe   :  { %v200_v25 = vadd.f32 %v199_v20, %v198_v22  ;;  %v4058_v20 = vld [vmem:[%s7682_s0 + $0xd0] sm:$0xff] }
  0x10   :  { %v202_v28 = vadd.f32 %v201_v23, %v200_v25  ;;  %v237_v23 = vsel %vm187_vm0, %v4051_v16, 0.0  ;;  %v4065_v25 = vld [vmem:[%s7682_s0 + $0xd8] sm:$0xff] }
  0x12   :  { %v204_v31 = vadd.f32 %v203_v26, %v202_v28  ;;  %v239_v28 = vsel %vm187_vm0, %v4058_v20, 0.0 }
  0x14   :  { %v206_v34 = vadd.f32 %v205_v29, %v204_v31  ;;  %v532_v29 = vmul.f32 %v3875_v2, %v3875_v2  ;;  %v533_v31 = vmul.f32 %v3880_v3, %v3880_v3  ;;  %v4087_v2 = vld [vmem:[%s7682_s0 + $0xe8] sm:$0xff] }
  0x16   :  { %v208_v37 = vadd.f32 %v207_v32, %v206_v34  ;;  %v534_v32 = vmul.f32 %v3885_v4, %v3885_v4  ;;  %v4078_v34 = vld [vmem:[%s7682_s0 + $0xe0] sm:$0xff]  ;;  %v536_v4 = vmul.f32 %v3904_v9, %v3904_v9  ;;  %v537_v9 = vmul.f32 %v3911_v12, %v3911_v12 }
  0x17   :  { %v4119_v12 = vld [vmem:[%s7682_s0 + $0x100] sm:$0xff] }
  0x18   :  { %v210_v40 = vadd.f32 %v209_v35, %v208_v37  ;;  %v241_v37 = vsel %vm187_vm0, %v4065_v25, 0.0 }
  0x1a   :  { %v212_v43 = vadd.f32 %v211_v38, %v210_v40  ;;  %v535_v38 = vmul.f32 %v3893_v5, %v3893_v5  ;;  %v243_v40 = vsel %vm187_vm0, %v4078_v34, 0.0  ;;  %v4099_v5 = vld [vmem:[%s7682_s0 + $0xf0] sm:$0xff] }
  0x1c   :  { %v214_v46 = vadd.f32 %v213_v41, %v212_v43  ;;  %v701_v41 = vsel %vm187_vm0, %v532_v29, 0.0  ;;  %v702_v43 = vsel %vm187_vm0, %v533_v31, 0.0 }
  0x1e   :  { %v216_v49 = vadd.f32 %v215_v44, %v214_v46  ;;  %v704_v44 = vsel %vm187_vm0, %v534_v32, 0.0 }
  0x20   :  { %v218_v52 = vadd.f32 %v217_v47, %v216_v49  ;;  %v703_v47 = vadd.f32 %v702_v43, %v701_v41  ;;  %v245_v49 = vsel %vm187_vm0, %v4087_v2, 0.0  ;;  %v543_v41 = vmul.f32 %v3953_v30, %v3953_v30  ;;  %v4179_v30 = vld [vmem:[%s7682_s0 + $0x130] sm:$0xff] }
  0x22   :  { %v220_v55 = vadd.f32 %v219_v50, %v218_v52  ;;  %v706_v50 = vsel %vm187_vm0, %v535_v38, 0.0  ;;  %v4109_v52 = vld [vmem:[%s7682_s0 + $0xf8] sm:$0xff] }
  0x24   :  { %v222_v58 = vadd.f32 %v221_v53, %v220_v55  ;;  %v705_v55 = vadd.f32 %v704_v44, %v703_v47 }
  0x26   :  { %v224_v61 = vadd.f32 %v223_v56, %v222_v58  ;;  %v247_v56 = vsel %vm187_vm0, %v4099_v5, 0.0  ;;  %v538_v58 = vmul.f32 %v3918_v15, %v3918_v15  ;;  %v4129_v15 = vld [vmem:[%s7682_s0 + $0x108] sm:$0xff] }
  0x28   :  { %v226_v1 = vadd.f32 %v225_v59, %v224_v61  ;;  %v708_v59 = vsel %vm187_vm0, %v536_v4, 0.0 }
  0x2a   :  { %v228_v8 = vadd.f32 %v227_v62, %v226_v1  ;;  %v707_v62 = vadd.f32 %v706_v50, %v705_v55  ;;  %v249_v1 = vsel %vm187_vm0, %v4109_v52, 0.0 }
  0x2c   :  { %v230_v13 = vadd.f32 %v229_v6, %v228_v8  ;;  %v539_v6 = vmul.f32 %v3925_v18, %v3925_v18  ;;  %v710_v8 = vsel %vm187_vm0, %v537_v9, 0.0  ;;  %v4139_v18 = vld [vmem:[%s7682_s0 + $0x110] sm:$0xff] }
  0x2e   :  { %v232_v17 = vadd.f32 %v231_v10, %v230_v13  ;;  %v709_v13 = vadd.f32 %v708_v59, %v707_v62  ;;  %v714_v29 = vsel %vm187_vm0, %v539_v6, 0.0  ;;  %v263_v62 = vsel %vm187_vm0, %v4179_v30, 0.0 }
  0x30   :  { %v234_v22 = vadd.f32 %v233_v14, %v232_v17  ;;  %v251_v14 = vsel %vm187_vm0, %v4119_v12, 0.0  ;;  %v540_v17 = vmul.f32 %v3932_v21, %v3932_v21  ;;  %v4149_v21 = vld [vmem:[%s7682_s0 + $0x118] sm:$0xff] }
  0x32   :  { %v236_v26 = vadd.f32 %v235_v19, %v234_v22  ;;  %v712_v19 = vsel %vm187_vm0, %v538_v58, 0.0  ;;  %v716_v38 = vsel %vm187_vm0, %v540_v17, 0.0  ;;  %v722_v58 = vsel %vm187_vm0, %v543_v41, 0.0 }
  0x34   :  { %v238_v35 = vadd.f32 %v237_v23, %v236_v26  ;;  %v711_v23 = vadd.f32 %v710_v8, %v709_v13  ;;  %v253_v26 = vsel %vm187_vm0, %v4129_v15, 0.0 }
  0x36   :  { %v240_v3 = vadd.f32 %v239_v28, %v238_v35  ;;  %v541_v28 = vmul.f32 %v3939_v24, %v3939_v24  ;;  %v713_v32 = vadd.f32 %v712_v19, %v711_v23  ;;  %v255_v35 = vsel %vm187_vm0, %v4139_v18, 0.0  ;;  %v4159_v24 = vld [vmem:[%s7682_s0 + $0x120] sm:$0xff] }
  0x37   :  { %v259_v47 = vsel %vm187_vm0, %v4159_v24, 0.0 }
  0x38   :  { %v242_v46 = vadd.f32 %v241_v37, %v240_v3  ;;  %v542_v37 = vmul.f32 %v3946_v27, %v3946_v27  ;;  %v715_v4 = vadd.f32 %v714_v29, %v713_v32  ;;  %v718_v43 = vsel %vm187_vm0, %v541_v28, 0.0  ;;  %v4169_v27 = vld [vmem:[%s7682_s0 + $0x128] sm:$0xff] }
  0x39   :  { %v261_v55 = vsel %vm187_vm0, %v4169_v27, 0.0 }
  0x3a   :  { %v244_v53 = vadd.f32 %v243_v40, %v242_v46  ;;  %v257_v40 = vsel %vm187_vm0, %v4149_v21, 0.0  ;;  %v717_v46 = vadd.f32 %v716_v38, %v715_v4  ;;  %v720_v9 = vsel %vm187_vm0, %v542_v37, 0.0 }
  0x3c   :  { %v246_v61 = vadd.f32 %v245_v49, %v244_v53  ;;  %v544_v49 = vmul.f32 %v3960_v33, %v3960_v33  ;;  %v719_v53 = vadd.f32 %v718_v43, %v717_v46  ;;  %v4189_v33 = vld [vmem:[%s7682_s0 + $0x138] sm:$0xff] }
  0x3d   :  { %v265_v13 = vsel %vm187_vm0, %v4189_v33, 0.0 }
  0x3e   :  { %v248_v10 = vadd.f32 %v247_v56, %v246_v61  ;;  %v545_v56 = vmul.f32 %v3967_v36, %v3967_v36  ;;  %v721_v61 = vadd.f32 %v720_v9, %v719_v53  ;;  %v724_v6 = vsel %vm187_vm0, %v544_v49, 0.0  ;;  %v4199_v36 = vld [vmem:[%s7682_s0 + $0x140] sm:$0xff] }
  0x3f   :  { %v267_v23 = vsel %vm187_vm0, %v4199_v36, 0.0 }
  0x40   :  { %v250_v22 = vadd.f32 %v249_v1, %v248_v10  ;;  %v546_v1 = vmul.f32 %v3974_v39, %v3974_v39  ;;  %v723_v10 = vadd.f32 %v722_v58, %v721_v61  ;;  %v726_v17 = vsel %vm187_vm0, %v545_v56, 0.0  ;;  %v4209_v39 = vld [vmem:[%s7682_s0 + $0x148] sm:$0xff] }
  0x41   :  { %v269_v32 = vsel %vm187_vm0, %v4209_v39, 0.0 }
  0x42   :  { %v252_v31 = vadd.f32 %v251_v14, %v250_v22  ;;  %v547_v14 = vmul.f32 %v3981_v42, %v3981_v42  ;;  %v725_v22 = vadd.f32 %v724_v6, %v723_v10  ;;  %v728_v28 = vsel %vm187_vm0, %v546_v1, 0.0  ;;  %v4219_v42 = vld [vmem:[%s7682_s0 + $0x150] sm:$0xff] }
  0x43   :  { %v271_v4 = vsel %vm187_vm0, %v4219_v42, 0.0 }
  0x44   :  { %v254_v3 = vadd.f32 %v253_v26, %v252_v31  ;;  %v548_v26 = vmul.f32 %v3988_v45, %v3988_v45  ;;  %v727_v31 = vadd.f32 %v726_v17, %v725_v22  ;;  %v730_v37 = vsel %vm187_vm0, %v547_v14, 0.0  ;;  %v4229_v45 = vld [vmem:[%s7682_s0 + $0x158] sm:$0xff] }
  0x45   :  { %v273_v46 = vsel %vm187_vm0, %v4229_v45, 0.0 }
  0x46   :  { %v256_v44 = vadd.f32 %v255_v35, %v254_v3  ;;  %v549_v35 = vmul.f32 %v3995_v48, %v3995_v48  ;;  %v729_v3 = vadd.f32 %v728_v28, %v727_v31  ;;  %v732_v41 = vsel %vm187_vm0, %v548_v26, 0.0  ;;  %v4239_v48 = vld [vmem:[%s7682_s0 + $0x160] sm:$0xff] }
  0x47   :  { %v275_v53 = vsel %vm187_vm0, %v4239_v48, 0.0 }
  0x48   :  { %v258_v50 = vadd.f32 %v257_v40, %v256_v44  ;;  %v550_v40 = vmul.f32 %v4002_v51, %v4002_v51  ;;  %v731_v44 = vadd.f32 %v730_v37, %v729_v3  ;;  %v734_v49 = vsel %vm187_vm0, %v549_v35, 0.0  ;;  %v4249_v51 = vld [vmem:[%s7682_s0 + $0x168] sm:$0xff] }
  0x49   :  { %v277_v61 = vsel %vm187_vm0, %v4249_v51, 0.0 }
  0x4a   :  { %v260_v59 = vadd.f32 %v259_v47, %v258_v50  ;;  %v551_v47 = vmul.f32 %v4009_v54, %v4009_v54  ;;  %v733_v50 = vadd.f32 %v732_v41, %v731_v44  ;;  %v736_v56 = vsel %vm187_vm0, %v550_v40, 0.0  ;;  %v4259_v54 = vld [vmem:[%s7682_s0 + $0x170] sm:$0xff] }
  0x4b   :  { %v279_v10 = vsel %vm187_vm0, %v4259_v54, 0.0 }
  0x4c   :  { %v262_v8 = vadd.f32 %v261_v55, %v260_v59  ;;  %v552_v55 = vmul.f32 %v4016_v57, %v4016_v57  ;;  %v735_v59 = vadd.f32 %v734_v49, %v733_v50  ;;  %v738_v1 = vsel %vm187_vm0, %v551_v47, 0.0  ;;  %v4269_v57 = vld [vmem:[%s7682_s0 + $0x178] sm:$0xff] }
  0x4d   :  { %v281_v22 = vsel %vm187_vm0, %v4269_v57, 0.0 }
  0x4e   :  { %v264_v19 = vadd.f32 %v263_v62, %v262_v8  ;;  %v553_v62 = vmul.f32 %v4023_v60, %v4023_v60  ;;  %v737_v8 = vadd.f32 %v736_v56, %v735_v59  ;;  %v740_v14 = vsel %vm187_vm0, %v552_v55, 0.0  ;;  %v4279_v60 = vld [vmem:[%s7682_s0 + $0x180] sm:$0xff] }
  0x4f   :  { %v283_v31 = vsel %vm187_vm0, %v4279_v60, 0.0 }
  0x50   :  { %v266_v29 = vadd.f32 %v265_v13, %v264_v19  ;;  %v554_v13 = vmul.f32 %v4030_v63, %v4030_v63  ;;  %v739_v19 = vadd.f32 %v738_v1, %v737_v8  ;;  %v742_v26 = vsel %vm187_vm0, %v553_v62, 0.0  ;;  %v4289_v63 = vld [vmem:[%s7682_s0 + $0x188] sm:$0xff] }
  0x51   :  { %v285_v3 = vsel %vm187_vm0, %v4289_v63, 0.0 }
  0x52   :  { %v268_v38 = vadd.f32 %v267_v23, %v266_v29  ;;  %v555_v23 = vmul.f32 %v4037_v7, %v4037_v7  ;;  %v741_v29 = vadd.f32 %v740_v14, %v739_v19  ;;  %v744_v35 = vsel %vm187_vm0, %v554_v13, 0.0  ;;  %v4299_v7 = vld [vmem:[%s7682_s0 + $0x190] sm:$0xff] }
  0x53   :  { %v287_v44 = vsel %vm187_vm0, %v4299_v7, 0.0 }
  0x54   :  { %v270_v43 = vadd.f32 %v269_v32, %v268_v38  ;;  %v556_v32 = vmul.f32 %v4044_v11, %v4044_v11  ;;  %v743_v38 = vadd.f32 %v742_v26, %v741_v29  ;;  %v746_v40 = vsel %vm187_vm0, %v555_v23, 0.0  ;;  %v4309_v11 = vld [vmem:[%s7682_s0 + $0x198] sm:$0xff] }
  0x55   :  { %v289_v50 = vsel %vm187_vm0, %v4309_v11, 0.0 }
  0x56   :  { %v272_v9 = vadd.f32 %v271_v4, %v270_v43  ;;  %v557_v4 = vmul.f32 %v4051_v16, %v4051_v16  ;;  %v745_v43 = vadd.f32 %v744_v35, %v743_v38  ;;  %v748_v47 = vsel %vm187_vm0, %v556_v32, 0.0  ;;  %v4319_v16 = vld [vmem:[%s7682_s0 + $0x1a0] sm:$0xff] }
  0x57   :  { %v291_v59 = vsel %vm187_vm0, %v4319_v16, 0.0 }
  0x58   :  { %v274_v58 = vadd.f32 %v273_v46, %v272_v9  ;;  %v558_v46 = vmul.f32 %v4058_v20, %v4058_v20  ;;  %v747_v9 = vadd.f32 %v746_v40, %v745_v43  ;;  %v750_v55 = vsel %vm187_vm0, %v557_v4, 0.0  ;;  %v4329_v20 = vld [vmem:[%s7682_s0 + $0x1a8] sm:$0xff] }
  0x59   :  { %v293_v8 = vsel %vm187_vm0, %v4329_v20, 0.0 }
  0x5a   :  { %v276_v6 = vadd.f32 %v275_v53, %v274_v58  ;;  %v559_v53 = vmul.f32 %v4065_v25, %v4065_v25  ;;  %v749_v58 = vadd.f32 %v748_v47, %v747_v9  ;;  %v752_v62 = vsel %vm187_vm0, %v558_v46, 0.0  ;;  %v4339_v25 = vld [vmem:[%s7682_s0 + $0x1b0] sm:$0xff] }
  0x5b   :  { %v295_v19 = vsel %vm187_vm0, %v4339_v25, 0.0 }
  0x5c   :  { %v278_v17 = vadd.f32 %v277_v61, %v276_v6  ;;  %v560_v61 = vmul.f32 %v4078_v34, %v4078_v34  ;;  %v751_v6 = vadd.f32 %v750_v55, %v749_v58  ;;  %v754_v13 = vsel %vm187_vm0, %v559_v53, 0.0  ;;  %v4349_v34 = vld [vmem:[%s7682_s0 + $0x1b8] sm:$0xff] }
  0x5d   :  { %v297_v29 = vsel %vm187_vm0, %v4349_v34, 0.0 }
  0x5e   :  { %v280_v28 = vadd.f32 %v279_v10, %v278_v17  ;;  %v561_v10 = vmul.f32 %v4087_v2, %v4087_v2  ;;  %v753_v17 = vadd.f32 %v752_v62, %v751_v6  ;;  %v756_v23 = vsel %vm187_vm0, %v560_v61, 0.0  ;;  %v4359_v2 = vld [vmem:[%s7682_s0 + $0x1c0] sm:$0xff] }
  0x5f   :  { %v299_v38 = vsel %vm187_vm0, %v4359_v2, 0.0 }
  0x60   :  { %v282_v37 = vadd.f32 %v281_v22, %v280_v28  ;;  %v562_v22 = vmul.f32 %v4099_v5, %v4099_v5  ;;  %v755_v28 = vadd.f32 %v754_v13, %v753_v17  ;;  %v758_v32 = vsel %vm187_vm0, %v561_v10, 0.0  ;;  %v4369_v5 = vld [vmem:[%s7682_s0 + $0x1c8] sm:$0xff] }
  0x61   :  { %v301_v43 = vsel %vm187_vm0, %v4369_v5, 0.0 }
  0x62   :  { %v284_v41 = vadd.f32 %v283_v31, %v282_v37  ;;  %v563_v31 = vmul.f32 %v4109_v52, %v4109_v52  ;;  %v757_v37 = vadd.f32 %v756_v23, %v755_v28  ;;  %v760_v4 = vsel %vm187_vm0, %v562_v22, 0.0  ;;  %v4379_v52 = vld [vmem:[%s7682_s0 + $0x1d0] sm:$0xff] }
  0x63   :  { %v303_v9 = vsel %vm187_vm0, %v4379_v52, 0.0 }
  0x64   :  { %v286_v49 = vadd.f32 %v285_v3, %v284_v41  ;;  %v564_v3 = vmul.f32 %v4119_v12, %v4119_v12  ;;  %v759_v41 = vadd.f32 %v758_v32, %v757_v37  ;;  %v762_v46 = vsel %vm187_vm0, %v563_v31, 0.0  ;;  %v4389_v12 = vld [vmem:[%s7682_s0 + $0x1d8] sm:$0xff] }
  0x65   :  { %v305_v58 = vsel %vm187_vm0, %v4389_v12, 0.0 }
  0x66   :  { %v288_v56 = vadd.f32 %v287_v44, %v286_v49  ;;  %v565_v44 = vmul.f32 %v4129_v15, %v4129_v15  ;;  %v761_v49 = vadd.f32 %v760_v4, %v759_v41  ;;  %v764_v53 = vsel %vm187_vm0, %v564_v3, 0.0  ;;  %v4399_v15 = vld [vmem:[%s7682_s0 + $0x1e0] sm:$0xff] }
  0x67   :  { %v307_v6 = vsel %vm187_vm0, %v4399_v15, 0.0 }
  0x68   :  { %v290_v1 = vadd.f32 %v289_v50, %v288_v56  ;;  %v566_v50 = vmul.f32 %v4139_v18, %v4139_v18  ;;  %v763_v56 = vadd.f32 %v762_v46, %v761_v49  ;;  %v766_v61 = vsel %vm187_vm0, %v565_v44, 0.0  ;;  %v4409_v18 = vld [vmem:[%s7682_s0 + $0x1e8] sm:$0xff] }
  0x69   :  { %v309_v17 = vsel %vm187_vm0, %v4409_v18, 0.0 }
  0x6a   :  { %v292_v14 = vadd.f32 %v291_v59, %v290_v1  ;;  %v567_v59 = vmul.f32 %v4149_v21, %v4149_v21  ;;  %v765_v1 = vadd.f32 %v764_v53, %v763_v56  ;;  %v768_v10 = vsel %vm187_vm0, %v566_v50, 0.0  ;;  %v4419_v21 = vld [vmem:[%s7682_s0 + $0x1f0] sm:$0xff] }
  0x6b   :  { %v311_v28 = vsel %vm187_vm0, %v4419_v21, 0.0 }
  0x6c   :  { %v294_v26 = vadd.f32 %v293_v8, %v292_v14  ;;  %v568_v8 = vmul.f32 %v4159_v24, %v4159_v24  ;;  %v767_v14 = vadd.f32 %v766_v61, %v765_v1  ;;  %v770_v22 = vsel %vm187_vm0, %v567_v59, 0.0  ;;  %v4429_v24 = vld [vmem:[%s7682_s0 + $0x1f8] sm:$0xff] }
  0x6d   :  { %v313_v37 = vsel %vm187_vm0, %v4429_v24, 0.0 }
  0x6e   :  { %v296_v35 = vadd.f32 %v295_v19, %v294_v26  ;;  %v569_v19 = vmul.f32 %v4169_v27, %v4169_v27  ;;  %v769_v26 = vadd.f32 %v768_v10, %v767_v14  ;;  %v772_v31 = vsel %vm187_vm0, %v568_v8, 0.0  ;;  %v4439_v27 = vld [vmem:[%s7682_s0 + $0x200] sm:$0xff] }
  0x6f   :  { %v315_v41 = vsel %vm187_vm0, %v4439_v27, 0.0 }
  0x70   :  { %v298_v40 = vadd.f32 %v297_v29, %v296_v35  ;;  %v570_v29 = vmul.f32 %v4179_v30, %v4179_v30  ;;  %v771_v35 = vadd.f32 %v770_v22, %v769_v26  ;;  %v774_v3 = vsel %vm187_vm0, %v569_v19, 0.0  ;;  %v4449_v30 = vld [vmem:[%s7682_s0 + $0x208] sm:$0xff] }
  0x71   :  { %v317_v49 = vsel %vm187_vm0, %v4449_v30, 0.0 }
  0x72   :  { %v300_v47 = vadd.f32 %v299_v38, %v298_v40  ;;  %v571_v38 = vmul.f32 %v4189_v33, %v4189_v33  ;;  %v773_v40 = vadd.f32 %v772_v31, %v771_v35  ;;  %v776_v44 = vsel %vm187_vm0, %v570_v29, 0.0  ;;  %v4459_v33 = vld [vmem:[%s7682_s0 + $0x210] sm:$0xff] }
  0x73   :  { %v319_v56 = vsel %vm187_vm0, %v4459_v33, 0.0 }
  0x74   :  { %v302_v55 = vadd.f32 %v301_v43, %v300_v47  ;;  %v572_v43 = vmul.f32 %v4199_v36, %v4199_v36  ;;  %v775_v47 = vadd.f32 %v774_v3, %v773_v40  ;;  %v778_v50 = vsel %vm187_vm0, %v571_v38, 0.0  ;;  %v4469_v36 = vld [vmem:[%s7682_s0 + $0x218] sm:$0xff] }
  0x75   :  { %v321_v1 = vsel %vm187_vm0, %v4469_v36, 0.0 }
  0x76   :  { %v304_v62 = vadd.f32 %v303_v9, %v302_v55  ;;  %v573_v9 = vmul.f32 %v4209_v39, %v4209_v39  ;;  %v777_v55 = vadd.f32 %v776_v44, %v775_v47  ;;  %v780_v59 = vsel %vm187_vm0, %v572_v43, 0.0  ;;  %v4479_v39 = vld [vmem:[%s7682_s0 + $0x220] sm:$0xff] }
  0x77   :  { %v323_v14 = vsel %vm187_vm0, %v4479_v39, 0.0 }
  0x78   :  { %v306_v13 = vadd.f32 %v305_v58, %v304_v62  ;;  %v574_v58 = vmul.f32 %v4219_v42, %v4219_v42  ;;  %v779_v62 = vadd.f32 %v778_v50, %v777_v55  ;;  %v782_v8 = vsel %vm187_vm0, %v573_v9, 0.0  ;;  %v4489_v42 = vld [vmem:[%s7682_s0 + $0x228] sm:$0xff] }
  0x79   :  { %v325_v26 = vsel %vm187_vm0, %v4489_v42, 0.0 }
  0x7a   :  { %v308_v23 = vadd.f32 %v307_v6, %v306_v13  ;;  %v575_v6 = vmul.f32 %v4229_v45, %v4229_v45  ;;  %v781_v13 = vadd.f32 %v780_v59, %v779_v62  ;;  %v784_v19 = vsel %vm187_vm0, %v574_v58, 0.0  ;;  %v4499_v45 = vld [vmem:[%s7682_s0 + $0x230] sm:$0xff] }
  0x7b   :  { %v327_v35 = vsel %vm187_vm0, %v4499_v45, 0.0 }
  0x7c   :  { %v310_v32 = vadd.f32 %v309_v17, %v308_v23  ;;  %v576_v17 = vmul.f32 %v4239_v48, %v4239_v48  ;;  %v783_v23 = vadd.f32 %v782_v8, %v781_v13  ;;  %v786_v29 = vsel %vm187_vm0, %v575_v6, 0.0  ;;  %v4509_v48 = vld [vmem:[%s7682_s0 + $0x238] sm:$0xff] }
  0x7d   :  { %v329_v40 = vsel %vm187_vm0, %v4509_v48, 0.0 }
  0x7e   :  { %v312_v4 = vadd.f32 %v311_v28, %v310_v32  ;;  %v577_v28 = vmul.f32 %v4249_v51, %v4249_v51  ;;  %v785_v32 = vadd.f32 %v784_v19, %v783_v23  ;;  %v788_v38 = vsel %vm187_vm0, %v576_v17, 0.0  ;;  %v4519_v51 = vld [vmem:[%s7682_s0 + $0x240] sm:$0xff] }
  0x7f   :  { %v331_v47 = vsel %vm187_vm0, %v4519_v51, 0.0 }
  0x80   :  { %v314_v46 = vadd.f32 %v313_v37, %v312_v4  ;;  %v578_v37 = vmul.f32 %v4259_v54, %v4259_v54  ;;  %v787_v4 = vadd.f32 %v786_v29, %v785_v32  ;;  %v790_v43 = vsel %vm187_vm0, %v577_v28, 0.0  ;;  %v4529_v54 = vld [vmem:[%s7682_s0 + $0x248] sm:$0xff] }
  0x81   :  { %v333_v55 = vsel %vm187_vm0, %v4529_v54, 0.0 }
  0x82   :  { %v316_v53 = vadd.f32 %v315_v41, %v314_v46  ;;  %v579_v41 = vmul.f32 %v4269_v57, %v4269_v57  ;;  %v789_v46 = vadd.f32 %v788_v38, %v787_v4  ;;  %v792_v9 = vsel %vm187_vm0, %v578_v37, 0.0  ;;  %v4539_v57 = vld [vmem:[%s7682_s0 + $0x250] sm:$0xff] }
  0x83   :  { %v335_v62 = vsel %vm187_vm0, %v4539_v57, 0.0 }
  0x84   :  { %v318_v61 = vadd.f32 %v317_v49, %v316_v53  ;;  %v580_v49 = vmul.f32 %v4279_v60, %v4279_v60  ;;  %v791_v53 = vadd.f32 %v790_v43, %v789_v46  ;;  %v794_v58 = vsel %vm187_vm0, %v579_v41, 0.0  ;;  %v4549_v60 = vld [vmem:[%s7682_s0 + $0x258] sm:$0xff] }
  0x85   :  { %v337_v13 = vsel %vm187_vm0, %v4549_v60, 0.0 }
  0x86   :  { %v320_v10 = vadd.f32 %v319_v56, %v318_v61  ;;  %v581_v56 = vmul.f32 %v4289_v63, %v4289_v63  ;;  %v793_v61 = vadd.f32 %v792_v9, %v791_v53  ;;  %v796_v6 = vsel %vm187_vm0, %v580_v49, 0.0  ;;  %v4559_v63 = vld [vmem:[%s7682_s0 + $0x260] sm:$0xff] }
  0x87   :  { %v339_v23 = vsel %vm187_vm0, %v4559_v63, 0.0 }
  0x88   :  { %v322_v22 = vadd.f32 %v321_v1, %v320_v10  ;;  %v582_v1 = vmul.f32 %v4299_v7, %v4299_v7  ;;  %v795_v10 = vadd.f32 %v794_v58, %v793_v61  ;;  %v798_v17 = vsel %vm187_vm0, %v581_v56, 0.0  ;;  %v4569_v7 = vld [vmem:[%s7682_s0 + $0x268] sm:$0xff] }
  0x89   :  { %v341_v32 = vsel %vm187_vm0, %v4569_v7, 0.0 }
  0x8a   :  { %v324_v31 = vadd.f32 %v323_v14, %v322_v22  ;;  %v583_v14 = vmul.f32 %v4309_v11, %v4309_v11  ;;  %v797_v22 = vadd.f32 %v796_v6, %v795_v10  ;;  %v800_v28 = vsel %vm187_vm0, %v582_v1, 0.0  ;;  %v4579_v11 = vld [vmem:[%s7682_s0 + $0x270] sm:$0xff] }
  0x8b   :  { %v343_v4 = vsel %vm187_vm0, %v4579_v11, 0.0 }
  0x8c   :  { %v326_v3 = vadd.f32 %v325_v26, %v324_v31  ;;  %v584_v26 = vmul.f32 %v4319_v16, %v4319_v16  ;;  %v799_v31 = vadd.f32 %v798_v17, %v797_v22  ;;  %v802_v37 = vsel %vm187_vm0, %v583_v14, 0.0  ;;  %v4589_v16 = vld [vmem:[%s7682_s0 + $0x278] sm:$0xff] }
  0x8d   :  { %v345_v46 = vsel %vm187_vm0, %v4589_v16, 0.0 }
  0x8e   :  { %v328_v44 = vadd.f32 %v327_v35, %v326_v3  ;;  %v585_v35 = vmul.f32 %v4329_v20, %v4329_v20  ;;  %v801_v3 = vadd.f32 %v800_v28, %v799_v31  ;;  %v804_v41 = vsel %vm187_vm0, %v584_v26, 0.0  ;;  %v4599_v20 = vld [vmem:[%s7682_s0 + $0x280] sm:$0xff] }
  0x8f   :  { %v347_v53 = vsel %vm187_vm0, %v4599_v20, 0.0 }
  0x90   :  { %v330_v50 = vadd.f32 %v329_v40, %v328_v44  ;;  %v586_v40 = vmul.f32 %v4339_v25, %v4339_v25  ;;  %v803_v44 = vadd.f32 %v802_v37, %v801_v3  ;;  %v806_v49 = vsel %vm187_vm0, %v585_v35, 0.0  ;;  %v4609_v25 = vld [vmem:[%s7682_s0 + $0x288] sm:$0xff] }
  0x91   :  { %v349_v61 = vsel %vm187_vm0, %v4609_v25, 0.0 }
  0x92   :  { %v332_v59 = vadd.f32 %v331_v47, %v330_v50  ;;  %v587_v47 = vmul.f32 %v4349_v34, %v4349_v34  ;;  %v805_v50 = vadd.f32 %v804_v41, %v803_v44  ;;  %v808_v56 = vsel %vm187_vm0, %v586_v40, 0.0  ;;  %v4619_v34 = vld [vmem:[%s7682_s0 + $0x290] sm:$0xff] }
  0x93   :  { %v351_v10 = vsel %vm187_vm0, %v4619_v34, 0.0 }
  0x94   :  { %v334_v8 = vadd.f32 %v333_v55, %v332_v59  ;;  %v588_v55 = vmul.f32 %v4359_v2, %v4359_v2  ;;  %v807_v59 = vadd.f32 %v806_v49, %v805_v50  ;;  %v810_v1 = vsel %vm187_vm0, %v587_v47, 0.0  ;;  %v4629_v2 = vld [vmem:[%s7682_s0 + $0x298] sm:$0xff] }
  0x95   :  { %v353_v22 = vsel %vm187_vm0, %v4629_v2, 0.0 }
  0x96   :  { %v336_v19 = vadd.f32 %v335_v62, %v334_v8  ;;  %v589_v62 = vmul.f32 %v4369_v5, %v4369_v5  ;;  %v809_v8 = vadd.f32 %v808_v56, %v807_v59  ;;  %v812_v14 = vsel %vm187_vm0, %v588_v55, 0.0  ;;  %v4639_v5 = vld [vmem:[%s7682_s0 + $0x2a0] sm:$0xff] }
  0x97   :  { %v355_v31 = vsel %vm187_vm0, %v4639_v5, 0.0 }
  0x98   :  { %v338_v29 = vadd.f32 %v337_v13, %v336_v19  ;;  %v590_v13 = vmul.f32 %v4379_v52, %v4379_v52  ;;  %v811_v19 = vadd.f32 %v810_v1, %v809_v8  ;;  %v814_v26 = vsel %vm187_vm0, %v589_v62, 0.0  ;;  %v4649_v52 = vld [vmem:[%s7682_s0 + $0x2a8] sm:$0xff] }
  0x99   :  { %v357_v3 = vsel %vm187_vm0, %v4649_v52, 0.0 }
  0x9a   :  { %v340_v38 = vadd.f32 %v339_v23, %v338_v29  ;;  %v591_v23 = vmul.f32 %v4389_v12, %v4389_v12  ;;  %v813_v29 = vadd.f32 %v812_v14, %v811_v19  ;;  %v816_v35 = vsel %vm187_vm0, %v590_v13, 0.0  ;;  %v4659_v12 = vld [vmem:[%s7682_s0 + $0x2b0] sm:$0xff] }
  0x9b   :  { %v359_v44 = vsel %vm187_vm0, %v4659_v12, 0.0 }
  0x9c   :  { %v342_v43 = vadd.f32 %v341_v32, %v340_v38  ;;  %v592_v32 = vmul.f32 %v4399_v15, %v4399_v15  ;;  %v815_v38 = vadd.f32 %v814_v26, %v813_v29  ;;  %v818_v40 = vsel %vm187_vm0, %v591_v23, 0.0  ;;  %v4669_v15 = vld [vmem:[%s7682_s0 + $0x2b8] sm:$0xff] }
  0x9d   :  { %v361_v50 = vsel %vm187_vm0, %v4669_v15, 0.0 }
  0x9e   :  { %v344_v9 = vadd.f32 %v343_v4, %v342_v43  ;;  %v593_v4 = vmul.f32 %v4409_v18, %v4409_v18  ;;  %v817_v43 = vadd.f32 %v816_v35, %v815_v38  ;;  %v820_v47 = vsel %vm187_vm0, %v592_v32, 0.0  ;;  %v4679_v18 = vld [vmem:[%s7682_s0 + $0x2c0] sm:$0xff] }
  0x9f   :  { %v363_v59 = vsel %vm187_vm0, %v4679_v18, 0.0 }
  0xa0   :  { %v346_v58 = vadd.f32 %v345_v46, %v344_v9  ;;  %v594_v46 = vmul.f32 %v4419_v21, %v4419_v21  ;;  %v819_v9 = vadd.f32 %v818_v40, %v817_v43  ;;  %v822_v55 = vsel %vm187_vm0, %v593_v4, 0.0  ;;  %v4689_v21 = vld [vmem:[%s7682_s0 + $0x2c8] sm:$0xff] }
  0xa1   :  { %v365_v8 = vsel %vm187_vm0, %v4689_v21, 0.0 }
  0xa2   :  { %v348_v6 = vadd.f32 %v347_v53, %v346_v58  ;;  %v595_v53 = vmul.f32 %v4429_v24, %v4429_v24  ;;  %v821_v58 = vadd.f32 %v820_v47, %v819_v9  ;;  %v824_v62 = vsel %vm187_vm0, %v594_v46, 0.0  ;;  %v4699_v24 = vld [vmem:[%s7682_s0 + $0x2d0] sm:$0xff] }
  0xa3   :  { %v367_v19 = vsel %vm187_vm0, %v4699_v24, 0.0 }
  0xa4   :  { %v350_v17 = vadd.f32 %v349_v61, %v348_v6  ;;  %v596_v61 = vmul.f32 %v4439_v27, %v4439_v27  ;;  %v823_v6 = vadd.f32 %v822_v55, %v821_v58  ;;  %v826_v13 = vsel %vm187_vm0, %v595_v53, 0.0  ;;  %v4709_v27 = vld [vmem:[%s7682_s0 + $0x2d8] sm:$0xff] }
  0xa5   :  { %v369_v29 = vsel %vm187_vm0, %v4709_v27, 0.0 }
  0xa6   :  { %v352_v28 = vadd.f32 %v351_v10, %v350_v17  ;;  %v597_v10 = vmul.f32 %v4449_v30, %v4449_v30  ;;  %v825_v17 = vadd.f32 %v824_v62, %v823_v6  ;;  %v828_v23 = vsel %vm187_vm0, %v596_v61, 0.0  ;;  %v4719_v30 = vld [vmem:[%s7682_s0 + $0x2e0] sm:$0xff] }
  0xa7   :  { %v371_v38 = vsel %vm187_vm0, %v4719_v30, 0.0 }
  0xa8   :  { %v354_v37 = vadd.f32 %v353_v22, %v352_v28  ;;  %v598_v22 = vmul.f32 %v4459_v33, %v4459_v33  ;;  %v827_v28 = vadd.f32 %v826_v13, %v825_v17  ;;  %v830_v32 = vsel %vm187_vm0, %v597_v10, 0.0  ;;  %v4729_v33 = vld [vmem:[%s7682_s0 + $0x2e8] sm:$0xff] }
  0xa9   :  { %v373_v43 = vsel %vm187_vm0, %v4729_v33, 0.0 }
  0xaa   :  { %v356_v41 = vadd.f32 %v355_v31, %v354_v37  ;;  %v599_v31 = vmul.f32 %v4469_v36, %v4469_v36  ;;  %v829_v37 = vadd.f32 %v828_v23, %v827_v28  ;;  %v832_v4 = vsel %vm187_vm0, %v598_v22, 0.0  ;;  %v4739_v36 = vld [vmem:[%s7682_s0 + $0x2f0] sm:$0xff] }
  0xab   :  { %v375_v9 = vsel %vm187_vm0, %v4739_v36, 0.0 }
  0xac   :  { %v358_v49 = vadd.f32 %v357_v3, %v356_v41  ;;  %v600_v3 = vmul.f32 %v4479_v39, %v4479_v39  ;;  %v831_v41 = vadd.f32 %v830_v32, %v829_v37  ;;  %v834_v46 = vsel %vm187_vm0, %v599_v31, 0.0  ;;  %v4749_v39 = vld [vmem:[%s7682_s0 + $0x2f8] sm:$0xff] }
  0xad   :  { %v377_v58 = vsel %vm187_vm0, %v4749_v39, 0.0 }
  0xae   :  { %v360_v56 = vadd.f32 %v359_v44, %v358_v49  ;;  %v601_v44 = vmul.f32 %v4489_v42, %v4489_v42  ;;  %v833_v49 = vadd.f32 %v832_v4, %v831_v41  ;;  %v836_v53 = vsel %vm187_vm0, %v600_v3, 0.0  ;;  %v4759_v42 = vld [vmem:[%s7682_s0 + $0x300] sm:$0xff] }
  0xaf   :  { %v379_v6 = vsel %vm187_vm0, %v4759_v42, 0.0 }
  0xb0   :  { %v362_v1 = vadd.f32 %v361_v50, %v360_v56  ;;  %v602_v50 = vmul.f32 %v4499_v45, %v4499_v45  ;;  %v835_v56 = vadd.f32 %v834_v46, %v833_v49  ;;  %v838_v61 = vsel %vm187_vm0, %v601_v44, 0.0  ;;  %v4769_v45 = vld [vmem:[%s7682_s0 + $0x308] sm:$0xff] }
  0xb1   :  { %v381_v17 = vsel %vm187_vm0, %v4769_v45, 0.0 }
  0xb2   :  { %v364_v14 = vadd.f32 %v363_v59, %v362_v1  ;;  %v603_v59 = vmul.f32 %v4509_v48, %v4509_v48  ;;  %v837_v1 = vadd.f32 %v836_v53, %v835_v56  ;;  %v840_v10 = vsel %vm187_vm0, %v602_v50, 0.0  ;;  %v4779_v48 = vld [vmem:[%s7682_s0 + $0x310] sm:$0xff] }
  0xb3   :  { %v383_v28 = vsel %vm187_vm0, %v4779_v48, 0.0 }
  0xb4   :  { %v366_v26 = vadd.f32 %v365_v8, %v364_v14  ;;  %v604_v8 = vmul.f32 %v4519_v51, %v4519_v51  ;;  %v839_v14 = vadd.f32 %v838_v61, %v837_v1  ;;  %v842_v22 = vsel %vm187_vm0, %v603_v59, 0.0  ;;  %v4789_v51 = vld [vmem:[%s7682_s0 + $0x318] sm:$0xff] }
  0xb5   :  { %v385_v37 = vsel %vm187_vm0, %v4789_v51, 0.0 }
  0xb6   :  { %v368_v35 = vadd.f32 %v367_v19, %v366_v26  ;;  %v605_v19 = vmul.f32 %v4529_v54, %v4529_v54  ;;  %v841_v26 = vadd.f32 %v840_v10, %v839_v14  ;;  %v844_v31 = vsel %vm187_vm0, %v604_v8, 0.0  ;;  %v4799_v54 = vld [vmem:[%s7682_s0 + $0x320] sm:$0xff] }
  0xb7   :  { %v387_v41 = vsel %vm187_vm0, %v4799_v54, 0.0 }
  0xb8   :  { %v370_v40 = vadd.f32 %v369_v29, %v368_v35  ;;  %v606_v29 = vmul.f32 %v4539_v57, %v4539_v57  ;;  %v843_v35 = vadd.f32 %v842_v22, %v841_v26  ;;  %v846_v3 = vsel %vm187_vm0, %v605_v19, 0.0  ;;  %v4809_v57 = vld [vmem:[%s7682_s0 + $0x328] sm:$0xff] }
  0xb9   :  { %v389_v49 = vsel %vm187_vm0, %v4809_v57, 0.0 }
  0xba   :  { %v372_v47 = vadd.f32 %v371_v38, %v370_v40  ;;  %v607_v38 = vmul.f32 %v4549_v60, %v4549_v60  ;;  %v845_v40 = vadd.f32 %v844_v31, %v843_v35  ;;  %v848_v44 = vsel %vm187_vm0, %v606_v29, 0.0  ;;  %v4819_v60 = vld [vmem:[%s7682_s0 + $0x330] sm:$0xff] }
  0xbb   :  { %v391_v56 = vsel %vm187_vm0, %v4819_v60, 0.0 }
  0xbc   :  { %v374_v55 = vadd.f32 %v373_v43, %v372_v47  ;;  %v608_v43 = vmul.f32 %v4559_v63, %v4559_v63  ;;  %v847_v47 = vadd.f32 %v846_v3, %v845_v40  ;;  %v850_v50 = vsel %vm187_vm0, %v607_v38, 0.0  ;;  %v4829_v63 = vld [vmem:[%s7682_s0 + $0x338] sm:$0xff] }
  0xbd   :  { %v393_v1 = vsel %vm187_vm0, %v4829_v63, 0.0 }
  0xbe   :  { %v376_v62 = vadd.f32 %v375_v9, %v374_v55  ;;  %v609_v9 = vmul.f32 %v4569_v7, %v4569_v7  ;;  %v849_v55 = vadd.f32 %v848_v44, %v847_v47  ;;  %v852_v59 = vsel %vm187_vm0, %v608_v43, 0.0  ;;  %v4839_v7 = vld [vmem:[%s7682_s0 + $0x340] sm:$0xff] }
  0xbf   :  { %v395_v14 = vsel %vm187_vm0, %v4839_v7, 0.0 }
  0xc0   :  { %v378_v13 = vadd.f32 %v377_v58, %v376_v62  ;;  %v610_v58 = vmul.f32 %v4579_v11, %v4579_v11  ;;  %v851_v62 = vadd.f32 %v850_v50, %v849_v55  ;;  %v854_v8 = vsel %vm187_vm0, %v609_v9, 0.0  ;;  %v4849_v11 = vld [vmem:[%s7682_s0 + $0x348] sm:$0xff] }
  0xc1   :  { %v397_v26 = vsel %vm187_vm0, %v4849_v11, 0.0 }
  0xc2   :  { %v380_v23 = vadd.f32 %v379_v6, %v378_v13  ;;  %v611_v6 = vmul.f32 %v4589_v16, %v4589_v16  ;;  %v853_v13 = vadd.f32 %v852_v59, %v851_v62  ;;  %v856_v19 = vsel %vm187_vm0, %v610_v58, 0.0  ;;  %v4859_v16 = vld [vmem:[%s7682_s0 + $0x350] sm:$0xff] }
  0xc3   :  { %v399_v35 = vsel %vm187_vm0, %v4859_v16, 0.0 }
  0xc4   :  { %v382_v32 = vadd.f32 %v381_v17, %v380_v23  ;;  %v612_v17 = vmul.f32 %v4599_v20, %v4599_v20  ;;  %v855_v23 = vadd.f32 %v854_v8, %v853_v13  ;;  %v858_v29 = vsel %vm187_vm0, %v611_v6, 0.0  ;;  %v4869_v20 = vld [vmem:[%s7682_s0 + $0x358] sm:$0xff] }
  0xc5   :  { %v401_v40 = vsel %vm187_vm0, %v4869_v20, 0.0 }
  0xc6   :  { %v384_v4 = vadd.f32 %v383_v28, %v382_v32  ;;  %v613_v28 = vmul.f32 %v4609_v25, %v4609_v25  ;;  %v857_v32 = vadd.f32 %v856_v19, %v855_v23  ;;  %v860_v38 = vsel %vm187_vm0, %v612_v17, 0.0  ;;  %v4879_v25 = vld [vmem:[%s7682_s0 + $0x360] sm:$0xff] }
  0xc7   :  { %v403_v47 = vsel %vm187_vm0, %v4879_v25, 0.0 }
  0xc8   :  { %v386_v46 = vadd.f32 %v385_v37, %v384_v4  ;;  %v614_v37 = vmul.f32 %v4619_v34, %v4619_v34  ;;  %v859_v4 = vadd.f32 %v858_v29, %v857_v32  ;;  %v862_v43 = vsel %vm187_vm0, %v613_v28, 0.0  ;;  %v4889_v34 = vld [vmem:[%s7682_s0 + $0x368] sm:$0xff] }
  0xc9   :  { %v405_v55 = vsel %vm187_vm0, %v4889_v34, 0.0 }
  0xca   :  { %v388_v53 = vadd.f32 %v387_v41, %v386_v46  ;;  %v615_v41 = vmul.f32 %v4629_v2, %v4629_v2  ;;  %v861_v46 = vadd.f32 %v860_v38, %v859_v4  ;;  %v864_v9 = vsel %vm187_vm0, %v614_v37, 0.0  ;;  %v4899_v2 = vld [vmem:[%s7682_s0 + $0x370] sm:$0xff] }
  0xcb   :  { %v407_v62 = vsel %vm187_vm0, %v4899_v2, 0.0 }
  0xcc   :  { %v390_v61 = vadd.f32 %v389_v49, %v388_v53  ;;  %v616_v49 = vmul.f32 %v4639_v5, %v4639_v5  ;;  %v863_v53 = vadd.f32 %v862_v43, %v861_v46  ;;  %v866_v58 = vsel %vm187_vm0, %v615_v41, 0.0  ;;  %v4909_v5 = vld [vmem:[%s7682_s0 + $0x378] sm:$0xff] }
  0xcd   :  { %v409_v13 = vsel %vm187_vm0, %v4909_v5, 0.0 }
  0xce   :  { %v392_v10 = vadd.f32 %v391_v56, %v390_v61  ;;  %v617_v56 = vmul.f32 %v4649_v52, %v4649_v52  ;;  %v865_v61 = vadd.f32 %v864_v9, %v863_v53  ;;  %v868_v6 = vsel %vm187_vm0, %v616_v49, 0.0  ;;  %v4919_v52 = vld [vmem:[%s7682_s0 + $0x380] sm:$0xff] }
  0xcf   :  { %v411_v23 = vsel %vm187_vm0, %v4919_v52, 0.0 }
  0xd0   :  { %v394_v22 = vadd.f32 %v393_v1, %v392_v10  ;;  %v618_v1 = vmul.f32 %v4659_v12, %v4659_v12  ;;  %v867_v10 = vadd.f32 %v866_v58, %v865_v61  ;;  %v870_v17 = vsel %vm187_vm0, %v617_v56, 0.0  ;;  %v4929_v12 = vld [vmem:[%s7682_s0 + $0x388] sm:$0xff] }
  0xd1   :  { %v413_v32 = vsel %vm187_vm0, %v4929_v12, 0.0 }
  0xd2   :  { %v396_v31 = vadd.f32 %v395_v14, %v394_v22  ;;  %v619_v14 = vmul.f32 %v4669_v15, %v4669_v15  ;;  %v869_v22 = vadd.f32 %v868_v6, %v867_v10  ;;  %v872_v28 = vsel %vm187_vm0, %v618_v1, 0.0  ;;  %v4939_v15 = vld [vmem:[%s7682_s0 + $0x390] sm:$0xff] }
  0xd3   :  { %v415_v4 = vsel %vm187_vm0, %v4939_v15, 0.0 }
  0xd4   :  { %v398_v3 = vadd.f32 %v397_v26, %v396_v31  ;;  %v620_v26 = vmul.f32 %v4679_v18, %v4679_v18  ;;  %v871_v31 = vadd.f32 %v870_v17, %v869_v22  ;;  %v874_v37 = vsel %vm187_vm0, %v619_v14, 0.0  ;;  %v4949_v18 = vld [vmem:[%s7682_s0 + $0x398] sm:$0xff] }
  0xd5   :  { %v417_v46 = vsel %vm187_vm0, %v4949_v18, 0.0 }
  0xd6   :  { %v400_v44 = vadd.f32 %v399_v35, %v398_v3  ;;  %v621_v35 = vmul.f32 %v4689_v21, %v4689_v21  ;;  %v873_v3 = vadd.f32 %v872_v28, %v871_v31  ;;  %v876_v41 = vsel %vm187_vm0, %v620_v26, 0.0  ;;  %v4959_v21 = vld [vmem:[%s7682_s0 + $0x3a0] sm:$0xff] }
  0xd7   :  { %v419_v53 = vsel %vm187_vm0, %v4959_v21, 0.0 }
  0xd8   :  { %v402_v50 = vadd.f32 %v401_v40, %v400_v44  ;;  %v622_v40 = vmul.f32 %v4699_v24, %v4699_v24  ;;  %v875_v44 = vadd.f32 %v874_v37, %v873_v3  ;;  %v878_v49 = vsel %vm187_vm0, %v621_v35, 0.0  ;;  %v4969_v24 = vld [vmem:[%s7682_s0 + $0x3a8] sm:$0xff] }
  0xd9   :  { %v421_v61 = vsel %vm187_vm0, %v4969_v24, 0.0 }
  0xda   :  { %v404_v59 = vadd.f32 %v403_v47, %v402_v50  ;;  %v623_v47 = vmul.f32 %v4709_v27, %v4709_v27  ;;  %v877_v50 = vadd.f32 %v876_v41, %v875_v44  ;;  %v880_v56 = vsel %vm187_vm0, %v622_v40, 0.0  ;;  %v4979_v27 = vld [vmem:[%s7682_s0 + $0x3b0] sm:$0xff] }
  0xdb   :  { %v423_v10 = vsel %vm187_vm0, %v4979_v27, 0.0 }
  0xdc   :  { %v406_v8 = vadd.f32 %v405_v55, %v404_v59  ;;  %v624_v55 = vmul.f32 %v4719_v30, %v4719_v30  ;;  %v879_v59 = vadd.f32 %v878_v49, %v877_v50  ;;  %v882_v1 = vsel %vm187_vm0, %v623_v47, 0.0  ;;  %v4989_v30 = vld [vmem:[%s7682_s0 + $0x3b8] sm:$0xff] }
  0xdd   :  { %v425_v22 = vsel %vm187_vm0, %v4989_v30, 0.0 }
  0xde   :  { %v408_v19 = vadd.f32 %v407_v62, %v406_v8  ;;  %v625_v62 = vmul.f32 %v4729_v33, %v4729_v33  ;;  %v881_v8 = vadd.f32 %v880_v56, %v879_v59  ;;  %v884_v14 = vsel %vm187_vm0, %v624_v55, 0.0  ;;  %v4999_v33 = vld [vmem:[%s7682_s0 + $0x3c0] sm:$0xff] }
  0xdf   :  { %v427_v31 = vsel %vm187_vm0, %v4999_v33, 0.0 }
  0xe0   :  { %v410_v29 = vadd.f32 %v409_v13, %v408_v19  ;;  %v626_v13 = vmul.f32 %v4739_v36, %v4739_v36  ;;  %v883_v19 = vadd.f32 %v882_v1, %v881_v8  ;;  %v886_v26 = vsel %vm187_vm0, %v625_v62, 0.0  ;;  %v5009_v36 = vld [vmem:[%s7682_s0 + $0x3c8] sm:$0xff] }
  0xe1   :  { %v429_v3 = vsel %vm187_vm0, %v5009_v36, 0.0 }
  0xe2   :  { %v412_v38 = vadd.f32 %v411_v23, %v410_v29  ;;  %v627_v23 = vmul.f32 %v4749_v39, %v4749_v39  ;;  %v885_v29 = vadd.f32 %v884_v14, %v883_v19  ;;  %v888_v35 = vsel %vm187_vm0, %v626_v13, 0.0  ;;  %v5019_v39 = vld [vmem:[%s7682_s0 + $0x3d0] sm:$0xff] }
  0xe3   :  { %v431_v44 = vsel %vm187_vm0, %v5019_v39, 0.0 }
  0xe4   :  { %v414_v43 = vadd.f32 %v413_v32, %v412_v38  ;;  %v628_v32 = vmul.f32 %v4759_v42, %v4759_v42  ;;  %v887_v38 = vadd.f32 %v886_v26, %v885_v29  ;;  %v890_v40 = vsel %vm187_vm0, %v627_v23, 0.0  ;;  %v5029_v42 = vld [vmem:[%s7682_s0 + $0x3d8] sm:$0xff] }
  0xe5   :  { %v433_v50 = vsel %vm187_vm0, %v5029_v42, 0.0 }
  0xe6   :  { %v416_v9 = vadd.f32 %v415_v4, %v414_v43  ;;  %v629_v4 = vmul.f32 %v4769_v45, %v4769_v45  ;;  %v889_v43 = vadd.f32 %v888_v35, %v887_v38  ;;  %v892_v47 = vsel %vm187_vm0, %v628_v32, 0.0  ;;  %v5039_v45 = vld [vmem:[%s7682_s0 + $0x3e0] sm:$0xff] }
  0xe7   :  { %v435_v59 = vsel %vm187_vm0, %v5039_v45, 0.0 }
  0xe8   :  { %v418_v58 = vadd.f32 %v417_v46, %v416_v9  ;;  %v630_v46 = vmul.f32 %v4779_v48, %v4779_v48  ;;  %v891_v9 = vadd.f32 %v890_v40, %v889_v43  ;;  %v894_v55 = vsel %vm187_vm0, %v629_v4, 0.0  ;;  %v5049_v48 = vld [vmem:[%s7682_s0 + $0x3e8] sm:$0xff] }
  0xe9   :  { %v437_v8 = vsel %vm187_vm0, %v5049_v48, 0.0 }
  0xea   :  { %v420_v6 = vadd.f32 %v419_v53, %v418_v58  ;;  %v631_v53 = vmul.f32 %v4789_v51, %v4789_v51  ;;  %v893_v58 = vadd.f32 %v892_v47, %v891_v9  ;;  %v896_v62 = vsel %vm187_vm0, %v630_v46, 0.0  ;;  %v5059_v51 = vld [vmem:[%s7682_s0 + $0x3f0] sm:$0xff] }
  0xeb   :  { %v439_v19 = vsel %vm187_vm0, %v5059_v51, 0.0 }
  0xec   :  { %v422_v17 = vadd.f32 %v421_v61, %v420_v6  ;;  %v632_v61 = vmul.f32 %v4799_v54, %v4799_v54  ;;  %v895_v6 = vadd.f32 %v894_v55, %v893_v58  ;;  %v898_v13 = vsel %vm187_vm0, %v631_v53, 0.0  ;;  %v5069_v54 = vld [vmem:[%s7682_s0 + $0x3f8] sm:$0xff] }
  0xed   :  { %v441_v29 = vsel %vm187_vm0, %v5069_v54, 0.0 }
  0xee   :  { %v424_v28 = vadd.f32 %v423_v10, %v422_v17  ;;  %v633_v10 = vmul.f32 %v4809_v57, %v4809_v57  ;;  %v897_v17 = vadd.f32 %v896_v62, %v895_v6  ;;  %v900_v23 = vsel %vm187_vm0, %v632_v61, 0.0  ;;  %v5079_v57 = vld [vmem:[%s7682_s0 + $0x400] sm:$0xff] }
  0xef   :  { %v443_v38 = vsel %vm187_vm0, %v5079_v57, 0.0 }
  0xf0   :  { %v426_v37 = vadd.f32 %v425_v22, %v424_v28  ;;  %v634_v22 = vmul.f32 %v4819_v60, %v4819_v60  ;;  %v899_v28 = vadd.f32 %v898_v13, %v897_v17  ;;  %v902_v32 = vsel %vm187_vm0, %v633_v10, 0.0  ;;  %v5089_v60 = vld [vmem:[%s7682_s0 + $0x408] sm:$0xff] }
  0xf1   :  { %v445_v43 = vsel %vm187_vm0, %v5089_v60, 0.0 }
  0xf2   :  { %v428_v41 = vadd.f32 %v427_v31, %v426_v37  ;;  %v635_v31 = vmul.f32 %v4829_v63, %v4829_v63  ;;  %v901_v37 = vadd.f32 %v900_v23, %v899_v28  ;;  %v904_v4 = vsel %vm187_vm0, %v634_v22, 0.0  ;;  %v5099_v63 = vld [vmem:[%s7682_s0 + $0x410] sm:$0xff] }
  0xf3   :  { %v447_v9 = vsel %vm187_vm0, %v5099_v63, 0.0 }
  0xf4   :  { %v430_v49 = vadd.f32 %v429_v3, %v428_v41  ;;  %v636_v3 = vmul.f32 %v4839_v7, %v4839_v7  ;;  %v903_v41 = vadd.f32 %v902_v32, %v901_v37  ;;  %v906_v46 = vsel %vm187_vm0, %v635_v31, 0.0  ;;  %v5109_v7 = vld [vmem:[%s7682_s0 + $0x418] sm:$0xff] }
  0xf5   :  { %v449_v58 = vsel %vm187_vm0, %v5109_v7, 0.0 }
  0xf6   :  { %v432_v56 = vadd.f32 %v431_v44, %v430_v49  ;;  %v637_v44 = vmul.f32 %v4849_v11, %v4849_v11  ;;  %v905_v49 = vadd.f32 %v904_v4, %v903_v41  ;;  %v908_v53 = vsel %vm187_vm0, %v636_v3, 0.0  ;;  %v5119_v11 = vld [vmem:[%s7682_s0 + $0x420] sm:$0xff] }
  0xf7   :  { %v451_v6 = vsel %vm187_vm0, %v5119_v11, 0.0 }
  0xf8   :  { %v434_v1 = vadd.f32 %v433_v50, %v432_v56  ;;  %v638_v50 = vmul.f32 %v4859_v16, %v4859_v16  ;;  %v907_v56 = vadd.f32 %v906_v46, %v905_v49  ;;  %v910_v61 = vsel %vm187_vm0, %v637_v44, 0.0  ;;  %v5129_v16 = vld [vmem:[%s7682_s0 + $0x428] sm:$0xff] }
  0xf9   :  { %v453_v17 = vsel %vm187_vm0, %v5129_v16, 0.0 }
  0xfa   :  { %v436_v14 = vadd.f32 %v435_v59, %v434_v1  ;;  %v639_v59 = vmul.f32 %v4869_v20, %v4869_v20  ;;  %v909_v1 = vadd.f32 %v908_v53, %v907_v56  ;;  %v912_v10 = vsel %vm187_vm0, %v638_v50, 0.0  ;;  %v5139_v20 = vld [vmem:[%s7682_s0 + $0x430] sm:$0xff] }
  0xfb   :  { %v455_v28 = vsel %vm187_vm0, %v5139_v20, 0.0 }
  0xfc   :  { %v438_v26 = vadd.f32 %v437_v8, %v436_v14  ;;  %v640_v8 = vmul.f32 %v4879_v25, %v4879_v25  ;;  %v911_v14 = vadd.f32 %v910_v61, %v909_v1  ;;  %v914_v22 = vsel %vm187_vm0, %v639_v59, 0.0  ;;  %v5149_v25 = vld [vmem:[%s7682_s0 + $0x438] sm:$0xff] }
  0xfd   :  { %v457_v37 = vsel %vm187_vm0, %v5149_v25, 0.0 }
  0xfe   :  { %v440_v35 = vadd.f32 %v439_v19, %v438_v26  ;;  %v641_v19 = vmul.f32 %v4889_v34, %v4889_v34  ;;  %v913_v26 = vadd.f32 %v912_v10, %v911_v14  ;;  %v916_v31 = vsel %vm187_vm0, %v640_v8, 0.0  ;;  %v5159_v34 = vld [vmem:[%s7682_s0 + $0x440] sm:$0xff] }
  0xff   :  { %v459_v41 = vsel %vm187_vm0, %v5159_v34, 0.0 }
 0x100   :  { %v442_v40 = vadd.f32 %v441_v29, %v440_v35  ;;  %v642_v29 = vmul.f32 %v4899_v2, %v4899_v2  ;;  %v915_v35 = vadd.f32 %v914_v22, %v913_v26  ;;  %v918_v3 = vsel %vm187_vm0, %v641_v19, 0.0  ;;  %v5169_v2 = vld [vmem:[%s7682_s0 + $0x448] sm:$0xff] }
 0x101   :  { %v461_v49 = vsel %vm187_vm0, %v5169_v2, 0.0 }
 0x102   :  { %v444_v47 = vadd.f32 %v443_v38, %v442_v40  ;;  %v643_v38 = vmul.f32 %v4909_v5, %v4909_v5  ;;  %v917_v40 = vadd.f32 %v916_v31, %v915_v35  ;;  %v920_v44 = vsel %vm187_vm0, %v642_v29, 0.0  ;;  %v5179_v5 = vld [vmem:[%s7682_s0 + $0x450] sm:$0xff] }
 0x103   :  { %v463_v56 = vsel %vm187_vm0, %v5179_v5, 0.0 }
 0x104   :  { %v446_v55 = vadd.f32 %v445_v43, %v444_v47  ;;  %v644_v43 = vmul.f32 %v4919_v52, %v4919_v52  ;;  %v919_v47 = vadd.f32 %v918_v3, %v917_v40  ;;  %v922_v50 = vsel %vm187_vm0, %v643_v38, 0.0  ;;  %v5189_v52 = vld [vmem:[%s7682_s0 + $0x458] sm:$0xff] }
 0x105   :  { %v465_v1 = vsel %vm187_vm0, %v5189_v52, 0.0 }
 0x106   :  { %v448_v62 = vadd.f32 %v447_v9, %v446_v55  ;;  %v645_v9 = vmul.f32 %v4929_v12, %v4929_v12  ;;  %v921_v55 = vadd.f32 %v920_v44, %v919_v47  ;;  %v924_v59 = vsel %vm187_vm0, %v644_v43, 0.0  ;;  %v5199_v12 = vld [vmem:[%s7682_s0 + $0x460] sm:$0xff] }
 0x107   :  { %v467_v14 = vsel %vm187_vm0, %v5199_v12, 0.0 }
 0x108   :  { %v450_v13 = vadd.f32 %v449_v58, %v448_v62  ;;  %v646_v58 = vmul.f32 %v4939_v15, %v4939_v15  ;;  %v923_v62 = vadd.f32 %v922_v50, %v921_v55  ;;  %v926_v8 = vsel %vm187_vm0, %v645_v9, 0.0  ;;  %v5209_v15 = vld [vmem:[%s7682_s0 + $0x468] sm:$0xff] }
 0x109   :  { %v469_v26 = vsel %vm187_vm0, %v5209_v15, 0.0 }
 0x10a   :  { %v452_v23 = vadd.f32 %v451_v6, %v450_v13  ;;  %v647_v6 = vmul.f32 %v4949_v18, %v4949_v18  ;;  %v925_v13 = vadd.f32 %v924_v59, %v923_v62  ;;  %v928_v19 = vsel %vm187_vm0, %v646_v58, 0.0  ;;  %v5219_v18 = vld [vmem:[%s7682_s0 + $0x470] sm:$0xff] }
 0x10b   :  { %v471_v35 = vsel %vm187_vm0, %v5219_v18, 0.0 }
 0x10c   :  { %v454_v32 = vadd.f32 %v453_v17, %v452_v23  ;;  %v648_v17 = vmul.f32 %v4959_v21, %v4959_v21  ;;  %v927_v23 = vadd.f32 %v926_v8, %v925_v13  ;;  %v930_v29 = vsel %vm187_vm0, %v647_v6, 0.0  ;;  %v5229_v21 = vld [vmem:[%s7682_s0 + $0x478] sm:$0xff] }
 0x10d   :  { %v473_v40 = vsel %vm187_vm0, %v5229_v21, 0.0 }
 0x10e   :  { %v456_v4 = vadd.f32 %v455_v28, %v454_v32  ;;  %v649_v28 = vmul.f32 %v4969_v24, %v4969_v24  ;;  %v929_v32 = vadd.f32 %v928_v19, %v927_v23  ;;  %v932_v38 = vsel %vm187_vm0, %v648_v17, 0.0  ;;  %v5239_v24 = vld [vmem:[%s7682_s0 + $0x480] sm:$0xff] }
 0x10f   :  { %v475_v47 = vsel %vm187_vm0, %v5239_v24, 0.0 }
 0x110   :  { %v458_v46 = vadd.f32 %v457_v37, %v456_v4  ;;  %v650_v37 = vmul.f32 %v4979_v27, %v4979_v27  ;;  %v931_v4 = vadd.f32 %v930_v29, %v929_v32  ;;  %v934_v43 = vsel %vm187_vm0, %v649_v28, 0.0  ;;  %v5249_v27 = vld [vmem:[%s7682_s0 + $0x488] sm:$0xff] }
 0x111   :  { %v477_v55 = vsel %vm187_vm0, %v5249_v27, 0.0 }
 0x112   :  { %v460_v53 = vadd.f32 %v459_v41, %v458_v46  ;;  %v651_v41 = vmul.f32 %v4989_v30, %v4989_v30  ;;  %v933_v46 = vadd.f32 %v932_v38, %v931_v4  ;;  %v936_v9 = vsel %vm187_vm0, %v650_v37, 0.0  ;;  %v5259_v30 = vld [vmem:[%s7682_s0 + $0x490] sm:$0xff] }
 0x113   :  { %v479_v62 = vsel %vm187_vm0, %v5259_v30, 0.0 }
 0x114   :  { %v462_v61 = vadd.f32 %v461_v49, %v460_v53  ;;  %v652_v49 = vmul.f32 %v4999_v33, %v4999_v33  ;;  %v935_v53 = vadd.f32 %v934_v43, %v933_v46  ;;  %v938_v58 = vsel %vm187_vm0, %v651_v41, 0.0  ;;  %v5269_v33 = vld [vmem:[%s7682_s0 + $0x498] sm:$0xff] }
 0x115   :  { %v481_v13 = vsel %vm187_vm0, %v5269_v33, 0.0 }
 0x116   :  { %v464_v10 = vadd.f32 %v463_v56, %v462_v61  ;;  %v653_v56 = vmul.f32 %v5009_v36, %v5009_v36  ;;  %v937_v61 = vadd.f32 %v936_v9, %v935_v53  ;;  %v940_v6 = vsel %vm187_vm0, %v652_v49, 0.0  ;;  %v5279_v36 = vld [vmem:[%s7682_s0 + $0x4a0] sm:$0xff] }
 0x117   :  { %v483_v23 = vsel %vm187_vm0, %v5279_v36, 0.0  ;;  %v660_v53 = vmul.f32 %v5079_v57, %v5079_v57  ;;  %v662_v57 = vmul.f32 %v5099_v63, %v5099_v63  ;;  %v664_v63 = vmul.f32 %v5119_v11, %v5119_v11 }
 0x118   :  { %v466_v22 = vadd.f32 %v465_v1, %v464_v10  ;;  %v654_v1 = vmul.f32 %v5019_v39, %v5019_v39  ;;  %v939_v10 = vadd.f32 %v938_v58, %v937_v61  ;;  %v942_v17 = vsel %vm187_vm0, %v653_v56, 0.0  ;;  %v5289_v39 = vld [vmem:[%s7682_s0 + $0x4a8] sm:$0xff] }
 0x119   :  { %v485_v32 = vsel %vm187_vm0, %v5289_v39, 0.0  ;;  %v5334_v56 = vld [vmem:[%s7682_s0 + $0x4c8] sm:$0xff]  ;;  %v666_v11 = vmul.f32 %v5139_v20, %v5139_v20  ;;  %v668_v20 = vmul.f32 %v5159_v34, %v5159_v34  ;;  %v670_v34 = vmul.f32 %v5179_v5, %v5179_v5 }
 0x11a   :  { %v468_v31 = vadd.f32 %v467_v14, %v466_v22  ;;  %v655_v14 = vmul.f32 %v5029_v42, %v5029_v42  ;;  %v941_v22 = vadd.f32 %v940_v6, %v939_v10  ;;  %v944_v28 = vsel %vm187_vm0, %v654_v1, 0.0  ;;  %v5299_v42 = vld [vmem:[%s7682_s0 + $0x4b0] sm:$0xff] }
 0x11b   :  { %v487_v4 = vsel %vm187_vm0, %v5299_v42, 0.0  ;;  %v493_v6 = vsel %vm187_vm0, %v5334_v56, 0.0  ;;  %v5347_v10 = vld [vmem:[%s7682_s0 + $0x4d0] sm:$0xff]  ;;  %v672_v5 = vmul.f32 %v5199_v12, %v5199_v12  ;;  %v674_v12 = vmul.f32 %v5219_v18, %v5219_v18 }
 0x11c   :  { %v470_v3 = vadd.f32 %v469_v26, %v468_v31  ;;  %v656_v26 = vmul.f32 %v5039_v45, %v5039_v45  ;;  %v943_v31 = vadd.f32 %v942_v17, %v941_v22  ;;  %v946_v37 = vsel %vm187_vm0, %v655_v14, 0.0  ;;  %v5309_v45 = vld [vmem:[%s7682_s0 + $0x4b8] sm:$0xff] }
 0x11d   :  { %v489_v46 = vsel %vm187_vm0, %v5309_v45, 0.0  ;;  %v495_v22 = vsel %vm187_vm0, %v5347_v10, 0.0  ;;  %v676_v18 = vmul.f32 %v5239_v24, %v5239_v24  ;;  %v678_v24 = vmul.f32 %v5259_v30, %v5259_v30 }
 0x11e   :  { %v472_v44 = vadd.f32 %v471_v35, %v470_v3  ;;  %v657_v35 = vmul.f32 %v5049_v48, %v5049_v48  ;;  %v945_v3 = vadd.f32 %v944_v28, %v943_v31  ;;  %v948_v41 = vsel %vm187_vm0, %v656_v26, 0.0  ;;  %v5319_v48 = vld [vmem:[%s7682_s0 + $0x4c0] sm:$0xff]  ;;  %v5360_v26 = vld [vmem:[%s7682_s0 + $0x4d8] sm:$0xff] }
 0x11f   :  { %v680_v30 = vmul.f32 %v5279_v36, %v5279_v36 }
 0x120   :  { %v474_v50 = vadd.f32 %v473_v40, %v472_v44  ;;  %v658_v40 = vmul.f32 %v5059_v51, %v5059_v51  ;;  %v947_v44 = vadd.f32 %v946_v37, %v945_v3  ;;  %v950_v49 = vsel %vm187_vm0, %v657_v35, 0.0 }
 0x121   :  { %v491_v51 = vsel %vm187_vm0, %v5319_v48, 0.0  ;;  %v497_v35 = vsel %vm187_vm0, %v5360_v26, 0.0  ;;  %v964_v37 = vsel %vm187_vm0, %v664_v63, 0.0  ;;  %v996_v36 = vsel %vm187_vm0, %v680_v30, 0.0 }
 0x122   :  { %v476_v59 = vadd.f32 %v475_v47, %v474_v50  ;;  %v659_v47 = vmul.f32 %v5069_v54, %v5069_v54  ;;  %v949_v50 = vadd.f32 %v948_v41, %v947_v44  ;;  %v661_v54 = vmul.f32 %v5089_v60, %v5089_v60 }
 0x123   :  { %v663_v60 = vmul.f32 %v5109_v7, %v5109_v7  ;;  %v665_v7 = vmul.f32 %v5129_v16, %v5129_v16  ;;  %v667_v16 = vmul.f32 %v5149_v25, %v5149_v25  ;;  %v968_v44 = vsel %vm187_vm0, %v666_v11, 0.0 }
 0x124   :  { %v478_v8 = vadd.f32 %v477_v55, %v476_v59  ;;  %v952_v55 = vsel %vm187_vm0, %v658_v40, 0.0  ;;  %v951_v59 = vadd.f32 %v950_v49, %v949_v50  ;;  %v954_v61 = vsel %vm187_vm0, %v659_v47, 0.0 }
 0x125   :  { %v958_v14 = vsel %vm187_vm0, %v661_v54, 0.0  ;;  %v669_v25 = vmul.f32 %v5169_v2, %v5169_v2  ;;  %v970_v49 = vsel %vm187_vm0, %v667_v16, 0.0  ;;  %v671_v2 = vmul.f32 %v5189_v52, %v5189_v52 }
 0x126   :  { %v480_v19 = vadd.f32 %v479_v62, %v478_v8  ;;  %v953_v1 = vadd.f32 %v952_v55, %v951_v59  ;;  %v956_v8 = vsel %vm187_vm0, %v660_v53, 0.0  ;;  %v972_v53 = vsel %vm187_vm0, %v668_v20, 0.0  ;;  %v5399_v55 = vld [vmem:[%s7682_s0 + $0x4f0] sm:$0xff] }
 0x127   :  { %v974_v59 = vsel %vm187_vm0, %v669_v25, 0.0  ;;  %v673_v52 = vmul.f32 %v5209_v15, %v5209_v15  ;;  %v675_v15 = vmul.f32 %v5229_v21, %v5229_v21  ;;  %v677_v21 = vmul.f32 %v5249_v27, %v5249_v27  ;;  %v181_v25 = vld [vmem:[%s7682_s0 + $0x518] sm:$0xff] }
 0x128   :  { %v482_v29 = vadd.f32 %v481_v13, %v480_v19  ;;  %v955_v13 = vadd.f32 %v954_v61, %v953_v1  ;;  %v976_v1 = vsel %vm187_vm0, %v670_v34, 0.0  ;;  %v988_v16 = vsel %vm187_vm0, %v676_v18, 0.0 }
 0x129   :  { %v982_v63 = vsel %vm187_vm0, %v673_v52, 0.0  ;;  %v679_v27 = vmul.f32 %v5269_v33, %v5269_v33  ;;  %v681_v33 = vmul.f32 %v5289_v39, %v5289_v39  ;;  %v513_v34 = vsel %vm187_vm0, %v181_v25, 0.0 }
 0x12a   :  { %v484_v38 = vadd.f32 %v483_v23, %v482_v29  ;;  %v957_v19 = vadd.f32 %v956_v8, %v955_v13  ;;  %v960_v23 = vsel %vm187_vm0, %v662_v57, 0.0  ;;  %v962_v29 = vsel %vm187_vm0, %v663_v60, 0.0 }
 0x12b   :  { %v978_v8 = vsel %vm187_vm0, %v671_v2, 0.0  ;;  %v998_v39 = vsel %vm187_vm0, %v681_v33, 0.0  ;;  %v685_v52 = vmul.f32 %v5334_v56, %v5334_v56 }
 0x12c   :  { %v486_v43 = vadd.f32 %v485_v32, %v484_v38  ;;  %v959_v28 = vadd.f32 %v958_v14, %v957_v19  ;;  %v5373_v38 = vld [vmem:[%s7682_s0 + $0x4e0] sm:$0xff] }
 0x12d   :  { %v5425_v19 = vld [vmem:[%s7682_s0 + $0x500] sm:$0xff]  ;;  %v1006_v56 = vsel %vm187_vm0, %v685_v52, 0.0 }
 0x12e   :  { %v488_v9 = vadd.f32 %v487_v4, %v486_v43  ;;  %v961_v32 = vadd.f32 %v960_v23, %v959_v28  ;;  %v966_v4 = vsel %vm187_vm0, %v665_v7, 0.0  ;;  %v499_v43 = vsel %vm187_vm0, %v5373_v38, 0.0 }
 0x12f   :  { %v507_v7 = vsel %vm187_vm0, %v5425_v19, 0.0 }
 0x130   :  { %v490_v58 = vadd.f32 %v489_v46, %v488_v9  ;;  %v963_v3 = vadd.f32 %v962_v29, %v961_v32  ;;  %v5386_v46 = vld [vmem:[%s7682_s0 + $0x4e8] sm:$0xff]  ;;  %v984_v29 = vsel %vm187_vm0, %v674_v12, 0.0  ;;  %v184_v12 = vld [vmem:[%s7682_s0 + $0x530] sm:$0xff] }
 0x132   :  { %v492_v62 = vadd.f32 %v491_v51, %v490_v58  ;;  %v965_v41 = vadd.f32 %v964_v37, %v963_v3  ;;  %v501_v51 = vsel %vm187_vm0, %v5386_v46, 0.0 }
 0x134   :  { %v494_v17 = vadd.f32 %v493_v6, %v492_v62  ;;  %v967_v47 = vadd.f32 %v966_v4, %v965_v41  ;;  %v503_v62 = vsel %vm187_vm0, %v5399_v55, 0.0  ;;  %v5412_v6 = vld [vmem:[%s7682_s0 + $0x4f8] sm:$0xff]  ;;  %v5451_v4 = vld [vmem:[%s7682_s0 + $0x510] sm:$0xff]  ;;  %v990_v41 = vsel %vm187_vm0, %v677_v21, 0.0 }
 0x135   :  { %v505_v14 = vsel %vm187_vm0, %v5412_v6, 0.0 }
 0x136   :  { %v496_v31 = vadd.f32 %v495_v22, %v494_v17  ;;  %v969_v50 = vadd.f32 %v968_v44, %v967_v47  ;;  %v980_v17 = vsel %vm187_vm0, %v672_v5, 0.0  ;;  %v511_v44 = vsel %vm187_vm0, %v5451_v4, 0.0 }
 0x137   :  { %v992_v47 = vsel %vm187_vm0, %v678_v24, 0.0  ;;  %v684_v5 = vmul.f32 %v5319_v48, %v5319_v48  ;;  %v691_v24 = vmul.f32 %v5412_v6, %v5412_v6  ;;  %v694_v6 = vmul.f32 %v5451_v4, %v5451_v4 }
 0x138   :  { %v498_v40 = vadd.f32 %v497_v35, %v496_v31  ;;  %v971_v58 = vadd.f32 %v970_v49, %v969_v50  ;;  %v5438_v31 = vld [vmem:[%s7682_s0 + $0x508] sm:$0xff]  ;;  %v986_v35 = vsel %vm187_vm0, %v675_v15, 0.0 }
 0x139   :  { %v509_v3 = vsel %vm187_vm0, %v5438_v31, 0.0  ;;  %v1004_v48 = vsel %vm187_vm0, %v684_v5, 0.0 }
 0x13a   :  { %v500_v9 = vadd.f32 %v499_v43, %v498_v40  ;;  %v973_v61 = vadd.f32 %v972_v53, %v971_v58  ;;  %v682_v53 = vmul.f32 %v5299_v42, %v5299_v42  ;;  %v182_v58 = vld [vmem:[%s7682_s0 + $0x520] sm:$0xff] }
 0x13c   :  { %v502_v54 = vadd.f32 %v501_v51, %v500_v9  ;;  %v975_v57 = vadd.f32 %v974_v59, %v973_v61  ;;  %v994_v9 = vsel %vm187_vm0, %v679_v27, 0.0  ;;  %v683_v59 = vmul.f32 %v5309_v45, %v5309_v45 }
 0x13d   :  { %v1000_v42 = vsel %vm187_vm0, %v682_v53, 0.0  ;;  %v1024_v53 = vsel %vm187_vm0, %v694_v6, 0.0 }
 0x13e   :  { %v504_v13 = vadd.f32 %v503_v62, %v502_v54  ;;  %v977_v60 = vadd.f32 %v976_v1, %v975_v57  ;;  %v515_v62 = vsel %vm187_vm0, %v182_v58, 0.0  ;;  %v183_v1 = vld [vmem:[%s7682_s0 + $0x528] sm:$0xff]  ;;  %v1002_v45 = vsel %vm187_vm0, %v683_v59, 0.0 }
 0x140   :  { %v979_v22 = vadd.f32 %v978_v8, %v977_v60  ;;  %v506_v23 = vadd.f32 %v505_v14, %v504_v13  ;;  %v517_v60 = vsel %vm187_vm0, %v183_v1, 0.0  ;;  %v686_v14 = vmul.f32 %v5347_v10, %v5347_v10 }
 0x142   :  { %v981_v28 = vadd.f32 %v980_v17, %v979_v22  ;;  %v508_v11 = vadd.f32 %v507_v7, %v506_v23  ;;  %v687_v22 = vmul.f32 %v5360_v26, %v5360_v26  ;;  %v519_v23 = vsel %vm187_vm0, %v184_v12, 0.0  ;;  %v185_v7 = vld [vmem:[%s7682_s0 + $0x538] sm:$0xff] }
 0x143   :  { %v1008_v10 = vsel %vm187_vm0, %v686_v14, 0.0 }
 0x144   :  { %v983_v32 = vadd.f32 %v982_v63, %v981_v28  ;;  %v510_v43 = vadd.f32 %v509_v3, %v508_v11  ;;  %v688_v28 = vmul.f32 %v5373_v38, %v5373_v38  ;;  %v1010_v26 = vsel %vm187_vm0, %v687_v22, 0.0 }
 0x145   :  { %v690_v11 = vmul.f32 %v5399_v55, %v5399_v55 }
 0x146   :  { %v985_v37 = vadd.f32 %v984_v29, %v983_v32  ;;  %v512_v50 = vadd.f32 %v511_v44, %v510_v43  ;;  %v689_v29 = vmul.f32 %v5386_v46, %v5386_v46  ;;  %v1012_v38 = vsel %vm187_vm0, %v688_v28, 0.0 }
 0x147   :  { %v1016_v55 = vsel %vm187_vm0, %v690_v11, 0.0  ;;  %v1018_v44 = vsel %vm187_vm0, %v691_v24, 0.0 }
 0x148   :  { %v987_v40 = vadd.f32 %v986_v35, %v985_v37  ;;  %v514_v54 = vadd.f32 %v513_v34, %v512_v50  ;;  %v521_v35 = vsel %vm187_vm0, %v185_v7, 0.0  ;;  %v186_v37 = vld [vmem:[%s7682_s0 + $0x540] sm:$0xff]  ;;  %v1014_v46 = vsel %vm187_vm0, %v689_v29, 0.0 }
 0x149   :  { %v523_v27 = vsel %vm187_vm0, %v186_v37, 0.0  ;;  %v696_v34 = vmul.f32 %v182_v58, %v182_v58 }
 0x14a   :  { %v989_v20 = vadd.f32 %v988_v16, %v987_v40  ;;  %v516_v8 = vadd.f32 %v515_v62, %v514_v54  ;;  %v698_v54 = vmul.f32 %v184_v12, %v184_v12  ;;  %v699_v62 = vmul.f32 %v185_v7, %v185_v7 }
 0x14b   :  { %v1028_v4 = vsel %vm187_vm0, %v696_v34, 0.0 }
 0x14c   :  { %v991_v49 = vadd.f32 %v990_v41, %v989_v20  ;;  %v518_v15 = vadd.f32 %v517_v60, %v516_v8  ;;  %v692_v41 = vmul.f32 %v5425_v19, %v5425_v19  ;;  %v693_v20 = vmul.f32 %v5438_v31, %v5438_v31 }
 0x14d   :  { %v697_v31 = vmul.f32 %v183_v1, %v183_v1  ;;  %v1032_v58 = vsel %vm187_vm0, %v698_v54, 0.0 }
 0x14e   :  { %v993_v51 = vadd.f32 %v992_v47, %v991_v49  ;;  %v520_v32 = vadd.f32 %v519_v23, %v518_v15  ;;  %v1020_v49 = vsel %vm187_vm0, %v692_v41, 0.0  ;;  %v1022_v50 = vsel %vm187_vm0, %v693_v20, 0.0  ;;  %v3672_v41 = vld [vmem:[%s7682_s0 + $0x2c0] sm:$0xff] }
 0x150   :  { %v995_v2 = vadd.f32 %v994_v9, %v993_v51  ;;  %v522_v16 = vadd.f32 %v521_v35, %v520_v32  ;;  %v695_v9 = vmul.f32 %v181_v25, %v181_v25  ;;  %v1030_v25 = vsel %vm187_vm0, %v697_v31, 0.0  ;;  %v3666_v32 = vld [vmem:[%s7682_s0] sm:$0xff]  ;;  %v3667_v35 = vld [vmem:[%s7682_s0 + $0x8] sm:$0xff] }
 0x152   :  { %v997_v61 = vadd.f32 %v996_v36, %v995_v2  ;;  %v524_v30 = vadd.f32 %v523_v27, %v522_v16  ;;  %v1026_v2 = vsel %vm187_vm0, %v695_v9, 0.0  ;;  %v3676_v9 = vld [vmem:[%s7682_s0 + $0x2d0] sm:$0xff] }
 0x154   :  { %v999_v57 = vadd.f32 %v998_v39, %v997_v61  ;;  %v525_v19 = vrot.slane %v524_v30, 4 }
 0x156   :  { %v1001_v13 = vadd.f32 %v1000_v42, %v999_v57  ;;  %v526_v59 = vadd.f32 %v525_v19, %v524_v30  ;;  %v700_v57 = vmul.f32 %v186_v37, %v186_v37  ;;  %v5576_v30 = vld [vmem:[%s7683_s1] ss:$0 sm:$0xff]  ;;  %v3677_v19 = vld [vmem:[%s7682_s0 + $0x2d8] sm:$0xff] }
 0x158   :  { %v1003_v17 = vadd.f32 %v1002_v45, %v1001_v13  ;;  %v527_v5 = vrot.slane %v526_v59, 2  ;;  %v1034_v45 = vsel %vm187_vm0, %v699_v62, 0.0  ;;  %v1036_v13 = vsel %vm187_vm0, %v700_v57, 0.0 }
 0x15a   :  { %v1005_v63 = vadd.f32 %v1004_v48, %v1003_v17  ;;  %v528_v1 = vadd.f32 %v527_v5, %v526_v59 }
 0x15c   :  { %v1007_v18 = vadd.f32 %v1006_v56, %v1005_v63  ;;  %v529_v14 = vrot.slane %v528_v1, 1 }
 0x15e   :  { %v1009_v21 = vadd.f32 %v1008_v10, %v1007_v18  ;;  %v530_v17 = vadd.f32 %v529_v14, %v528_v1 }
 0x160   :  { %v1011_v3 = vadd.f32 %v1010_v26, %v1009_v21  ;;  %v5535_v15 = vmul.f32 0.000739645, %v530_v17 }
 0x162   :  { %v1013_v40 = vadd.f32 %v1012_v38, %v1011_v3  ;;  %v1045_v10 = vmul.f32 %v5535_v15, %v5535_v15  ;;  %v1048_v21 = vsub.f32 %v3666_v32, %v5535_v15  ;;  %v1049_v11 = vsub.f32 %v3667_v35, %v5535_v15  ;;  %v3668_v38 = vld [vmem:[%s7682_s0 + $0x2b0] sm:$0xff]  ;;  %v3669_v3 = vld [vmem:[%s7682_s0 + $0x2b8] sm:$0xff] }
 0x163   :  { %v1134_v37 = vsub.f32 %v3668_v38, %v5535_v15  ;;  %v1135_v24 = vsub.f32 %v3669_v3, %v5535_v15 }
 0x164   :  { %v1015_v43 = vadd.f32 %v1014_v46, %v1013_v40  ;;  %v3670_v46 = vld [vmem:[%s7682_s0 + $0x10] sm:$0xff]  ;;  %v3671_v40 = vld [vmem:[%s7682_s0 + $0x18] sm:$0xff] }
 0x165   :  { %v1050_v16 = vsub.f32 %v3670_v46, %v5535_v15  ;;  %v1051_v27 = vsub.f32 %v3671_v40, %v5535_v15 }
 0x166   :  { %v1017_v47 = vadd.f32 %v1016_v55, %v1015_v43  ;;  %v1136_v55 = vsub.f32 %v3672_v41, %v5535_v15  ;;  %v3673_v43 = vld [vmem:[%s7682_s0 + $0x2c8] sm:$0xff] }
 0x167   :  { %v1137_v20 = vsub.f32 %v3673_v43, %v5535_v15 }
 0x168   :  { %v1019_v33 = vadd.f32 %v1018_v44, %v1017_v47  ;;  %v3674_v47 = vld [vmem:[%s7682_s0 + $0x20] sm:$0xff] }
 0x169   :  { %v1052_v6 = vsub.f32 %v3674_v47, %v5535_v15 }
 0x16a   :  { %v1021_v51 = vadd.f32 %v1020_v49, %v1019_v33  ;;  %v3675_v49 = vld [vmem:[%s7682_s0 + $0x28] sm:$0xff] }
 0x16b   :  { %v1053_v33 = vsub.f32 %v3675_v49, %v5535_v15 }
 0x16c   :  { %v1023_v36 = vadd.f32 %v1022_v50, %v1021_v51  ;;  %v1138_v50 = vsub.f32 %v3676_v9, %v5535_v15  ;;  %v1139_v51 = vsub.f32 %v3677_v19, %v5535_v15 }
 0x16e   :  { %v1025_v39 = vadd.f32 %v1024_v53, %v1023_v36 }
 0x170   :  { %v1027_v61 = vadd.f32 %v1026_v2, %v1025_v39  ;;  %v5601_v2 = vld [vmem:[%s7684_s2] ss:$0 sm:$0xff] }
 0x172   :  { %v1029_v42 = vadd.f32 %v1028_v4, %v1027_v61 }
 0x174   :  { %v1031_v52 = vadd.f32 %v1030_v25, %v1029_v42 }
 0x176   :  { %v1033_v8 = vadd.f32 %v1032_v58, %v1031_v52 }
 0x178   :  { %v1035_v60 = vadd.f32 %v1034_v45, %v1033_v8 }
 0x17a   :  { %v1037_v48 = vadd.f32 %v1036_v13, %v1035_v60 }
 0x17c   :  { %v1038_v12 = vrot.slane %v1037_v48, 4 }
 0x17e   :  { %v1039_v22 = vadd.f32 %v1038_v12, %v1037_v48 }
 0x180   :  { %v1040_v56 = vrot.slane %v1039_v22, 2 }
 0x182   :  { %v1041_v63 = vadd.f32 %v1040_v56, %v1039_v22 }
 0x184   :  { %v1042_v23 = vrot.slane %v1041_v63, 1 }
 0x186   :  { %v1043_v28 = vadd.f32 %v1042_v23, %v1041_v63  ;;  %v3678_v23 = vld [vmem:[%s7682_s0 + $0x30] sm:$0xff] }
 0x188   :  { %v1044_v7 = vmul.f32 0.000739645, %v1043_v28  ;;  %v1054_v28 = vsub.f32 %v3678_v23, %v5535_v15 }
 0x18a   :  { %v1046_v18 = vsub.f32 %v1044_v7, %v1045_v10  ;;  %v3679_v10 = vld [vmem:[%s7682_s0 + $0x38] sm:$0xff] }
 0x18b   :  { %v1055_v7 = vsub.f32 %v3679_v10, %v5535_v15 }
 0x18c   :  { %v1047_v29 = vmax.f32 %v1046_v18, 0.0  ;;  %v3680_v18 = vld [vmem:[%s7682_s0 + $0x2e0] sm:$0xff] }
 0x18e   :  { %v1217_v26 = vadd.f32 1e-05, %v1047_v29  ;;  %v1140_v29 = vsub.f32 %v3680_v18, %v5535_v15 }
 0x190   :  { %3664 = vrsqrt.f32 %v1217_v26  ;;  %v3681_v26 = vld [vmem:[%s7682_s0 + $0x2e8] sm:$0xff] }
 0x191   :  { %v1141_v32 = vsub.f32 %v3681_v26, %v5535_v15 }
 0x19a   :  { %v5571_v44 = vpop.eup %3664 }
 0x19b   :  { %v1219_v34 = vmul.f32 %v5571_v44, %v1048_v21  ;;  %v1220_v53 = vmul.f32 %v5571_v44, %v1049_v11  ;;  %v1305_v36 = vmul.f32 %v5571_v44, %v1134_v37  ;;  %v1306_v31 = vmul.f32 %v5571_v44, %v1135_v24 }
 0x19c   :  { %v1221_v59 = vmul.f32 %v5571_v44, %v1050_v16  ;;  %v1222_v39 = vmul.f32 %v5571_v44, %v1051_v27  ;;  %v1307_v54 = vmul.f32 %v5571_v44, %v1136_v55  ;;  %v1308_v4 = vmul.f32 %v5571_v44, %v1137_v20 }
 0x19d   :  { %v1395_v61 = vmul.f32 %v5576_v30, %v1219_v34  ;;  %v1396_v62 = vmul.f32 %v5576_v30, %v1220_v53  ;;  %v1481_v25 = vmul.f32 %v5576_v30, %v1305_v36  ;;  %v1482_v5 = vmul.f32 %v5576_v30, %v1306_v31  ;;  %v3682_v31 = vld [vmem:[%s7682_s0 + $0x40] sm:$0xff] }
 0x19e   :  { %v1397_v42 = vmul.f32 %v5576_v30, %v1221_v59  ;;  %v1398_v57 = vmul.f32 %v5576_v30, %v1222_v39  ;;  %v1483_v58 = vmul.f32 %v5576_v30, %v1307_v54  ;;  %v1484_v52 = vmul.f32 %v5576_v30, %v1308_v4  ;;  %v3683_v39 = vld [vmem:[%s7682_s0 + $0x48] sm:$0xff] }
 0x19f   :  { %v1571_v45 = vadd.f32 %v5601_v2, %v1395_v61  ;;  %v1572_v1 = vadd.f32 %v5601_v2, %v1396_v62  ;;  %v1657_v8 = vadd.f32 %v5601_v2, %v1481_v25  ;;  %v1658_v13 = vadd.f32 %v5601_v2, %v1482_v5  ;;  %v3684_v25 = vld [vmem:[%s7682_s0 + $0x2f0] sm:$0xff] }
 0x1a0   :  { %v1573_v60 = vadd.f32 %v5601_v2, %v1397_v42  ;;  %v1574_v14 = vadd.f32 %v5601_v2, %v1398_v57  ;;  %v1659_v48 = vadd.f32 %v5601_v2, %v1483_v58  ;;  %v1660_v12 = vadd.f32 %v5601_v2, %v1484_v52  ;;  %v3685_v52 = vld [vmem:[%s7682_s0 + $0x2f8] sm:$0xff] }
 0x1a1   :  { %v1740_v17 = vmax.f32 %v1571_v45, 0.0  ;;  %v1741_v22 = vmax.f32 %v1572_v1, 0.0  ;;  %v1826_v56 = vmax.f32 %v1657_v8, 0.0  ;;  %v1827_v63 = vmax.f32 %v1658_v13, 0.0 }
 0x1a2   :  { %v1223_v11 = vmul.f32 %v5571_v44, %v1052_v6  ;;  %v1224_v38 = vmul.f32 %v5571_v44, %v1053_v33  ;;  %v1742_v37 = vmax.f32 %v1573_v60, 0.0  ;;  %v1743_v3 = vmax.f32 %v1574_v14, 0.0 }
 0x1a3   :  { %v1909_v21 = vpack.c.bf16 %v1741_v22, %v1740_v17  ;;  %v1952_v35 = vpack.c.bf16 %v1827_v63, %v1826_v56  ;;  %v1309_v24 = vmul.f32 %v5571_v44, %v1138_v50  ;;  %v1310_v46 = vmul.f32 %v5571_v44, %v1139_v51  ;;  %v3686_v63 = vld [vmem:[%s7682_s0 + $0x50] sm:$0xff] }
 0x1a4   :  { %v1828_v16 = vmax.f32 %v1659_v48, 0.0  ;;  %v1829_v40 = vmax.f32 %v1660_v12, 0.0  ;;  %v1399_v27 = vmul.f32 %v5576_v30, %v1223_v11  ;;  %v1400_v41 = vmul.f32 %v5576_v30, %v1224_v38 }
 0x1a5   :  { %3320 = vmatmul.mubr.msk.bf16.vlgmr.msra.gmra.mrb[0].mxu0 %vm187_vm0, %v1909_v21  ;;  %3492 = vmatmul.mubr.msk.bf16.vlgmr.msra.gmra.mrb[0].mxu1 %vm187_vm0, %v1952_v35  ;;  %v1485_v55 = vmul.f32 %v5576_v30, %v1309_v24  ;;  %v1486_v43 = vmul.f32 %v5576_v30, %v1310_v46  ;;  %v1225_v20 = vmul.f32 %v5571_v44, %v1054_v28  ;;  %v3687_v28 = vld [vmem:[%s7682_s0 + $0x58] sm:$0xff] }
 0x1a6   :  { %3323 = vmatprep.mubr.msk.bf16.mxu0 %vm3840_vm1, %v3839_v0  ;;  %3495 = vmatprep.mubr.msk.bf16.mxu1 %vm3840_vm1, %v3839_v0  ;;  %v1226_v47 = vmul.f32 %v5571_v44, %v1055_v7  ;;  %v1910_v6 = vpack.c.bf16 %v1743_v3, %v1742_v37  ;;  %v1575_v49 = vadd.f32 %v5601_v2, %v1399_v27  ;;  %v3688_v7 = vld [vmem:[%s7682_s0 + $0x300] sm:$0xff] }
 0x1a7   :  { %v1576_v33 = vadd.f32 %v5601_v2, %v1400_v41  ;;  %v1311_v9 = vmul.f32 %v5571_v44, %v1140_v29  ;;  %v1953_v50 = vpack.c.bf16 %v1829_v40, %v1828_v16  ;;  %v1661_v19 = vadd.f32 %v5601_v2, %v1485_v55  ;;  %v3689_v29 = vld [vmem:[%s7682_s0 + $0x308] sm:$0xff] }
 0x1a8   :  { %v1662_v51 = vadd.f32 %v5601_v2, %v1486_v43  ;;  %v1312_v34 = vmul.f32 %v5571_v44, %v1141_v32  ;;  %v1401_v53 = vmul.f32 %v5576_v30, %v1225_v20  ;;  %v1402_v36 = vmul.f32 %v5576_v30, %v1226_v47 }
 0x1a9   :  { %v1056_v59 = vsub.f32 %v3682_v31, %v5535_v15  ;;  %v1057_v54 = vsub.f32 %v3683_v39, %v5535_v15  ;;  %v1744_v4 = vmax.f32 %v1575_v49, 0.0  ;;  %v1745_v61 = vmax.f32 %v1576_v33, 0.0  ;;  %v3692_v31 = vld [vmem:[%s7682_s0 + $0x310] sm:$0xff] }
 0x1aa   :  { %v1487_v62 = vmul.f32 %v5576_v30, %v1311_v9  ;;  %v1142_v5 = vsub.f32 %v3684_v25, %v5535_v15  ;;  %v1830_v42 = vmax.f32 %v1661_v19, 0.0  ;;  %v1831_v57 = vmax.f32 %v1662_v51, 0.0  ;;  %v3690_v9 = vld [vmem:[%s7682_s0 + $0x60] sm:$0xff]  ;;  %v3691_v19 = vld [vmem:[%s7682_s0 + $0x68] sm:$0xff] }
 0x1ab   :  { %v1488_v58 = vmul.f32 %v5576_v30, %v1312_v34  ;;  %v1143_v45 = vsub.f32 %v3685_v52, %v5535_v15  ;;  %v1577_v1 = vadd.f32 %v5601_v2, %v1401_v53  ;;  %v1578_v8 = vadd.f32 %v5601_v2, %v1402_v36 }
 0x1ac   :  { %v1911_v13 = vpack.c.bf16 %v1745_v61, %v1744_v4  ;;  %v1663_v60 = vadd.f32 %v5601_v2, %v1487_v62  ;;  %v1227_v14 = vmul.f32 %v5571_v44, %v1056_v59  ;;  %v1228_v48 = vmul.f32 %v5571_v44, %v1057_v54  ;;  %v3693_v61 = vld [vmem:[%s7682_s0 + $0x318] sm:$0xff] }
 0x1ad   :  { %3324 = vmatmul.mubr.msk.bf16.gmra.mrb[4].mxu0 %vm187_vm0, %v1910_v6  ;;  %3496 = vmatmul.mubr.msk.bf16.gmra.mrb[4].mxu1 %vm187_vm0, %v1953_v50  ;;  %v1954_v12 = vpack.c.bf16 %v1831_v57, %v1830_v42  ;;  %v1664_v17 = vadd.f32 %v5601_v2, %v1488_v58  ;;  %v1313_v22 = vmul.f32 %v5571_v44, %v1142_v5  ;;  %v1746_v32 = vmax.f32 %v1577_v1, 0.0 }
 0x1ae   :  { %3327 = vmatprep.mubr.msk.bf16.mxu0 %vm3840_vm1, %v3839_v0  ;;  %3499 = vmatprep.mubr.msk.bf16.mxu1 %vm3840_vm1, %v3839_v0  ;;  %v1314_v56 = vmul.f32 %v5571_v44, %v1143_v45  ;;  %v1058_v23 = vsub.f32 %v3686_v63, %v5535_v15  ;;  %v1059_v10 = vsub.f32 %v3687_v28, %v5535_v15  ;;  %v1747_v21 = vmax.f32 %v1578_v8, 0.0 }
 0x1af   :  { %v1144_v18 = vsub.f32 %v3688_v7, %v5535_v15  ;;  %v1145_v26 = vsub.f32 %v3689_v29, %v5535_v15  ;;  %v1403_v35 = vmul.f32 %v5576_v30, %v1227_v14  ;;  %v1404_v11 = vmul.f32 %v5576_v30, %v1228_v48  ;;  %v3695_v48 = vld [vmem:[%s7682_s0 + $0x78] sm:$0xff] }
 0x1b0   :  { %v1832_v38 = vmax.f32 %v1663_v60, 0.0  ;;  %v1833_v37 = vmax.f32 %v1664_v17, 0.0  ;;  %v1489_v3 = vmul.f32 %v5576_v30, %v1313_v22  ;;  %v1490_v24 = vmul.f32 %v5576_v30, %v1314_v56  ;;  %v3694_v60 = vld [vmem:[%s7682_s0 + $0x70] sm:$0xff]  ;;  %v3696_v17 = vld [vmem:[%s7682_s0 + $0x320] sm:$0xff]  ;;  %v3697_v56 = vld [vmem:[%s7682_s0 + $0x328] sm:$0xff] }
 0x1b1   :  { %v1229_v46 = vmul.f32 %v5571_v44, %v1058_v23  ;;  %v1230_v16 = vmul.f32 %v5571_v44, %v1059_v10  ;;  %v1912_v40 = vpack.c.bf16 %v1747_v21, %v1746_v32  ;;  %v1579_v27 = vadd.f32 %v5601_v2, %v1403_v35 }
 0x1b2   :  { %v1580_v41 = vadd.f32 %v5601_v2, %v1404_v11  ;;  %v1315_v55 = vmul.f32 %v5571_v44, %v1144_v18  ;;  %v1955_v43 = vpack.c.bf16 %v1833_v37, %v1832_v38  ;;  %v1665_v20 = vadd.f32 %v5601_v2, %v1489_v3 }
 0x1b3   :  { %v1666_v47 = vadd.f32 %v5601_v2, %v1490_v24  ;;  %v1316_v6 = vmul.f32 %v5571_v44, %v1145_v26  ;;  %v1405_v49 = vmul.f32 %v5576_v30, %v1229_v46  ;;  %v1406_v33 = vmul.f32 %v5576_v30, %v1230_v16 }
 0x1b4   :  { %v1060_v50 = vsub.f32 %v3690_v9, %v5535_v15  ;;  %v1061_v51 = vsub.f32 %v3691_v19, %v5535_v15  ;;  %v1748_v34 = vmax.f32 %v1579_v27, 0.0  ;;  %v1749_v53 = vmax.f32 %v1580_v41, 0.0  ;;  %v3700_v9 = vld [vmem:[%s7682_s0 + $0x330] sm:$0xff] }
 0x1b5   :  { %3328 = vmatmul.mubr.msk.bf16.gmra.mrb[8].mxu0 %vm187_vm0, %v1911_v13  ;;  %3500 = vmatmul.mubr.msk.bf16.gmra.mrb[8].mxu1 %vm187_vm0, %v1954_v12  ;;  %v1491_v36 = vmul.f32 %v5576_v30, %v1315_v55  ;;  %v1146_v59 = vsub.f32 %v3692_v31, %v5535_v15  ;;  %v1834_v39 = vmax.f32 %v1665_v20, 0.0  ;;  %v1835_v54 = vmax.f32 %v1666_v47, 0.0  ;;  %v3698_v55 = vld [vmem:[%s7682_s0 + $0x80] sm:$0xff]  ;;  %v3699_v20 = vld [vmem:[%s7682_s0 + $0x88] sm:$0xff] }
 0x1b6   :  { %3331 = vmatprep.mubr.msk.bf16.mxu0 %vm3840_vm1, %v3839_v0  ;;  %3503 = vmatprep.mubr.msk.bf16.mxu1 %vm3840_vm1, %v3839_v0  ;;  %v1492_v4 = vmul.f32 %v5576_v30, %v1316_v6  ;;  %v1147_v62 = vsub.f32 %v3693_v61, %v5535_v15  ;;  %v1581_v25 = vadd.f32 %v5601_v2, %v1405_v49 }
 0x1b7   :  { %v1582_v5 = vadd.f32 %v5601_v2, %v1406_v33  ;;  %v1913_v42 = vpack.c.bf16 %v1749_v53, %v1748_v34  ;;  %v1667_v57 = vadd.f32 %v5601_v2, %v1491_v36  ;;  %v1231_v58 = vmul.f32 %v5571_v44, %v1060_v50  ;;  %v3701_v53 = vld [vmem:[%s7682_s0 + $0x338] sm:$0xff] }
 0x1b8   :  { %v1232_v52 = vmul.f32 %v5571_v44, %v1061_v51  ;;  %v1956_v45 = vpack.c.bf16 %v1835_v54, %v1834_v39  ;;  %v1668_v1 = vadd.f32 %v5601_v2, %v1492_v4  ;;  %v1317_v8 = vmul.f32 %v5571_v44, %v1146_v59 }
 0x1b9   :  { %v1318_v13 = vmul.f32 %v5571_v44, %v1147_v62  ;;  %v1062_v14 = vsub.f32 %v3694_v60, %v5535_v15  ;;  %v1063_v12 = vsub.f32 %v3695_v48, %v5535_v15  ;;  %v1148_v22 = vsub.f32 %v3696_v17, %v5535_v15 }
 0x1ba   :  { %v1149_v63 = vsub.f32 %v3697_v56, %v5535_v15  ;;  %v1750_v23 = vmax.f32 %v1581_v25, 0.0  ;;  %v1751_v28 = vmax.f32 %v1582_v5, 0.0  ;;  %v1407_v10 = vmul.f32 %v5576_v30, %v1231_v58 }
 0x1bb   :  { %v1408_v7 = vmul.f32 %v5576_v30, %v1232_v52  ;;  %v1836_v18 = vmax.f32 %v1667_v57, 0.0  ;;  %v1837_v29 = vmax.f32 %v1668_v1, 0.0  ;;  %v1493_v26 = vmul.f32 %v5576_v30, %v1317_v8  ;;  %v3702_v57 = vld [vmem:[%s7682_s0 + $0x90] sm:$0xff]  ;;  %v3703_v52 = vld [vmem:[%s7682_s0 + $0x98] sm:$0xff]  ;;  %v3704_v1 = vld [vmem:[%s7682_s0 + $0x340] sm:$0xff] }
 0x1bc   :  { %v1494_v32 = vmul.f32 %v5576_v30, %v1318_v13  ;;  %v1233_v21 = vmul.f32 %v5571_v44, %v1062_v14  ;;  %v1234_v35 = vmul.f32 %v5571_v44, %v1063_v12  ;;  %v1914_v11 = vpack.c.bf16 %v1751_v28, %v1750_v23  ;;  %v3705_v13 = vld [vmem:[%s7682_s0 + $0x348] sm:$0xff] }
 0x1bd   :  { %3332 = vmatmul.mubr.msk.bf16.gmra.mrb[12].mxu0 %vm187_vm0, %v1912_v40  ;;  %3504 = vmatmul.mubr.msk.bf16.gmra.mrb[12].mxu1 %vm187_vm0, %v1955_v43  ;;  %v1583_v38 = vadd.f32 %v5601_v2, %v1407_v10  ;;  %v1584_v37 = vadd.f32 %v5601_v2, %v1408_v7  ;;  %v1319_v3 = vmul.f32 %v5571_v44, %v1148_v22 }
 0x1be   :  { %3335 = vmatprep.mubr.msk.bf16.mxu0 %vm3840_vm1, %v3839_v0  ;;  %3507 = vmatprep.mubr.msk.bf16.mxu1 %vm3840_vm1, %v3839_v0  ;;  %v1957_v24 = vpack.c.bf16 %v1837_v29, %v1836_v18  ;;  %v1669_v46 = vadd.f32 %v5601_v2, %v1493_v26  ;;  %v1670_v16 = vadd.f32 %v5601_v2, %v1494_v32 }
 0x1bf   :  { %v1320_v40 = vmul.f32 %v5571_v44, %v1149_v63  ;;  %v1409_v27 = vmul.f32 %v5576_v30, %v1233_v21  ;;  %v1410_v41 = vmul.f32 %v5576_v30, %v1234_v35  ;;  %v1064_v43 = vsub.f32 %v3698_v55, %v5535_v15  ;;  %v3708_v55 = vld [vmem:[%s7682_s0 + $0x350] sm:$0xff] }
 0x1c0   :  { %v1065_v47 = vsub.f32 %v3699_v20, %v5535_v15  ;;  %v1752_v6 = vmax.f32 %v1583_v38, 0.0  ;;  %v1753_v49 = vmax.f32 %v1584_v37, 0.0  ;;  %v1495_v33 = vmul.f32 %v5576_v30, %v1319_v3  ;;  %v3706_v3 = vld [vmem:[%s7682_s0 + $0xa0] sm:$0xff] }
 0x1c1   :  { %v1150_v50 = vsub.f32 %v3700_v9, %v5535_v15  ;;  %v1838_v19 = vmax.f32 %v1669_v46, 0.0  ;;  %v1839_v51 = vmax.f32 %v1670_v16, 0.0  ;;  %v1496_v34 = vmul.f32 %v5576_v30, %v1320_v40  ;;  %v3707_v46 = vld [vmem:[%s7682_s0 + $0xa8] sm:$0xff] }
 0x1c2   :  { %v1151_v36 = vsub.f32 %v3701_v53, %v5535_v15  ;;  %v1585_v31 = vadd.f32 %v5601_v2, %v1409_v27  ;;  %v1586_v59 = vadd.f32 %v5601_v2, %v1410_v41  ;;  %v1915_v39 = vpack.c.bf16 %v1753_v49, %v1752_v6  ;;  %v3709_v49 = vld [vmem:[%s7682_s0 + $0x358] sm:$0xff] }
 0x1c3   :  { %v1671_v54 = vadd.f32 %v5601_v2, %v1495_v33  ;;  %v1235_v4 = vmul.f32 %v5571_v44, %v1064_v43  ;;  %v1236_v61 = vmul.f32 %v5571_v44, %v1065_v47  ;;  %v1958_v62 = vpack.c.bf16 %v1839_v51, %v1838_v19 }
 0x1c4   :  { %v1672_v25 = vadd.f32 %v5601_v2, %v1496_v34  ;;  %v1321_v5 = vmul.f32 %v5571_v44, %v1150_v50  ;;  %v1066_v58 = vsub.f32 %v3702_v57, %v5535_v15  ;;  %v1152_v8 = vsub.f32 %v3704_v1, %v5535_v15 }
 0x1c5   :  { %3336 = vmatmul.mubr.msk.bf16.gmra.mrb[16].mxu0 %vm187_vm0, %v1913_v42  ;;  %3508 = vmatmul.mubr.msk.bf16.gmra.mrb[16].mxu1 %vm187_vm0, %v1956_v45  ;;  %v1322_v42 = vmul.f32 %v5571_v44, %v1151_v36  ;;  %v1067_v45 = vsub.f32 %v3703_v52, %v5535_v15  ;;  %v1153_v60 = vsub.f32 %v3705_v13, %v5535_v15  ;;  %v1754_v14 = vmax.f32 %v1585_v31, 0.0 }
 0x1c6   :  { %3339 = vmatprep.mubr.msk.bf16.mxu0 %vm3840_vm1, %v3839_v0  ;;  %3511 = vmatprep.mubr.msk.bf16.mxu1 %vm3840_vm1, %v3839_v0  ;;  %v1755_v48 = vmax.f32 %v1586_v59, 0.0  ;;  %v1411_v12 = vmul.f32 %v5576_v30, %v1235_v4  ;;  %v1412_v17 = vmul.f32 %v5576_v30, %v1236_v61  ;;  %v1840_v22 = vmax.f32 %v1671_v54, 0.0  ;;  %v3710_v54 = vld [vmem:[%s7682_s0 + $0xb0] sm:$0xff]  ;;  %v3711_v61 = vld [vmem:[%s7682_s0 + $0xb8] sm:$0xff] }
 0x1c7   :  { %v1841_v56 = vmax.f32 %v1672_v25, 0.0  ;;  %v1497_v63 = vmul.f32 %v5576_v30, %v1321_v5  ;;  %v1498_v23 = vmul.f32 %v5576_v30, %v1322_v42  ;;  %v1237_v28 = vmul.f32 %v5571_v44, %v1066_v58  ;;  %v3712_v25 = vld [vmem:[%s7682_s0 + $0x360] sm:$0xff]  ;;  %v3713_v42 = vld [vmem:[%s7682_s0 + $0x368] sm:$0xff] }
 0x1c8   :  { %v1238_v10 = vmul.f32 %v5571_v44, %v1067_v45  ;;  %v1916_v7 = vpack.c.bf16 %v1755_v48, %v1754_v14  ;;  %v1587_v18 = vadd.f32 %v5601_v2, %v1411_v12  ;;  %v1588_v29 = vadd.f32 %v5601_v2, %v1412_v17 }
 0x1c9   :  { %v1323_v26 = vmul.f32 %v5571_v44, %v1152_v8  ;;  %v1959_v32 = vpack.c.bf16 %v1841_v56, %v1840_v22  ;;  %v1673_v21 = vadd.f32 %v5601_v2, %v1497_v63  ;;  %v1674_v35 = vadd.f32 %v5601_v2, %v1498_v23 }
 0x1ca   :  { %v1413_v38 = vmul.f32 %v5576_v30, %v1237_v28  ;;  %v1414_v37 = vmul.f32 %v5576_v30, %v1238_v10  ;;  %v1069_v16 = vsub.f32 %v3707_v46, %v5535_v15  ;;  %v1756_v40 = vmax.f32 %v1587_v18, 0.0 }
 0x1cb   :  { %v1757_v27 = vmax.f32 %v1588_v29, 0.0  ;;  %v1499_v41 = vmul.f32 %v5576_v30, %v1323_v26  ;;  %v1154_v43 = vsub.f32 %v3708_v55, %v5535_v15  ;;  %v1842_v20 = vmax.f32 %v1673_v21, 0.0  ;;  %v3714_v26 = vld [vmem:[%s7682_s0 + $0xc0] sm:$0xff]  ;;  %v3715_v21 = vld [vmem:[%s7682_s0 + $0xc8] sm:$0xff] }
 0x1cc   :  { %v1843_v47 = vmax.f32 %v1674_v35, 0.0  ;;  %v1155_v33 = vsub.f32 %v3709_v49, %v5535_v15  ;;  %v1589_v9 = vadd.f32 %v5601_v2, %v1413_v38  ;;  %v1590_v50 = vadd.f32 %v5601_v2, %v1414_v37 }
 0x1cd   :  { %3340 = vmatmul.mubr.msk.bf16.gmra.mrb[20].mxu0 %vm187_vm0, %v1914_v11  ;;  %3512 = vmatmul.mubr.msk.bf16.gmra.mrb[20].mxu1 %vm187_vm0, %v1957_v24  ;;  %v1324_v11 = vmul.f32 %v5571_v44, %v1153_v60  ;;  %v1068_v24 = vsub.f32 %v3706_v3, %v5535_v15  ;;  %v1917_v19 = vpack.c.bf16 %v1757_v27, %v1756_v40  ;;  %v3716_v3 = vld [vmem:[%s7682_s0 + $0x370] sm:$0xff]  ;;  %v3717_v27 = vld [vmem:[%s7682_s0 + $0x378] sm:$0xff] }
 0x1ce   :  { %3343 = vmatprep.mubr.msk.bf16.mxu0 %vm3840_vm1, %v3839_v0  ;;  %3515 = vmatprep.mubr.msk.bf16.mxu1 %vm3840_vm1, %v3839_v0  ;;  %v1675_v51 = vadd.f32 %v5601_v2, %v1499_v41  ;;  %v1240_v53 = vmul.f32 %v5571_v44, %v1069_v16  ;;  %v1960_v36 = vpack.c.bf16 %v1843_v47, %v1842_v20  ;;  %v1758_v58 = vmax.f32 %v1589_v9, 0.0 }
 0x1cf   :  { %v1500_v6 = vmul.f32 %v5576_v30, %v1324_v11  ;;  %v1239_v34 = vmul.f32 %v5571_v44, %v1068_v24  ;;  %v1325_v59 = vmul.f32 %v5571_v44, %v1154_v43  ;;  %v1070_v4 = vsub.f32 %v3710_v54, %v5535_v15 }
 0x1d0   :  { %v1156_v5 = vsub.f32 %v3712_v25, %v5535_v15  ;;  %v1157_v57 = vsub.f32 %v3713_v42, %v5535_v15  ;;  %v1759_v52 = vmax.f32 %v1590_v50, 0.0  ;;  %v1416_v1 = vmul.f32 %v5576_v30, %v1240_v53  ;;  %v3718_v53 = vld [vmem:[%s7682_s0 + $0xd0] sm:$0xff] }
 0x1d1   :  { %v1676_v31 = vadd.f32 %v5601_v2, %v1500_v6  ;;  %v1415_v45 = vmul.f32 %v5576_v30, %v1239_v34  ;;  %v1844_v8 = vmax.f32 %v1675_v51, 0.0  ;;  %v1501_v60 = vmul.f32 %v5576_v30, %v1325_v59 }
 0x1d2   :  { %v1241_v48 = vmul.f32 %v5571_v44, %v1070_v4  ;;  %v1918_v17 = vpack.c.bf16 %v1759_v52, %v1758_v58  ;;  %v1592_v56 = vadd.f32 %v5601_v2, %v1416_v1  ;;  %v1327_v63 = vmul.f32 %v5571_v44, %v1156_v5  ;;  %v3720_v4 = vld [vmem:[%s7682_s0 + $0x380] sm:$0xff] }
 0x1d3   :  { %v1845_v13 = vmax.f32 %v1676_v31, 0.0  ;;  %v1591_v22 = vadd.f32 %v5601_v2, %v1415_v45  ;;  %v1677_v28 = vadd.f32 %v5601_v2, %v1501_v60  ;;  %v1073_v35 = vsub.f32 %v3715_v21, %v5535_v15  ;;  %v3719_v31 = vld [vmem:[%s7682_s0 + $0xd8] sm:$0xff] }
 0x1d4   :  { %v1417_v18 = vmul.f32 %v5576_v30, %v1241_v48  ;;  %v1761_v38 = vmax.f32 %v1592_v56, 0.0  ;;  %v1503_v37 = vmul.f32 %v5576_v30, %v1327_v63  ;;  %v1158_v24 = vsub.f32 %v3716_v3, %v5535_v15  ;;  %v3722_v56 = vld [vmem:[%s7682_s0 + $0xe0] sm:$0xff] }
 0x1d5   :  { %3344 = vmatmul.mubr.msk.bf16.gmra.mrb[24].mxu0 %vm187_vm0, %v1915_v39  ;;  %3516 = vmatmul.mubr.msk.bf16.gmra.mrb[24].mxu1 %vm187_vm0, %v1958_v62  ;;  %v1326_v39 = vmul.f32 %v5571_v44, %v1155_v33  ;;  %v1071_v62 = vsub.f32 %v3711_v61, %v5535_v15  ;;  %v1961_v23 = vpack.c.bf16 %v1845_v13, %v1844_v8  ;;  %v1760_v11 = vmax.f32 %v1591_v22, 0.0 }
 0x1d6   :  { %3347 = vmatprep.mubr.msk.bf16.mxu0 %vm3840_vm1, %v3839_v0  ;;  %3519 = vmatprep.mubr.msk.bf16.mxu1 %vm3840_vm1, %v3839_v0  ;;  %v1846_v46 = vmax.f32 %v1677_v28, 0.0  ;;  %v1159_v41 = vsub.f32 %v3717_v27, %v5535_v15  ;;  %v1593_v55 = vadd.f32 %v5601_v2, %v1417_v18  ;;  %v1679_v47 = vadd.f32 %v5601_v2, %v1503_v37 }
 0x1d7   :  { %v1502_v14 = vmul.f32 %v5576_v30, %v1326_v39  ;;  %v1242_v12 = vmul.f32 %v5571_v44, %v1071_v62  ;;  %v1919_v20 = vpack.c.bf16 %v1761_v38, %v1760_v11  ;;  %v1244_v49 = vmul.f32 %v5571_v44, %v1073_v35  ;;  %v3721_v62 = vld [vmem:[%s7682_s0 + $0x388] sm:$0xff] }
 0x1d8   :  { %v1329_v50 = vmul.f32 %v5571_v44, %v1158_v24  ;;  %v1762_v51 = vmax.f32 %v1593_v55, 0.0  ;;  %v1075_v59 = vsub.f32 %v3719_v31, %v5535_v15  ;;  %v1160_v61 = vsub.f32 %v3720_v4, %v5535_v15 }
 0x1d9   :  { %v1678_v10 = vadd.f32 %v5601_v2, %v1502_v14  ;;  %v1418_v29 = vmul.f32 %v5576_v30, %v1242_v12  ;;  %v1420_v54 = vmul.f32 %v5576_v30, %v1244_v49  ;;  %v1161_v25 = vsub.f32 %v3721_v62, %v5535_v15 }
 0x1da   :  { %v1848_v5 = vmax.f32 %v1679_v47, 0.0  ;;  %v1246_v13 = vmul.f32 %v5571_v44, %v1075_v59  ;;  %v1331_v60 = vmul.f32 %v5571_v44, %v1160_v61  ;;  %v1076_v63 = vsub.f32 %v3722_v56, %v5535_v15 }
 0x1db   :  { %v1847_v16 = vmax.f32 %v1678_v10, 0.0  ;;  %v1594_v43 = vadd.f32 %v5601_v2, %v1418_v29  ;;  %v1596_v8 = vadd.f32 %v5601_v2, %v1420_v54  ;;  %v3724_v10 = vld [vmem:[%s7682_s0 + $0x390] sm:$0xff]  ;;  %v3729_v54 = vld [vmem:[%s7682_s0 + $0x3a8] sm:$0xff] }
 0x1dc   :  { %v1507_v38 = vmul.f32 %v5576_v30, %v1331_v60  ;;  %v1247_v24 = vmul.f32 %v5571_v44, %v1076_v63  ;;  %v1165_v4 = vsub.f32 %v3729_v54, %v5535_v15  ;;  %v3730_v60 = vld [vmem:[%s7682_s0 + $0x100] sm:$0xff]  ;;  %v3732_v63 = vld [vmem:[%s7682_s0 + $0x3b0] sm:$0xff] }
 0x1dd   :  { %3348 = vmatmul.mubr.msk.bf16.gmra.mrb[28].mxu0 %vm187_vm0, %v1916_v7  ;;  %3520 = vmatmul.mubr.msk.bf16.gmra.mrb[28].mxu1 %vm187_vm0, %v1959_v32  ;;  %v1328_v7 = vmul.f32 %v5571_v44, %v1157_v57  ;;  %v1072_v32 = vsub.f32 %v3714_v26, %v5535_v15  ;;  %v1962_v33 = vpack.c.bf16 %v1847_v16, %v1846_v46  ;;  %v1763_v34 = vmax.f32 %v1594_v43, 0.0 }
 0x1de   :  { %3351 = vmatprep.mubr.msk.bf16.mxu0 %vm3840_vm1, %v3839_v0  ;;  %3523 = vmatprep.mubr.msk.bf16.mxu1 %vm3840_vm1, %v3839_v0  ;;  %v1505_v57 = vmul.f32 %v5576_v30, %v1329_v50  ;;  %v1765_v29 = vmax.f32 %v1596_v8, 0.0  ;;  %v1422_v26 = vmul.f32 %v5576_v30, %v1246_v13  ;;  %v1683_v55 = vadd.f32 %v5601_v2, %v1507_v38  ;;  %v3728_v50 = vld [vmem:[%s7682_s0 + $0x3a0] sm:$0xff] }
 0x1df   :  { %v1504_v40 = vmul.f32 %v5576_v30, %v1328_v7  ;;  %v1243_v6 = vmul.f32 %v5571_v44, %v1072_v32  ;;  %v1920_v52 = vpack.c.bf16 %v1763_v34, %v1762_v51  ;;  %v1162_v7 = vsub.f32 %v3724_v10, %v5535_v15  ;;  %v3725_v32 = vld [vmem:[%s7682_s0 + $0x398] sm:$0xff] }
 0x1e0   :  { %v1681_v48 = vadd.f32 %v5601_v2, %v1505_v57  ;;  %v1163_v21 = vsub.f32 %v3725_v32, %v5535_v15  ;;  %v1598_v16 = vadd.f32 %v5601_v2, %v1422_v26  ;;  %v1423_v34 = vmul.f32 %v5576_v30, %v1247_v24 }
 0x1e1   :  { %v1680_v9 = vadd.f32 %v5601_v2, %v1504_v40  ;;  %v1419_v39 = vmul.f32 %v5576_v30, %v1243_v6  ;;  %v1333_v27 = vmul.f32 %v5571_v44, %v1162_v7  ;;  %v3726_v6 = vld [vmem:[%s7682_s0 + $0xf0] sm:$0xff]  ;;  %v1852_v31 = vmax.f32 %v1683_v55, 0.0 }
 0x1e2   :  { %v1850_v35 = vmax.f32 %v1681_v48, 0.0  ;;  %v1078_v49 = vsub.f32 %v3726_v6, %v5535_v15  ;;  %v1767_v51 = vmax.f32 %v1598_v16, 0.0  ;;  %v3731_v48 = vld [vmem:[%s7682_s0 + $0x108] sm:$0xff] }
 0x1e3   :  { %v1849_v42 = vmax.f32 %v1680_v9, 0.0  ;;  %v1595_v1 = vadd.f32 %v5601_v2, %v1419_v39 }
 0x1e4   :  { %v1249_v61 = vmul.f32 %v5571_v44, %v1078_v49  ;;  %v3736_v49 = vld [vmem:[%s7682_s0 + $0x3c0] sm:$0xff] }
 0x1e5   :  { %3352 = vmatmul.mubr.msk.bf16.gmra.mrb[32].mxu0 %vm187_vm0, %v1917_v19  ;;  %3524 = vmatmul.mubr.msk.bf16.gmra.mrb[32].mxu1 %vm187_vm0, %v1960_v36  ;;  %v1330_v19 = vmul.f32 %v5571_v44, %v1159_v41  ;;  %v1074_v36 = vsub.f32 %v3718_v53, %v5535_v15  ;;  %v1963_v14 = vpack.c.bf16 %v1849_v42, %v1848_v5  ;;  %v1764_v18 = vmax.f32 %v1595_v1, 0.0 }
 0x1e6   :  { %3355 = vmatprep.mubr.msk.bf16.mxu0 %vm3840_vm1, %v3839_v0  ;;  %3527 = vmatprep.mubr.msk.bf16.mxu1 %vm3840_vm1, %v3839_v0  ;;  %v1599_v5 = vadd.f32 %v5601_v2, %v1423_v34  ;;  %v1336_v1 = vmul.f32 %v5571_v44, %v1165_v4  ;;  %v1425_v8 = vmul.f32 %v5576_v30, %v1249_v61 }
 0x1e7   :  { %v1506_v58 = vmul.f32 %v5576_v30, %v1330_v19  ;;  %v1245_v45 = vmul.f32 %v5571_v44, %v1074_v36  ;;  %v1921_v46 = vpack.c.bf16 %v1765_v29, %v1764_v18  ;;  %v1164_v19 = vsub.f32 %v3728_v50, %v5535_v15  ;;  %v3733_v18 = vld [vmem:[%s7682_s0 + $0x3b8] sm:$0xff] }
 0x1e8   :  { %v1509_v36 = vmul.f32 %v5576_v30, %v1333_v27  ;;  %v1512_v7 = vmul.f32 %v5576_v30, %v1336_v1  ;;  %v1167_v29 = vsub.f32 %v3733_v18, %v5535_v15  ;;  %v1601_v26 = vadd.f32 %v5601_v2, %v1425_v8 }
 0x1e9   :  { %v1682_v12 = vadd.f32 %v5601_v2, %v1506_v58  ;;  %v1421_v22 = vmul.f32 %v5576_v30, %v1245_v45  ;;  %v1335_v45 = vmul.f32 %v5571_v44, %v1164_v19 }
 0x1ea   :  { %v1685_v57 = vadd.f32 %v5601_v2, %v1509_v36  ;;  %v1688_v24 = vadd.f32 %v5601_v2, %v1512_v7  ;;  %v1770_v16 = vmax.f32 %v1601_v26, 0.0 }
 0x1eb   :  { %v1851_v11 = vmax.f32 %v1682_v12, 0.0  ;;  %v1597_v3 = vadd.f32 %v5601_v2, %v1421_v22  ;;  %v1081_v12 = vsub.f32 %v3731_v48, %v5535_v15  ;;  %v1511_v10 = vmul.f32 %v5576_v30, %v1335_v45 }
 0x1ec   :  { %v1854_v56 = vmax.f32 %v1685_v57, 0.0  ;;  %v1857_v50 = vmax.f32 %v1688_v24, 0.0  ;;  %v3738_v57 = vld [vmem:[%s7682_s0 + $0x120] sm:$0xff] }
 0x1ed   :  { %3356 = vmatmul.mubr.msk.bf16.gmra.mrb[36].mxu0 %vm187_vm0, %v1918_v17  ;;  %3528 = vmatmul.mubr.msk.bf16.gmra.mrb[36].mxu1 %vm187_vm0, %v1961_v23  ;;  %v1332_v17 = vmul.f32 %v5571_v44, %v1161_v25  ;;  %v3723_v23 = vld [vmem:[%s7682_s0 + $0xe8] sm:$0xff]  ;;  %v1964_v41 = vpack.c.bf16 %v1851_v11, %v1850_v35  ;;  %v1766_v47 = vmax.f32 %v1597_v3, 0.0  ;;  %v1252_v11 = vmul.f32 %v5571_v44, %v1081_v12  ;;  %v3740_v12 = vld [vmem:[%s7682_s0 + $0x3d0] sm:$0xff] }
 0x1ee   :  { %3359 = vmatprep.mubr.msk.bf16.mxu0 %vm3840_vm1, %v3839_v0  ;;  %3531 = vmatprep.mubr.msk.bf16.mxu1 %vm3840_vm1, %v3839_v0  ;;  %v1077_v28 = vsub.f32 %v3723_v23, %v5535_v15  ;;  %v1166_v23 = vsub.f32 %v3732_v63, %v5535_v15  ;;  %v1687_v3 = vadd.f32 %v5601_v2, %v1511_v10 }
 0x1ef   :  { %v1508_v37 = vmul.f32 %v5576_v30, %v1332_v17  ;;  %v1922_v25 = vpack.c.bf16 %v1767_v51, %v1766_v47  ;;  %v1768_v17 = vmax.f32 %v1599_v5, 0.0  ;;  %v3735_v47 = vld [vmem:[%s7682_s0 + $0x118] sm:$0xff]  ;;  %v3737_v51 = vld [vmem:[%s7682_s0 + $0x3c8] sm:$0xff] }
 0x1f0   :  { %v1248_v40 = vmul.f32 %v5571_v44, %v1077_v28  ;;  %v1337_v38 = vmul.f32 %v5571_v44, %v1166_v23  ;;  %v1083_v6 = vsub.f32 %v3735_v47, %v5535_v15  ;;  %v1169_v34 = vsub.f32 %v3737_v51, %v5535_v15  ;;  %v3745_v47 = vld [vmem:[%s7682_s0 + $0x3e8] sm:$0xff] }
 0x1f1   :  { %v1684_v43 = vadd.f32 %v5601_v2, %v1508_v37 }
 0x1f2   :  { %v1424_v53 = vmul.f32 %v5576_v30, %v1248_v40 }
 0x1f3   :  { %v1853_v59 = vmax.f32 %v1684_v43, 0.0  ;;  %v1428_v43 = vmul.f32 %v5576_v30, %v1252_v11 }
 0x1f4   :  { %v1600_v42 = vadd.f32 %v5601_v2, %v1424_v53 }
 0x1f5   :  { %3360 = vmatmul.mubr.msk.bf16.gmra.mrb[40].mxu0 %vm187_vm0, %v1919_v20  ;;  %3532 = vmatmul.mubr.msk.bf16.gmra.mrb[40].mxu1 %vm187_vm0, %v1962_v33  ;;  %v1334_v20 = vmul.f32 %v5571_v44, %v1163_v21  ;;  %v3727_v33 = vld [vmem:[%s7682_s0 + $0xf8] sm:$0xff]  ;;  %v1965_v58 = vpack.c.bf16 %v1853_v59, %v1852_v31  ;;  %v1604_v31 = vadd.f32 %v5601_v2, %v1428_v43 }
 0x1f6   :  { %3363 = vmatprep.mubr.msk.bf16.mxu0 %vm3840_vm1, %v3839_v0  ;;  %3535 = vmatprep.mubr.msk.bf16.mxu1 %vm3840_vm1, %v3839_v0  ;;  %v1079_v9 = vsub.f32 %v3727_v33, %v5535_v15  ;;  %v1769_v22 = vmax.f32 %v1600_v42, 0.0  ;;  %v1168_v33 = vsub.f32 %v3736_v49, %v5535_v15 }
 0x1f7   :  { %v1510_v39 = vmul.f32 %v5576_v30, %v1334_v20  ;;  %v1513_v20 = vmul.f32 %v5576_v30, %v1337_v38  ;;  %v1773_v1 = vmax.f32 %v1604_v31, 0.0 }
 0x1f8   :  { %v1250_v62 = vmul.f32 %v5571_v44, %v1079_v9  ;;  %v1923_v35 = vpack.c.bf16 %v1769_v22, %v1768_v17  ;;  %v1856_v9 = vmax.f32 %v1687_v3, 0.0  ;;  %v1339_v54 = vmul.f32 %v5571_v44, %v1168_v33  ;;  %v3741_v22 = vld [vmem:[%s7682_s0 + $0x3d8] sm:$0xff] }
 0x1f9   :  { %v1689_v59 = vadd.f32 %v5601_v2, %v1513_v20  ;;  %v1170_v17 = vsub.f32 %v3740_v12, %v5535_v15 }
 0x1fa   :  { %v1426_v13 = vmul.f32 %v5576_v30, %v1250_v62  ;;  %v1967_v61 = vpack.c.bf16 %v1857_v50, %v1856_v9 }
 0x1fb   :  { %v1858_v8 = vmax.f32 %v1689_v59, 0.0 }
 0x1fc   :  { %v1602_v32 = vadd.f32 %v5601_v2, %v1426_v13 }
 0x1fd   :  { %3364 = vmatmul.mubr.msk.bf16.gmra.mrb[44].mxu0 %vm187_vm0, %v1920_v52  ;;  %3536 = vmatmul.mubr.msk.bf16.gmra.mrb[44].mxu1 %vm187_vm0, %v1963_v14  ;;  %v1686_v52 = vadd.f32 %v5601_v2, %v1510_v39  ;;  %v1080_v14 = vsub.f32 %v3730_v60, %v5535_v15  ;;  %v1254_v39 = vmul.f32 %v5571_v44, %v1083_v6 }
 0x1fe   :  { %3367 = vmatprep.mubr.msk.bf16.mxu0 %vm3840_vm1, %v3839_v0  ;;  %3539 = vmatprep.mubr.msk.bf16.mxu1 %vm3840_vm1, %v3839_v0  ;;  %v1771_v40 = vmax.f32 %v1602_v32, 0.0  ;;  %v1515_v60 = vmul.f32 %v5576_v30, %v1339_v54  ;;  %v1341_v32 = vmul.f32 %v5571_v44, %v1170_v17  ;;  %v1173_v6 = vsub.f32 %v3745_v47, %v5535_v15 }
 0x1ff   :  { %v1855_v28 = vmax.f32 %v1686_v52, 0.0  ;;  %v1251_v21 = vmul.f32 %v5571_v44, %v1080_v14  ;;  %v3739_v52 = vld [vmem:[%s7682_s0 + $0x128] sm:$0xff]  ;;  %v1430_v13 = vmul.f32 %v5576_v30, %v1254_v39 }
 0x200   :  { %v1924_v4 = vpack.c.bf16 %v1771_v40, %v1770_v16  ;;  %v1085_v45 = vsub.f32 %v3739_v52, %v5535_v15  ;;  %v1691_v18 = vadd.f32 %v5601_v2, %v1515_v60  ;;  %v3743_v16 = vld [vmem:[%s7682_s0 + $0x138] sm:$0xff]  ;;  %v1517_v43 = vmul.f32 %v5576_v30, %v1341_v32 }
 0x201   :  { %v1966_v37 = vpack.c.bf16 %v1855_v28, %v1854_v56  ;;  %v1427_v27 = vmul.f32 %v5576_v30, %v1251_v21  ;;  %v1171_v56 = vsub.f32 %v3741_v22, %v5535_v15  ;;  %v1606_v7 = vadd.f32 %v5601_v2, %v1430_v13 }
 0x202   :  { %v1256_v28 = vmul.f32 %v5571_v44, %v1085_v45  ;;  %v1087_v40 = vsub.f32 %v3743_v16, %v5535_v15  ;;  %v1344_v31 = vmul.f32 %v5571_v44, %v1173_v6 }
 0x203   :  { %v1603_v53 = vadd.f32 %v5601_v2, %v1427_v27  ;;  %v1342_v21 = vmul.f32 %v5571_v44, %v1171_v56  ;;  %v1775_v24 = vmax.f32 %v1606_v7, 0.0  ;;  %v3744_v27 = vld [vmem:[%s7682_s0 + $0x3e0] sm:$0xff] }
 0x204   :  { %v1432_v38 = vmul.f32 %v5576_v30, %v1256_v28 }
 0x205   :  { %3368 = vmatmul.mubr.msk.bf16.gmra.mrb[48].mxu0 %vm187_vm0, %v1921_v46  ;;  %3540 = vmatmul.mubr.msk.bf16.gmra.mrb[48].mxu1 %vm187_vm0, %v1964_v41  ;;  %v1338_v46 = vmul.f32 %v5571_v44, %v1167_v29  ;;  %v3734_v41 = vld [vmem:[%s7682_s0 + $0x110] sm:$0xff]  ;;  %v1772_v5 = vmax.f32 %v1603_v53, 0.0  ;;  %v1518_v20 = vmul.f32 %v5576_v30, %v1342_v21  ;;  %v1693_v53 = vadd.f32 %v5601_v2, %v1517_v43 }
 0x206   :  { %3371 = vmatprep.mubr.msk.bf16.mxu0 %vm3840_vm1, %v3839_v0  ;;  %3543 = vmatprep.mubr.msk.bf16.mxu1 %vm3840_vm1, %v3839_v0  ;;  %v1082_v55 = vsub.f32 %v3734_v41, %v5535_v15  ;;  %v1172_v41 = vsub.f32 %v3744_v27, %v5535_v15  ;;  %v1608_v33 = vadd.f32 %v5601_v2, %v1432_v38 }
 0x207   :  { %v1514_v19 = vmul.f32 %v5576_v30, %v1338_v46  ;;  %v1925_v10 = vpack.c.bf16 %v1773_v1, %v1772_v5  ;;  %v1860_v46 = vmax.f32 %v1691_v18, 0.0  ;;  %v3747_v5 = vld [vmem:[%s7682_s0 + $0x148] sm:$0xff]  ;;  %v1862_v52 = vmax.f32 %v1693_v53, 0.0  ;;  %v3750_v18 = vld [vmem:[%s7682_s0 + $0x150] sm:$0xff] }
 0x208   :  { %v1253_v36 = vmul.f32 %v5571_v44, %v1082_v55  ;;  %v1343_v51 = vmul.f32 %v5571_v44, %v1172_v41  ;;  %v1777_v39 = vmax.f32 %v1608_v33, 0.0  ;;  %v1520_v1 = vmul.f32 %v5576_v30, %v1344_v31 }
 0x209   :  { %v1690_v62 = vadd.f32 %v5601_v2, %v1514_v19  ;;  %v1258_v19 = vmul.f32 %v5571_v44, %v1087_v40  ;;  %v6273_v40 = vld [vmem:[%s7684_s2] ss:$0 sm:$0xff] }
 0x20a   :  { %v1429_v42 = vmul.f32 %v5576_v30, %v1253_v36  ;;  %v1694_v36 = vadd.f32 %v5601_v2, %v1518_v20 }
 0x20b   :  { %v1859_v14 = vmax.f32 %v1690_v62, 0.0  ;;  %v1434_v62 = vmul.f32 %v5576_v30, %v1258_v19 }
 0x20c   :  { %v1605_v63 = vadd.f32 %v5601_v2, %v1429_v42  ;;  %v1089_v42 = vsub.f32 %v3747_v5, %v5535_v15  ;;  %v1863_v45 = vmax.f32 %v1694_v36, 0.0  ;;  %v3759_v5 = vld [vmem:[%s7682_s0 + $0x418] sm:$0xff] }
 0x20d   :  { %3372 = vmatmul.mubr.msk.bf16.gmra.mrb[52].mxu0 %vm187_vm0, %v1922_v25  ;;  %3544 = vmatmul.mubr.msk.bf16.gmra.mrb[52].mxu1 %vm187_vm0, %v1965_v58  ;;  %v1340_v25 = vmul.f32 %v5571_v44, %v1169_v34  ;;  %v1084_v58 = vsub.f32 %v3738_v57, %v5535_v15  ;;  %v1968_v29 = vpack.c.bf16 %v1859_v14, %v1858_v8  ;;  %v3748_v57 = vld [vmem:[%s7682_s0 + $0x3f0] sm:$0xff]  ;;  %v3749_v8 = vld [vmem:[%s7682_s0 + $0x3f8] sm:$0xff] }
 0x20e   :  { %3375 = vmatprep.mubr.msk.bf16.mxu0 %vm3840_vm1, %v3839_v0  ;;  %3547 = vmatprep.mubr.msk.bf16.mxu1 %vm3840_vm1, %v3839_v0  ;;  %v1175_v13 = vsub.f32 %v3749_v8, %v5535_v15  ;;  %v1260_v17 = vmul.f32 %v5571_v44, %v1089_v42  ;;  %v1179_v42 = vsub.f32 %v3759_v5, %v5535_v15 }
 0x20f   :  { %v1516_v48 = vmul.f32 %v5576_v30, %v1340_v25  ;;  %v1255_v23 = vmul.f32 %v5571_v44, %v1084_v58  ;;  %v1519_v25 = vmul.f32 %v5576_v30, %v1343_v51  ;;  %v1174_v58 = vsub.f32 %v3748_v57, %v5535_v15 }
 0x210   :  { %v1346_v28 = vmul.f32 %v5571_v44, %v1175_v13 }
 0x211   :  { %v1692_v26 = vadd.f32 %v5601_v2, %v1516_v48  ;;  %v1431_v11 = vmul.f32 %v5576_v30, %v1255_v23  ;;  %v1610_v48 = vadd.f32 %v5601_v2, %v1434_v62  ;;  %v1695_v12 = vadd.f32 %v5601_v2, %v1519_v25 }
 0x212   :  { %v1345_v22 = vmul.f32 %v5571_v44, %v1174_v58  ;;  %v1696_v23 = vadd.f32 %v5601_v2, %v1520_v1 }
 0x213   :  { %v1861_v55 = vmax.f32 %v1692_v26, 0.0  ;;  %v1607_v49 = vadd.f32 %v5601_v2, %v1431_v11  ;;  %v3751_v26 = vld [vmem:[%s7682_s0 + $0x158] sm:$0xff]  ;;  %v1779_v21 = vmax.f32 %v1610_v48, 0.0  ;;  %v1350_v48 = vmul.f32 %v5571_v44, %v1179_v42 }
 0x214   :  { %v1091_v32 = vsub.f32 %v3751_v26, %v5535_v15  ;;  %v1865_v38 = vmax.f32 %v1696_v23, 0.0 }
 0x215   :  { %3376 = vmatmul.mubr.msk.bf16.gmra.mrb[56].mxu0 %vm187_vm0, %v1923_v35  ;;  %3548 = vmatmul.mubr.msk.bf16.gmra.mrb[56].mxu1 %vm187_vm0, %v1966_v37  ;;  %v1774_v35 = vmax.f32 %v1605_v63, 0.0  ;;  %v3742_v37 = vld [vmem:[%s7682_s0 + $0x130] sm:$0xff]  ;;  %v1969_v34 = vpack.c.bf16 %v1861_v55, %v1860_v46  ;;  %v1776_v59 = vmax.f32 %v1607_v49, 0.0  ;;  %v1970_v63 = vpack.c.bf16 %v1863_v45, %v1862_v52  ;;  %v3754_v46 = vld [vmem:[%s7682_s0 + $0x408] sm:$0xff] }
 0x216   :  { %3379 = vmatprep.mubr.msk.bf16.mxu0 %vm3840_vm1, %v3839_v0  ;;  %3551 = vmatprep.mubr.msk.bf16.mxu1 %vm3840_vm1, %v3839_v0  ;;  %v1086_v3 = vsub.f32 %v3742_v37, %v5535_v15  ;;  %v1177_v16 = vsub.f32 %v3754_v46, %v5535_v15  ;;  %v1262_v55 = vmul.f32 %v5571_v44, %v1091_v32 }
 0x217   :  { %v1926_v50 = vpack.c.bf16 %v1775_v24, %v1774_v35  ;;  %v1927_v56 = vpack.c.bf16 %v1777_v39, %v1776_v59  ;;  %v1864_v35 = vmax.f32 %v1695_v12, 0.0  ;;  %v3757_v59 = vld [vmem:[%s7682_s0 + $0x168] sm:$0xff] }
 0x218   :  { %v1257_v9 = vmul.f32 %v5571_v44, %v1086_v3  ;;  %v3753_v3 = vld [vmem:[%s7682_s0 + $0x400] sm:$0xff]  ;;  %v1093_v39 = vsub.f32 %v3757_v59, %v5535_v15  ;;  %v3767_v59 = vld [vmem:[%s7682_s0 + $0x438] sm:$0xff] }
 0x219   :  { %v1176_v24 = vsub.f32 %v3753_v3, %v5535_v15  ;;  %v1971_v6 = vpack.c.bf16 %v1865_v38, %v1864_v35  ;;  %v3763_v35 = vld [vmem:[%s7682_s0 + $0x428] sm:$0xff] }
 0x21a   :  { %v1433_v54 = vmul.f32 %v5576_v30, %v1257_v9  ;;  %v1348_v9 = vmul.f32 %v5571_v44, %v1177_v16  ;;  %v1264_v1 = vmul.f32 %v5571_v44, %v1093_v39  ;;  %v1183_v39 = vsub.f32 %v3767_v59, %v5535_v15 }
 0x21b   :  { %v1347_v33 = vmul.f32 %v5571_v44, %v1176_v24 }
 0x21c   :  { %v1609_v60 = vadd.f32 %v5601_v2, %v1433_v54  ;;  %v6251_v2 = vld [vmem:[%s7683_s1] ss:$0 sm:$0xff]  ;;  %v3758_v54 = vld [vmem:[%s7682_s0 + $0x410] sm:$0xff] }
 0x21d   :  { %3380 = vmatmul.mubr.msk.bf16.gmra.mrb[60].mxu0 %vm187_vm0, %v1924_v4  ;;  %3552 = vmatmul.mubr.msk.bf16.gmra.mrb[60].mxu1 %vm187_vm0, %v1967_v61  ;;  %v3746_v4 = vld [vmem:[%s7682_s0 + $0x140] sm:$0xff]  ;;  %v1521_v11 = vmul.f32 %v6251_v2, %v1345_v22  ;;  %v1522_v37 = vmul.f32 %v6251_v2, %v1346_v28  ;;  %v1438_v51 = vmul.f32 %v6251_v2, %v1262_v55 }
 0x21e   :  { %3383 = vmatprep.mubr.msk.bf16.mxu0 %vm3840_vm1, %v3839_v0  ;;  %3555 = vmatprep.mubr.msk.bf16.mxu1 %vm3840_vm1, %v3839_v0  ;;  %v1088_v61 = vsub.f32 %v3746_v4, %v5535_v15  ;;  %v1178_v4 = vsub.f32 %v3758_v54, %v5535_v15  ;;  %v1523_v62 = vmul.f32 %v6251_v2, %v1347_v33 }
 0x21f   :  { %v1697_v47 = vadd.f32 %v6273_v40, %v1521_v11  ;;  %v1698_v49 = vadd.f32 %v6273_v40, %v1522_v37  ;;  %v1524_v25 = vmul.f32 %v6251_v2, %v1348_v9  ;;  %v1614_v58 = vadd.f32 %v6273_v40, %v1438_v51 }
 0x220   :  { %v1259_v14 = vmul.f32 %v5571_v44, %v1088_v61  ;;  %v1349_v8 = vmul.f32 %v5571_v44, %v1178_v4  ;;  %v1440_v23 = vmul.f32 %v6251_v2, %v1264_v1 }
 0x221   :  { %v1866_v31 = vmax.f32 %v1697_v47, 0.0  ;;  %v1867_v61 = vmax.f32 %v1698_v49, 0.0  ;;  %v3764_v47 = vld [vmem:[%s7682_s0 + $0x180] sm:$0xff]  ;;  %v3765_v49 = vld [vmem:[%s7682_s0 + $0x188] sm:$0xff] }
 0x222   :  { %v1435_v7 = vmul.f32 %v5576_v30, %v1259_v14  ;;  %v1436_v30 = vmul.f32 %v6251_v2, %v1260_v17  ;;  %v1700_v14 = vadd.f32 %v6273_v40, %v1524_v25  ;;  %v1783_v17 = vmax.f32 %v1614_v58, 0.0 }
 0x223   :  { %v1972_v13 = vpack.c.bf16 %v1867_v61, %v1866_v31  ;;  %v1525_v28 = vmul.f32 %v6251_v2, %v1349_v8  ;;  %v1616_v37 = vadd.f32 %v6273_v40, %v1440_v23  ;;  %v1097_v33 = vsub.f32 %v3765_v49, %v5535_v15 }
 0x224   :  { %v1611_v27 = vadd.f32 %v6273_v40, %v1435_v7  ;;  %v1612_v20 = vadd.f32 %v6273_v40, %v1436_v30  ;;  %v1869_v32 = vmax.f32 %v1700_v14, 0.0  ;;  %v1181_v30 = vsub.f32 %v3763_v35, %v5535_v15 }
 0x225   :  { %3384 = vmatmul.mubr.msk.bf16.gmra.mrb[64].mxu0 %vm187_vm0, %v1925_v10  ;;  %3556 = vmatmul.mubr.msk.bf16.gmra.mrb[64].mxu1 %vm187_vm0, %v1968_v29  ;;  %v1778_v10 = vmax.f32 %v1609_v60, 0.0  ;;  %v1090_v29 = vsub.f32 %v3750_v18, %v5535_v15  ;;  %v1699_v60 = vadd.f32 %v6273_v40, %v1523_v62  ;;  %v3762_v18 = vld [vmem:[%s7682_s0 + $0x420] sm:$0xff]  ;;  %v1701_v3 = vadd.f32 %v6273_v40, %v1525_v28 }
 0x226   :  { %3387 = vmatprep.mubr.msk.bf16.mxu0 %vm3840_vm1, %v3839_v0  ;;  %3559 = vmatprep.mubr.msk.bf16.mxu1 %vm3840_vm1, %v3839_v0  ;;  %v1781_v36 = vmax.f32 %v1612_v20, 0.0  ;;  %v1352_v55 = vmul.f32 %v5571_v44, %v1181_v30  ;;  %v1785_v9 = vmax.f32 %v1616_v37, 0.0  ;;  %v1268_v61 = vmul.f32 %v5571_v44, %v1097_v33 }
 0x227   :  { %v1261_v41 = vmul.f32 %v5571_v44, %v1090_v29  ;;  %v1928_v43 = vpack.c.bf16 %v1779_v21, %v1778_v10  ;;  %v3761_v10 = vld [vmem:[%s7682_s0 + $0x178] sm:$0xff]  ;;  %v1180_v29 = vsub.f32 %v3762_v18, %v5535_v15  ;;  %v1868_v26 = vmax.f32 %v1699_v60, 0.0 }
 0x228   :  { %v1095_v7 = vsub.f32 %v3761_v10, %v5535_v15  ;;  %v1526_v21 = vmul.f32 %v6251_v2, %v1350_v48  ;;  %v1444_v8 = vmul.f32 %v6251_v2, %v1268_v61  ;;  %v3771_v10 = vld [vmem:[%s7682_s0 + $0x448] sm:$0xff] }
 0x229   :  { %v1437_v19 = vmul.f32 %v6251_v2, %v1261_v41  ;;  %v1351_v46 = vmul.f32 %v5571_v44, %v1180_v29 }
 0x22a   :  { %v1266_v24 = vmul.f32 %v5571_v44, %v1095_v7  ;;  %v1702_v41 = vadd.f32 %v6273_v40, %v1526_v21  ;;  %v1185_v7 = vsub.f32 %v3771_v10, %v5535_v15  ;;  %v1620_v29 = vadd.f32 %v6273_v40, %v1444_v8 }
 0x22b   :  { %v1613_v57 = vadd.f32 %v6273_v40, %v1437_v19  ;;  %v1527_v51 = vmul.f32 %v6251_v2, %v1351_v46 }
 0x22c   :  { %v1442_v19 = vmul.f32 %v6251_v2, %v1266_v24  ;;  %v1356_v37 = vmul.f32 %v5571_v44, %v1185_v7  ;;  %v1789_v24 = vmax.f32 %v1620_v29, 0.0 }
 0x22d   :  { %3388 = vmatmul.mubr.msk.bf16.gmra.mrb[68].mxu0 %vm187_vm0, %v1926_v50  ;;  %3560 = vmatmul.mubr.msk.bf16.gmra.mrb[68].mxu1 %vm187_vm0, %v1969_v34  ;;  %v1780_v50 = vmax.f32 %v1611_v27, 0.0  ;;  %v3756_v34 = vld [vmem:[%s7682_s0 + $0x160] sm:$0xff]  ;;  %v1782_v12 = vmax.f32 %v1613_v57, 0.0  ;;  %v1973_v27 = vpack.c.bf16 %v1869_v32, %v1868_v26  ;;  %v1703_v5 = vadd.f32 %v6273_v40, %v1527_v51 }
 0x22e   :  { %3391 = vmatprep.mubr.msk.bf16.mxu0 %vm3840_vm1, %v3839_v0  ;;  %3563 = vmatprep.mubr.msk.bf16.mxu1 %vm3840_vm1, %v3839_v0  ;;  %v1092_v53 = vsub.f32 %v3756_v34, %v5535_v15  ;;  %v1871_v34 = vmax.f32 %v1702_v41, 0.0  ;;  %v1618_v25 = vadd.f32 %v6273_v40, %v1442_v19 }
 0x22f   :  { %v1929_v45 = vpack.c.bf16 %v1781_v36, %v1780_v50  ;;  %v1930_v16 = vpack.c.bf16 %v1783_v17, %v1782_v12  ;;  %v1870_v50 = vmax.f32 %v1701_v3, 0.0  ;;  %v3766_v36 = vld [vmem:[%s7682_s0 + $0x430] sm:$0xff]  ;;  %v1872_v48 = vmax.f32 %v1703_v5, 0.0  ;;  %v3769_v12 = vld [vmem:[%s7682_s0 + $0x198] sm:$0xff] }
 0x230   :  { %v1263_v52 = vmul.f32 %v5571_v44, %v1092_v53  ;;  %v1528_v53 = vmul.f32 %v6251_v2, %v1352_v55  ;;  %v1182_v31 = vsub.f32 %v3766_v36, %v5535_v15  ;;  %v1787_v14 = vmax.f32 %v1618_v25, 0.0  ;;  %v3776_v5 = vld [vmem:[%s7682_s0 + $0x1b0] sm:$0xff] }
 0x231   :  { %v1974_v42 = vpack.c.bf16 %v1871_v34, %v1870_v50  ;;  %v1099_v17 = vsub.f32 %v3769_v12, %v5535_v15  ;;  %v3775_v50 = vld [vmem:[%s7682_s0 + $0x458] sm:$0xff]  ;;  %v3779_v12 = vld [vmem:[%s7682_s0 + $0x468] sm:$0xff] }
 0x232   :  { %v1439_v22 = vmul.f32 %v6251_v2, %v1263_v52  ;;  %v1704_v57 = vadd.f32 %v6273_v40, %v1528_v53  ;;  %v1353_v58 = vmul.f32 %v5571_v44, %v1182_v31  ;;  %v1354_v52 = vmul.f32 %v5571_v44, %v1183_v39 }
 0x233   :  { %v1270_v21 = vmul.f32 %v5571_v44, %v1099_v17  ;;  %v1187_v19 = vsub.f32 %v3775_v50, %v5535_v15  ;;  %v1189_v17 = vsub.f32 %v3779_v12, %v5535_v15 }
 0x234   :  { %v1615_v11 = vadd.f32 %v6273_v40, %v1439_v22  ;;  %v3770_v22 = vld [vmem:[%s7682_s0 + $0x440] sm:$0xff]  ;;  %v1529_v23 = vmul.f32 %v6251_v2, %v1353_v58  ;;  %v1530_v28 = vmul.f32 %v6251_v2, %v1354_v52 }
 0x235   :  { %3392 = vmatmul.mubr.msk.bf16.gmra.mrb[72].mxu0 %vm187_vm0, %v1927_v56  ;;  %3564 = vmatmul.mubr.msk.bf16.gmra.mrb[72].mxu1 %vm187_vm0, %v1970_v63  ;;  %v3760_v56 = vld [vmem:[%s7682_s0 + $0x170] sm:$0xff]  ;;  %v1446_v41 = vmul.f32 %v6251_v2, %v1270_v21  ;;  %v1358_v61 = vmul.f32 %v5571_v44, %v1187_v19 }
 0x236   :  { %3395 = vmatprep.mubr.msk.bf16.mxu0 %vm3840_vm1, %v3839_v0  ;;  %3567 = vmatprep.mubr.msk.bf16.mxu1 %vm3840_vm1, %v3839_v0  ;;  %v1094_v63 = vsub.f32 %v3760_v56, %v5535_v15  ;;  %v1184_v56 = vsub.f32 %v3770_v22, %v5535_v15 }
 0x237   :  { %v1622_v53 = vadd.f32 %v6273_v40, %v1446_v41 }
 0x238   :  { %v1265_v38 = vmul.f32 %v5571_v44, %v1094_v63  ;;  %v1873_v63 = vmax.f32 %v1704_v57, 0.0  ;;  %v1355_v35 = vmul.f32 %v5571_v44, %v1184_v56  ;;  %v3777_v57 = vld [vmem:[%s7682_s0 + $0x1b8] sm:$0xff] }
 0x239   :  { %v1103_v58 = vsub.f32 %v3777_v57, %v5535_v15  ;;  %v1791_v52 = vmax.f32 %v1622_v53, 0.0 }
 0x23a   :  { %v1441_v20 = vmul.f32 %v6251_v2, %v1265_v38  ;;  %v1975_v30 = vpack.c.bf16 %v1873_v63, %v1872_v48  ;;  %v1706_v38 = vadd.f32 %v6273_v40, %v1530_v28  ;;  %v1531_v55 = vmul.f32 %v6251_v2, %v1355_v35 }
 0x23b   :  { %v1274_v63 = vmul.f32 %v5571_v44, %v1103_v58 }
 0x23c   :  { %v1617_v54 = vadd.f32 %v6273_v40, %v1441_v20  ;;  %v1875_v33 = vmax.f32 %v1706_v38, 0.0  ;;  %v1707_v36 = vadd.f32 %v6273_v40, %v1531_v55 }
 0x23d   :  { %3396 = vmatmul.mubr.msk.bf16.gmra.mrb[76].mxu0 %vm187_vm0, %v1928_v43  ;;  %3568 = vmatmul.mubr.msk.bf16.gmra.mrb[76].mxu1 %vm187_vm0, %v1971_v6  ;;  %v1784_v43 = vmax.f32 %v1615_v11, 0.0  ;;  %v1096_v6 = vsub.f32 %v3764_v47, %v5535_v15  ;;  %v1705_v11 = vadd.f32 %v6273_v40, %v1529_v23  ;;  %v3774_v47 = vld [vmem:[%s7682_s0 + $0x450] sm:$0xff]  ;;  %v1450_v35 = vmul.f32 %v6251_v2, %v1274_v63 }
 0x23e   :  { %3399 = vmatprep.mubr.msk.bf16.mxu0 %vm3840_vm1, %v3839_v0  ;;  %3571 = vmatprep.mubr.msk.bf16.mxu1 %vm3840_vm1, %v3839_v0 }
 0x23f   :  { %v1267_v4 = vmul.f32 %v5571_v44, %v1096_v6  ;;  %v1931_v62 = vpack.c.bf16 %v1785_v9, %v1784_v43  ;;  %v3773_v43 = vld [vmem:[%s7682_s0 + $0x1a8] sm:$0xff]  ;;  %v1186_v6 = vsub.f32 %v3774_v47, %v5535_v15  ;;  %v1874_v49 = vmax.f32 %v1705_v11, 0.0 }
 0x240   :  { %v1101_v20 = vsub.f32 %v3773_v43, %v5535_v15  ;;  %v1532_v9 = vmul.f32 %v6251_v2, %v1356_v37  ;;  %v3783_v43 = vld [vmem:[%s7682_s0 + $0x478] sm:$0xff] }
 0x241   :  { %v1443_v1 = vmul.f32 %v6251_v2, %v1267_v4  ;;  %v1357_v59 = vmul.f32 %v5571_v44, %v1186_v6  ;;  %v1626_v6 = vadd.f32 %v6273_v40, %v1450_v35 }
 0x242   :  { %v1272_v31 = vmul.f32 %v5571_v44, %v1101_v20  ;;  %v1708_v4 = vadd.f32 %v6273_v40, %v1532_v9  ;;  %v1191_v20 = vsub.f32 %v3783_v43, %v5535_v15 }
 0x243   :  { %v1619_v18 = vadd.f32 %v6273_v40, %v1443_v1  ;;  %v1533_v8 = vmul.f32 %v6251_v2, %v1357_v59 }
 0x244   :  { %v1448_v1 = vmul.f32 %v6251_v2, %v1272_v31  ;;  %v1362_v53 = vmul.f32 %v5571_v44, %v1191_v20  ;;  %v1795_v31 = vmax.f32 %v1626_v6, 0.0  ;;  %v3791_v20 = vld [vmem:[%s7682_s0 + $0x498] sm:$0xff] }
 0x245   :  { %3400 = vmatmul.mubr.msk.bf16.gmra.mrb[80].mxu0 %vm187_vm0, %v1929_v45  ;;  %3572 = vmatmul.mubr.msk.bf16.gmra.mrb[80].mxu1 %vm187_vm0, %v1972_v13  ;;  %v1786_v45 = vmax.f32 %v1617_v54, 0.0  ;;  %v3768_v13 = vld [vmem:[%s7682_s0 + $0x190] sm:$0xff]  ;;  %v1788_v3 = vmax.f32 %v1619_v18, 0.0  ;;  %v1976_v54 = vpack.c.bf16 %v1875_v33, %v1874_v49  ;;  %v1709_v10 = vadd.f32 %v6273_v40, %v1533_v8 }
 0x246   :  { %3403 = vmatprep.mubr.msk.bf16.mxu0 %vm3840_vm1, %v3839_v0  ;;  %3575 = vmatprep.mubr.msk.bf16.mxu1 %vm3840_vm1, %v3839_v0  ;;  %v1098_v60 = vsub.f32 %v3768_v13, %v5535_v15  ;;  %v1877_v13 = vmax.f32 %v1708_v4, 0.0  ;;  %v1624_v28 = vadd.f32 %v6273_v40, %v1448_v1 }
 0x247   :  { %v1932_v32 = vpack.c.bf16 %v1787_v14, %v1786_v45  ;;  %v1933_v39 = vpack.c.bf16 %v1789_v24, %v1788_v3  ;;  %v1876_v45 = vmax.f32 %v1707_v36, 0.0  ;;  %v3778_v14 = vld [vmem:[%s7682_s0 + $0x460] sm:$0xff]  ;;  %v1878_v37 = vmax.f32 %v1709_v10, 0.0  ;;  %v3781_v3 = vld [vmem:[%s7682_s0 + $0x1c8] sm:$0xff] }
 0x248   :  { %v1269_v26 = vmul.f32 %v5571_v44, %v1098_v60  ;;  %v1534_v60 = vmul.f32 %v6251_v2, %v1358_v61  ;;  %v1188_v48 = vsub.f32 %v3778_v14, %v5535_v15  ;;  %v1793_v38 = vmax.f32 %v1624_v28, 0.0 }
 0x249   :  { %v1977_v7 = vpack.c.bf16 %v1877_v13, %v1876_v45  ;;  %v1105_v24 = vsub.f32 %v3781_v3, %v5535_v15  ;;  %v3787_v45 = vld [vmem:[%s7682_s0 + $0x488] sm:$0xff] }
 0x24a   :  { %v1445_v46 = vmul.f32 %v6251_v2, %v1269_v26  ;;  %v1710_v18 = vadd.f32 %v6273_v40, %v1534_v60  ;;  %v1359_v29 = vmul.f32 %v5571_v44, %v1188_v48  ;;  %v1360_v26 = vmul.f32 %v5571_v44, %v1189_v17 }
 0x24b   :  { %v1276_v9 = vmul.f32 %v5571_v44, %v1105_v24  ;;  %v1193_v1 = vsub.f32 %v3787_v45, %v5535_v15 }
 0x24c   :  { %v1621_v51 = vadd.f32 %v6273_v40, %v1445_v46  ;;  %v3782_v46 = vld [vmem:[%s7682_s0 + $0x470] sm:$0xff]  ;;  %v1535_v41 = vmul.f32 %v6251_v2, %v1359_v29  ;;  %v1536_v55 = vmul.f32 %v6251_v2, %v1360_v26 }
 0x24d   :  { %3404 = vmatmul.mubr.msk.bf16.gmra.mrb[84].mxu0 %vm187_vm0, %v1930_v16  ;;  %3576 = vmatmul.mubr.msk.bf16.gmra.mrb[84].mxu1 %vm187_vm0, %v1973_v27  ;;  %v3772_v16 = vld [vmem:[%s7682_s0 + $0x1a0] sm:$0xff]  ;;  %v1452_v4 = vmul.f32 %v6251_v2, %v1276_v9 }
 0x24e   :  { %3407 = vmatprep.mubr.msk.bf16.mxu0 %vm3840_vm1, %v3839_v0  ;;  %3579 = vmatprep.mubr.msk.bf16.mxu1 %vm3840_vm1, %v3839_v0  ;;  %v1100_v27 = vsub.f32 %v3772_v16, %v5535_v15  ;;  %v1190_v16 = vsub.f32 %v3782_v46, %v5535_v15 }
 0x24f   :  { %v1628_v48 = vadd.f32 %v6273_v40, %v1452_v4 }
 0x250   :  { %v1271_v34 = vmul.f32 %v5571_v44, %v1100_v27  ;;  %v1879_v27 = vmax.f32 %v1710_v18, 0.0  ;;  %v1361_v50 = vmul.f32 %v5571_v44, %v1190_v16 }
 0x251   :  { %v1797_v3 = vmax.f32 %v1628_v48, 0.0 }
 0x252   :  { %v1447_v25 = vmul.f32 %v6251_v2, %v1271_v34  ;;  %v1978_v19 = vpack.c.bf16 %v1879_v27, %v1878_v37  ;;  %v1712_v34 = vadd.f32 %v6273_v40, %v1536_v55  ;;  %v1537_v61 = vmul.f32 %v6251_v2, %v1361_v50  ;;  %v3790_v55 = vld [vmem:[%s7682_s0 + $0x490] sm:$0xff] }
 0x253   :  { %v1194_v43 = vsub.f32 %v3790_v55, %v5535_v15  ;;  %v3796_v55 = vld [vmem:[%s7682_s0 + $0x200] sm:$0xff] }
 0x254   :  { %v1623_v22 = vadd.f32 %v6273_v40, %v1447_v25  ;;  %v1881_v58 = vmax.f32 %v1712_v34, 0.0  ;;  %v1713_v12 = vadd.f32 %v6273_v40, %v1537_v61 }
 0x255   :  { %3408 = vmatmul.mubr.msk.bf16.gmra.mrb[88].mxu0 %vm187_vm0, %v1931_v62  ;;  %3580 = vmatmul.mubr.msk.bf16.gmra.mrb[88].mxu1 %vm187_vm0, %v1974_v42  ;;  %v1790_v62 = vmax.f32 %v1621_v51, 0.0  ;;  %v1102_v42 = vsub.f32 %v3776_v5, %v5535_v15  ;;  %v1711_v51 = vadd.f32 %v6273_v40, %v1535_v41  ;;  %v3786_v5 = vld [vmem:[%s7682_s0 + $0x480] sm:$0xff] }
 0x256   :  { %3411 = vmatprep.mubr.msk.bf16.mxu0 %vm3840_vm1, %v3839_v0  ;;  %3583 = vmatprep.mubr.msk.bf16.mxu1 %vm3840_vm1, %v3839_v0  ;;  %v1882_v24 = vmax.f32 %v1713_v12, 0.0 }
 0x257   :  { %v1273_v56 = vmul.f32 %v5571_v44, %v1102_v42  ;;  %v1934_v23 = vpack.c.bf16 %v1791_v52, %v1790_v62  ;;  %v3785_v62 = vld [vmem:[%s7682_s0 + $0x1d8] sm:$0xff]  ;;  %v1192_v42 = vsub.f32 %v3786_v5, %v5535_v15  ;;  %v1880_v57 = vmax.f32 %v1711_v51, 0.0 }
 0x258   :  { %v1107_v25 = vsub.f32 %v3785_v62, %v5535_v15  ;;  %v1538_v52 = vmul.f32 %v6251_v2, %v1362_v53 }
 0x259   :  { %v1449_v21 = vmul.f32 %v6251_v2, %v1273_v56  ;;  %v1979_v28 = vpack.c.bf16 %v1881_v58, %v1880_v57  ;;  %v3792_v58 = vld [vmem:[%s7682_s0 + $0x1f0] sm:$0xff] }
 0x25a   :  { %v1278_v17 = vmul.f32 %v5571_v44, %v1107_v25  ;;  %v1714_v10 = vadd.f32 %v6273_v40, %v1538_v52  ;;  %v1110_v52 = vsub.f32 %v3792_v58, %v5535_v15 }
 0x25b   :  { %v1625_v47 = vadd.f32 %v6273_v40, %v1449_v21 }
 0x25c   :  { %v1454_v46 = vmul.f32 %v6251_v2, %v1278_v17  ;;  %v1883_v27 = vmax.f32 %v1714_v10, 0.0 }
 0x25d   :  { %3412 = vmatmul.mubr.msk.bf16.gmra.mrb[92].mxu0 %vm187_vm0, %v1932_v32  ;;  %3584 = vmatmul.mubr.msk.bf16.gmra.mrb[92].mxu1 %vm187_vm0, %v1975_v30  ;;  %v1792_v32 = vmax.f32 %v1623_v22, 0.0  ;;  %v3780_v30 = vld [vmem:[%s7682_s0 + $0x1c0] sm:$0xff]  ;;  %v1794_v36 = vmax.f32 %v1625_v47, 0.0  ;;  %v1363_v22 = vmul.f32 %v5571_v44, %v1192_v42  ;;  %v1195_v47 = vsub.f32 %v3791_v20, %v5535_v15 }
 0x25e   :  { %3415 = vmatprep.mubr.msk.bf16.mxu0 %vm3840_vm1, %v3839_v0  ;;  %3587 = vmatprep.mubr.msk.bf16.mxu1 %vm3840_vm1, %v3839_v0  ;;  %v1104_v11 = vsub.f32 %v3780_v30, %v5535_v15  ;;  %v3788_v30 = vld [vmem:[%s7682_s0 + $0x1e0] sm:$0xff]  ;;  %v1630_v51 = vadd.f32 %v6273_v40, %v1454_v46 }
 0x25f   :  { %v1935_v33 = vpack.c.bf16 %v1793_v38, %v1792_v32  ;;  %v1936_v63 = vpack.c.bf16 %v1795_v31, %v1794_v36  ;;  %v3789_v38 = vld [vmem:[%s7682_s0 + $0x1e8] sm:$0xff]  ;;  %v1539_v16 = vmul.f32 %v6251_v2, %v1363_v22  ;;  %v1980_v31 = vpack.c.bf16 %v1883_v27, %v1882_v24 }
 0x260   :  { %v1275_v49 = vmul.f32 %v5571_v44, %v1104_v11  ;;  %v1108_v11 = vsub.f32 %v3788_v30, %v5535_v15  ;;  %v1109_v37 = vsub.f32 %v3789_v38, %v5535_v15  ;;  %v1799_v45 = vmax.f32 %v1630_v51, 0.0  ;;  %v3795_v22 = vld [vmem:[%s7682_s0 + $0x4a8] sm:$0xff] }
 0x261   :  { %v1715_v34 = vadd.f32 %v6273_v40, %v1539_v16 }
 0x262   :  { %v1451_v59 = vmul.f32 %v6251_v2, %v1275_v49  ;;  %v1279_v49 = vmul.f32 %v5571_v44, %v1108_v11 }
 0x264   :  { %v1627_v8 = vadd.f32 %v6273_v40, %v1451_v59  ;;  %v1455_v42 = vmul.f32 %v6251_v2, %v1279_v49 }
 0x265   :  { %3416 = vmatmul.mubr.msk.bf16.gmra.mrb[96].mxu0 %vm187_vm0, %v1933_v39  ;;  %3588 = vmatmul.mubr.msk.bf16.gmra.mrb[96].mxu1 %vm187_vm0, %v1976_v54  ;;  %v3784_v39 = vld [vmem:[%s7682_s0 + $0x1d0] sm:$0xff] }
 0x266   :  { %3419 = vmatprep.mubr.msk.bf16.mxu0 %vm3840_vm1, %v3839_v0  ;;  %3591 = vmatprep.mubr.msk.bf16.mxu1 %vm3840_vm1, %v3839_v0  ;;  %v1106_v54 = vsub.f32 %v3784_v39, %v5535_v15  ;;  %v1796_v21 = vmax.f32 %v1627_v8, 0.0  ;;  %v1365_v39 = vmul.f32 %v5571_v44, %v1194_v43  ;;  %v3793_v8 = vld [vmem:[%s7682_s0 + $0x1f8] sm:$0xff]  ;;  %v1112_v43 = vsub.f32 %v3796_v55, %v5535_v15 }
 0x268   :  { %v1277_v13 = vmul.f32 %v5571_v44, %v1106_v54  ;;  %v1937_v50 = vpack.c.bf16 %v1797_v3, %v1796_v21  ;;  %v1366_v54 = vmul.f32 %v5571_v44, %v1195_v47  ;;  %v1541_v12 = vmul.f32 %v6251_v2, %v1365_v39 }
 0x26a   :  { %v1453_v35 = vmul.f32 %v6251_v2, %v1277_v13  ;;  %v1111_v13 = vsub.f32 %v3793_v8, %v5535_v15  ;;  %v1542_v17 = vmul.f32 %v6251_v2, %v1366_v54  ;;  %v1717_v30 = vadd.f32 %v6273_v40, %v1541_v12 }
 0x26c   :  { %v1629_v6 = vadd.f32 %v6273_v40, %v1453_v35  ;;  %v1718_v11 = vadd.f32 %v6273_v40, %v1542_v17  ;;  %v3801_v17 = vld [vmem:[%s7682_s0 + $0x218] sm:$0xff] }
 0x26d   :  { %3420 = vmatmul.mubr.msk.bf16.gmra.mrb[100].mxu0 %vm187_vm0, %v1934_v23  ;;  %3592 = vmatmul.mubr.msk.bf16.gmra.mrb[100].mxu1 %vm187_vm0, %v1977_v7  ;;  %v1364_v7 = vmul.f32 %v5571_v44, %v1193_v1  ;;  %v1884_v1 = vmax.f32 %v1715_v34, 0.0  ;;  %v3799_v34 = vld [vmem:[%s7682_s0 + $0x4b8] sm:$0xff] }
 0x26e   :  { %3423 = vmatprep.mubr.msk.bf16.mxu0 %vm3840_vm1, %v3839_v0  ;;  %3595 = vmatprep.mubr.msk.bf16.mxu1 %vm3840_vm1, %v3839_v0  ;;  %v1798_v5 = vmax.f32 %v1629_v6, 0.0  ;;  %v3797_v6 = vld [vmem:[%s7682_s0 + $0x208] sm:$0xff] }
 0x26f   :  { %v1540_v41 = vmul.f32 %v6251_v2, %v1364_v7  ;;  %v1113_v49 = vsub.f32 %v3797_v6, %v5535_v15 }
 0x270   :  { %v1938_v7 = vpack.c.bf16 %v1799_v45, %v1798_v5 }
 0x271   :  { %v1716_v59 = vadd.f32 %v6273_v40, %v1540_v41 }
 0x273   :  { %v1885_v48 = vmax.f32 %v1716_v59, 0.0 }
 0x275   :  { %3424 = vmatmul.mubr.msk.bf16.gmra.mrb[104].mxu0 %vm187_vm0, %v1935_v33  ;;  %3596 = vmatmul.mubr.msk.bf16.gmra.mrb[104].mxu1 %vm187_vm0, %v1978_v19  ;;  %v1280_v33 = vmul.f32 %v5571_v44, %v1109_v37  ;;  %v1981_v35 = vpack.c.bf16 %v1885_v48, %v1884_v1  ;;  %v3800_v48 = vld [vmem:[%s7682_s0 + $0x210] sm:$0xff] }
 0x276   :  { %3427 = vmatprep.mubr.msk.bf16.mxu0 %vm3840_vm1, %v3839_v0  ;;  %3599 = vmatprep.mubr.msk.bf16.mxu1 %vm3840_vm1, %v3839_v0  ;;  %v1114_v12 = vsub.f32 %v3800_v48, %v5535_v15 }
 0x277   :  { %v1456_v57 = vmul.f32 %v6251_v2, %v1280_v33  ;;  %v3798_v33 = vld [vmem:[%s7682_s0 + $0x4b0] sm:$0xff] }
 0x278   :  { %v2291_v60 = vpop.f32.mrb[0].mxu0  ;;  %v2635_v14 = vpop.f32.mrb[0].mxu1 }
 0x279   :  { %2970 = vst.msk [vmem:[%s7685_s4] sm:$0xff] %vm2969_vm2, %v2291_v60  ;;  %v3321_v56 = vpop.f32.mrb[1].mxu0  ;;  %3056 = vst.msk [vmem:[%s7685_s4 + $0x2b0] sm:$0xff] %vm2969_vm2, %v2635_v14  ;;  %v3493_v23 = vpop.f32.mrb[1].mxu1  ;;  %v3794_v60 = vld [vmem:[%s7682_s0 + $0x4a0] sm:$0xff] }
 0x27a   :  { %v2294_v18 = vpop.f32.mrb[2].mxu0  ;;  %v2638_v29 = vpop.f32.mrb[2].mxu1  ;;  %v1196_v14 = vsub.f32 %v3794_v60, %v5535_v15  ;;  %v1197_v56 = vsub.f32 %v3795_v22, %v5535_v15  ;;  %v1632_v23 = vadd.f32 %v6273_v40, %v1456_v57  ;;  %v1115_v22 = vsub.f32 %v3801_v17, %v5535_v15 }
 0x27b   :  { %2971 = vst.msk [vmem:[%s7685_s4 + $0x8] sm:$0xff] %vm2969_vm2, %v2294_v18  ;;  %v3322_v26 = vpop.f32.mrb[3].mxu0  ;;  %3057 = vst.msk [vmem:[%s7685_s4 + $0x2b8] sm:$0xff] %vm2969_vm2, %v2638_v29  ;;  %v3494_v32 = vpop.f32.mrb[3].mxu1  ;;  %v1282_v29 = vmul.f32 %v5571_v44, %v1111_v13 }
 0x27c   :  { %v1367_v26 = vmul.f32 %v5571_v44, %v1196_v14  ;;  %v1368_v38 = vmul.f32 %v5571_v44, %v1197_v56  ;;  %v1801_v27 = vmax.f32 %v1632_v23, 0.0 }
 0x27d   :  { %3428 = vmatmul.mubr.msk.bf16.gmra.mrb[108].mxu0 %vm187_vm0, %v1936_v63  ;;  %3600 = vmatmul.mubr.msk.bf16.gmra.mrb[108].mxu1 %vm187_vm0, %v1979_v28  ;;  %v1631_v63 = vadd.f32 %v6273_v40, %v1455_v42  ;;  %v1281_v28 = vmul.f32 %v5571_v44, %v1110_v52  ;;  %v1458_v20 = vmul.f32 %v6251_v2, %v1282_v29 }
 0x27e   :  { %3431 = vmatprep.mubr.msk.bf16.mxu0 %vm3840_vm1, %v3839_v0  ;;  %3603 = vmatprep.mubr.msk.bf16.mxu1 %vm3840_vm1, %v3839_v0  ;;  %v1543_v47 = vmul.f32 %v6251_v2, %v1367_v26  ;;  %v1544_v51 = vmul.f32 %v6251_v2, %v1368_v38  ;;  %v3803_v26 = vld [vmem:[%s7682_s0 + $0x4c8] sm:$0xff] }
 0x27f   :  { %v1800_v16 = vmax.f32 %v1631_v63, 0.0  ;;  %v1457_v41 = vmul.f32 %v6251_v2, %v1281_v28  ;;  %v1634_v54 = vadd.f32 %v6273_v40, %v1458_v20 }
 0x280   :  { %v2299_v9 = vpop.f32.mrb[4].mxu0  ;;  %v2643_v19 = vpop.f32.mrb[4].mxu1  ;;  %v1720_v58 = vadd.f32 %v6273_v40, %v1544_v51 }
 0x281   :  { %2972 = vst.msk [vmem:[%s7685_s4 + $0x10] sm:$0xff] %vm2969_vm2, %v2299_v9  ;;  %v3325_v53 = vpop.f32.mrb[5].mxu0  ;;  %3058 = vst.msk [vmem:[%s7685_s4 + $0x2c0] sm:$0xff] %vm2969_vm2, %v2643_v19  ;;  %v3497_v36 = vpop.f32.mrb[5].mxu1  ;;  %v1198_v9 = vsub.f32 %v3798_v33, %v5535_v15  ;;  %v1887_v19 = vmax.f32 %v1718_v11, 0.0  ;;  %v1939_v5 = vpack.c.bf16 %v1801_v27, %v1800_v16  ;;  %v1803_v56 = vmax.f32 %v1634_v54, 0.0 }
 0x282   :  { %v2302_v4 = vpop.f32.mrb[6].mxu0  ;;  %v2646_v61 = vpop.f32.mrb[6].mxu1  ;;  %v1199_v53 = vsub.f32 %v3799_v34, %v5535_v15  ;;  %v1633_v36 = vadd.f32 %v6273_v40, %v1457_v41 }
 0x283   :  { %2973 = vst.msk [vmem:[%s7685_s4 + $0x18] sm:$0xff] %vm2969_vm2, %v2302_v4  ;;  %v3326_v62 = vpop.f32.mrb[7].mxu0  ;;  %3059 = vst.msk [vmem:[%s7685_s4 + $0x2c8] sm:$0xff] %vm2969_vm2, %v2646_v61  ;;  %v3498_v25 = vpop.f32.mrb[7].mxu1  ;;  %v1719_v4 = vadd.f32 %v6273_v40, %v1543_v47  ;;  %v1284_v61 = vmul.f32 %v5571_v44, %v1113_v49 }
 0x284   :  { %v1369_v62 = vmul.f32 %v5571_v44, %v1198_v9  ;;  %v1370_v52 = vmul.f32 %v5571_v44, %v1199_v53  ;;  %v1802_v60 = vmax.f32 %v1633_v36, 0.0  ;;  %v3805_v36 = vld [vmem:[%s7682_s0 + $0x228] sm:$0xff] }
 0x285   :  { %3432 = vmatmul.mubr.msk.bf16.gmra.mrb[112].mxu0 %vm187_vm0, %v1937_v50  ;;  %3604 = vmatmul.mubr.msk.bf16.gmra.mrb[112].mxu1 %vm187_vm0, %v1980_v31  ;;  %v1886_v50 = vmax.f32 %v1717_v30, 0.0  ;;  %v1283_v31 = vmul.f32 %v5571_v44, %v1112_v43  ;;  %v1888_v63 = vmax.f32 %v1719_v4, 0.0  ;;  %v1460_v23 = vmul.f32 %v6251_v2, %v1284_v61 }
 0x286   :  { %3435 = vmatprep.mubr.msk.bf16.mxu0 %vm3840_vm1, %v3839_v0  ;;  %3607 = vmatprep.mubr.msk.bf16.mxu1 %vm3840_vm1, %v3839_v0  ;;  %v1545_v28 = vmul.f32 %v6251_v2, %v1369_v62  ;;  %v1286_v30 = vmul.f32 %v5571_v44, %v1115_v22  ;;  %v1940_v38 = vpack.c.bf16 %v1803_v56, %v1802_v60  ;;  %v3807_v62 = vld [vmem:[%s7682_s0 + $0x4d8] sm:$0xff] }
 0x287   :  { %v1982_v57 = vpack.c.bf16 %v1887_v19, %v1886_v50  ;;  %v1459_v14 = vmul.f32 %v6251_v2, %v1283_v31  ;;  %v3804_v19 = vld [vmem:[%s7682_s0 + $0x220] sm:$0xff]  ;;  %v1117_v31 = vsub.f32 %v3805_v36, %v5535_v15 }
 0x288   :  { %v2307_v10 = vpop.f32.mrb[8].mxu0  ;;  %v2651_v18 = vpop.f32.mrb[8].mxu1  ;;  %v1462_v50 = vmul.f32 %v6251_v2, %v1286_v30  ;;  %v1116_v51 = vsub.f32 %v3804_v19, %v5535_v15  ;;  %v3810_v30 = vld [vmem:[%s7682_s0 + $0x4e0] sm:$0xff] }
 0x289   :  { %2974 = vst.msk [vmem:[%s7685_s4 + $0x20] sm:$0xff] %vm2969_vm2, %v2307_v10  ;;  %v3329_v32 = vpop.f32.mrb[9].mxu0  ;;  %3060 = vst.msk [vmem:[%s7685_s4 + $0x2d0] sm:$0xff] %vm2969_vm2, %v2651_v18  ;;  %v3501_v21 = vpop.f32.mrb[9].mxu1  ;;  %v1889_v10 = vmax.f32 %v1720_v58, 0.0  ;;  %v3802_v18 = vld [vmem:[%s7682_s0 + $0x4c0] sm:$0xff] }
 0x28a   :  { %v2310_v37 = vpop.f32.mrb[10].mxu0  ;;  %v2654_v3 = vpop.f32.mrb[10].mxu1  ;;  %v1200_v29 = vsub.f32 %v3802_v18, %v5535_v15  ;;  %v1201_v32 = vsub.f32 %v3803_v26, %v5535_v15  ;;  %v1635_v21 = vadd.f32 %v6273_v40, %v1459_v14  ;;  %v3808_v18 = vld [vmem:[%s7682_s0 + $0x230] sm:$0xff] }
 0x28b   :  { %2975 = vst.msk [vmem:[%s7685_s4 + $0x28] sm:$0xff] %vm2969_vm2, %v2310_v37  ;;  %v3330_v24 = vpop.f32.mrb[11].mxu0  ;;  %3061 = vst.msk [vmem:[%s7685_s4 + $0x2d8] sm:$0xff] %vm2969_vm2, %v2654_v3  ;;  %v3502_v46 = vpop.f32.mrb[11].mxu1  ;;  %v1636_v3 = vadd.f32 %v6273_v40, %v1460_v23  ;;  %v1983_v27 = vpack.c.bf16 %v1889_v10, %v1888_v63 }
 0x28c   :  { %v1721_v24 = vadd.f32 %v6273_v40, %v1545_v28  ;;  %v1371_v55 = vmul.f32 %v5571_v44, %v1200_v29  ;;  %v1372_v43 = vmul.f32 %v5571_v44, %v1201_v32  ;;  %v1804_v33 = vmax.f32 %v1635_v21, 0.0  ;;  %v3809_v21 = vld [vmem:[%s7682_s0 + $0x238] sm:$0xff] }
 0x28d   :  { %3436 = vmatmul.mubr.msk.bf16.gmra.mrb[116].mxu0 %vm187_vm0, %v1938_v7  ;;  %3608 = vmatmul.mubr.msk.bf16.gmra.mrb[116].mxu1 %vm187_vm0, %v1981_v35  ;;  %v1546_v7 = vmul.f32 %v6251_v2, %v1370_v52  ;;  %v1285_v35 = vmul.f32 %v5571_v44, %v1114_v12  ;;  %v1805_v34 = vmax.f32 %v1636_v3, 0.0  ;;  %v1118_v29 = vsub.f32 %v3808_v18, %v5535_v15 }
 0x28e   :  { %3439 = vmatprep.mubr.msk.bf16.mxu0 %vm3840_vm1, %v3839_v0  ;;  %3611 = vmatprep.mubr.msk.bf16.mxu1 %vm3840_vm1, %v3839_v0  ;;  %v1890_v53 = vmax.f32 %v1721_v24, 0.0  ;;  %v1547_v4 = vmul.f32 %v6251_v2, %v1371_v55  ;;  %v1548_v61 = vmul.f32 %v6251_v2, %v1372_v43  ;;  %v3811_v24 = vld [vmem:[%s7682_s0 + $0x4e8] sm:$0xff] }
 0x28f   :  { %v1722_v41 = vadd.f32 %v6273_v40, %v1546_v7  ;;  %v1461_v9 = vmul.f32 %v6251_v2, %v1285_v35  ;;  %v1941_v52 = vpack.c.bf16 %v1805_v34, %v1804_v33  ;;  %v1119_v35 = vsub.f32 %v3809_v21, %v5535_v15 }
 0x290   :  { %v2315_v59 = vpop.f32.mrb[12].mxu0  ;;  %v2659_v39 = vpop.f32.mrb[12].mxu1  ;;  %v1723_v48 = vadd.f32 %v6273_v40, %v1547_v4  ;;  %v1724_v12 = vadd.f32 %v6273_v40, %v1548_v61  ;;  %v3813_v61 = vld [vmem:[%s7682_s0 + $0x248] sm:$0xff] }
 0x291   :  { %2976 = vst.msk [vmem:[%s7685_s4 + $0x30] sm:$0xff] %vm2969_vm2, %v2315_v59  ;;  %v3333_v25 = vpop.f32.mrb[13].mxu0  ;;  %3062 = vst.msk [vmem:[%s7685_s4 + $0x2e0] sm:$0xff] %vm2969_vm2, %v2659_v39  ;;  %v3505_v42 = vpop.f32.mrb[13].mxu1  ;;  %v3806_v59 = vld [vmem:[%s7682_s0 + $0x4d0] sm:$0xff]  ;;  %v1891_v54 = vmax.f32 %v1722_v41, 0.0 }
 0x292   :  { %v2318_v45 = vpop.f32.mrb[14].mxu0  ;;  %v2662_v1 = vpop.f32.mrb[14].mxu1  ;;  %v1202_v39 = vsub.f32 %v3806_v59, %v5535_v15  ;;  %v1203_v25 = vsub.f32 %v3807_v62, %v5535_v15  ;;  %v1638_v42 = vadd.f32 %v6273_v40, %v1462_v50  ;;  %v1121_v62 = vsub.f32 %v3813_v61, %v5535_v15 }
 0x293   :  { %2977 = vst.msk [vmem:[%s7685_s4 + $0x38] sm:$0xff] %vm2969_vm2, %v2318_v45  ;;  %v3334_v8 = vpop.f32.mrb[15].mxu0  ;;  %3063 = vst.msk [vmem:[%s7685_s4 + $0x2e8] sm:$0xff] %vm2969_vm2, %v2662_v1  ;;  %v3506_v13 = vpop.f32.mrb[15].mxu1  ;;  %v1288_v1 = vmul.f32 %v5571_v44, %v1117_v31  ;;  %v1984_v14 = vpack.c.bf16 %v1891_v54, %v1890_v53  ;;  %v3812_v54 = vld [vmem:[%s7682_s0 + $0x240] sm:$0xff] }
 0x294   :  { %v1373_v8 = vmul.f32 %v5571_v44, %v1202_v39  ;;  %v1374_v17 = vmul.f32 %v5571_v44, %v1203_v25  ;;  %v1807_v10 = vmax.f32 %v1638_v42, 0.0  ;;  %v1120_v4 = vsub.f32 %v3812_v54, %v5535_v15 }
 0x295   :  { %3440 = vmatmul.mubr.msk.bf16.gmra.mrb[120].mxu0 %vm187_vm0, %v1939_v5  ;;  %3612 = vmatmul.mubr.msk.bf16.gmra.mrb[120].mxu1 %vm187_vm0, %v1982_v57  ;;  %v1637_v5 = vadd.f32 %v6273_v40, %v1461_v9  ;;  %v1287_v57 = vmul.f32 %v5571_v44, %v1116_v51  ;;  %v1464_v26 = vmul.f32 %v6251_v2, %v1288_v1 }
 0x296   :  { %3443 = vmatprep.mubr.msk.bf16.mxu0 %vm3840_vm1, %v3839_v0  ;;  %3615 = vmatprep.mubr.msk.bf16.mxu1 %vm3840_vm1, %v3839_v0  ;;  %v1549_v32 = vmul.f32 %v6251_v2, %v1373_v8  ;;  %v1550_v3 = vmul.f32 %v6251_v2, %v1374_v17  ;;  %v3815_v8 = vld [vmem:[%s7682_s0 + $0x4f8] sm:$0xff] }
 0x297   :  { %v1806_v28 = vmax.f32 %v1637_v5, 0.0  ;;  %v1463_v7 = vmul.f32 %v6251_v2, %v1287_v57  ;;  %v1640_v43 = vadd.f32 %v6273_v40, %v1464_v26 }
 0x298   :  { %v2323_v11 = vpop.f32.mrb[16].mxu0  ;;  %v2667_v37 = vpop.f32.mrb[16].mxu1  ;;  %v1726_v19 = vadd.f32 %v6273_v40, %v1550_v3 }
 0x299   :  { %2978 = vst.msk [vmem:[%s7685_s4 + $0x40] sm:$0xff] %vm2969_vm2, %v2323_v11  ;;  %v3337_v46 = vpop.f32.mrb[17].mxu0  ;;  %3064 = vst.msk [vmem:[%s7685_s4 + $0x2f0] sm:$0xff] %vm2969_vm2, %v2667_v37  ;;  %v3509_v16 = vpop.f32.mrb[17].mxu1  ;;  %v1204_v11 = vsub.f32 %v3810_v30, %v5535_v15  ;;  %v1893_v37 = vmax.f32 %v1724_v12, 0.0  ;;  %v1942_v33 = vpack.c.bf16 %v1807_v10, %v1806_v28  ;;  %v1809_v25 = vmax.f32 %v1640_v43, 0.0 }
 0x29a   :  { %v2326_v20 = vpop.f32.mrb[18].mxu0  ;;  %v2670_v47 = vpop.f32.mrb[18].mxu1  ;;  %v1205_v46 = vsub.f32 %v3811_v24, %v5535_v15  ;;  %v1639_v16 = vadd.f32 %v6273_v40, %v1463_v7 }
 0x29b   :  { %2979 = vst.msk [vmem:[%s7685_s4 + $0x48] sm:$0xff] %vm2969_vm2, %v2326_v20  ;;  %v3338_v6 = vpop.f32.mrb[19].mxu0  ;;  %3065 = vst.msk [vmem:[%s7685_s4 + $0x2f8] sm:$0xff] %vm2969_vm2, %v2670_v47  ;;  %v3510_v49 = vpop.f32.mrb[19].mxu1  ;;  %v1725_v20 = vadd.f32 %v6273_v40, %v1549_v32  ;;  %v1290_v47 = vmul.f32 %v5571_v44, %v1119_v35 }
 0x29c   :  { %v1375_v6 = vmul.f32 %v5571_v44, %v1204_v11  ;;  %v1376_v51 = vmul.f32 %v5571_v44, %v1205_v46  ;;  %v1808_v59 = vmax.f32 %v1639_v16, 0.0  ;;  %v3817_v46 = vld [vmem:[%s7682_s0 + $0x258] sm:$0xff] }
 0x29d   :  { %3444 = vmatmul.mubr.msk.bf16.gmra.mrb[124].mxu0 %vm187_vm0, %v1940_v38  ;;  %3616 = vmatmul.mubr.msk.bf16.gmra.mrb[124].mxu1 %vm187_vm0, %v1983_v27  ;;  %v1892_v38 = vmax.f32 %v1723_v48, 0.0  ;;  %v1289_v27 = vmul.f32 %v5571_v44, %v1118_v29  ;;  %v1894_v5 = vmax.f32 %v1725_v20, 0.0  ;;  %v1466_v42 = vmul.f32 %v6251_v2, %v1290_v47  ;;  %v3820_v47 = vld [vmem:[%s7682_s0 + $0x508] sm:$0xff] }
 0x29e   :  { %3447 = vmatprep.mubr.msk.bf16.mxu0 %vm3840_vm1, %v3839_v0  ;;  %3619 = vmatprep.mubr.msk.bf16.mxu1 %vm3840_vm1, %v3839_v0  ;;  %v1551_v57 = vmul.f32 %v6251_v2, %v1375_v6  ;;  %v1292_v48 = vmul.f32 %v5571_v44, %v1121_v62  ;;  %v1943_v17 = vpack.c.bf16 %v1809_v25, %v1808_v59 }
 0x29f   :  { %v1985_v50 = vpack.c.bf16 %v1893_v37, %v1892_v38  ;;  %v1465_v39 = vmul.f32 %v6251_v2, %v1289_v27  ;;  %v3816_v38 = vld [vmem:[%s7682_s0 + $0x250] sm:$0xff]  ;;  %v1123_v16 = vsub.f32 %v3817_v46, %v5535_v15  ;;  %v3818_v27 = vld [vmem:[%s7682_s0 + $0x500] sm:$0xff]  ;;  %v1209_v6 = vsub.f32 %v3820_v47, %v5535_v15 }
 0x2a0   :  { %v2331_v58 = vpop.f32.mrb[20].mxu0  ;;  %v2675_v45 = vpop.f32.mrb[20].mxu1  ;;  %v1468_v11 = vmul.f32 %v6251_v2, %v1292_v48  ;;  %v1122_v37 = vsub.f32 %v3816_v38, %v5535_v15  ;;  %v3824_v48 = vld [vmem:[%s7682_s0 + $0x510] sm:$0xff] }
 0x2a1   :  { %2980 = vst.msk [vmem:[%s7685_s4 + $0x50] sm:$0xff] %vm2969_vm2, %v2331_v58  ;;  %v3341_v13 = vpop.f32.mrb[21].mxu0  ;;  %3066 = vst.msk [vmem:[%s7685_s4 + $0x300] sm:$0xff] %vm2969_vm2, %v2675_v45  ;;  %v3513_v60 = vpop.f32.mrb[21].mxu1  ;;  %v1895_v58 = vmax.f32 %v1726_v19, 0.0  ;;  %v3814_v45 = vld [vmem:[%s7682_s0 + $0x4f0] sm:$0xff]  ;;  %v1380_v61 = vmul.f32 %v5571_v44, %v1209_v6 }
 0x2a2   :  { %v2334_v22 = vpop.f32.mrb[22].mxu0  ;;  %v2678_v56 = vpop.f32.mrb[22].mxu1  ;;  %v1206_v1 = vsub.f32 %v3814_v45, %v5535_v15  ;;  %v1207_v13 = vsub.f32 %v3815_v8, %v5535_v15  ;;  %v1641_v60 = vadd.f32 %v6273_v40, %v1465_v39  ;;  %v3822_v45 = vld [vmem:[%s7682_s0 + $0x260] sm:$0xff] }
 0x2a3   :  { %2981 = vst.msk [vmem:[%s7685_s4 + $0x58] sm:$0xff] %vm2969_vm2, %v2334_v22  ;;  %v3342_v63 = vpop.f32.mrb[23].mxu0  ;;  %3067 = vst.msk [vmem:[%s7685_s4 + $0x308] sm:$0xff] %vm2969_vm2, %v2678_v56  ;;  %v3514_v23 = vpop.f32.mrb[23].mxu1  ;;  %v1642_v56 = vadd.f32 %v6273_v40, %v1466_v42  ;;  %v1986_v10 = vpack.c.bf16 %v1895_v58, %v1894_v5 }
 0x2a4   :  { %v1727_v63 = vadd.f32 %v6273_v40, %v1551_v57  ;;  %v1377_v18 = vmul.f32 %v5571_v44, %v1206_v1  ;;  %v1378_v29 = vmul.f32 %v5571_v44, %v1207_v13  ;;  %v1810_v30 = vmax.f32 %v1641_v60, 0.0  ;;  %v3823_v60 = vld [vmem:[%s7682_s0 + $0x268] sm:$0xff] }
 0x2a5   :  { %3448 = vmatmul.mubr.msk.bf16.gmra.mrb[128].mxu0 %vm187_vm0, %v1941_v52  ;;  %3620 = vmatmul.mubr.msk.bf16.gmra.mrb[128].mxu1 %vm187_vm0, %v1984_v14  ;;  %v1552_v52 = vmul.f32 %v6251_v2, %v1376_v51  ;;  %v1291_v14 = vmul.f32 %v5571_v44, %v1120_v4  ;;  %v1811_v3 = vmax.f32 %v1642_v56, 0.0  ;;  %v1124_v1 = vsub.f32 %v3822_v45, %v5535_v15 }
 0x2a6   :  { %3451 = vmatprep.mubr.msk.bf16.mxu0 %vm3840_vm1, %v3839_v0  ;;  %3623 = vmatprep.mubr.msk.bf16.mxu1 %vm3840_vm1, %v3839_v0  ;;  %v1896_v24 = vmax.f32 %v1727_v63, 0.0  ;;  %v3825_v63 = vld [vmem:[%s7682_s0 + $0x518] sm:$0xff] }
 0x2a7   :  { %v1728_v7 = vadd.f32 %v6273_v40, %v1552_v52  ;;  %v1467_v40 = vmul.f32 %v6251_v2, %v1291_v14  ;;  %v1208_v2 = vsub.f32 %v3818_v27, %v5535_v15  ;;  %v1944_v51 = vpack.c.bf16 %v1811_v3, %v1810_v30 }
 0x2a8   :  { %v2339_v41 = vpop.f32.mrb[24].mxu0  ;;  %v2683_v55 = vpop.f32.mrb[24].mxu1  ;;  %v1125_v14 = vsub.f32 %v3823_v60, %v5535_v15 }
 0x2a9   :  { %2982 = vst.msk [vmem:[%s7685_s4 + $0x60] sm:$0xff] %vm2969_vm2, %v2339_v41  ;;  %v3345_v49 = vpop.f32.mrb[25].mxu0  ;;  %3068 = vst.msk [vmem:[%s7685_s4 + $0x310] sm:$0xff] %vm2969_vm2, %v2683_v55  ;;  %v3517_v9 = vpop.f32.mrb[25].mxu1  ;;  %v1897_v41 = vmax.f32 %v1728_v7, 0.0 }
 0x2aa   :  { %v2342_v34 = vpop.f32.mrb[26].mxu0  ;;  %v2686_v53 = vpop.f32.mrb[26].mxu1  ;;  %v6940_v55 = vld [vmem:[%s7683_s1] ss:$0 sm:$0xff] }
 0x2ab   :  { %2983 = vst.msk [vmem:[%s7685_s4 + $0x68] sm:$0xff] %vm2969_vm2, %v2342_v34  ;;  %v3346_v36 = vpop.f32.mrb[27].mxu0  ;;  %3069 = vst.msk [vmem:[%s7685_s4 + $0x318] sm:$0xff] %vm2969_vm2, %v2686_v53  ;;  %v3518_v31 = vpop.f32.mrb[27].mxu1  ;;  %v1553_v43 = vmul.f32 %v6940_v55, %v1377_v18  ;;  %v1554_v20 = vmul.f32 %v6940_v55, %v1378_v29  ;;  %v6955_v49 = vld [vmem:[%s7684_s2] ss:$0 sm:$0xff]  ;;  %v1294_v53 = vmul.f32 %v5571_v44, %v1123_v16 }
 0x2ac   :  { %v1644_v9 = vadd.f32 %v6955_v49, %v1468_v11  ;;  %v1379_v36 = vmul.f32 %v5571_v44, %v1208_v2  ;;  %v1987_v39 = vpack.c.bf16 %v1897_v41, %v1896_v24  ;;  %v1556_v56 = vmul.f32 %v6940_v55, %v1380_v61  ;;  %v3826_v41 = vld [vmem:[%s7682_s0 + $0x270] sm:$0xff] }
 0x2ad   :  { %3452 = vmatmul.mubr.msk.bf16.gmra.mrb[132].mxu0 %vm187_vm0, %v1942_v33  ;;  %3624 = vmatmul.mubr.msk.bf16.gmra.mrb[132].mxu1 %vm187_vm0, %v1985_v50  ;;  %v1643_v33 = vadd.f32 %v6955_v49, %v1467_v40  ;;  %v1293_v50 = vmul.f32 %v5571_v44, %v1122_v37  ;;  %v1729_v54 = vadd.f32 %v6955_v49, %v1553_v43 }
 0x2ae   :  { %3455 = vmatprep.mubr.msk.bf16.mxu0 %vm3840_vm1, %v3839_v0  ;;  %3627 = vmatprep.mubr.msk.bf16.mxu1 %vm3840_vm1, %v3839_v0  ;;  %v1730_v4 = vadd.f32 %v6955_v49, %v1554_v20  ;;  %v1813_v58 = vmax.f32 %v1644_v9, 0.0  ;;  %v1470_v8 = vmul.f32 %v6940_v55, %v1294_v53  ;;  %v1555_v13 = vmul.f32 %v6940_v55, %v1379_v36  ;;  %v3827_v20 = vld [vmem:[%s7682_s0 + $0x278] sm:$0xff]  ;;  %v3829_v36 = vld [vmem:[%s7682_s0 + $0x528] sm:$0xff] }
 0x2af   :  { %v1812_v57 = vmax.f32 %v1643_v33, 0.0  ;;  %v1469_v52 = vmul.f32 %v6940_v55, %v1293_v50  ;;  %v1732_v38 = vadd.f32 %v6955_v49, %v1556_v56  ;;  %v1126_v43 = vsub.f32 %v3826_v41, %v5535_v15 }
 0x2b0   :  { %v2347_v12 = vpop.f32.mrb[28].mxu0  ;;  %v2691_v22 = vpop.f32.mrb[28].mxu1  ;;  %v1646_v29 = vadd.f32 %v6955_v49, %v1470_v8  ;;  %v1127_v47 = vsub.f32 %v3827_v20, %v5535_v15 }
 0x2b1   :  { %2984 = vst.msk [vmem:[%s7685_s4 + $0x70] sm:$0xff] %vm2969_vm2, %v2347_v12  ;;  %v3349_v23 = vpop.f32.mrb[29].mxu0  ;;  %3070 = vst.msk [vmem:[%s7685_s4 + $0x320] sm:$0xff] %vm2969_vm2, %v2691_v22  ;;  %v3521_v28 = vpop.f32.mrb[29].mxu1  ;;  %v1210_v12 = vsub.f32 %v3824_v48, %v5535_v15  ;;  %v1899_v22 = vmax.f32 %v1730_v4, 0.0  ;;  %v1945_v30 = vpack.c.bf16 %v1813_v58, %v1812_v57 }
 0x2b2   :  { %v2350_v26 = vpop.f32.mrb[30].mxu0  ;;  %v2694_v32 = vpop.f32.mrb[30].mxu1  ;;  %v1211_v23 = vsub.f32 %v3825_v63, %v5535_v15  ;;  %v1645_v28 = vadd.f32 %v6955_v49, %v1469_v52  ;;  %v1815_v6 = vmax.f32 %v1646_v29, 0.0 }
 0x2b3   :  { %2985 = vst.msk [vmem:[%s7685_s4 + $0x78] sm:$0xff] %vm2969_vm2, %v2350_v26  ;;  %v3350_v21 = vpop.f32.mrb[31].mxu0  ;;  %3071 = vst.msk [vmem:[%s7685_s4 + $0x328] sm:$0xff] %vm2969_vm2, %v2694_v32  ;;  %v3522_v35 = vpop.f32.mrb[31].mxu1  ;;  %v1731_v26 = vadd.f32 %v6955_v49, %v1555_v13  ;;  %v1296_v32 = vmul.f32 %v5571_v44, %v1125_v14 }
 0x2b4   :  { %v1381_v21 = vmul.f32 %v5571_v44, %v1210_v12  ;;  %v1382_v37 = vmul.f32 %v5571_v44, %v1211_v23  ;;  %v1814_v27 = vmax.f32 %v1645_v28, 0.0  ;;  %v3831_v28 = vld [vmem:[%s7682_s0 + $0x288] sm:$0xff] }
 0x2b5   :  { %3456 = vmatmul.mubr.msk.bf16.gmra.mrb[136].mxu0 %vm187_vm0, %v1943_v17  ;;  %3628 = vmatmul.mubr.msk.bf16.gmra.mrb[136].mxu1 %vm187_vm0, %v1986_v10  ;;  %v1898_v17 = vmax.f32 %v1729_v54, 0.0  ;;  %v1295_v10 = vmul.f32 %v5571_v44, %v1124_v1  ;;  %v1900_v33 = vmax.f32 %v1731_v26, 0.0  ;;  %v1472_v9 = vmul.f32 %v6940_v55, %v1296_v32 }
 0x2b6   :  { %3459 = vmatprep.mubr.msk.bf16.mxu0 %vm3840_vm1, %v3839_v0  ;;  %3631 = vmatprep.mubr.msk.bf16.mxu1 %vm3840_vm1, %v3839_v0  ;;  %v1557_v50 = vmul.f32 %v6940_v55, %v1381_v21  ;;  %v1298_v54 = vmul.f32 %v5571_v44, %v1127_v47  ;;  %v1946_v61 = vpack.c.bf16 %v1815_v6, %v1814_v27  ;;  %v3833_v21 = vld [vmem:[%s7682_s0 + $0x538] sm:$0xff] }
 0x2b7   :  { %v1988_v11 = vpack.c.bf16 %v1899_v22, %v1898_v17  ;;  %v1471_v2 = vmul.f32 %v6940_v55, %v1295_v10  ;;  %v3830_v22 = vld [vmem:[%s7682_s0 + $0x280] sm:$0xff]  ;;  %v1129_v10 = vsub.f32 %v3831_v28, %v5535_v15 }
 0x2b8   :  { %v2355_v19 = vpop.f32.mrb[32].mxu0  ;;  %v2699_v34 = vpop.f32.mrb[32].mxu1  ;;  %v1474_v17 = vmul.f32 %v6940_v55, %v1298_v54  ;;  %v1128_v56 = vsub.f32 %v3830_v22, %v5535_v15 }
 0x2b9   :  { %2986 = vst.msk [vmem:[%s7685_s4 + $0x80] sm:$0xff] %vm2969_vm2, %v2355_v19  ;;  %v3353_v31 = vpop.f32.mrb[33].mxu0  ;;  %3072 = vst.msk [vmem:[%s7685_s4 + $0x330] sm:$0xff] %vm2969_vm2, %v2699_v34  ;;  %v3525_v59 = vpop.f32.mrb[33].mxu1  ;;  %v1901_v19 = vmax.f32 %v1732_v38, 0.0  ;;  %v3828_v34 = vld [vmem:[%s7682_s0 + $0x520] sm:$0xff] }
 0x2ba   :  { %v2358_v62 = vpop.f32.mrb[34].mxu0  ;;  %v2702_v25 = vpop.f32.mrb[34].mxu1  ;;  %v1212_v53 = vsub.f32 %v3828_v34, %v5535_v15  ;;  %v1213_v31 = vsub.f32 %v3829_v36, %v5535_v15  ;;  %v1647_v59 = vadd.f32 %v6955_v49, %v1471_v2  ;;  %v3834_v36 = vld [vmem:[%s7682_s0 + $0x290] sm:$0xff] }
 0x2bb   :  { %2987 = vst.msk [vmem:[%s7685_s4 + $0x88] sm:$0xff] %vm2969_vm2, %v2358_v62  ;;  %v3354_v5 = vpop.f32.mrb[35].mxu0  ;;  %3073 = vst.msk [vmem:[%s7685_s4 + $0x338] sm:$0xff] %vm2969_vm2, %v2702_v25  ;;  %v3526_v42 = vpop.f32.mrb[35].mxu1  ;;  %v1648_v25 = vadd.f32 %v6955_v49, %v1472_v9  ;;  %v1989_v58 = vpack.c.bf16 %v1901_v19, %v1900_v33 }
 0x2bc   :  { %v1733_v5 = vadd.f32 %v6955_v49, %v1557_v50  ;;  %v1383_v45 = vmul.f32 %v5571_v44, %v1212_v53  ;;  %v1384_v1 = vmul.f32 %v5571_v44, %v1213_v31  ;;  %v1816_v48 = vmax.f32 %v1647_v59, 0.0  ;;  %v3835_v59 = vld [vmem:[%s7682_s0 + $0x298] sm:$0xff] }
 0x2bd   :  { %3460 = vmatmul.mubr.msk.bf16.gmra.mrb[140].mxu0 %vm187_vm0, %v1944_v51  ;;  %3632 = vmatmul.mubr.msk.bf16.gmra.mrb[140].mxu1 %vm187_vm0, %v1987_v39  ;;  %v1558_v51 = vmul.f32 %v6940_v55, %v1382_v37  ;;  %v1297_v39 = vmul.f32 %v5571_v44, %v1126_v43  ;;  %v1817_v63 = vmax.f32 %v1648_v25, 0.0  ;;  %v1130_v31 = vsub.f32 %v3834_v36, %v5535_v15 }
 0x2be   :  { %3463 = vmatprep.mubr.msk.bf16.mxu0 %vm3840_vm1, %v3839_v0  ;;  %3635 = vmatprep.mubr.msk.bf16.mxu1 %vm3840_vm1, %v3839_v0  ;;  %v1902_v23 = vmax.f32 %v1733_v5, 0.0  ;;  %v1559_v26 = vmul.f32 %v6940_v55, %v1383_v45  ;;  %v1560_v32 = vmul.f32 %v6940_v55, %v1384_v1 }
 0x2bf   :  { %v1734_v52 = vadd.f32 %v6955_v49, %v1558_v51  ;;  %v1473_v12 = vmul.f32 %v6940_v55, %v1297_v39  ;;  %v1947_v37 = vpack.c.bf16 %v1817_v63, %v1816_v48  ;;  %v1131_v39 = vsub.f32 %v3835_v59, %v5535_v15 }
 0x2c0   :  { %v2363_v7 = vpop.f32.mrb[36].mxu0  ;;  %v2707_v18 = vpop.f32.mrb[36].mxu1  ;;  %v1735_v41 = vadd.f32 %v6955_v49, %v1559_v26  ;;  %v1736_v43 = vadd.f32 %v6955_v49, %v1560_v32  ;;  %v1301_v45 = vmul.f32 %v5571_v44, %v1130_v31  ;;  %v3837_v32 = vld [vmem:[%s7682_s0 + $0x2a0] sm:$0xff] }
 0x2c1   :  { %2988 = vst.msk [vmem:[%s7685_s4 + $0x90] sm:$0xff] %vm2969_vm2, %v2363_v7  ;;  %v3357_v35 = vpop.f32.mrb[37].mxu0  ;;  %3074 = vst.msk [vmem:[%s7685_s4 + $0x340] sm:$0xff] %vm2969_vm2, %v2707_v18  ;;  %v3529_v40 = vpop.f32.mrb[37].mxu1  ;;  %v3832_v7 = vld [vmem:[%s7682_s0 + $0x530] sm:$0xff]  ;;  %v1903_v29 = vmax.f32 %v1734_v52, 0.0  ;;  %v1302_v1 = vmul.f32 %v5571_v44, %v1131_v39 }
 0x2c2   :  { %v2366_v3 = vpop.f32.mrb[38].mxu0  ;;  %v2710_v24 = vpop.f32.mrb[38].mxu1  ;;  %v1214_v18 = vsub.f32 %v3832_v7, %v5535_v15  ;;  %v1215_v35 = vsub.f32 %v3833_v21, %v5535_v15  ;;  %v1650_v40 = vadd.f32 %v6955_v49, %v1474_v17  ;;  %v1904_v54 = vmax.f32 %v1735_v41, 0.0 }
 0x2c3   :  { %2989 = vst.msk [vmem:[%s7685_s4 + $0x98] sm:$0xff] %vm2969_vm2, %v2366_v3  ;;  %v3358_v46 = vpop.f32.mrb[39].mxu0  ;;  %3075 = vst.msk [vmem:[%s7685_s4 + $0x348] sm:$0xff] %vm2969_vm2, %v2710_v24  ;;  %v3530_v16 = vpop.f32.mrb[39].mxu1  ;;  %v1300_v24 = vmul.f32 %v5571_v44, %v1129_v10  ;;  %v1990_v2 = vpack.c.bf16 %v1903_v29, %v1902_v23  ;;  %v1477_v7 = vmul.f32 %v6940_v55, %v1301_v45 }
 0x2c4   :  { %v1385_v46 = vmul.f32 %v5571_v44, %v1214_v18  ;;  %v1386_v20 = vmul.f32 %v5571_v44, %v1215_v35  ;;  %v1819_v19 = vmax.f32 %v1650_v40, 0.0  ;;  %v1478_v18 = vmul.f32 %v6940_v55, %v1302_v1  ;;  %v3838_v35 = vld [vmem:[%s7682_s0 + $0x2a8] sm:$0xff] }
 0x2c5   :  { %3464 = vmatmul.mubr.msk.bf16.gmra.mrb[144].mxu0 %vm187_vm0, %v1945_v30  ;;  %3636 = vmatmul.mubr.msk.bf16.gmra.mrb[144].mxu1 %vm187_vm0, %v1988_v11  ;;  %v1649_v30 = vadd.f32 %v6955_v49, %v1473_v12  ;;  %v1299_v11 = vmul.f32 %v5571_v44, %v1128_v56  ;;  %v1476_v34 = vmul.f32 %v6940_v55, %v1300_v24 }
 0x2c6   :  { %3467 = vmatprep.mubr.msk.bf16.mxu0 %vm3840_vm1, %v3839_v0  ;;  %3639 = vmatprep.mubr.msk.bf16.mxu1 %vm3840_vm1, %v3839_v0  ;;  %v1561_v53 = vmul.f32 %v6940_v55, %v1385_v46  ;;  %v1132_v21 = vsub.f32 %v3837_v32, %v5535_v15 }
 0x2c7   :  { %v1818_v50 = vmax.f32 %v1649_v30, 0.0  ;;  %v1475_v51 = vmul.f32 %v6940_v55, %v1299_v11  ;;  %v1133_v30 = vsub.f32 %v3838_v35, %v5535_v15 }
 0x2c8   :  { %v2371_v4 = vpop.f32.mrb[40].mxu0  ;;  %v2715_v62 = vpop.f32.mrb[40].mxu1  ;;  %v1737_v52 = vadd.f32 %v6955_v49, %v1561_v53 }
 0x2c9   :  { %2990 = vst.msk [vmem:[%s7685_s4 + $0xa0] sm:$0xff] %vm2969_vm2, %v2371_v4  ;;  %v3361_v42 = vpop.f32.mrb[41].mxu0  ;;  %3076 = vst.msk [vmem:[%s7685_s4 + $0x350] sm:$0xff] %vm2969_vm2, %v2715_v62  ;;  %v3533_v57 = vpop.f32.mrb[41].mxu1  ;;  %v1905_v4 = vmax.f32 %v1736_v43, 0.0  ;;  %v3836_v62 = vld [vmem:[%s7682_s0 + $0x540] sm:$0xff]  ;;  %v1651_v5 = vadd.f32 %v6955_v49, %v1475_v51 }
 0x2ca   :  { %v2374_v8 = vpop.f32.mrb[42].mxu0  ;;  %v2718_v13 = vpop.f32.mrb[42].mxu1  ;;  %v1216_v25 = vsub.f32 %v3836_v62, %v5535_v15  ;;  %v1906_v10 = vmax.f32 %v1737_v52, 0.0 }
 0x2cb   :  { %2991 = vst.msk [vmem:[%s7685_s4 + $0xa8] sm:$0xff] %vm2969_vm2, %v2374_v8  ;;  %v3362_v60 = vpop.f32.mrb[43].mxu0  ;;  %3077 = vst.msk [vmem:[%s7685_s4 + $0x358] sm:$0xff] %vm2969_vm2, %v2718_v13  ;;  %v3534_v14 = vpop.f32.mrb[43].mxu1  ;;  %v1948_v13 = vpack.c.bf16 %v1819_v19, %v1818_v50  ;;  %v1820_v23 = vmax.f32 %v1651_v5, 0.0 }
 0x2cc   :  { %v1991_v14 = vpack.c.bf16 %v1905_v4, %v1904_v54  ;;  %v1387_v12 = vmul.f32 %v5571_v44, %v1216_v25 }
 0x2cd   :  { %3468 = vmatmul.mubr.msk.bf16.gmra.mrb[148].mxu0 %vm187_vm0, %v1946_v61  ;;  %3640 = vmatmul.mubr.msk.bf16.gmra.mrb[148].mxu1 %vm187_vm0, %v1989_v58  ;;  %v1562_v61 = vmul.f32 %v6940_v55, %v1386_v20  ;;  %v1652_v58 = vadd.f32 %v6955_v49, %v1476_v34 }
 0x2ce   :  { %3471 = vmatprep.mubr.msk.bf16.mxu0 %vm3840_vm1, %v3839_v0  ;;  %3643 = vmatprep.mubr.msk.bf16.mxu1 %vm3840_vm1, %v3839_v0  ;;  %v1563_v26 = vmul.f32 %v6940_v55, %v1387_v12 }
 0x2cf   :  { %v1738_v48 = vadd.f32 %v6955_v49, %v1562_v61  ;;  %v1821_v28 = vmax.f32 %v1652_v58, 0.0 }
 0x2d0   :  { %v2379_v38 = vpop.f32.mrb[44].mxu0  ;;  %v2723_v3 = vpop.f32.mrb[44].mxu1 }
 0x2d1   :  { %2992 = vst.msk [vmem:[%s7685_s4 + $0xb0] sm:$0xff] %vm2969_vm2, %v2379_v38  ;;  %v3365_v16 = vpop.f32.mrb[45].mxu0  ;;  %3078 = vst.msk [vmem:[%s7685_s4 + $0x360] sm:$0xff] %vm2969_vm2, %v2723_v3  ;;  %v3537_v27 = vpop.f32.mrb[45].mxu1  ;;  %v1907_v29 = vmax.f32 %v1738_v48, 0.0  ;;  %v1949_v11 = vpack.c.bf16 %v1821_v28, %v1820_v23  ;;  %v1654_v3 = vadd.f32 %v6955_v49, %v1478_v18 }
 0x2d2   :  { %v2382_v47 = vpop.f32.mrb[46].mxu0  ;;  %v2726_v6 = vpop.f32.mrb[46].mxu1  ;;  %v1739_v16 = vadd.f32 %v6955_v49, %v1563_v26  ;;  %v1303_v27 = vmul.f32 %v5571_v44, %v1132_v21 }
 0x2d3   :  { %2993 = vst.msk [vmem:[%s7685_s4 + $0xb8] sm:$0xff] %vm2969_vm2, %v2382_v47  ;;  %v3366_v33 = vpop.f32.mrb[47].mxu0  ;;  %3079 = vst.msk [vmem:[%s7685_s4 + $0x368] sm:$0xff] %vm2969_vm2, %v2726_v6  ;;  %v3538_v9 = vpop.f32.mrb[47].mxu1  ;;  %v1992_v46 = vpack.c.bf16 %v1907_v29, %v1906_v10 }
 0x2d4   :  { %v1908_v33 = vmax.f32 %v1739_v16, 0.0  ;;  %v1479_v9 = vmul.f32 %v6940_v55, %v1303_v27 }
 0x2d5   :  { %3472 = vmatmul.mubr.msk.bf16.gmra.mrb[152].mxu0 %vm187_vm0, %v1947_v37  ;;  %3644 = vmatmul.mubr.msk.bf16.gmra.mrb[152].mxu1 %vm187_vm0, %v1990_v2  ;;  %v1653_v37 = vadd.f32 %v6955_v49, %v1477_v7  ;;  %v1304_v2 = vmul.f32 %v5571_v44, %v1133_v30  ;;  %v1823_v44 = vmax.f32 %v1654_v3, 0.0 }
 0x2d6   :  { %3475 = vmatprep.mubr.msk.bf16.mxu0 %vm3840_vm1, %v3839_v0  ;;  %3647 = vmatprep.mubr.msk.bf16.mxu1 %vm3840_vm1, %v3839_v0  ;;  %v1993_v36 = vpack.c.bf16 %v1908_v33, %v1908_v33  ;;  %v1655_v31 = vadd.f32 %v6955_v49, %v1479_v9 }
 0x2d7   :  { %v1822_v6 = vmax.f32 %v1653_v37, 0.0  ;;  %v1480_v50 = vmul.f32 %v6940_v55, %v1304_v2 }
 0x2d8   :  { %v2387_v42 = vpop.f32.mrb[48].mxu0  ;;  %v2731_v57 = vpop.f32.mrb[48].mxu1  ;;  %v1824_v62 = vmax.f32 %v1655_v31, 0.0 }
 0x2d9   :  { %2994 = vst.msk [vmem:[%s7685_s4 + $0xc0] sm:$0xff] %vm2969_vm2, %v2387_v42  ;;  %v3369_v8 = vpop.f32.mrb[49].mxu0  ;;  %3080 = vst.msk [vmem:[%s7685_s4 + $0x370] sm:$0xff] %vm2969_vm2, %v2731_v57  ;;  %v3541_v60 = vpop.f32.mrb[49].mxu1  ;;  %v1950_v53 = vpack.c.bf16 %v1823_v44, %v1822_v6  ;;  %v1656_v59 = vadd.f32 %v6955_v49, %v1480_v50 }
 0x2da   :  { %v2390_v17 = vpop.f32.mrb[50].mxu0  ;;  %v2734_v22 = vpop.f32.mrb[50].mxu1 }
 0x2db   :  { %2995 = vst.msk [vmem:[%s7685_s4 + $0xc8] sm:$0xff] %vm2969_vm2, %v2390_v17  ;;  %v3370_v56 = vpop.f32.mrb[51].mxu0  ;;  %3081 = vst.msk [vmem:[%s7685_s4 + $0x378] sm:$0xff] %vm2969_vm2, %v2734_v22  ;;  %v3542_v63 = vpop.f32.mrb[51].mxu1  ;;  %v1825_v49 = vmax.f32 %v1656_v59, 0.0 }
 0x2dd   :  { %3476 = vmatmul.mubr.msk.bf16.gmra.mrb[156].mxu0 %vm187_vm0, %v1948_v13  ;;  %3648 = vmatmul.mubr.msk.bf16.gmra.mrb[156].mxu1 %vm187_vm0, %v1991_v14  ;;  %v1951_v57 = vpack.c.bf16 %v1825_v49, %v1824_v62 }
 0x2de   :  { %3479 = vmatprep.mubr.msk.bf16.mxu0 %vm3840_vm1, %v3839_v0  ;;  %3651 = vmatprep.mubr.msk.bf16.mxu1 %vm3840_vm1, %v3839_v0 }
 0x2e0   :  { %v2395_v40 = vpop.f32.mrb[52].mxu0  ;;  %v2739_v38 = vpop.f32.mrb[52].mxu1 }
 0x2e1   :  { %2996 = vst.msk [vmem:[%s7685_s4 + $0xd0] sm:$0xff] %vm2969_vm2, %v2395_v40  ;;  %v3373_v24 = vpop.f32.mrb[53].mxu0  ;;  %3082 = vst.msk [vmem:[%s7685_s4 + $0x380] sm:$0xff] %vm2969_vm2, %v2739_v38  ;;  %v3545_v15 = vpop.f32.mrb[53].mxu1 }
 0x2e2   :  { %v2398_v41 = vpop.f32.mrb[54].mxu0  ;;  %v2742_v43 = vpop.f32.mrb[54].mxu1 }
 0x2e3   :  { %2997 = vst.msk [vmem:[%s7685_s4 + $0xd8] sm:$0xff] %vm2969_vm2, %v2398_v41  ;;  %v3374_v20 = vpop.f32.mrb[55].mxu0  ;;  %3083 = vst.msk [vmem:[%s7685_s4 + $0x388] sm:$0xff] %vm2969_vm2, %v2742_v43  ;;  %v3546_v47 = vpop.f32.mrb[55].mxu1 }
 0x2e5   :  { %3480 = vmatmul.mubr.msk.bf16.gmra.mrb[160].mxu0 %vm187_vm0, %v1949_v11  ;;  %3652 = vmatmul.mubr.msk.bf16.gmra.mrb[160].mxu1 %vm187_vm0, %v1992_v46 }
 0x2e6   :  { %3483 = vmatprep.mubr.msk.bf16.mxu0 %vm3840_vm1, %v3839_v0  ;;  %3655 = vmatprep.mubr.msk.bf16.mxu1 %vm3840_vm1, %v3839_v0 }
 0x2e8   :  { %v2403_v19 = vpop.f32.mrb[56].mxu0  ;;  %v2747_v51 = vpop.f32.mrb[56].mxu1 }
 0x2e9   :  { %2998 = vst.msk [vmem:[%s7685_s4 + $0xe0] sm:$0xff] %vm2969_vm2, %v2403_v19  ;;  %v3377_v34 = vpop.f32.mrb[57].mxu0  ;;  %3084 = vst.msk [vmem:[%s7685_s4 + $0x390] sm:$0xff] %vm2969_vm2, %v2747_v51  ;;  %v3549_v55 = vpop.f32.mrb[57].mxu1 }
 0x2ea   :  { %v2406_v39 = vpop.f32.mrb[58].mxu0  ;;  %v2750_v54 = vpop.f32.mrb[58].mxu1 }
 0x2eb   :  { %2999 = vst.msk [vmem:[%s7685_s4 + $0xe8] sm:$0xff] %vm2969_vm2, %v2406_v39  ;;  %v3378_v4 = vpop.f32.mrb[59].mxu0  ;;  %3085 = vst.msk [vmem:[%s7685_s4 + $0x398] sm:$0xff] %vm2969_vm2, %v2750_v54  ;;  %v3550_v61 = vpop.f32.mrb[59].mxu1 }
 0x2ed   :  { %3484 = vmatmul.mubr.msk.bf16.gmra.mrb[164].mxu0 %vm187_vm0, %v1950_v53  ;;  %3656 = vmatmul.mubr.msk.bf16.gmra.mrb[164].mxu1 %vm187_vm0, %v1993_v36 }
 0x2ee   :  { %3487 = vmatprep.mubr.msk.bf16.mxu0 %vm3840_vm1, %v3839_v0 }
 0x2f0   :  { %v2411_v25 = vpop.f32.mrb[60].mxu0  ;;  %v2755_v5 = vpop.f32.mrb[60].mxu1 }
 0x2f1   :  { %3000 = vst.msk [vmem:[%s7685_s4 + $0xf0] sm:$0xff] %vm2969_vm2, %v2411_v25  ;;  %v3381_v42 = vpop.f32.mrb[61].mxu0  ;;  %3086 = vst.msk [vmem:[%s7685_s4 + $0x3a0] sm:$0xff] %vm2969_vm2, %v2755_v5  ;;  %v3553_v58 = vpop.f32.mrb[61].mxu1 }
 0x2f2   :  { %v2414_v52 = vpop.f32.mrb[62].mxu0  ;;  %v2758_v45 = vpop.f32.mrb[62].mxu1 }
 0x2f3   :  { %3001 = vst.msk [vmem:[%s7685_s4 + $0xf8] sm:$0xff] %vm2969_vm2, %v2414_v52  ;;  %v3382_v0 = vpop.f32.mrb[63].mxu0  ;;  %3087 = vst.msk [vmem:[%s7685_s4 + $0x3a8] sm:$0xff] %vm2969_vm2, %v2758_v45  ;;  %v3554_v1 = vpop.f32.mrb[63].mxu1 }
 0x2f5   :  { %3488 = vmatmul.mubr.msk.bf16.gmra.mrb[168].mxu0 %vm187_vm0, %v1951_v57 }
 0x2f8   :  { %v2419_v8 = vpop.f32.mrb[64].mxu0  ;;  %v2763_v13 = vpop.f32.mrb[64].mxu1 }
 0x2f9   :  { %3002 = vst.msk [vmem:[%s7685_s4 + $0x100] sm:$0xff] %vm2969_vm2, %v2419_v8  ;;  %v3385_v60 = vpop.f32.mrb[65].mxu0  ;;  %3088 = vst.msk [vmem:[%s7685_s4 + $0x3b0] sm:$0xff] %vm2969_vm2, %v2763_v13  ;;  %v3557_v14 = vpop.f32.mrb[65].mxu1 }
 0x2fa   :  { %v2422_v48 = vpop.f32.mrb[66].mxu0  ;;  %v2766_v12 = vpop.f32.mrb[66].mxu1 }
 0x2fb   :  { %3003 = vst.msk [vmem:[%s7685_s4 + $0x108] sm:$0xff] %vm2969_vm2, %v2422_v48  ;;  %v3386_v17 = vpop.f32.mrb[67].mxu0  ;;  %3089 = vst.msk [vmem:[%s7685_s4 + $0x3b8] sm:$0xff] %vm2969_vm2, %v2766_v12  ;;  %v3558_v22 = vpop.f32.mrb[67].mxu1 }
 0x300   :  { %v2427_v56 = vpop.f32.mrb[68].mxu0  ;;  %v2771_v63 = vpop.f32.mrb[68].mxu1 }
 0x301   :  { %3004 = vst.msk [vmem:[%s7685_s4 + $0x110] sm:$0xff] %vm2969_vm2, %v2427_v56  ;;  %v3389_v23 = vpop.f32.mrb[69].mxu0  ;;  %3090 = vst.msk [vmem:[%s7685_s4 + $0x3c0] sm:$0xff] %vm2969_vm2, %v2771_v63  ;;  %v3561_v28 = vpop.f32.mrb[69].mxu1 }
 0x302   :  { %v2430_v10 = vpop.f32.mrb[70].mxu0  ;;  %v2774_v7 = vpop.f32.mrb[70].mxu1 }
 0x303   :  { %3005 = vst.msk [vmem:[%s7685_s4 + $0x118] sm:$0xff] %vm2969_vm2, %v2430_v10  ;;  %v3390_v18 = vpop.f32.mrb[71].mxu0  ;;  %3091 = vst.msk [vmem:[%s7685_s4 + $0x3c8] sm:$0xff] %vm2969_vm2, %v2774_v7  ;;  %v3562_v29 = vpop.f32.mrb[71].mxu1 }
 0x308   :  { %v2435_v26 = vpop.f32.mrb[72].mxu0  ;;  %v2779_v32 = vpop.f32.mrb[72].mxu1 }
 0x309   :  { %3006 = vst.msk [vmem:[%s7685_s4 + $0x120] sm:$0xff] %vm2969_vm2, %v2435_v26  ;;  %v3393_v21 = vpop.f32.mrb[73].mxu0  ;;  %3092 = vst.msk [vmem:[%s7685_s4 + $0x3d0] sm:$0xff] %vm2969_vm2, %v2779_v32  ;;  %v3565_v35 = vpop.f32.mrb[73].mxu1 }
 0x30a   :  { %v2438_v30 = vpop.f32.mrb[74].mxu0  ;;  %v2782_v40 = vpop.f32.mrb[74].mxu1 }
 0x30b   :  { %3007 = vst.msk [vmem:[%s7685_s4 + $0x128] sm:$0xff] %vm2969_vm2, %v2438_v30  ;;  %v3394_v11 = vpop.f32.mrb[75].mxu0  ;;  %3093 = vst.msk [vmem:[%s7685_s4 + $0x3d8] sm:$0xff] %vm2969_vm2, %v2782_v40  ;;  %v3566_v38 = vpop.f32.mrb[75].mxu1 }
 0x310   :  { %v2443_v37 = vpop.f32.mrb[76].mxu0  ;;  %v2787_v3 = vpop.f32.mrb[76].mxu1 }
 0x311   :  { %3008 = vst.msk [vmem:[%s7685_s4 + $0x130] sm:$0xff] %vm2969_vm2, %v2443_v37  ;;  %v3397_v24 = vpop.f32.mrb[77].mxu0  ;;  %3094 = vst.msk [vmem:[%s7685_s4 + $0x3e0] sm:$0xff] %vm2969_vm2, %v2787_v3  ;;  %v3569_v15 = vpop.f32.mrb[77].mxu1 }
 0x312   :  { %v2446_v46 = vpop.f32.mrb[78].mxu0  ;;  %v2790_v16 = vpop.f32.mrb[78].mxu1 }
 0x313   :  { %3009 = vst.msk [vmem:[%s7685_s4 + $0x138] sm:$0xff] %vm2969_vm2, %v2446_v46  ;;  %v3398_v27 = vpop.f32.mrb[79].mxu0  ;;  %3095 = vst.msk [vmem:[%s7685_s4 + $0x3e8] sm:$0xff] %vm2969_vm2, %v2790_v16  ;;  %v3570_v2 = vpop.f32.mrb[79].mxu1 }
 0x318   :  { %v2451_v41 = vpop.f32.mrb[80].mxu0  ;;  %v2795_v43 = vpop.f32.mrb[80].mxu1 }
 0x319   :  { %3010 = vst.msk [vmem:[%s7685_s4 + $0x140] sm:$0xff] %vm2969_vm2, %v2451_v41  ;;  %v3401_v20 = vpop.f32.mrb[81].mxu0  ;;  %3096 = vst.msk [vmem:[%s7685_s4 + $0x3f0] sm:$0xff] %vm2969_vm2, %v2795_v43  ;;  %v3573_v47 = vpop.f32.mrb[81].mxu1 }
 0x31a   :  { %v2454_v6 = vpop.f32.mrb[82].mxu0  ;;  %v2798_v44 = vpop.f32.mrb[82].mxu1 }
 0x31b   :  { %3011 = vst.msk [vmem:[%s7685_s4 + $0x148] sm:$0xff] %vm2969_vm2, %v2454_v6  ;;  %v3402_v33 = vpop.f32.mrb[83].mxu0  ;;  %3097 = vst.msk [vmem:[%s7685_s4 + $0x3f8] sm:$0xff] %vm2969_vm2, %v2798_v44  ;;  %v3574_v9 = vpop.f32.mrb[83].mxu1 }
 0x320   :  { %v2459_v50 = vpop.f32.mrb[84].mxu0  ;;  %v2803_v19 = vpop.f32.mrb[84].mxu1 }
 0x321   :  { %3012 = vst.msk [vmem:[%s7685_s4 + $0x150] sm:$0xff] %vm2969_vm2, %v2459_v50  ;;  %v3405_v51 = vpop.f32.mrb[85].mxu0  ;;  %3098 = vst.msk [vmem:[%s7685_s4 + $0x400] sm:$0xff] %vm2969_vm2, %v2803_v19  ;;  %v3577_v34 = vpop.f32.mrb[85].mxu1 }
 0x322   :  { %v2462_v53 = vpop.f32.mrb[86].mxu0  ;;  %v2806_v55 = vpop.f32.mrb[86].mxu1 }
 0x323   :  { %3013 = vst.msk [vmem:[%s7685_s4 + $0x158] sm:$0xff] %vm2969_vm2, %v2462_v53  ;;  %v3406_v36 = vpop.f32.mrb[87].mxu0  ;;  %3099 = vst.msk [vmem:[%s7685_s4 + $0x408] sm:$0xff] %vm2969_vm2, %v2806_v55  ;;  %v3578_v31 = vpop.f32.mrb[87].mxu1 }
 0x328   :  { %v2467_v59 = vpop.f32.mrb[88].mxu0  ;;  %v2811_v39 = vpop.f32.mrb[88].mxu1 }
 0x329   :  { %3014 = vst.msk [vmem:[%s7685_s4 + $0x160] sm:$0xff] %vm2969_vm2, %v2467_v59  ;;  %v3409_v54 = vpop.f32.mrb[89].mxu0  ;;  %3100 = vst.msk [vmem:[%s7685_s4 + $0x410] sm:$0xff] %vm2969_vm2, %v2811_v39  ;;  %v3581_v4 = vpop.f32.mrb[89].mxu1 }
 0x32a   :  { %v2470_v61 = vpop.f32.mrb[90].mxu0  ;;  %v2814_v62 = vpop.f32.mrb[90].mxu1 }
 0x32b   :  { %3015 = vst.msk [vmem:[%s7685_s4 + $0x168] sm:$0xff] %vm2969_vm2, %v2470_v61  ;;  %v3410_v49 = vpop.f32.mrb[91].mxu0  ;;  %3101 = vst.msk [vmem:[%s7685_s4 + $0x418] sm:$0xff] %vm2969_vm2, %v2814_v62  ;;  %v3582_v25 = vpop.f32.mrb[91].mxu1 }
 0x330   :  { %v2475_v5 = vpop.f32.mrb[92].mxu0  ;;  %v2819_v42 = vpop.f32.mrb[92].mxu1 }
 0x331   :  { %3016 = vst.msk [vmem:[%s7685_s4 + $0x170] sm:$0xff] %vm2969_vm2, %v2475_v5  ;;  %v3413_v57 = vpop.f32.mrb[93].mxu0  ;;  %3102 = vst.msk [vmem:[%s7685_s4 + $0x420] sm:$0xff] %vm2969_vm2, %v2819_v42  ;;  %v3585_v58 = vpop.f32.mrb[93].mxu1 }
 0x332   :  { %v2478_v52 = vpop.f32.mrb[94].mxu0  ;;  %v2822_v45 = vpop.f32.mrb[94].mxu1 }
 0x333   :  { %3017 = vst.msk [vmem:[%s7685_s4 + $0x178] sm:$0xff] %vm2969_vm2, %v2478_v52  ;;  %v3414_v0 = vpop.f32.mrb[95].mxu0  ;;  %3103 = vst.msk [vmem:[%s7685_s4 + $0x428] sm:$0xff] %vm2969_vm2, %v2822_v45  ;;  %v3586_v1 = vpop.f32.mrb[95].mxu1 }
 0x338   :  { %v2483_v8 = vpop.f32.mrb[96].mxu0  ;;  %v2827_v13 = vpop.f32.mrb[96].mxu1 }
 0x339   :  { %3018 = vst.msk [vmem:[%s7685_s4 + $0x180] sm:$0xff] %vm2969_vm2, %v2483_v8  ;;  %v3417_v60 = vpop.f32.mrb[97].mxu0  ;;  %3104 = vst.msk [vmem:[%s7685_s4 + $0x430] sm:$0xff] %vm2969_vm2, %v2827_v13  ;;  %v3589_v14 = vpop.f32.mrb[97].mxu1 }
 0x33a   :  { %v2486_v48 = vpop.f32.mrb[98].mxu0  ;;  %v2830_v12 = vpop.f32.mrb[98].mxu1 }
 0x33b   :  { %3019 = vst.msk [vmem:[%s7685_s4 + $0x188] sm:$0xff] %vm2969_vm2, %v2486_v48  ;;  %v3418_v17 = vpop.f32.mrb[99].mxu0  ;;  %3105 = vst.msk [vmem:[%s7685_s4 + $0x438] sm:$0xff] %vm2969_vm2, %v2830_v12  ;;  %v3590_v22 = vpop.f32.mrb[99].mxu1 }
 0x340   :  { %v2491_v56 = vpop.f32.mrb[100].mxu0  ;;  %v2835_v63 = vpop.f32.mrb[100].mxu1 }
 0x341   :  { %3020 = vst.msk [vmem:[%s7685_s4 + $0x190] sm:$0xff] %vm2969_vm2, %v2491_v56  ;;  %v3421_v23 = vpop.f32.mrb[101].mxu0  ;;  %3106 = vst.msk [vmem:[%s7685_s4 + $0x440] sm:$0xff] %vm2969_vm2, %v2835_v63  ;;  %v3593_v28 = vpop.f32.mrb[101].mxu1 }
 0x342   :  { %v2494_v10 = vpop.f32.mrb[102].mxu0  ;;  %v2838_v7 = vpop.f32.mrb[102].mxu1 }
 0x343   :  { %3021 = vst.msk [vmem:[%s7685_s4 + $0x198] sm:$0xff] %vm2969_vm2, %v2494_v10  ;;  %v3422_v18 = vpop.f32.mrb[103].mxu0  ;;  %3107 = vst.msk [vmem:[%s7685_s4 + $0x448] sm:$0xff] %vm2969_vm2, %v2838_v7  ;;  %v3594_v29 = vpop.f32.mrb[103].mxu1 }
 0x348   :  { %v2499_v26 = vpop.f32.mrb[104].mxu0  ;;  %v2843_v32 = vpop.f32.mrb[104].mxu1 }
 0x349   :  { %3022 = vst.msk [vmem:[%s7685_s4 + $0x1a0] sm:$0xff] %vm2969_vm2, %v2499_v26  ;;  %v3425_v21 = vpop.f32.mrb[105].mxu0  ;;  %3108 = vst.msk [vmem:[%s7685_s4 + $0x450] sm:$0xff] %vm2969_vm2, %v2843_v32  ;;  %v3597_v35 = vpop.f32.mrb[105].mxu1 }
 0x34a   :  { %v2502_v30 = vpop.f32.mrb[106].mxu0  ;;  %v2846_v40 = vpop.f32.mrb[106].mxu1 }
 0x34b   :  { %3023 = vst.msk [vmem:[%s7685_s4 + $0x1a8] sm:$0xff] %vm2969_vm2, %v2502_v30  ;;  %v3426_v11 = vpop.f32.mrb[107].mxu0  ;;  %3109 = vst.msk [vmem:[%s7685_s4 + $0x458] sm:$0xff] %vm2969_vm2, %v2846_v40  ;;  %v3598_v38 = vpop.f32.mrb[107].mxu1 }
 0x350   :  { %v2507_v37 = vpop.f32.mrb[108].mxu0  ;;  %v2851_v3 = vpop.f32.mrb[108].mxu1 }
 0x351   :  { %3024 = vst.msk [vmem:[%s7685_s4 + $0x1b0] sm:$0xff] %vm2969_vm2, %v2507_v37  ;;  %v3429_v24 = vpop.f32.mrb[109].mxu0  ;;  %3110 = vst.msk [vmem:[%s7685_s4 + $0x460] sm:$0xff] %vm2969_vm2, %v2851_v3  ;;  %v3601_v15 = vpop.f32.mrb[109].mxu1 }
 0x352   :  { %v2510_v46 = vpop.f32.mrb[110].mxu0  ;;  %v2854_v16 = vpop.f32.mrb[110].mxu1 }
 0x353   :  { %3025 = vst.msk [vmem:[%s7685_s4 + $0x1b8] sm:$0xff] %vm2969_vm2, %v2510_v46  ;;  %v3430_v27 = vpop.f32.mrb[111].mxu0  ;;  %3111 = vst.msk [vmem:[%s7685_s4 + $0x468] sm:$0xff] %vm2969_vm2, %v2854_v16  ;;  %v3602_v2 = vpop.f32.mrb[111].mxu1 }
 0x358   :  { %v2515_v41 = vpop.f32.mrb[112].mxu0  ;;  %v2859_v43 = vpop.f32.mrb[112].mxu1 }
 0x359   :  { %3026 = vst.msk [vmem:[%s7685_s4 + $0x1c0] sm:$0xff] %vm2969_vm2, %v2515_v41  ;;  %v3433_v20 = vpop.f32.mrb[113].mxu0  ;;  %3112 = vst.msk [vmem:[%s7685_s4 + $0x470] sm:$0xff] %vm2969_vm2, %v2859_v43  ;;  %v3605_v47 = vpop.f32.mrb[113].mxu1 }
 0x35a   :  { %v2518_v6 = vpop.f32.mrb[114].mxu0  ;;  %v2862_v44 = vpop.f32.mrb[114].mxu1 }
 0x35b   :  { %3027 = vst.msk [vmem:[%s7685_s4 + $0x1c8] sm:$0xff] %vm2969_vm2, %v2518_v6  ;;  %v3434_v33 = vpop.f32.mrb[115].mxu0  ;;  %3113 = vst.msk [vmem:[%s7685_s4 + $0x478] sm:$0xff] %vm2969_vm2, %v2862_v44  ;;  %v3606_v9 = vpop.f32.mrb[115].mxu1 }
 0x360   :  { %v2523_v50 = vpop.f32.mrb[116].mxu0  ;;  %v2867_v19 = vpop.f32.mrb[116].mxu1 }
 0x361   :  { %3028 = vst.msk [vmem:[%s7685_s4 + $0x1d0] sm:$0xff] %vm2969_vm2, %v2523_v50  ;;  %v3437_v51 = vpop.f32.mrb[117].mxu0  ;;  %3114 = vst.msk [vmem:[%s7685_s4 + $0x480] sm:$0xff] %vm2969_vm2, %v2867_v19  ;;  %v3609_v34 = vpop.f32.mrb[117].mxu1 }
 0x362   :  { %v2526_v53 = vpop.f32.mrb[118].mxu0  ;;  %v2870_v55 = vpop.f32.mrb[118].mxu1 }
 0x363   :  { %3029 = vst.msk [vmem:[%s7685_s4 + $0x1d8] sm:$0xff] %vm2969_vm2, %v2526_v53  ;;  %v3438_v36 = vpop.f32.mrb[119].mxu0  ;;  %3115 = vst.msk [vmem:[%s7685_s4 + $0x488] sm:$0xff] %vm2969_vm2, %v2870_v55  ;;  %v3610_v31 = vpop.f32.mrb[119].mxu1 }
 0x368   :  { %v2531_v59 = vpop.f32.mrb[120].mxu0  ;;  %v2875_v39 = vpop.f32.mrb[120].mxu1 }
 0x369   :  { %3030 = vst.msk [vmem:[%s7685_s4 + $0x1e0] sm:$0xff] %vm2969_vm2, %v2531_v59  ;;  %v3441_v54 = vpop.f32.mrb[121].mxu0  ;;  %3116 = vst.msk [vmem:[%s7685_s4 + $0x490] sm:$0xff] %vm2969_vm2, %v2875_v39  ;;  %v3613_v4 = vpop.f32.mrb[121].mxu1 }
 0x36a   :  { %v2534_v61 = vpop.f32.mrb[122].mxu0  ;;  %v2878_v62 = vpop.f32.mrb[122].mxu1 }
 0x36b   :  { %3031 = vst.msk [vmem:[%s7685_s4 + $0x1e8] sm:$0xff] %vm2969_vm2, %v2534_v61  ;;  %v3442_v49 = vpop.f32.mrb[123].mxu0  ;;  %3117 = vst.msk [vmem:[%s7685_s4 + $0x498] sm:$0xff] %vm2969_vm2, %v2878_v62  ;;  %v3614_v25 = vpop.f32.mrb[123].mxu1 }
 0x370   :  { %v2539_v5 = vpop.f32.mrb[124].mxu0  ;;  %v2883_v42 = vpop.f32.mrb[124].mxu1 }
 0x371   :  { %3032 = vst.msk [vmem:[%s7685_s4 + $0x1f0] sm:$0xff] %vm2969_vm2, %v2539_v5  ;;  %v3445_v57 = vpop.f32.mrb[125].mxu0  ;;  %3118 = vst.msk [vmem:[%s7685_s4 + $0x4a0] sm:$0xff] %vm2969_vm2, %v2883_v42  ;;  %v3617_v58 = vpop.f32.mrb[125].mxu1 }
 0x372   :  { %v2542_v52 = vpop.f32.mrb[126].mxu0  ;;  %v2886_v45 = vpop.f32.mrb[126].mxu1 }
 0x373   :  { %3033 = vst.msk [vmem:[%s7685_s4 + $0x1f8] sm:$0xff] %vm2969_vm2, %v2542_v52  ;;  %v3446_v0 = vpop.f32.mrb[127].mxu0  ;;  %3119 = vst.msk [vmem:[%s7685_s4 + $0x4a8] sm:$0xff] %vm2969_vm2, %v2886_v45  ;;  %v3618_v1 = vpop.f32.mrb[127].mxu1 }
 0x378   :  { %v2547_v8 = vpop.f32.mrb[128].mxu0  ;;  %v2891_v13 = vpop.f32.mrb[128].mxu1 }
 0x379   :  { %3034 = vst.msk [vmem:[%s7685_s4 + $0x200] sm:$0xff] %vm2969_vm2, %v2547_v8  ;;  %v3449_v60 = vpop.f32.mrb[129].mxu0  ;;  %3120 = vst.msk [vmem:[%s7685_s4 + $0x4b0] sm:$0xff] %vm2969_vm2, %v2891_v13  ;;  %v3621_v14 = vpop.f32.mrb[129].mxu1 }
 0x37a   :  { %v2550_v48 = vpop.f32.mrb[130].mxu0  ;;  %v2894_v12 = vpop.f32.mrb[130].mxu1 }
 0x37b   :  { %3035 = vst.msk [vmem:[%s7685_s4 + $0x208] sm:$0xff] %vm2969_vm2, %v2550_v48  ;;  %v3450_v17 = vpop.f32.mrb[131].mxu0  ;;  %3121 = vst.msk [vmem:[%s7685_s4 + $0x4b8] sm:$0xff] %vm2969_vm2, %v2894_v12  ;;  %v3622_v22 = vpop.f32.mrb[131].mxu1 }
 0x380   :  { %v2555_v56 = vpop.f32.mrb[132].mxu0  ;;  %v2899_v63 = vpop.f32.mrb[132].mxu1 }
 0x381   :  { %3036 = vst.msk [vmem:[%s7685_s4 + $0x210] sm:$0xff] %vm2969_vm2, %v2555_v56  ;;  %v3453_v23 = vpop.f32.mrb[133].mxu0  ;;  %3122 = vst.msk [vmem:[%s7685_s4 + $0x4c0] sm:$0xff] %vm2969_vm2, %v2899_v63  ;;  %v3625_v28 = vpop.f32.mrb[133].mxu1 }
 0x382   :  { %v2558_v10 = vpop.f32.mrb[134].mxu0  ;;  %v2902_v7 = vpop.f32.mrb[134].mxu1 }
 0x383   :  { %3037 = vst.msk [vmem:[%s7685_s4 + $0x218] sm:$0xff] %vm2969_vm2, %v2558_v10  ;;  %v3454_v18 = vpop.f32.mrb[135].mxu0  ;;  %3123 = vst.msk [vmem:[%s7685_s4 + $0x4c8] sm:$0xff] %vm2969_vm2, %v2902_v7  ;;  %v3626_v29 = vpop.f32.mrb[135].mxu1 }
 0x388   :  { %v2563_v26 = vpop.f32.mrb[136].mxu0  ;;  %v2907_v32 = vpop.f32.mrb[136].mxu1 }
 0x389   :  { %3038 = vst.msk [vmem:[%s7685_s4 + $0x220] sm:$0xff] %vm2969_vm2, %v2563_v26  ;;  %v3457_v21 = vpop.f32.mrb[137].mxu0  ;;  %3124 = vst.msk [vmem:[%s7685_s4 + $0x4d0] sm:$0xff] %vm2969_vm2, %v2907_v32  ;;  %v3629_v35 = vpop.f32.mrb[137].mxu1 }
 0x38a   :  { %v2566_v30 = vpop.f32.mrb[138].mxu0  ;;  %v2910_v40 = vpop.f32.mrb[138].mxu1 }
 0x38b   :  { %3039 = vst.msk [vmem:[%s7685_s4 + $0x228] sm:$0xff] %vm2969_vm2, %v2566_v30  ;;  %v3458_v11 = vpop.f32.mrb[139].mxu0  ;;  %3125 = vst.msk [vmem:[%s7685_s4 + $0x4d8] sm:$0xff] %vm2969_vm2, %v2910_v40  ;;  %v3630_v38 = vpop.f32.mrb[139].mxu1 }
 0x390   :  { %v2571_v37 = vpop.f32.mrb[140].mxu0  ;;  %v2915_v3 = vpop.f32.mrb[140].mxu1 }
 0x391   :  { %3040 = vst.msk [vmem:[%s7685_s4 + $0x230] sm:$0xff] %vm2969_vm2, %v2571_v37  ;;  %v3461_v24 = vpop.f32.mrb[141].mxu0  ;;  %3126 = vst.msk [vmem:[%s7685_s4 + $0x4e0] sm:$0xff] %vm2969_vm2, %v2915_v3  ;;  %v3633_v15 = vpop.f32.mrb[141].mxu1 }
 0x392   :  { %v2574_v46 = vpop.f32.mrb[142].mxu0  ;;  %v2918_v16 = vpop.f32.mrb[142].mxu1 }
 0x393   :  { %3041 = vst.msk [vmem:[%s7685_s4 + $0x238] sm:$0xff] %vm2969_vm2, %v2574_v46  ;;  %v3462_v27 = vpop.f32.mrb[143].mxu0  ;;  %3127 = vst.msk [vmem:[%s7685_s4 + $0x4e8] sm:$0xff] %vm2969_vm2, %v2918_v16  ;;  %v3634_v2 = vpop.f32.mrb[143].mxu1 }
 0x398   :  { %v2579_v41 = vpop.f32.mrb[144].mxu0  ;;  %v2923_v43 = vpop.f32.mrb[144].mxu1 }
 0x399   :  { %3042 = vst.msk [vmem:[%s7685_s4 + $0x240] sm:$0xff] %vm2969_vm2, %v2579_v41  ;;  %v3465_v20 = vpop.f32.mrb[145].mxu0  ;;  %3128 = vst.msk [vmem:[%s7685_s4 + $0x4f0] sm:$0xff] %vm2969_vm2, %v2923_v43  ;;  %v3637_v47 = vpop.f32.mrb[145].mxu1 }
 0x39a   :  { %v2582_v6 = vpop.f32.mrb[146].mxu0  ;;  %v2926_v44 = vpop.f32.mrb[146].mxu1 }
 0x39b   :  { %3043 = vst.msk [vmem:[%s7685_s4 + $0x248] sm:$0xff] %vm2969_vm2, %v2582_v6  ;;  %v3466_v33 = vpop.f32.mrb[147].mxu0  ;;  %3129 = vst.msk [vmem:[%s7685_s4 + $0x4f8] sm:$0xff] %vm2969_vm2, %v2926_v44  ;;  %v3638_v9 = vpop.f32.mrb[147].mxu1 }
 0x3a0   :  { %v2587_v50 = vpop.f32.mrb[148].mxu0  ;;  %v2931_v19 = vpop.f32.mrb[148].mxu1 }
 0x3a1   :  { %3044 = vst.msk [vmem:[%s7685_s4 + $0x250] sm:$0xff] %vm2969_vm2, %v2587_v50  ;;  %v3469_v51 = vpop.f32.mrb[149].mxu0  ;;  %3130 = vst.msk [vmem:[%s7685_s4 + $0x500] sm:$0xff] %vm2969_vm2, %v2931_v19  ;;  %v3641_v34 = vpop.f32.mrb[149].mxu1 }
 0x3a2   :  { %v2590_v53 = vpop.f32.mrb[150].mxu0  ;;  %v2934_v55 = vpop.f32.mrb[150].mxu1 }
 0x3a3   :  { %3045 = vst.msk [vmem:[%s7685_s4 + $0x258] sm:$0xff] %vm2969_vm2, %v2590_v53  ;;  %v3470_v36 = vpop.f32.mrb[151].mxu0  ;;  %3131 = vst.msk [vmem:[%s7685_s4 + $0x508] sm:$0xff] %vm2969_vm2, %v2934_v55  ;;  %v3642_v31 = vpop.f32.mrb[151].mxu1 }
 0x3a8   :  { %v2595_v59 = vpop.f32.mrb[152].mxu0  ;;  %v2939_v39 = vpop.f32.mrb[152].mxu1 }
 0x3a9   :  { %3046 = vst.msk [vmem:[%s7685_s4 + $0x260] sm:$0xff] %vm2969_vm2, %v2595_v59  ;;  %v3473_v54 = vpop.f32.mrb[153].mxu0  ;;  %3132 = vst.msk [vmem:[%s7685_s4 + $0x510] sm:$0xff] %vm2969_vm2, %v2939_v39  ;;  %v3645_v4 = vpop.f32.mrb[153].mxu1 }
 0x3aa   :  { %v2598_v61 = vpop.f32.mrb[154].mxu0  ;;  %v2942_v62 = vpop.f32.mrb[154].mxu1 }
 0x3ab   :  { %3047 = vst.msk [vmem:[%s7685_s4 + $0x268] sm:$0xff] %vm2969_vm2, %v2598_v61  ;;  %v3474_v49 = vpop.f32.mrb[155].mxu0  ;;  %3133 = vst.msk [vmem:[%s7685_s4 + $0x518] sm:$0xff] %vm2969_vm2, %v2942_v62  ;;  %v3646_v25 = vpop.f32.mrb[155].mxu1 }
 0x3b0   :  { %v2603_v5 = vpop.f32.mrb[156].mxu0  ;;  %v2947_v42 = vpop.f32.mrb[156].mxu1 }
 0x3b1   :  { %3048 = vst.msk [vmem:[%s7685_s4 + $0x270] sm:$0xff] %vm2969_vm2, %v2603_v5  ;;  %v3477_v57 = vpop.f32.mrb[157].mxu0  ;;  %3134 = vst.msk [vmem:[%s7685_s4 + $0x520] sm:$0xff] %vm2969_vm2, %v2947_v42  ;;  %v3649_v58 = vpop.f32.mrb[157].mxu1 }
 0x3b2   :  { %v2606_v52 = vpop.f32.mrb[158].mxu0  ;;  %v2950_v45 = vpop.f32.mrb[158].mxu1 }
 0x3b3   :  { %3049 = vst.msk [vmem:[%s7685_s4 + $0x278] sm:$0xff] %vm2969_vm2, %v2606_v52  ;;  %v3478_v0 = vpop.f32.mrb[159].mxu0  ;;  %3135 = vst.msk [vmem:[%s7685_s4 + $0x528] sm:$0xff] %vm2969_vm2, %v2950_v45  ;;  %v3650_v1 = vpop.f32.mrb[159].mxu1 }
 0x3b8   :  { %v2611_v8 = vpop.f32.mrb[160].mxu0  ;;  %v2955_v13 = vpop.f32.mrb[160].mxu1 }
 0x3b9   :  { %3050 = vst.msk [vmem:[%s7685_s4 + $0x280] sm:$0xff] %vm2969_vm2, %v2611_v8  ;;  %v3481_v60 = vpop.f32.mrb[161].mxu0  ;;  %3136 = vst.msk [vmem:[%s7685_s4 + $0x530] sm:$0xff] %vm2969_vm2, %v2955_v13  ;;  %v3653_v14 = vpop.f32.mrb[161].mxu1 }
 0x3ba   :  { %v2614_v48 = vpop.f32.mrb[162].mxu0  ;;  %v2958_v12 = vpop.f32.mrb[162].mxu1 }
 0x3bb   :  { %3051 = vst.msk [vmem:[%s7685_s4 + $0x288] sm:$0xff] %vm2969_vm2, %v2614_v48  ;;  %v3482_v17 = vpop.f32.mrb[163].mxu0  ;;  %3137 = vst.msk [vmem:[%s7685_s4 + $0x538] sm:$0xff] %vm2969_vm2, %v2958_v12  ;;  %v3654_v22 = vpop.f32.mrb[163].mxu1 }
 0x3c0   :  { %v2619_v56 = vpop.f32.mrb[164].mxu0  ;;  %v2963_v63 = vpop.f32.mrb[164].mxu1 }
 0x3c1   :  { %3052 = vst.msk [vmem:[%s7685_s4 + $0x290] sm:$0xff] %vm2969_vm2, %v2619_v56  ;;  %v3485_v23 = vpop.f32.mrb[165].mxu0  ;;  %3138 = vst.msk [vmem:[%s7685_s4 + $0x540] sm:$0xff] %vm2969_vm2, %v2963_v63  ;;  %v3657_v28 = vpop.f32.mrb[165].mxu1 }
 0x3c2   :  { %v2622_v10 = vpop.f32.mrb[166].mxu0  ;;  %v2966_v7 = vpop.f32.mrb[166].mxu1 }
 0x3c3   :  { %3053 = vst.msk [vmem:[%s7685_s4 + $0x298] sm:$0xff] %vm2969_vm2, %v2622_v10  ;;  %v3486_v18 = vpop.f32.mrb[167].mxu0  ;;  %v3658_v29 = vpop.f32.mrb[167].mxu1 }
 0x3c8   :  { %v2627_v26 = vpop.f32.mrb[168].mxu0 }
 0x3c9   :  { %3054 = vst.msk [vmem:[%s7685_s4 + $0x2a0] sm:$0xff] %vm2969_vm2, %v2627_v26  ;;  %v3489_v32 = vpop.f32.mrb[169].mxu0 }
 0x3ca   :  { %v2630_v21 = vpop.f32.mrb[170].mxu0 }
 0x3cb   :  { %3055 = vst.msk [vmem:[%s7685_s4 + $0x2a8] sm:$0xff] %vm2969_vm2, %v2630_v21  ;;  %v3490_v35 = vpop.f32.mrb[171].mxu0 }

// kernel: generator_forward.13
= control target key start
LH: loop header
LB: loop body
LE: loop exit
PB: predicated region body
PF: predicated region fallthrough
CT: control target
= control target key end

     0   :  { %vm31_vm2 = vcmask 1041408   ;;  %vm32_vm3 = vcmask 1043458   ;;  %vm34_vm5 = vcmask 128004   ;;  %s75_s0 = inlined_call_operand.vmem [shape: f32[2,784], index: 0, kind: input, shape index: {}]   ;;  %s76_s1 = inlined_call_operand.vmem [shape: f32[2,784], index: 1, kind: output, shape index: {}]  }
   0x1   :  { %v8_v0 = vld [vmem:[%s75_s0] sm:$0xff]  ;;  %v9_v1 = vld [vmem:[%s75_s0 + $0x8] sm:$0x3f]  ;;  %vm33_vm4 = vmor %vm32_vm3, %vm31_vm2 }
   0x2   :  { %vm10_vm0 = vcmp.ge.f32.partialorder %v8_v0, 0.0  ;;  %v12_v2 = vsub.f32 0.0, %v8_v0  ;;  %vm11_vm1 = vcmp.ge.f32.partialorder %v9_v1, 0.0  ;;  %v13_v3 = vsub.f32 0.0, %v9_v1  ;;  %vm35_vm6 = vmor %vm34_vm5, %vm33_vm4 }
   0x4   :  { %v14_v4 = vsel %vm10_vm0, %v12_v2, %v8_v0  ;;  %v15_v5 = vsel %vm11_vm1, %v13_v3, %v9_v1 }
   0x5   :  { %v16_v6 = vmul.f32 1.442695, %v14_v4  ;;  %v18_v7 = vmul.f32 1.442695, %v15_v5 }
   0x7   :  { %41 = vpow2.f32 %v16_v6 }
   0x8   :  { %43 = vpow2.f32 %v18_v7 }
  0x11   :  { %v42_v8 = vpop.eup %41 }
  0x12   :  { %v44_v9 = vpop.eup %43  ;;  %v20_v10 = vadd.f32 1.0, %v42_v8 }
  0x13   :  { %v21_v11 = vadd.f32 1.0, %v44_v9 }
  0x14   :  { %45 = vrcp.f32 %v20_v10 }
  0x15   :  { %47 = vrcp.f32 %v21_v11 }
  0x1e   :  { %v46_v12 = vpop.eup %45 }
  0x1f   :  { %v48_v13 = vpop.eup %47  ;;  %v26_v14 = vmul.f32 %v46_v12, %v42_v8 }
  0x20   :  { %v27_v15 = vmul.f32 %v48_v13, %v44_v9 }
  0x21   :  { %v28_v16 = vsel %vm10_vm0, %v46_v12, %v26_v14 }
  0x22   :  { %30 = vst [vmem:[%s76_s1] sm:$0xff] %v28_v16  ;;  %v29_v17 = vsel %vm11_vm1, %v48_v13, %v27_v15 }
  0x23   :  { %36 = vst.msk [vmem:[%s76_s1 + $0x8] sm:$0x3f] %vm35_vm6, %v29_v17 }

</bundles_post_ra>
